<compile_context>
chip_gen: v7x
topology: tpu7x:2x2x1
jax: 0.10.0
libtpu: 0.0.40
codegen_flags: <defaults>
</compile_context>

<pallas_src>
import functools
import math

import jax
import jax.numpy as jnp
from jax import lax
from jax.experimental import pallas as pl
from jax.experimental.pallas import tpu as pltpu

F32 = jnp.float32

# Flip to True on v6e/v7x for ~3x MXU throughput on the projection / gram
# matmuls (perturbs low-order bits vs. the f32 PyTorch reference, so off by
# default for numerical parity).
USE_BF16_MXU = False

_VMEM_LIMIT = 48 * 1024 * 1024   # above v5e(16M)/v6e,v7x(32M) scoped defaults
_CLAMP = 10.0


# ------------------------------------------------------------- utilities ----

def _ceil_to(v, m):
    return ((v + m - 1) // m) * m


def _pad_to(a, shape):
    pads = [(0, t - s) for s, t in zip(a.shape, shape)]
    if not any(p for _, p in pads):
        return a
    return jnp.pad(a, pads)


def _pick_tile(n):
    # Largest row tile that divides n (>=16 so bf16 adjacency blocks tile).
    for t in (256, 128, 64, 32, 16):
        if n % t == 0:
            return t
    raise ValueError(f"node count n={n} must be a multiple of 16")


def _mxu(a):
    return a.astype(jnp.bfloat16) if USE_BF16_MXU else a


def _cparams():
    return pltpu.CompilerParams(
        dimension_semantics=("parallel",),
        vmem_limit_bytes=_VMEM_LIMIT)


def _pairwise_d2(rows, full):
    """Squared distances between `rows` (R,F) and `full` (N,F) via MXU gram
    matmul; squared norms of `full` come from a tiny ones-matmul (keeps the
    (1,N) lane layout without an in-kernel transpose)."""
    g = lax.dot_general(_mxu(rows), _mxu(full), (((1,), (1,)), ((), ())),
                        preferred_element_type=jnp.float32)          # (R, N)
    sq_r = jnp.sum(rows * rows, axis=1, keepdims=True)               # (R, 1)
    ones = jnp.ones((1, full.shape[1]), jnp.float32)
    sq_f = lax.dot_general(ones, full * full, (((1,), (1,)), ((), ())),
                           preferred_element_type=jnp.float32)       # (1, N)
    return jnp.maximum(sq_r + sq_f - 2.0 * g, 0.0)


# ----------------------------------------------------- pairwise distances ----

def _sqdist_kernel(xr_ref, xf_ref, o_ref):
    o_ref[...] = _pairwise_d2(xr_ref[...], xf_ref[...])


def pairwise_sqdist(x):
    n, f = x.shape
    ti = _pick_tile(n)
    kp = _ceil_to(f, 128)
    xq = _pad_to(x, (n, kp))            # zero-pad: distances unchanged
    return pl.pallas_call(
        _sqdist_kernel,
        out_shape=jax.ShapeDtypeStruct((n, n), F32),
        grid_spec=pltpu.PrefetchScalarGridSpec(
            num_scalar_prefetch=0,
            grid=(n // ti,),
            in_specs=[pl.BlockSpec((ti, kp), lambda i: (i, 0)),
                      pl.BlockSpec((n, kp), lambda i: (0, 0))],
            out_specs=pl.BlockSpec((ti, n), lambda i: (i, 0)),
        ),
        compiler_params=_cparams(),
        cost_estimate=pl.CostEstimate(
            flops=2 * n * n * kp,
            transcendentals=0,
            bytes_accessed=4 * (2 * n * kp + n * n)),
    )(xq, xq)


# ----------------------------------------------- stage 1: per-node project ----

def _project_kernel(x_ref, fw_ref, fb_ref, w1_ref, b1_ref, w2_ref, b2_ref,
                    xp_ref, emb_ref):
    # Linear (+BatchNorm eval folded) stack; runs ONCE per node row block.
    xp = jnp.dot(_mxu(x_ref[...]), _mxu(fw_ref[...]),
                 preferred_element_type=jnp.float32) + fb_ref[...]
    h = jnp.maximum(
        jnp.dot(_mxu(xp), _mxu(w1_ref[...]),
                preferred_element_type=jnp.float32) + b1_ref[...], 0.0)
    emb = jnp.maximum(
        jnp.dot(_mxu(h), _mxu(w2_ref[...]),
                preferred_element_type=jnp.float32) + b2_ref[...], 0.0)
    xp_ref[...] = xp
    emb_ref[...] = emb


def _project(xq, fw_p, fb_p, w1_p, b1_p, w2_p, b2_p, *, ti):
    n, kp = xq.shape
    fp = fw_p.shape[1]
    hp = w1_p.shape[1]
    flops = 2 * n * (kp * fp + fp * hp + hp * fp)
    bytes_acc = 4 * (n * kp + 2 * n * fp + kp * fp + fp * hp + hp * fp
                     + 2 * fp + hp)
    return pl.pallas_call(
        _project_kernel,
        out_shape=(jax.ShapeDtypeStruct((n, fp), F32),
                   jax.ShapeDtypeStruct((n, fp), F32)),
        grid_spec=pltpu.PrefetchScalarGridSpec(
            num_scalar_prefetch=0,
            grid=(n // ti,),
            in_specs=[
                pl.BlockSpec((ti, kp), lambda i: (i, 0)),   # x rows
                pl.BlockSpec((kp, fp), lambda i: (0, 0)),   # fproj W
                pl.BlockSpec((1, fp), lambda i: (0, 0)),    # fproj b
                pl.BlockSpec((fp, hp), lambda i: (0, 0)),   # mlp1 W
                pl.BlockSpec((1, hp), lambda i: (0, 0)),    # mlp1 b
                pl.BlockSpec((hp, fp), lambda i: (0, 0)),   # mlp2 W
                pl.BlockSpec((1, fp), lambda i: (0, 0)),    # mlp2 b
            ],
            out_specs=[pl.BlockSpec((ti, fp), lambda i: (i, 0)),
                       pl.BlockSpec((ti, fp), lambda i: (i, 0))],
        ),
        compiler_params=_cparams(),
        cost_estimate=pl.CostEstimate(flops=flops, transcendentals=0,
                                      bytes_accessed=bytes_acc),
    )(xq, fw_p, fb_p, w1_p, b1_p, w2_p, b2_p)


# ------------------------------------------------ stage 2: edge weights -----

def _edges_kernel(adj_ref, xp_ref, embr_ref, emba_ref, wm_ref, xs_ref):
    # Gaussian edge weights + row degrees + degree-normalized features for
    # this block's ti rows (each row needs ALL columns -> perfectly tiled).
    d2 = _pairwise_d2(embr_ref[...], emba_ref[...])           # (ti, n)
    e = jnp.exp(-d2) + 1e-9
    wm = jnp.where(adj_ref[...] > 0, e, 0.0)                  # adj is 0/1 bf16
    deg = jnp.sum(wm, axis=1, keepdims=True)                  # (ti, 1)
    deg = jnp.maximum(deg, 1e-30)   # guard: node with no same-batch neighbour
    wm_ref[...] = wm
    xs_ref[...] = xp_ref[...] * (1.0 / deg)


def _edge_weights(adj, xp, emb, *, ti):
    n, fp = xp.shape
    flops = 2 * n * n * fp + 6 * n * n
    bytes_acc = 2 * n * n + 4 * n * n + 4 * (3 * n * fp)
    return pl.pallas_call(
        _edges_kernel,
        out_shape=(jax.ShapeDtypeStruct((n, n), F32),
                   jax.ShapeDtypeStruct((n, fp), F32)),
        grid_spec=pltpu.PrefetchScalarGridSpec(
            num_scalar_prefetch=0,
            grid=(n // ti,),
            in_specs=[
                pl.BlockSpec((ti, n), lambda i: (i, 0)),    # adjacency rows
                pl.BlockSpec((ti, fp), lambda i: (i, 0)),   # xp rows
                pl.BlockSpec((ti, fp), lambda i: (i, 0)),   # emb rows
                pl.BlockSpec((n, fp), lambda i: (0, 0)),    # emb (all nodes)
            ],
            out_specs=[pl.BlockSpec((ti, n), lambda i: (i, 0)),
                       pl.BlockSpec((ti, fp), lambda i: (i, 0))],
        ),
        compiler_params=_cparams(),
        cost_estimate=pl.CostEstimate(flops=flops, transcendentals=n * n,
                                      bytes_accessed=bytes_acc),
    )(adj, xp, emb, emb)


# ------------------------------------------------ stage 3: aggregation ------

def _aggregate_kernel(wm_ref, xs_ref, o_ref, *, ci, cj):
    wm = wm_ref[...]                       # (ta, n)
    xs = xs_ref[...]                       # (n, fp)
    n, fp = xs.shape
    ta = wm.shape[0]

    # Hot path on the MXU: wm in [0, 1+1e-9], so clamp(w*xs, +-10) == w*xs for
    # every (j,f) with |xs| <= 10; zero those rare entries and do one matmul.
    xs_safe = jnp.where(jnp.abs(xs) > _CLAMP, 0.0, xs)
    o_ref[...] = jnp.dot(wm, xs_safe, preferred_element_type=jnp.float32)

    # Cold path: exact per-message clamp correction, only when some |xs| > 10.
    @pl.when(jnp.max(jnp.abs(xs)) > _CLAMP)
    def _():
        @pl.loop(0, ta // ci)
        def _(c):
            r0 = pl.multiple_of(c * ci, ci)
            wrows = wm_ref[pl.ds(r0, ci), :]            # (ci, n)
            corr = jnp.zeros((ci, fp), jnp.float32)
            # TODO(synk): switch to lax.fori_loop(..., unroll=4) if n grows
            # enough that this static unroll pressures vregs / code size.
            for jc in range(n // cj):
                j0 = jc * cj
                xraw = xs_ref[j0:j0 + cj, :]            # (cj, fp)
                xbig = jnp.where(jnp.abs(xraw) > _CLAMP, xraw, 0.0)
                wblk = wrows[:, j0:j0 + cj]             # (ci, cj)
                msg = jnp.clip(wblk[:, :, None] * xbig[None, :, :],
                               -_CLAMP, _CLAMP)
                corr = corr + jnp.sum(msg, axis=1)
            o_ref[pl.ds(r0, ci), :] = o_ref[pl.ds(r0, ci), :] + corr


def _aggregate(wm, xs, *, ta, ci=8, cj=8):
    n, fp = xs.shape
    assert ta % ci == 0 and n % cj == 0
    return pl.pallas_call(
        functools.partial(_aggregate_kernel, ci=ci, cj=cj),
        out_shape=jax.ShapeDtypeStruct((n, fp), F32),
        grid_spec=pltpu.PrefetchScalarGridSpec(
            num_scalar_prefetch=0,
            grid=(n // ta,),
            in_specs=[pl.BlockSpec((ta, n), lambda i: (i, 0)),
                      pl.BlockSpec((n, fp), lambda i: (0, 0))],
            out_specs=pl.BlockSpec((ta, fp), lambda i: (i, 0)),
        ),
        compiler_params=_cparams(),
        cost_estimate=pl.CostEstimate(flops=2 * n * n * fp, transcendentals=0,
                                      bytes_accessed=4 * (n * n + 2 * n * fp)),
    )(wm, xs)


# ---------------------------------------------------------- layer wrapper ----

def bilateral_filter(params, x, adj):
    n, fin = x.shape
    fw, fb = params["fproj"]
    w1, b1 = params["mlp1"]
    w2, b2 = params["mlp2"]
    fbf, hid = fw.shape[1], w1.shape[1]
    kp, fp, hp = _ceil_to(fin, 128), _ceil_to(fbf, 128), _ceil_to(hid, 128)
    ti = _pick_tile(n)

    # Zero-pad feature axes to lane multiples: lane-dense loads/stores, no
    # tiny-K MXU passes; padded columns provably stay zero end-to-end.
    xq   = _pad_to(x, (n, kp))
    fw_p = _pad_to(fw, (kp, fp))
    fb_p = _pad_to(fb.reshape(1, -1), (1, fp))
    w1_p = _pad_to(w1, (fp, hp))
    b1_p = _pad_to(b1.reshape(1, -1), (1, hp))
    w2_p = _pad_to(w2, (hp, fp))
    b2_p = _pad_to(b2.reshape(1, -1), (1, fp))

    xp, emb = _project(xq, fw_p, fb_p, w1_p, b1_p, w2_p, b2_p, ti=ti)
    wm, xs = _edge_weights(adj, xp, emb, ti=ti)
    out = _aggregate(wm, xs, ta=ti)
    return out[:, :fbf]


# ------------------------------------------------------------------ glue ----

def knn_adjacency(x, batch, k):
    """adj[i, j] = 1 iff j is one of the k nearest same-batch neighbours of
    center i (self-loops excluded).  Threshold form instead of a dense
    scatter; stored as a bf16 0/1 mask (exact) to halve N^2 DMA/VMEM."""
    n = x.shape[0]
    d2 = pairwise_sqdist(x)                            # Pallas (MXU) hot path
    valid = (batch[:, None] == batch[None, :]) & ~jnp.eye(n, dtype=bool)
    d2m = jnp.where(valid, d2, jnp.inf)
    # TODO(synk): top-k neighbour selection stays in XLA (no clean Pallas
    # top-k primitive on TPU); exact ties at the k-th distance admit all
    # tied neighbours, which is measure-zero for continuous inputs.
    kth = -lax.top_k(-d2m, k)[0][:, -1:]               # k-th smallest distance
    return ((d2m <= kth) & valid).astype(jnp.bfloat16)


def ama_filter_forward(params_list, x, batch, target, *, k):
    nf = len(params_list)
    for i, p in enumerate(params_list):
        adj = knn_adjacency(x, batch, k)
        y = bilateral_filter(p, x, adj)
        x = jnp.concatenate([x, y], axis=-1) if i != nf - 1 else y
    loss = jnp.mean((x - target) ** 2)
    return x, loss


# ------------------------------------------------------------ parameters ----

def _init_linear(key, fin, fout, scale=1.0):
    kw, kb = jax.random.split(key)
    bound = 1.0 / math.sqrt(fin)
    w = jax.random.uniform(kw, (fin, fout), F32, -bound, bound) * scale
    b = jax.random.uniform(kb, (fout,), F32, -bound, bound) * scale
    return w, b


def make_params(key, fin=6, fout=6):
    # TODO(synk): BatchNorm1d reproduced in eval mode with default running
    # stats (mean=0, var=1, gamma=1, beta=0) and folded into the linear;
    # training-mode batch statistics over edges are not reproduced.
    bn_scale = 1.0 / math.sqrt(1.0 + 1e-5)
    dims = [(fin, 64), (64 + fin, 128), (64 + fin + 128, fout)]
    params = []
    for fi, fo in dims:
        key, k0, k1, k2 = jax.random.split(key, 4)
        params.append(dict(
            fproj=_init_linear(k0, fi, fo),
            mlp1=_init_linear(k1, fo, 128, scale=bn_scale),
            mlp2=_init_linear(k2, 128, fo, scale=bn_scale),
        ))
    return params


# ------------------------------------------------------------------- main ---

if __name__ == "__main__":
    key = jax.random.PRNGKey(0)
    k_x, k_y, k_p = jax.random.split(key, 3)

    n_per_graph, n_graphs = 64, 2
    fin, fout, knn_k = 6, 6, 16
    n = n_per_graph * n_graphs

    x = jax.random.normal(k_x, (n, fin), F32)
    target = jax.random.normal(k_y, (n, fout), F32)
    batch = jnp.repeat(jnp.arange(n_graphs, dtype=jnp.int32), n_per_graph)
    params = make_params(k_p, fin=fin, fout=fout)

    fwd = jax.jit(functools.partial(ama_filter_forward, k=knn_k))
    out, loss = fwd(params, x, batch, target)
    jax.block_until_ready((out, loss))

    assert out.shape == (n, fout)
    assert bool(jnp.isfinite(loss))
    print("KERNEL_OK")
</pallas_src>

<mosaic_0001>
module attributes {stable_mosaic.version = 11 : i64} {
  func.func @_sqdist_kernel(%arg0: i32, %arg1: memref<128x128xf32, #tpu.memory_space<vmem>>, %arg2: memref<128x128xf32, #tpu.memory_space<vmem>>, %arg3: memref<128x128xf32, #tpu.memory_space<vmem>>) attributes {dimension_semantics = [#tpu.dimension_semantics<parallel>], iteration_bounds = array<i64: 1>, scalar_prefetch = 0 : i64, scratch_operands = 0 : i64, tpu.core_type = #tpu.core_type<tc>, window_params = [{transform_indices = @transform_0, window_bounds = array<i64: 128, 128>}, {pipeline_mode = #tpu.pipeline_mode<synchronous>, transform_indices = @transform_1, window_bounds = array<i64: 128, 128>}, {transform_indices = @transform_2, window_bounds = array<i64: 128, 128>}]} {
    %c0 = arith.constant 0 : index
    %c0_0 = arith.constant 0 : index
    %0 = vector.load %arg1[%c0, %c0_0] : memref<128x128xf32, #tpu.memory_space<vmem>>, vector<128x128xf32>
    %c0_1 = arith.constant 0 : index
    %c0_2 = arith.constant 0 : index
    %1 = vector.load %arg2[%c0_1, %c0_2] : memref<128x128xf32, #tpu.memory_space<vmem>>, vector<128x128xf32>
    %cst = arith.constant dense<0.000000e+00> : vector<128x128xf32>
    %2 = tpu.matmul %0, %1, %cst {dimension_numbers = #tpu.dot_dimension_numbers<[1], [1], [0], [0], [0, 0, 1, 0], [], []>} : vector<128x128xf32>, vector<128x128xf32>, vector<128x128xf32> -> vector<128x128xf32>
    %3 = arith.mulf %0, %0 : vector<128x128xf32>
    %cst_3 = arith.constant dense<0.000000e+00> : vector<128xf32>
    %4 = vector.multi_reduction <add>, %3, %cst_3 [1] : vector<128x128xf32> to vector<128xf32>
    %5 = vector.shape_cast %4 : vector<128xf32> to vector<128x1xf32>
    %cst_4 = arith.constant 1.000000e+00 : f32
    %6 = vector.broadcast %cst_4 : f32 to vector<1x128xf32>
    %7 = arith.mulf %1, %1 : vector<128x128xf32>
    %cst_5 = arith.constant dense<0.000000e+00> : vector<1x128xf32>
    %8 = tpu.matmul %6, %7, %cst_5 {dimension_numbers = #tpu.dot_dimension_numbers<[1], [1], [0], [0], [0, 0, 1, 0], [], []>} : vector<1x128xf32>, vector<128x128xf32>, vector<1x128xf32> -> vector<1x128xf32>
    %9 = vector.broadcast %5 : vector<128x1xf32> to vector<128x128xf32>
    %10 = vector.broadcast %8 : vector<1x128xf32> to vector<128x128xf32>
    %11 = arith.addf %9, %10 : vector<128x128xf32>
    %cst_6 = arith.constant 2.000000e+00 : f32
    %12 = vector.broadcast %cst_6 : f32 to vector<128x128xf32>
    %13 = arith.mulf %12, %2 : vector<128x128xf32>
    %14 = arith.subf %11, %13 : vector<128x128xf32>
    %cst_7 = arith.constant 0.000000e+00 : f32
    %15 = vector.broadcast %cst_7 : f32 to vector<128x128xf32>
    %16 = arith.maximumf %14, %15 : vector<128x128xf32>
    %c0_8 = arith.constant 0 : index
    %c0_9 = arith.constant 0 : index
    %17 = vector.load %arg3[%c0_8, %c0_9] : memref<128x128xf32, #tpu.memory_space<vmem>>, vector<128x128xf32>
    tpu.vector_store %arg3[%c0_8, %c0_9], %16 {strides = array<i32>} : memref<128x128xf32, #tpu.memory_space<vmem>>, vector<128x128xf32>,
    return
  }
  func.func @transform_0(%arg0: i32) -> (i32, i32) {
    %c0_i32 = arith.constant 0 : i32
    %c0_i32_0 = arith.constant 0 : i32
    return %arg0, %c0_i32 : i32, i32
  }
  func.func @transform_1(%arg0: i32) -> (i32, i32) {
    %c0_i32 = arith.constant 0 : i32
    %c0_i32_0 = arith.constant 0 : i32
    %c0_i32_1 = arith.constant 0 : i32
    return %c0_i32, %c0_i32_0 : i32, i32
  }
  func.func @transform_2(%arg0: i32) -> (i32, i32) {
    %c0_i32 = arith.constant 0 : i32
    %c0_i32_0 = arith.constant 0 : i32
    return %arg0, %c0_i32 : i32, i32
  }
}

module attributes {stable_mosaic.version = 11 : i64} {
  func.func @_project_kernel(%arg0: i32, %arg1: memref<128x128xf32, #tpu.memory_space<vmem>>, %arg2: memref<128x128xf32, #tpu.memory_space<vmem>>, %arg3: memref<1x128xf32, #tpu.memory_space<vmem>>, %arg4: memref<128x128xf32, #tpu.memory_space<vmem>>, %arg5: memref<1x128xf32, #tpu.memory_space<vmem>>, %arg6: memref<128x128xf32, #tpu.memory_space<vmem>>, %arg7: memref<1x128xf32, #tpu.memory_space<vmem>>, %arg8: memref<128x128xf32, #tpu.memory_space<vmem>>, %arg9: memref<128x128xf32, #tpu.memory_space<vmem>>) attributes {dimension_semantics = [#tpu.dimension_semantics<parallel>], iteration_bounds = array<i64: 1>, scalar_prefetch = 0 : i64, scratch_operands = 0 : i64, tpu.core_type = #tpu.core_type<tc>, window_params = [{transform_indices = @transform_0, window_bounds = array<i64: 128, 128>}, {pipeline_mode = #tpu.pipeline_mode<synchronous>, transform_indices = @transform_1, window_bounds = array<i64: 128, 128>}, {pipeline_mode = #tpu.pipeline_mode<synchronous>, transform_indices = @transform_2, window_bounds = array<i64: 1, 128>}, {pipeline_mode = #tpu.pipeline_mode<synchronous>, transform_indices = @transform_3, window_bounds = array<i64: 128, 128>}, {pipeline_mode = #tpu.pipeline_mode<synchronous>, transform_indices = @transform_4, window_bounds = array<i64: 1, 128>}, {pipeline_mode = #tpu.pipeline_mode<synchronous>, transform_indices = @transform_5, window_bounds = array<i64: 128, 128>}, {pipeline_mode = #tpu.pipeline_mode<synchronous>, transform_indices = @transform_6, window_bounds = array<i64: 1, 128>}, {transform_indices = @transform_7, window_bounds = array<i64: 128, 128>}, {transform_indices = @transform_8, window_bounds = array<i64: 128, 128>}]} {
    %c0 = arith.constant 0 : index
    %c0_0 = arith.constant 0 : index
    %0 = vector.load %arg1[%c0, %c0_0] : memref<128x128xf32, #tpu.memory_space<vmem>>, vector<128x128xf32>
    %c0_1 = arith.constant 0 : index
    %c0_2 = arith.constant 0 : index
    %1 = vector.load %arg2[%c0_1, %c0_2] : memref<128x128xf32, #tpu.memory_space<vmem>>, vector<128x128xf32>
    %cst = arith.constant dense<0.000000e+00> : vector<128x128xf32>
    %2 = tpu.matmul %0, %1, %cst {dimension_numbers = #tpu.dot_dimension_numbers<[1], [0], [0], [1], [0, 0, 1, 1], [], []>} : vector<128x128xf32>, vector<128x128xf32>, vector<128x128xf32> -> vector<128x128xf32>
    %c0_3 = arith.constant 0 : index
    %c0_4 = arith.constant 0 : index
    %3 = vector.load %arg3[%c0_3, %c0_4] : memref<1x128xf32, #tpu.memory_space<vmem>>, vector<1x128xf32>
    %4 = vector.broadcast %3 : vector<1x128xf32> to vector<128x128xf32>
    %5 = arith.addf %2, %4 : vector<128x128xf32>
    %c0_5 = arith.constant 0 : index
    %c0_6 = arith.constant 0 : index
    %6 = vector.load %arg4[%c0_5, %c0_6] : memref<128x128xf32, #tpu.memory_space<vmem>>, vector<128x128xf32>
    %cst_7 = arith.constant dense<0.000000e+00> : vector<128x128xf32>
    %7 = tpu.matmul %5, %6, %cst_7 {dimension_numbers = #tpu.dot_dimension_numbers<[1], [0], [0], [1], [0, 0, 1, 1], [], []>} : vector<128x128xf32>, vector<128x128xf32>, vector<128x128xf32> -> vector<128x128xf32>
    %c0_8 = arith.constant 0 : index
    %c0_9 = arith.constant 0 : index
    %8 = vector.load %arg5[%c0_8, %c0_9] : memref<1x128xf32, #tpu.memory_space<vmem>>, vector<1x128xf32>
    %9 = vector.broadcast %8 : vector<1x128xf32> to vector<128x128xf32>
    %10 = arith.addf %7, %9 : vector<128x128xf32>
    %cst_10 = arith.constant 0.000000e+00 : f32
    %11 = vector.broadcast %cst_10 : f32 to vector<128x128xf32>
    %12 = arith.maximumf %10, %11 : vector<128x128xf32>
    %c0_11 = arith.constant 0 : index
    %c0_12 = arith.constant 0 : index
    %13 = vector.load %arg6[%c0_11, %c0_12] : memref<128x128xf32, #tpu.memory_space<vmem>>, vector<128x128xf32>
    %cst_13 = arith.constant dense<0.000000e+00> : vector<128x128xf32>
    %14 = tpu.matmul %12, %13, %cst_13 {dimension_numbers = #tpu.dot_dimension_numbers<[1], [0], [0], [1], [0, 0, 1, 1], [], []>} : vector<128x128xf32>, vector<128x128xf32>, vector<128x128xf32> -> vector<128x128xf32>
    %c0_14 = arith.constant 0 : index
    %c0_15 = arith.constant 0 : index
    %15 = vector.load %arg7[%c0_14, %c0_15] : memref<1x128xf32, #tpu.memory_space<vmem>>, vector<1x128xf32>
    %16 = vector.broadcast %15 : vector<1x128xf32> to vector<128x128xf32>
    %17 = arith.addf %14, %16 : vector<128x128xf32>
    %cst_16 = arith.constant 0.000000e+00 : f32
    %18 = vector.broadcast %cst_16 : f32 to vector<128x128xf32>
    %19 = arith.maximumf %17, %18 : vector<128x128xf32>
    %c0_17 = arith.constant 0 : index
    %c0_18 = arith.constant 0 : index
    %20 = vector.load %arg8[%c0_17, %c0_18] : memref<128x128xf32, #tpu.memory_space<vmem>>, vector<128x128xf32>
    tpu.vector_store %arg8[%c0_17, %c0_18], %5 {strides = array<i32>} : memref<128x128xf32, #tpu.memory_space<vmem>>, vector<128x128xf32>,
    %c0_19 = arith.constant 0 : index
    %c0_20 = arith.constant 0 : index
    %21 = vector.load %arg9[%c0_19, %c0_20] : memref<128x128xf32, #tpu.memory_space<vmem>>, vector<128x128xf32>
    tpu.vector_store %arg9[%c0_19, %c0_20], %19 {strides = array<i32>} : memref<128x128xf32, #tpu.memory_space<vmem>>, vector<128x128xf32>,
    return
  }
  func.func @transform_0(%arg0: i32) -> (i32, i32) {
    %c0_i32 = arith.constant 0 : i32
    %c0_i32_0 = arith.constant 0 : i32
    return %arg0, %c0_i32 : i32, i32
  }
  func.func @transform_1(%arg0: i32) -> (i32, i32) {
    %c0_i32 = arith.constant 0 : i32
    %c0_i32_0 = arith.constant 0 : i32
    %c0_i32_1 = arith.constant 0 : i32
    return %c0_i32, %c0_i32_0 : i32, i32
  }
  func.func @transform_2(%arg0: i32) -> (i32, i32) {
    %c0_i32 = arith.constant 0 : i32
    %c0_i32_0 = arith.constant 0 : i32
    %c0_i32_1 = arith.constant 0 : i32
    return %c0_i32, %c0_i32_0 : i32, i32
  }
  func.func @transform_3(%arg0: i32) -> (i32, i32) {
    %c0_i32 = arith.constant 0 : i32
    %c0_i32_0 = arith.constant 0 : i32
    %c0_i32_1 = arith.constant 0 : i32
    return %c0_i32, %c0_i32_0 : i32, i32
  }
  func.func @transform_4(%arg0: i32) -> (i32, i32) {
    %c0_i32 = arith.constant 0 : i32
    %c0_i32_0 = arith.constant 0 : i32
    %c0_i32_1 = arith.constant 0 : i32
    return %c0_i32, %c0_i32_0 : i32, i32
  }
  func.func @transform_5(%arg0: i32) -> (i32, i32) {
    %c0_i32 = arith.constant 0 : i32
    %c0_i32_0 = arith.constant 0 : i32
    %c0_i32_1 = arith.constant 0 : i32
    return %c0_i32, %c0_i32_0 : i32, i32
  }
  func.func @transform_6(%arg0: i32) -> (i32, i32) {
    %c0_i32 = arith.constant 0 : i32
    %c0_i32_0 = arith.constant 0 : i32
    %c0_i32_1 = arith.constant 0 : i32
    return %c0_i32, %c0_i32_0 : i32, i32
  }
  func.func @transform_7(%arg0: i32) -> (i32, i32) {
    %c0_i32 = arith.constant 0 : i32
    %c0_i32_0 = arith.constant 0 : i32
    return %arg0, %c0_i32 : i32, i32
  }
  func.func @transform_8(%arg0: i32) -> (i32, i32) {
    %c0_i32 = arith.constant 0 : i32
    %c0_i32_0 = arith.constant 0 : i32
    return %arg0, %c0_i32 : i32, i32
  }
}

module attributes {stable_mosaic.version = 11 : i64} {
  func.func @_edges_kernel(%arg0: i32, %arg1: memref<128x128xbf16, #tpu.memory_space<vmem>>, %arg2: memref<128x128xf32, #tpu.memory_space<vmem>>, %arg3: memref<128x128xf32, #tpu.memory_space<vmem>>, %arg4: memref<128x128xf32, #tpu.memory_space<vmem>>, %arg5: memref<128x128xf32, #tpu.memory_space<vmem>>, %arg6: memref<128x128xf32, #tpu.memory_space<vmem>>) attributes {dimension_semantics = [#tpu.dimension_semantics<parallel>], iteration_bounds = array<i64: 1>, scalar_prefetch = 0 : i64, scratch_operands = 0 : i64, tpu.core_type = #tpu.core_type<tc>, window_params = [{transform_indices = @transform_0, window_bounds = array<i64: 128, 128>}, {transform_indices = @transform_1, window_bounds = array<i64: 128, 128>}, {transform_indices = @transform_2, window_bounds = array<i64: 128, 128>}, {pipeline_mode = #tpu.pipeline_mode<synchronous>, transform_indices = @transform_3, window_bounds = array<i64: 128, 128>}, {transform_indices = @transform_4, window_bounds = array<i64: 128, 128>}, {transform_indices = @transform_5, window_bounds = array<i64: 128, 128>}]} {
    %c0 = arith.constant 0 : index
    %c0_0 = arith.constant 0 : index
    %0 = vector.load %arg3[%c0, %c0_0] : memref<128x128xf32, #tpu.memory_space<vmem>>, vector<128x128xf32>
    %c0_1 = arith.constant 0 : index
    %c0_2 = arith.constant 0 : index
    %1 = vector.load %arg4[%c0_1, %c0_2] : memref<128x128xf32, #tpu.memory_space<vmem>>, vector<128x128xf32>
    %cst = arith.constant dense<0.000000e+00> : vector<128x128xf32>
    %2 = tpu.matmul %0, %1, %cst {dimension_numbers = #tpu.dot_dimension_numbers<[1], [1], [0], [0], [0, 0, 1, 0], [], []>} : vector<128x128xf32>, vector<128x128xf32>, vector<128x128xf32> -> vector<128x128xf32>
    %3 = arith.mulf %0, %0 : vector<128x128xf32>
    %cst_3 = arith.constant dense<0.000000e+00> : vector<128xf32>
    %4 = vector.multi_reduction <add>, %3, %cst_3 [1] : vector<128x128xf32> to vector<128xf32>
    %5 = vector.shape_cast %4 : vector<128xf32> to vector<128x1xf32>
    %cst_4 = arith.constant 1.000000e+00 : f32
    %6 = vector.broadcast %cst_4 : f32 to vector<1x128xf32>
    %7 = arith.mulf %1, %1 : vector<128x128xf32>
    %cst_5 = arith.constant dense<0.000000e+00> : vector<1x128xf32>
    %8 = tpu.matmul %6, %7, %cst_5 {dimension_numbers = #tpu.dot_dimension_numbers<[1], [1], [0], [0], [0, 0, 1, 0], [], []>} : vector<1x128xf32>, vector<128x128xf32>, vector<1x128xf32> -> vector<1x128xf32>
    %9 = vector.broadcast %5 : vector<128x1xf32> to vector<128x128xf32>
    %10 = vector.broadcast %8 : vector<1x128xf32> to vector<128x128xf32>
    %11 = arith.addf %9, %10 : vector<128x128xf32>
    %cst_6 = arith.constant 2.000000e+00 : f32
    %12 = vector.broadcast %cst_6 : f32 to vector<128x128xf32>
    %13 = arith.mulf %12, %2 : vector<128x128xf32>
    %14 = arith.subf %11, %13 : vector<128x128xf32>
    %cst_7 = arith.constant 0.000000e+00 : f32
    %15 = vector.broadcast %cst_7 : f32 to vector<128x128xf32>
    %16 = arith.maximumf %14, %15 : vector<128x128xf32>
    %cst_8 = arith.constant 0.000000e+00 : f32
    %17 = vector.broadcast %cst_8 : f32 to vector<128x128xf32>
    %18 = arith.subf %17, %16 : vector<128x128xf32>
    %19 = math.exp %18 : vector<128x128xf32>
    %cst_9 = arith.constant 9.99999971E-10 : f32
    %20 = vector.broadcast %cst_9 : f32 to vector<128x128xf32>
    %21 = arith.addf %19, %20 : vector<128x128xf32>
    %c0_10 = arith.constant 0 : index
    %c0_11 = arith.constant 0 : index
    %22 = vector.load %arg1[%c0_10, %c0_11] : memref<128x128xbf16, #tpu.memory_space<vmem>>, vector<128x128xbf16>
    %cst_12 = arith.constant 0.000000e+00 : bf16
    %23 = vector.broadcast %cst_12 : bf16 to vector<128x128xbf16>
    %24 = arith.cmpf ogt, %22, %23 : vector<128x128xbf16>
    %cst_13 = arith.constant 0.000000e+00 : f32
    %25 = vector.broadcast %cst_13 : f32 to vector<128x128xf32>
    %26 = arith.select %24, %21, %25 : vector<128x128xi1>, vector<128x128xf32>
    %cst_14 = arith.constant dense<0.000000e+00> : vector<128xf32>
    %27 = vector.multi_reduction <add>, %26, %cst_14 [1] : vector<128x128xf32> to vector<128xf32>
    %28 = vector.shape_cast %27 : vector<128xf32> to vector<128x1xf32>
    %cst_15 = arith.constant 1.000000e-30 : f32
    %29 = vector.broadcast %cst_15 : f32 to vector<128x1xf32>
    %30 = arith.maximumf %28, %29 : vector<128x1xf32>
    %c0_16 = arith.constant 0 : index
    %c0_17 = arith.constant 0 : index
    %31 = vector.load %arg5[%c0_16, %c0_17] : memref<128x128xf32, #tpu.memory_space<vmem>>, vector<128x128xf32>
    tpu.vector_store %arg5[%c0_16, %c0_17], %26 {strides = array<i32>} : memref<128x128xf32, #tpu.memory_space<vmem>>, vector<128x128xf32>,
    %c0_18 = arith.constant 0 : index
    %c0_19 = arith.constant 0 : index
    %32 = vector.load %arg2[%c0_18, %c0_19] : memref<128x128xf32, #tpu.memory_space<vmem>>, vector<128x128xf32>
    %cst_20 = arith.constant 1.000000e+00 : f32
    %33 = vector.broadcast %cst_20 : f32 to vector<128x1xf32>
    %34 = arith.divf %33, %30 : vector<128x1xf32>
    %35 = vector.broadcast %34 : vector<128x1xf32> to vector<128x128xf32>
    %36 = arith.mulf %32, %35 : vector<128x128xf32>
    %c0_21 = arith.constant 0 : index
    %c0_22 = arith.constant 0 : index
    %37 = vector.load %arg6[%c0_21, %c0_22] : memref<128x128xf32, #tpu.memory_space<vmem>>, vector<128x128xf32>
    tpu.vector_store %arg6[%c0_21, %c0_22], %36 {strides = array<i32>} : memref<128x128xf32, #tpu.memory_space<vmem>>, vector<128x128xf32>,
    return
  }
  func.func @transform_0(%arg0: i32) -> (i32, i32) {
    %c0_i32 = arith.constant 0 : i32
    %c0_i32_0 = arith.constant 0 : i32
    return %arg0, %c0_i32 : i32, i32
  }
  func.func @transform_1(%arg0: i32) -> (i32, i32) {
    %c0_i32 = arith.constant 0 : i32
    %c0_i32_0 = arith.constant 0 : i32
    return %arg0, %c0_i32 : i32, i32
  }
  func.func @transform_2(%arg0: i32) -> (i32, i32) {
    %c0_i32 = arith.constant 0 : i32
    %c0_i32_0 = arith.constant 0 : i32
    return %arg0, %c0_i32 : i32, i32
  }
  func.func @transform_3(%arg0: i32) -> (i32, i32) {
    %c0_i32 = arith.constant 0 : i32
    %c0_i32_0 = arith.constant 0 : i32
    %c0_i32_1 = arith.constant 0 : i32
    return %c0_i32, %c0_i32_0 : i32, i32
  }
  func.func @transform_4(%arg0: i32) -> (i32, i32) {
    %c0_i32 = arith.constant 0 : i32
    %c0_i32_0 = arith.constant 0 : i32
    return %arg0, %c0_i32 : i32, i32
  }
  func.func @transform_5(%arg0: i32) -> (i32, i32) {
    %c0_i32 = arith.constant 0 : i32
    %c0_i32_0 = arith.constant 0 : i32
    return %arg0, %c0_i32 : i32, i32
  }
}

module attributes {stable_mosaic.version = 11 : i64} {
  func.func @_aggregate_kernel(%arg0: i32, %arg1: memref<128x128xf32, #tpu.memory_space<vmem>>, %arg2: memref<128x128xf32, #tpu.memory_space<vmem>>, %arg3: memref<128x128xf32, #tpu.memory_space<vmem>>) attributes {dimension_semantics = [#tpu.dimension_semantics<parallel>], iteration_bounds = array<i64: 1>, scalar_prefetch = 0 : i64, scratch_operands = 0 : i64, tpu.core_type = #tpu.core_type<tc>, window_params = [{transform_indices = @transform_0, window_bounds = array<i64: 128, 128>}, {pipeline_mode = #tpu.pipeline_mode<synchronous>, transform_indices = @transform_1, window_bounds = array<i64: 128, 128>}, {transform_indices = @transform_2, window_bounds = array<i64: 128, 128>}]} {
    %c0 = arith.constant 0 : index
    %c0_0 = arith.constant 0 : index
    %0 = vector.load %arg1[%c0, %c0_0] : memref<128x128xf32, #tpu.memory_space<vmem>>, vector<128x128xf32>
    %c0_1 = arith.constant 0 : index
    %c0_2 = arith.constant 0 : index
    %1 = vector.load %arg2[%c0_1, %c0_2] : memref<128x128xf32, #tpu.memory_space<vmem>>, vector<128x128xf32>
    %2 = math.absf %1 : vector<128x128xf32>
    %cst = arith.constant 1.000000e+01 : f32
    %3 = vector.broadcast %cst : f32 to vector<128x128xf32>
    %4 = arith.cmpf ogt, %2, %3 : vector<128x128xf32>
    %cst_3 = arith.constant 0.000000e+00 : f32
    %5 = vector.broadcast %cst_3 : f32 to vector<128x128xf32>
    %6 = arith.select %4, %5, %1 : vector<128x128xi1>, vector<128x128xf32>
    %cst_4 = arith.constant dense<0.000000e+00> : vector<128x128xf32>
    %7 = tpu.matmul %0, %6, %cst_4 {dimension_numbers = #tpu.dot_dimension_numbers<[1], [0], [0], [1], [0, 0, 1, 1], [], []>} : vector<128x128xf32>, vector<128x128xf32>, vector<128x128xf32> -> vector<128x128xf32>
    %c0_5 = arith.constant 0 : index
    %c0_6 = arith.constant 0 : index
    %8 = vector.load %arg3[%c0_5, %c0_6] : memref<128x128xf32, #tpu.memory_space<vmem>>, vector<128x128xf32>
    tpu.vector_store %arg3[%c0_5, %c0_6], %7 {strides = array<i32>} : memref<128x128xf32, #tpu.memory_space<vmem>>, vector<128x128xf32>,
    %9 = math.absf %1 : vector<128x128xf32>
    %10 = vector.shape_cast %9 : vector<128x128xf32> to vector<1x128x128xf32>
    %cst_7 = arith.constant dense<0xFF800000> : vector<1xf32>
    %11 = vector.multi_reduction <maximumf>, %10, %cst_7 [1, 2] : vector<1x128x128xf32> to vector<1xf32>
    %12 = vector.shape_cast %11 : vector<1xf32> to vector<1x1x1xf32>
    %13 = vector.extract %12[0, 0, 0] : f32 from vector<1x1x1xf32>
    %cst_8 = arith.constant 1.000000e+01 : f32
    %14 = arith.cmpf ogt, %13, %cst_8 : f32
    %15 = arith.extui %14 : i1 to i32
    %c0_i32 = arith.constant 0 : i32
    %16 = arith.cmpi ne, %15, %c0_i32 : i32
    scf.if %16 {
      %c0_i32_9 = arith.constant 0 : i32
      %c16_i32 = arith.constant 16 : i32
      %17 = arith.addi %c0_i32_9, %c16_i32 : i32
      %c1_i32 = arith.constant 1 : i32
      scf.for %arg4 = %c0_i32_9 to %17 step %c1_i32  : i32 {
        %c1_i32_11 = arith.constant 1 : i32
        %18 = arith.muli %arg4, %c1_i32_11 : i32
        %c0_i32_12 = arith.constant 0 : i32
        %19 = arith.addi %c0_i32_12, %18 : i32
        %c8_i32 = arith.constant 8 : i32
        %20 = arith.muli %19, %c8_i32 : i32
        %21 = tpu.assume_multiple %20, 8 : i32
        %22 = arith.index_cast %21 : i32 to index
        %c0_13 = arith.constant 0 : index
        %23 = vector.load %arg1[%22, %c0_13] : memref<128x128xf32, #tpu.memory_space<vmem>>, vector<8x128xf32>
        %cst_14 = arith.constant 0.000000e+00 : f32
        %24 = vector.broadcast %cst_14 : f32 to vector<8x128xf32>
        %c0_15 = arith.constant 0 : index
        %c0_16 = arith.constant 0 : index
        %25 = vector.load %arg2[%c0_15, %c0_16] : memref<128x128xf32, #tpu.memory_space<vmem>>, vector<8x128xf32>
        %26 = math.absf %25 : vector<8x128xf32>
        %cst_17 = arith.constant 1.000000e+01 : f32
        %27 = vector.broadcast %cst_17 : f32 to vector<8x128xf32>
        %28 = arith.cmpf ogt, %26, %27 : vector<8x128xf32>
        %cst_18 = arith.constant 0.000000e+00 : f32
        %29 = vector.broadcast %cst_18 : f32 to vector<8x128xf32>
        %30 = arith.select %28, %25, %29 : vector<8x128xi1>, vector<8x128xf32>
        %31 = vector.extract_strided_slice %23 {offsets = [0, 0], sizes = [8, 8], strides = [1, 1]} : vector<8x128xf32> to vector<8x8xf32>
        %32 = vector.shape_cast %31 : vector<8x8xf32> to vector<8x8x1xf32>
        %33 = vector.shape_cast %30 : vector<8x128xf32> to vector<1x8x128xf32>
        %34 = vector.broadcast %32 : vector<8x8x1xf32> to vector<8x8x128xf32>
        %35 = vector.broadcast %33 : vector<1x8x128xf32> to vector<8x8x128xf32>
        %36 = arith.mulf %34, %35 : vector<8x8x128xf32>
        %cst_19 = arith.constant -1.000000e+01 : f32
        %cst_20 = arith.constant 1.000000e+01 : f32
        %37 = vector.broadcast %cst_19 : f32 to vector<8x8x128xf32>
        %38 = arith.maximumf %37, %36 : vector<8x8x128xf32>
        %39 = vector.broadcast %cst_20 : f32 to vector<8x8x128xf32>
        %40 = arith.minimumf %39, %38 : vector<8x8x128xf32>
        %cst_21 = arith.constant dense<0.000000e+00> : vector<8x128xf32>
        %41 = vector.multi_reduction <add>, %40, %cst_21 [1] : vector<8x8x128xf32> to vector<8x128xf32>
        %42 = arith.addf %24, %41 : vector<8x128xf32>
        %c8 = arith.constant 8 : index
        %c0_22 = arith.constant 0 : index
        %43 = vector.load %arg2[%c8, %c0_22] : memref<128x128xf32, #tpu.memory_space<vmem>>, vector<8x128xf32>
        %44 = math.absf %43 : vector<8x128xf32>
        %cst_23 = arith.constant 1.000000e+01 : f32
        %45 = vector.broadcast %cst_23 : f32 to vector<8x128xf32>
        %46 = arith.cmpf ogt, %44, %45 : vector<8x128xf32>
        %cst_24 = arith.constant 0.000000e+00 : f32
        %47 = vector.broadcast %cst_24 : f32 to vector<8x128xf32>
        %48 = arith.select %46, %43, %47 : vector<8x128xi1>, vector<8x128xf32>
        %49 = vector.extract_strided_slice %23 {offsets = [0, 8], sizes = [8, 8], strides = [1, 1]} : vector<8x128xf32> to vector<8x8xf32>
        %50 = vector.shape_cast %49 : vector<8x8xf32> to vector<8x8x1xf32>
        %51 = vector.shape_cast %48 : vector<8x128xf32> to vector<1x8x128xf32>
        %52 = vector.broadcast %50 : vector<8x8x1xf32> to vector<8x8x128xf32>
        %53 = vector.broadcast %51 : vector<1x8x128xf32> to vector<8x8x128xf32>
        %54 = arith.mulf %52, %53 : vector<8x8x128xf32>
        %cst_25 = arith.constant -1.000000e+01 : f32
        %cst_26 = arith.constant 1.000000e+01 : f32
        %55 = vector.broadcast %cst_25 : f32 to vector<8x8x128xf32>
        %56 = arith.maximumf %55, %54 : vector<8x8x128xf32>
        %57 = vector.broadcast %cst_26 : f32 to vector<8x8x128xf32>
        %58 = arith.minimumf %57, %56 : vector<8x8x128xf32>
        %cst_27 = arith.constant dense<0.000000e+00> : vector<8x128xf32>
        %59 = vector.multi_reduction <add>, %58, %cst_27 [1] : vector<8x8x128xf32> to vector<8x128xf32>
        %60 = arith.addf %42, %59 : vector<8x128xf32>
        %c16 = arith.constant 16 : index
        %c0_28 = arith.constant 0 : index
        %61 = vector.load %arg2[%c16, %c0_28] : memref<128x128xf32, #tpu.memory_space<vmem>>, vector<8x128xf32>
        %62 = math.absf %61 : vector<8x128xf32>
        %cst_29 = arith.constant 1.000000e+01 : f32
        %63 = vector.broadcast %cst_29 : f32 to vector<8x128xf32>
        %64 = arith.cmpf ogt, %62, %63 : vector<8x128xf32>
        %cst_30 = arith.constant 0.000000e+00 : f32
        %65 = vector.broadcast %cst_30 : f32 to vector<8x128xf32>
        %66 = arith.select %64, %61, %65 : vector<8x128xi1>, vector<8x128xf32>
        %67 = vector.extract_strided_slice %23 {offsets = [0, 16], sizes = [8, 8], strides = [1, 1]} : vector<8x128xf32> to vector<8x8xf32>
        %68 = vector.shape_cast %67 : vector<8x8xf32> to vector<8x8x1xf32>
        %69 = vector.shape_cast %66 : vector<8x128xf32> to vector<1x8x128xf32>
        %70 = vector.broadcast %68 : vector<8x8x1xf32> to vector<8x8x128xf32>
        %71 = vector.broadcast %69 : vector<1x8x128xf32> to vector<8x8x128xf32>
        %72 = arith.mulf %70, %71 : vector<8x8x128xf32>
        %cst_31 = arith.constant -1.000000e+01 : f32
        %cst_32 = arith.constant 1.000000e+01 : f32
        %73 = vector.broadcast %cst_31 : f32 to vector<8x8x128xf32>
        %74 = arith.maximumf %73, %72 : vector<8x8x128xf32>
        %75 = vector.broadcast %cst_32 : f32 to vector<8x8x128xf32>
        %76 = arith.minimumf %75, %74 : vector<8x8x128xf32>
        %cst_33 = arith.constant dense<0.000000e+00> : vector<8x128xf32>
        %77 = vector.multi_reduction <add>, %76, %cst_33 [1] : vector<8x8x128xf32> to vector<8x128xf32>
        %78 = arith.addf %60, %77 : vector<8x128xf32>
        %c24 = arith.constant 24 : index
        %c0_34 = arith.constant 0 : index
        %79 = vector.load %arg2[%c24, %c0_34] : memref<128x128xf32, #tpu.memory_space<vmem>>, vector<8x128xf32>
        %80 = math.absf %79 : vector<8x128xf32>
        %cst_35 = arith.constant 1.000000e+01 : f32
        %81 = vector.broadcast %cst_35 : f32 to vector<8x128xf32>
        %82 = arith.cmpf ogt, %80, %81 : vector<8x128xf32>
        %cst_36 = arith.constant 0.000000e+00 : f32
        %83 = vector.broadcast %cst_36 : f32 to vector<8x128xf32>
        %84 = arith.select %82, %79, %83 : vector<8x128xi1>, vector<8x128xf32>
        %85 = vector.extract_strided_slice %23 {offsets = [0, 24], sizes = [8, 8], strides = [1, 1]} : vector<8x128xf32> to vector<8x8xf32>
        %86 = vector.shape_cast %85 : vector<8x8xf32> to vector<8x8x1xf32>
        %87 = vector.shape_cast %84 : vector<8x128xf32> to vector<1x8x128xf32>
        %88 = vector.broadcast %86 : vector<8x8x1xf32> to vector<8x8x128xf32>
        %89 = vector.broadcast %87 : vector<1x8x128xf32> to vector<8x8x128xf32>
        %90 = arith.mulf %88, %89 : vector<8x8x128xf32>
        %cst_37 = arith.constant -1.000000e+01 : f32
        %cst_38 = arith.constant 1.000000e+01 : f32
        %91 = vector.broadcast %cst_37 : f32 to vector<8x8x128xf32>
        %92 = arith.maximumf %91, %90 : vector<8x8x128xf32>
        %93 = vector.broadcast %cst_38 : f32 to vector<8x8x128xf32>
        %94 = arith.minimumf %93, %92 : vector<8x8x128xf32>
        %cst_39 = arith.constant dense<0.000000e+00> : vector<8x128xf32>
        %95 = vector.multi_reduction <add>, %94, %cst_39 [1] : vector<8x8x128xf32> to vector<8x128xf32>
        %96 = arith.addf %78, %95 : vector<8x128xf32>
        %c32 = arith.constant 32 : index
        %c0_40 = arith.constant 0 : index
        %97 = vector.load %arg2[%c32, %c0_40] : memref<128x128xf32, #tpu.memory_space<vmem>>, vector<8x128xf32>
        %98 = math.absf %97 : vector<8x128xf32>
        %cst_41 = arith.constant 1.000000e+01 : f32
        %99 = vector.broadcast %cst_41 : f32 to vector<8x128xf32>
        %100 = arith.cmpf ogt, %98, %99 : vector<8x128xf32>
        %cst_42 = arith.constant 0.000000e+00 : f32
        %101 = vector.broadcast %cst_42 : f32 to vector<8x128xf32>
        %102 = arith.select %100, %97, %101 : vector<8x128xi1>, vector<8x128xf32>
        %103 = vector.extract_strided_slice %23 {offsets = [0, 32], sizes = [8, 8], strides = [1, 1]} : vector<8x128xf32> to vector<8x8xf32>
        %104 = vector.shape_cast %103 : vector<8x8xf32> to vector<8x8x1xf32>
        %105 = vector.shape_cast %102 : vector<8x128xf32> to vector<1x8x128xf32>
        %106 = vector.broadcast %104 : vector<8x8x1xf32> to vector<8x8x128xf32>
        %107 = vector.broadcast %105 : vector<1x8x128xf32> to vector<8x8x128xf32>
        %108 = arith.mulf %106, %107 : vector<8x8x128xf32>
        %cst_43 = arith.constant -1.000000e+01 : f32
        %cst_44 = arith.constant 1.000000e+01 : f32
        %109 = vector.broadcast %cst_43 : f32 to vector<8x8x128xf32>
        %110 = arith.maximumf %109, %108 : vector<8x8x128xf32>
        %111 = vector.broadcast %cst_44 : f32 to vector<8x8x128xf32>
        %112 = arith.minimumf %111, %110 : vector<8x8x128xf32>
        %cst_45 = arith.constant dense<0.000000e+00> : vector<8x128xf32>
        %113 = vector.multi_reduction <add>, %112, %cst_45 [1] : vector<8x8x128xf32> to vector<8x128xf32>
        %114 = arith.addf %96, %113 : vector<8x128xf32>
        %c40 = arith.constant 40 : index
        %c0_46 = arith.constant 0 : index
        %115 = vector.load %arg2[%c40, %c0_46] : memref<128x128xf32, #tpu.memory_space<vmem>>, vector<8x128xf32>
        %116 = math.absf %115 : vector<8x128xf32>
        %cst_47 = arith.constant 1.000000e+01 : f32
        %117 = vector.broadcast %cst_47 : f32 to vector<8x128xf32>
        %118 = arith.cmpf ogt, %116, %117 : vector<8x128xf32>
        %cst_48 = arith.constant 0.000000e+00 : f32
        %119 = vector.broadcast %cst_48 : f32 to vector<8x128xf32>
        %120 = arith.select %118, %115, %119 : vector<8x128xi1>, vector<8x128xf32>
        %121 = vector.extract_strided_slice %23 {offsets = [0, 40], sizes = [8, 8], strides = [1, 1]} : vector<8x128xf32> to vector<8x8xf32>
        %122 = vector.shape_cast %121 : vector<8x8xf32> to vector<8x8x1xf32>
        %123 = vector.shape_cast %120 : vector<8x128xf32> to vector<1x8x128xf32>
        %124 = vector.broadcast %122 : vector<8x8x1xf32> to vector<8x8x128xf32>
        %125 = vector.broadcast %123 : vector<1x8x128xf32> to vector<8x8x128xf32>
        %126 = arith.mulf %124, %125 : vector<8x8x128xf32>
        %cst_49 = arith.constant -1.000000e+01 : f32
        %cst_50 = arith.constant 1.000000e+01 : f32
        %127 = vector.broadcast %cst_49 : f32 to vector<8x8x128xf32>
        %128 = arith.maximumf %127, %126 : vector<8x8x128xf32>
        %129 = vector.broadcast %cst_50 : f32 to vector<8x8x128xf32>
        %130 = arith.minimumf %129, %128 : vector<8x8x128xf32>
        %cst_51 = arith.constant dense<0.000000e+00> : vector<8x128xf32>
        %131 = vector.multi_reduction <add>, %130, %cst_51 [1] : vector<8x8x128xf32> to vector<8x128xf32>
        %132 = arith.addf %114, %131 : vector<8x128xf32>
        %c48 = arith.constant 48 : index
        %c0_52 = arith.constant 0 : index
        %133 = vector.load %arg2[%c48, %c0_52] : memref<128x128xf32, #tpu.memory_space<vmem>>, vector<8x128xf32>
        %134 = math.absf %133 : vector<8x128xf32>
        %cst_53 = arith.constant 1.000000e+01 : f32
        %135 = vector.broadcast %cst_53 : f32 to vector<8x128xf32>
        %136 = arith.cmpf ogt, %134, %135 : vector<8x128xf32>
        %cst_54 = arith.constant 0.000000e+00 : f32
        %137 = vector.broadcast %cst_54 : f32 to vector<8x128xf32>
        %138 = arith.select %136, %133, %137 : vector<8x128xi1>, vector<8x128xf32>
        %139 = vector.extract_strided_slice %23 {offsets = [0, 48], sizes = [8, 8], strides = [1, 1]} : vector<8x128xf32> to vector<8x8xf32>
        %140 = vector.shape_cast %139 : vector<8x8xf32> to vector<8x8x1xf32>
        %141 = vector.shape_cast %138 : vector<8x128xf32> to vector<1x8x128xf32>
        %142 = vector.broadcast %140 : vector<8x8x1xf32> to vector<8x8x128xf32>
        %143 = vector.broadcast %141 : vector<1x8x128xf32> to vector<8x8x128xf32>
        %144 = arith.mulf %142, %143 : vector<8x8x128xf32>
        %cst_55 = arith.constant -1.000000e+01 : f32
        %cst_56 = arith.constant 1.000000e+01 : f32
        %145 = vector.broadcast %cst_55 : f32 to vector<8x8x128xf32>
        %146 = arith.maximumf %145, %144 : vector<8x8x128xf32>
        %147 = vector.broadcast %cst_56 : f32 to vector<8x8x128xf32>
        %148 = arith.minimumf %147, %146 : vector<8x8x128xf32>
        %cst_57 = arith.constant dense<0.000000e+00> : vector<8x128xf32>
        %149 = vector.multi_reduction <add>, %148, %cst_57 [1] : vector<8x8x128xf32> to vector<8x128xf32>
        %150 = arith.addf %132, %149 : vector<8x128xf32>
        %c56 = arith.constant 56 : index
        %c0_58 = arith.constant 0 : index
        %151 = vector.load %arg2[%c56, %c0_58] : memref<128x128xf32, #tpu.memory_space<vmem>>, vector<8x128xf32>
        %152 = math.absf %151 : vector<8x128xf32>
        %cst_59 = arith.constant 1.000000e+01 : f32
        %153 = vector.broadcast %cst_59 : f32 to vector<8x128xf32>
        %154 = arith.cmpf ogt, %152, %153 : vector<8x128xf32>
        %cst_60 = arith.constant 0.000000e+00 : f32
        %155 = vector.broadcast %cst_60 : f32 to vector<8x128xf32>
        %156 = arith.select %154, %151, %155 : vector<8x128xi1>, vector<8x128xf32>
        %157 = vector.extract_strided_slice %23 {offsets = [0, 56], sizes = [8, 8], strides = [1, 1]} : vector<8x128xf32> to vector<8x8xf32>
        %158 = vector.shape_cast %157 : vector<8x8xf32> to vector<8x8x1xf32>
        %159 = vector.shape_cast %156 : vector<8x128xf32> to vector<1x8x128xf32>
        %160 = vector.broadcast %158 : vector<8x8x1xf32> to vector<8x8x128xf32>
        %161 = vector.broadcast %159 : vector<1x8x128xf32> to vector<8x8x128xf32>
        %162 = arith.mulf %160, %161 : vector<8x8x128xf32>
        %cst_61 = arith.constant -1.000000e+01 : f32
        %cst_62 = arith.constant 1.000000e+01 : f32
        %163 = vector.broadcast %cst_61 : f32 to vector<8x8x128xf32>
        %164 = arith.maximumf %163, %162 : vector<8x8x128xf32>
        %165 = vector.broadcast %cst_62 : f32 to vector<8x8x128xf32>
        %166 = arith.minimumf %165, %164 : vector<8x8x128xf32>
        %cst_63 = arith.constant dense<0.000000e+00> : vector<8x128xf32>
        %167 = vector.multi_reduction <add>, %166, %cst_63 [1] : vector<8x8x128xf32> to vector<8x128xf32>
        %168 = arith.addf %150, %167 : vector<8x128xf32>
        %c64 = arith.constant 64 : index
        %c0_64 = arith.constant 0 : index
        %169 = vector.load %arg2[%c64, %c0_64] : memref<128x128xf32, #tpu.memory_space<vmem>>, vector<8x128xf32>
        %170 = math.absf %169 : vector<8x128xf32>
        %cst_65 = arith.constant 1.000000e+01 : f32
        %171 = vector.broadcast %cst_65 : f32 to vector<8x128xf32>
        %172 = arith.cmpf ogt, %170, %171 : vector<8x128xf32>
        %cst_66 = arith.constant 0.000000e+00 : f32
        %173 = vector.broadcast %cst_66 : f32 to vector<8x128xf32>
        %174 = arith.select %172, %169, %173 : vector<8x128xi1>, vector<8x128xf32>
        %175 = vector.extract_strided_slice %23 {offsets = [0, 64], sizes = [8, 8], strides = [1, 1]} : vector<8x128xf32> to vector<8x8xf32>
        %176 = vector.shape_cast %175 : vector<8x8xf32> to vector<8x8x1xf32>
        %177 = vector.shape_cast %174 : vector<8x128xf32> to vector<1x8x128xf32>
        %178 = vector.broadcast %176 : vector<8x8x1xf32> to vector<8x8x128xf32>
        %179 = vector.broadcast %177 : vector<1x8x128xf32> to vector<8x8x128xf32>
        %180 = arith.mulf %178, %179 : vector<8x8x128xf32>
        %cst_67 = arith.constant -1.000000e+01 : f32
        %cst_68 = arith.constant 1.000000e+01 : f32
        %181 = vector.broadcast %cst_67 : f32 to vector<8x8x128xf32>
        %182 = arith.maximumf %181, %180 : vector<8x8x128xf32>
        %183 = vector.broadcast %cst_68 : f32 to vector<8x8x128xf32>
        %184 = arith.minimumf %183, %182 : vector<8x8x128xf32>
        %cst_69 = arith.constant dense<0.000000e+00> : vector<8x128xf32>
        %185 = vector.multi_reduction <add>, %184, %cst_69 [1] : vector<8x8x128xf32> to vector<8x128xf32>
        %186 = arith.addf %168, %185 : vector<8x128xf32>
        %c72 = arith.constant 72 : index
        %c0_70 = arith.constant 0 : index
        %187 = vector.load %arg2[%c72, %c0_70] : memref<128x128xf32, #tpu.memory_space<vmem>>, vector<8x128xf32>
        %188 = math.absf %187 : vector<8x128xf32>
        %cst_71 = arith.constant 1.000000e+01 : f32
        %189 = vector.broadcast %cst_71 : f32 to vector<8x128xf32>
        %190 = arith.cmpf ogt, %188, %189 : vector<8x128xf32>
        %cst_72 = arith.constant 0.000000e+00 : f32
        %191 = vector.broadcast %cst_72 : f32 to vector<8x128xf32>
        %192 = arith.select %190, %187, %191 : vector<8x128xi1>, vector<8x128xf32>
        %193 = vector.extract_strided_slice %23 {offsets = [0, 72], sizes = [8, 8], strides = [1, 1]} : vector<8x128xf32> to vector<8x8xf32>
        %194 = vector.shape_cast %193 : vector<8x8xf32> to vector<8x8x1xf32>
        %195 = vector.shape_cast %192 : vector<8x128xf32> to vector<1x8x128xf32>
        %196 = vector.broadcast %194 : vector<8x8x1xf32> to vector<8x8x128xf32>
        %197 = vector.broadcast %195 : vector<1x8x128xf32> to vector<8x8x128xf32>
        %198 = arith.mulf %196, %197 : vector<8x8x128xf32>
        %cst_73 = arith.constant -1.000000e+01 : f32
        %cst_74 = arith.constant 1.000000e+01 : f32
        %199 = vector.broadcast %cst_73 : f32 to vector<8x8x128xf32>
        %200 = arith.maximumf %199, %198 : vector<8x8x128xf32>
        %201 = vector.broadcast %cst_74 : f32 to vector<8x8x128xf32>
        %202 = arith.minimumf %201, %200 : vector<8x8x128xf32>
        %cst_75 = arith.constant dense<0.000000e+00> : vector<8x128xf32>
        %203 = vector.multi_reduction <add>, %202, %cst_75 [1] : vector<8x8x128xf32> to vector<8x128xf32>
        %204 = arith.addf %186, %203 : vector<8x128xf32>
        %c80 = arith.constant 80 : index
        %c0_76 = arith.constant 0 : index
        %205 = vector.load %arg2[%c80, %c0_76] : memref<128x128xf32, #tpu.memory_space<vmem>>, vector<8x128xf32>
        %206 = math.absf %205 : vector<8x128xf32>
        %cst_77 = arith.constant 1.000000e+01 : f32
        %207 = vector.broadcast %cst_77 : f32 to vector<8x128xf32>
        %208 = arith.cmpf ogt, %206, %207 : vector<8x128xf32>
        %cst_78 = arith.constant 0.000000e+00 : f32
        %209 = vector.broadcast %cst_78 : f32 to vector<8x128xf32>
        %210 = arith.select %208, %205, %209 : vector<8x128xi1>, vector<8x128xf32>
        %211 = vector.extract_strided_slice %23 {offsets = [0, 80], sizes = [8, 8], strides = [1, 1]} : vector<8x128xf32> to vector<8x8xf32>
        %212 = vector.shape_cast %211 : vector<8x8xf32> to vector<8x8x1xf32>
        %213 = vector.shape_cast %210 : vector<8x128xf32> to vector<1x8x128xf32>
        %214 = vector.broadcast %212 : vector<8x8x1xf32> to vector<8x8x128xf32>
        %215 = vector.broadcast %213 : vector<1x8x128xf32> to vector<8x8x128xf32>
        %216 = arith.mulf %214, %215 : vector<8x8x128xf32>
        %cst_79 = arith.constant -1.000000e+01 : f32
        %cst_80 = arith.constant 1.000000e+01 : f32
        %217 = vector.broadcast %cst_79 : f32 to vector<8x8x128xf32>
        %218 = arith.maximumf %217, %216 : vector<8x8x128xf32>
        %219 = vector.broadcast %cst_80 : f32 to vector<8x8x128xf32>
        %220 = arith.minimumf %219, %218 : vector<8x8x128xf32>
        %cst_81 = arith.constant dense<0.000000e+00> : vector<8x128xf32>
        %221 = vector.multi_reduction <add>, %220, %cst_81 [1] : vector<8x8x128xf32> to vector<8x128xf32>
        %222 = arith.addf %204, %221 : vector<8x128xf32>
        %c88 = arith.constant 88 : index
        %c0_82 = arith.constant 0 : index
        %223 = vector.load %arg2[%c88, %c0_82] : memref<128x128xf32, #tpu.memory_space<vmem>>, vector<8x128xf32>
        %224 = math.absf %223 : vector<8x128xf32>
        %cst_83 = arith.constant 1.000000e+01 : f32
        %225 = vector.broadcast %cst_83 : f32 to vector<8x128xf32>
        %226 = arith.cmpf ogt, %224, %225 : vector<8x128xf32>
        %cst_84 = arith.constant 0.000000e+00 : f32
        %227 = vector.broadcast %cst_84 : f32 to vector<8x128xf32>
        %228 = arith.select %226, %223, %227 : vector<8x128xi1>, vector<8x128xf32>
        %229 = vector.extract_strided_slice %23 {offsets = [0, 88], sizes = [8, 8], strides = [1, 1]} : vector<8x128xf32> to vector<8x8xf32>
        %230 = vector.shape_cast %229 : vector<8x8xf32> to vector<8x8x1xf32>
        %231 = vector.shape_cast %228 : vector<8x128xf32> to vector<1x8x128xf32>
        %232 = vector.broadcast %230 : vector<8x8x1xf32> to vector<8x8x128xf32>
        %233 = vector.broadcast %231 : vector<1x8x128xf32> to vector<8x8x128xf32>
        %234 = arith.mulf %232, %233 : vector<8x8x128xf32>
        %cst_85 = arith.constant -1.000000e+01 : f32
        %cst_86 = arith.constant 1.000000e+01 : f32
        %235 = vector.broadcast %cst_85 : f32 to vector<8x8x128xf32>
        %236 = arith.maximumf %235, %234 : vector<8x8x128xf32>
        %237 = vector.broadcast %cst_86 : f32 to vector<8x8x128xf32>
        %238 = arith.minimumf %237, %236 : vector<8x8x128xf32>
        %cst_87 = arith.constant dense<0.000000e+00> : vector<8x128xf32>
        %239 = vector.multi_reduction <add>, %238, %cst_87 [1] : vector<8x8x128xf32> to vector<8x128xf32>
        %240 = arith.addf %222, %239 : vector<8x128xf32>
        %c96 = arith.constant 96 : index
        %c0_88 = arith.constant 0 : index
        %241 = vector.load %arg2[%c96, %c0_88] : memref<128x128xf32, #tpu.memory_space<vmem>>, vector<8x128xf32>
        %242 = math.absf %241 : vector<8x128xf32>
        %cst_89 = arith.constant 1.000000e+01 : f32
        %243 = vector.broadcast %cst_89 : f32 to vector<8x128xf32>
        %244 = arith.cmpf ogt, %242, %243 : vector<8x128xf32>
        %cst_90 = arith.constant 0.000000e+00 : f32
        %245 = vector.broadcast %cst_90 : f32 to vector<8x128xf32>
        %246 = arith.select %244, %241, %245 : vector<8x128xi1>, vector<8x128xf32>
        %247 = vector.extract_strided_slice %23 {offsets = [0, 96], sizes = [8, 8], strides = [1, 1]} : vector<8x128xf32> to vector<8x8xf32>
        %248 = vector.shape_cast %247 : vector<8x8xf32> to vector<8x8x1xf32>
        %249 = vector.shape_cast %246 : vector<8x128xf32> to vector<1x8x128xf32>
        %250 = vector.broadcast %248 : vector<8x8x1xf32> to vector<8x8x128xf32>
        %251 = vector.broadcast %249 : vector<1x8x128xf32> to vector<8x8x128xf32>
        %252 = arith.mulf %250, %251 : vector<8x8x128xf32>
        %cst_91 = arith.constant -1.000000e+01 : f32
        %cst_92 = arith.constant 1.000000e+01 : f32
        %253 = vector.broadcast %cst_91 : f32 to vector<8x8x128xf32>
        %254 = arith.maximumf %253, %252 : vector<8x8x128xf32>
        %255 = vector.broadcast %cst_92 : f32 to vector<8x8x128xf32>
        %256 = arith.minimumf %255, %254 : vector<8x8x128xf32>
        %cst_93 = arith.constant dense<0.000000e+00> : vector<8x128xf32>
        %257 = vector.multi_reduction <add>, %256, %cst_93 [1] : vector<8x8x128xf32> to vector<8x128xf32>
        %258 = arith.addf %240, %257 : vector<8x128xf32>
        %c104 = arith.constant 104 : index
        %c0_94 = arith.constant 0 : index
        %259 = vector.load %arg2[%c104, %c0_94] : memref<128x128xf32, #tpu.memory_space<vmem>>, vector<8x128xf32>
        %260 = math.absf %259 : vector<8x128xf32>
        %cst_95 = arith.constant 1.000000e+01 : f32
        %261 = vector.broadcast %cst_95 : f32 to vector<8x128xf32>
        %262 = arith.cmpf ogt, %260, %261 : vector<8x128xf32>
        %cst_96 = arith.constant 0.000000e+00 : f32
        %263 = vector.broadcast %cst_96 : f32 to vector<8x128xf32>
        %264 = arith.select %262, %259, %263 : vector<8x128xi1>, vector<8x128xf32>
        %265 = vector.extract_strided_slice %23 {offsets = [0, 104], sizes = [8, 8], strides = [1, 1]} : vector<8x128xf32> to vector<8x8xf32>
        %266 = vector.shape_cast %265 : vector<8x8xf32> to vector<8x8x1xf32>
        %267 = vector.shape_cast %264 : vector<8x128xf32> to vector<1x8x128xf32>
        %268 = vector.broadcast %266 : vector<8x8x1xf32> to vector<8x8x128xf32>
        %269 = vector.broadcast %267 : vector<1x8x128xf32> to vector<8x8x128xf32>
        %270 = arith.mulf %268, %269 : vector<8x8x128xf32>
        %cst_97 = arith.constant -1.000000e+01 : f32
        %cst_98 = arith.constant 1.000000e+01 : f32
        %271 = vector.broadcast %cst_97 : f32 to vector<8x8x128xf32>
        %272 = arith.maximumf %271, %270 : vector<8x8x128xf32>
        %273 = vector.broadcast %cst_98 : f32 to vector<8x8x128xf32>
        %274 = arith.minimumf %273, %272 : vector<8x8x128xf32>
        %cst_99 = arith.constant dense<0.000000e+00> : vector<8x128xf32>
        %275 = vector.multi_reduction <add>, %274, %cst_99 [1] : vector<8x8x128xf32> to vector<8x128xf32>
        %276 = arith.addf %258, %275 : vector<8x128xf32>
        %c112 = arith.constant 112 : index
        %c0_100 = arith.constant 0 : index
        %277 = vector.load %arg2[%c112, %c0_100] : memref<128x128xf32, #tpu.memory_space<vmem>>, vector<8x128xf32>
        %278 = math.absf %277 : vector<8x128xf32>
        %cst_101 = arith.constant 1.000000e+01 : f32
        %279 = vector.broadcast %cst_101 : f32 to vector<8x128xf32>
        %280 = arith.cmpf ogt, %278, %279 : vector<8x128xf32>
        %cst_102 = arith.constant 0.000000e+00 : f32
        %281 = vector.broadcast %cst_102 : f32 to vector<8x128xf32>
        %282 = arith.select %280, %277, %281 : vector<8x128xi1>, vector<8x128xf32>
        %283 = vector.extract_strided_slice %23 {offsets = [0, 112], sizes = [8, 8], strides = [1, 1]} : vector<8x128xf32> to vector<8x8xf32>
        %284 = vector.shape_cast %283 : vector<8x8xf32> to vector<8x8x1xf32>
        %285 = vector.shape_cast %282 : vector<8x128xf32> to vector<1x8x128xf32>
        %286 = vector.broadcast %284 : vector<8x8x1xf32> to vector<8x8x128xf32>
        %287 = vector.broadcast %285 : vector<1x8x128xf32> to vector<8x8x128xf32>
        %288 = arith.mulf %286, %287 : vector<8x8x128xf32>
        %cst_103 = arith.constant -1.000000e+01 : f32
        %cst_104 = arith.constant 1.000000e+01 : f32
        %289 = vector.broadcast %cst_103 : f32 to vector<8x8x128xf32>
        %290 = arith.maximumf %289, %288 : vector<8x8x128xf32>
        %291 = vector.broadcast %cst_104 : f32 to vector<8x8x128xf32>
        %292 = arith.minimumf %291, %290 : vector<8x8x128xf32>
        %cst_105 = arith.constant dense<0.000000e+00> : vector<8x128xf32>
        %293 = vector.multi_reduction <add>, %292, %cst_105 [1] : vector<8x8x128xf32> to vector<8x128xf32>
        %294 = arith.addf %276, %293 : vector<8x128xf32>
        %c120 = arith.constant 120 : index
        %c0_106 = arith.constant 0 : index
        %295 = vector.load %arg2[%c120, %c0_106] : memref<128x128xf32, #tpu.memory_space<vmem>>, vector<8x128xf32>
        %296 = math.absf %295 : vector<8x128xf32>
        %cst_107 = arith.constant 1.000000e+01 : f32
        %297 = vector.broadcast %cst_107 : f32 to vector<8x128xf32>
        %298 = arith.cmpf ogt, %296, %297 : vector<8x128xf32>
        %cst_108 = arith.constant 0.000000e+00 : f32
        %299 = vector.broadcast %cst_108 : f32 to vector<8x128xf32>
        %300 = arith.select %298, %295, %299 : vector<8x128xi1>, vector<8x128xf32>
        %301 = vector.extract_strided_slice %23 {offsets = [0, 120], sizes = [8, 8], strides = [1, 1]} : vector<8x128xf32> to vector<8x8xf32>
        %302 = vector.shape_cast %301 : vector<8x8xf32> to vector<8x8x1xf32>
        %303 = vector.shape_cast %300 : vector<8x128xf32> to vector<1x8x128xf32>
        %304 = vector.broadcast %302 : vector<8x8x1xf32> to vector<8x8x128xf32>
        %305 = vector.broadcast %303 : vector<1x8x128xf32> to vector<8x8x128xf32>
        %306 = arith.mulf %304, %305 : vector<8x8x128xf32>
        %cst_109 = arith.constant -1.000000e+01 : f32
        %cst_110 = arith.constant 1.000000e+01 : f32
        %307 = vector.broadcast %cst_109 : f32 to vector<8x8x128xf32>
        %308 = arith.maximumf %307, %306 : vector<8x8x128xf32>
        %309 = vector.broadcast %cst_110 : f32 to vector<8x8x128xf32>
        %310 = arith.minimumf %309, %308 : vector<8x8x128xf32>
        %cst_111 = arith.constant dense<0.000000e+00> : vector<8x128xf32>
        %311 = vector.multi_reduction <add>, %310, %cst_111 [1] : vector<8x8x128xf32> to vector<8x128xf32>
        %312 = arith.addf %294, %311 : vector<8x128xf32>
        %313 = arith.index_cast %21 : i32 to index
        %c0_112 = arith.constant 0 : index
        %314 = vector.load %arg3[%313, %c0_112] : memref<128x128xf32, #tpu.memory_space<vmem>>, vector<8x128xf32>
        %315 = arith.addf %314, %312 : vector<8x128xf32>
        %316 = arith.index_cast %21 : i32 to index
        %c0_113 = arith.constant 0 : index
        %317 = vector.load %arg3[%316, %c0_113] : memref<128x128xf32, #tpu.memory_space<vmem>>, vector<8x128xf32>
        tpu.vector_store %arg3[%316, %c0_113], %315 {strides = array<i32>} : memref<128x128xf32, #tpu.memory_space<vmem>>, vector<8x128xf32>,
      }
      %c16_i32_10 = arith.constant 16 : i32
    } else {
    }
    return
  }
  func.func @transform_0(%arg0: i32) -> (i32, i32) {
    %c0_i32 = arith.constant 0 : i32
    %c0_i32_0 = arith.constant 0 : i32
    return %arg0, %c0_i32 : i32, i32
  }
  func.func @transform_1(%arg0: i32) -> (i32, i32) {
    %c0_i32 = arith.constant 0 : i32
    %c0_i32_0 = arith.constant 0 : i32
    %c0_i32_1 = arith.constant 0 : i32
    return %c0_i32, %c0_i32_0 : i32, i32
  }
  func.func @transform_2(%arg0: i32) -> (i32, i32) {
    %c0_i32 = arith.constant 0 : i32
    %c0_i32_0 = arith.constant 0 : i32
    return %arg0, %c0_i32 : i32, i32
  }
}

module attributes {stable_mosaic.version = 11 : i64} {
  func.func @_project_kernel(%arg0: i32, %arg1: memref<128x256xf32, #tpu.memory_space<vmem>>, %arg2: memref<256x128xf32, #tpu.memory_space<vmem>>, %arg3: memref<1x128xf32, #tpu.memory_space<vmem>>, %arg4: memref<128x128xf32, #tpu.memory_space<vmem>>, %arg5: memref<1x128xf32, #tpu.memory_space<vmem>>, %arg6: memref<128x128xf32, #tpu.memory_space<vmem>>, %arg7: memref<1x128xf32, #tpu.memory_space<vmem>>, %arg8: memref<128x128xf32, #tpu.memory_space<vmem>>, %arg9: memref<128x128xf32, #tpu.memory_space<vmem>>) attributes {dimension_semantics = [#tpu.dimension_semantics<parallel>], iteration_bounds = array<i64: 1>, scalar_prefetch = 0 : i64, scratch_operands = 0 : i64, tpu.core_type = #tpu.core_type<tc>, window_params = [{transform_indices = @transform_0, window_bounds = array<i64: 128, 256>}, {pipeline_mode = #tpu.pipeline_mode<synchronous>, transform_indices = @transform_1, window_bounds = array<i64: 256, 128>}, {pipeline_mode = #tpu.pipeline_mode<synchronous>, transform_indices = @transform_2, window_bounds = array<i64: 1, 128>}, {pipeline_mode = #tpu.pipeline_mode<synchronous>, transform_indices = @transform_3, window_bounds = array<i64: 128, 128>}, {pipeline_mode = #tpu.pipeline_mode<synchronous>, transform_indices = @transform_4, window_bounds = array<i64: 1, 128>}, {pipeline_mode = #tpu.pipeline_mode<synchronous>, transform_indices = @transform_5, window_bounds = array<i64: 128, 128>}, {pipeline_mode = #tpu.pipeline_mode<synchronous>, transform_indices = @transform_6, window_bounds = array<i64: 1, 128>}, {transform_indices = @transform_7, window_bounds = array<i64: 128, 128>}, {transform_indices = @transform_8, window_bounds = array<i64: 128, 128>}]} {
    %c0 = arith.constant 0 : index
    %c0_0 = arith.constant 0 : index
    %0 = vector.load %arg1[%c0, %c0_0] : memref<128x256xf32, #tpu.memory_space<vmem>>, vector<128x256xf32>
    %c0_1 = arith.constant 0 : index
    %c0_2 = arith.constant 0 : index
    %1 = vector.load %arg2[%c0_1, %c0_2] : memref<256x128xf32, #tpu.memory_space<vmem>>, vector<256x128xf32>
    %cst = arith.constant dense<0.000000e+00> : vector<128x128xf32>
    %2 = tpu.matmul %0, %1, %cst {dimension_numbers = #tpu.dot_dimension_numbers<[1], [0], [0], [1], [0, 0, 1, 1], [], []>} : vector<128x256xf32>, vector<256x128xf32>, vector<128x128xf32> -> vector<128x128xf32>
    %c0_3 = arith.constant 0 : index
    %c0_4 = arith.constant 0 : index
    %3 = vector.load %arg3[%c0_3, %c0_4] : memref<1x128xf32, #tpu.memory_space<vmem>>, vector<1x128xf32>
    %4 = vector.broadcast %3 : vector<1x128xf32> to vector<128x128xf32>
    %5 = arith.addf %2, %4 : vector<128x128xf32>
    %c0_5 = arith.constant 0 : index
    %c0_6 = arith.constant 0 : index
    %6 = vector.load %arg4[%c0_5, %c0_6] : memref<128x128xf32, #tpu.memory_space<vmem>>, vector<128x128xf32>
    %cst_7 = arith.constant dense<0.000000e+00> : vector<128x128xf32>
    %7 = tpu.matmul %5, %6, %cst_7 {dimension_numbers = #tpu.dot_dimension_numbers<[1], [0], [0], [1], [0, 0, 1, 1], [], []>} : vector<128x128xf32>, vector<128x128xf32>, vector<128x128xf32> -> vector<128x128xf32>
    %c0_8 = arith.constant 0 : index
    %c0_9 = arith.constant 0 : index
    %8 = vector.load %arg5[%c0_8, %c0_9] : memref<1x128xf32, #tpu.memory_space<vmem>>, vector<1x128xf32>
    %9 = vector.broadcast %8 : vector<1x128xf32> to vector<128x128xf32>
    %10 = arith.addf %7, %9 : vector<128x128xf32>
    %cst_10 = arith.constant 0.000000e+00 : f32
    %11 = vector.broadcast %cst_10 : f32 to vector<128x128xf32>
    %12 = arith.maximumf %10, %11 : vector<128x128xf32>
    %c0_11 = arith.constant 0 : index
    %c0_12 = arith.constant 0 : index
    %13 = vector.load %arg6[%c0_11, %c0_12] : memref<128x128xf32, #tpu.memory_space<vmem>>, vector<128x128xf32>
    %cst_13 = arith.constant dense<0.000000e+00> : vector<128x128xf32>
    %14 = tpu.matmul %12, %13, %cst_13 {dimension_numbers = #tpu.dot_dimension_numbers<[1], [0], [0], [1], [0, 0, 1, 1], [], []>} : vector<128x128xf32>, vector<128x128xf32>, vector<128x128xf32> -> vector<128x128xf32>
    %c0_14 = arith.constant 0 : index
    %c0_15 = arith.constant 0 : index
    %15 = vector.load %arg7[%c0_14, %c0_15] : memref<1x128xf32, #tpu.memory_space<vmem>>, vector<1x128xf32>
    %16 = vector.broadcast %15 : vector<1x128xf32> to vector<128x128xf32>
    %17 = arith.addf %14, %16 : vector<128x128xf32>
    %cst_16 = arith.constant 0.000000e+00 : f32
    %18 = vector.broadcast %cst_16 : f32 to vector<128x128xf32>
    %19 = arith.maximumf %17, %18 : vector<128x128xf32>
    %c0_17 = arith.constant 0 : index
    %c0_18 = arith.constant 0 : index
    %20 = vector.load %arg8[%c0_17, %c0_18] : memref<128x128xf32, #tpu.memory_space<vmem>>, vector<128x128xf32>
    tpu.vector_store %arg8[%c0_17, %c0_18], %5 {strides = array<i32>} : memref<128x128xf32, #tpu.memory_space<vmem>>, vector<128x128xf32>,
    %c0_19 = arith.constant 0 : index
    %c0_20 = arith.constant 0 : index
    %21 = vector.load %arg9[%c0_19, %c0_20] : memref<128x128xf32, #tpu.memory_space<vmem>>, vector<128x128xf32>
    tpu.vector_store %arg9[%c0_19, %c0_20], %19 {strides = array<i32>} : memref<128x128xf32, #tpu.memory_space<vmem>>, vector<128x128xf32>,
    return
  }
  func.func @transform_0(%arg0: i32) -> (i32, i32) {
    %c0_i32 = arith.constant 0 : i32
    %c0_i32_0 = arith.constant 0 : i32
    return %arg0, %c0_i32 : i32, i32
  }
  func.func @transform_1(%arg0: i32) -> (i32, i32) {
    %c0_i32 = arith.constant 0 : i32
    %c0_i32_0 = arith.constant 0 : i32
    %c0_i32_1 = arith.constant 0 : i32
    return %c0_i32, %c0_i32_0 : i32, i32
  }
  func.func @transform_2(%arg0: i32) -> (i32, i32) {
    %c0_i32 = arith.constant 0 : i32
    %c0_i32_0 = arith.constant 0 : i32
    %c0_i32_1 = arith.constant 0 : i32
    return %c0_i32, %c0_i32_0 : i32, i32
  }
  func.func @transform_3(%arg0: i32) -> (i32, i32) {
    %c0_i32 = arith.constant 0 : i32
    %c0_i32_0 = arith.constant 0 : i32
    %c0_i32_1 = arith.constant 0 : i32
    return %c0_i32, %c0_i32_0 : i32, i32
  }
  func.func @transform_4(%arg0: i32) -> (i32, i32) {
    %c0_i32 = arith.constant 0 : i32
    %c0_i32_0 = arith.constant 0 : i32
    %c0_i32_1 = arith.constant 0 : i32
    return %c0_i32, %c0_i32_0 : i32, i32
  }
  func.func @transform_5(%arg0: i32) -> (i32, i32) {
    %c0_i32 = arith.constant 0 : i32
    %c0_i32_0 = arith.constant 0 : i32
    %c0_i32_1 = arith.constant 0 : i32
    return %c0_i32, %c0_i32_0 : i32, i32
  }
  func.func @transform_6(%arg0: i32) -> (i32, i32) {
    %c0_i32 = arith.constant 0 : i32
    %c0_i32_0 = arith.constant 0 : i32
    %c0_i32_1 = arith.constant 0 : i32
    return %c0_i32, %c0_i32_0 : i32, i32
  }
  func.func @transform_7(%arg0: i32) -> (i32, i32) {
    %c0_i32 = arith.constant 0 : i32
    %c0_i32_0 = arith.constant 0 : i32
    return %arg0, %c0_i32 : i32, i32
  }
  func.func @transform_8(%arg0: i32) -> (i32, i32) {
    %c0_i32 = arith.constant 0 : i32
    %c0_i32_0 = arith.constant 0 : i32
    return %arg0, %c0_i32 : i32, i32
  }
}

module attributes {stable_mosaic.version = 11 : i64} {
  func.func @_sqdist_kernel(%arg0: i32, %arg1: memref<128x256xf32, #tpu.memory_space<vmem>>, %arg2: memref<128x256xf32, #tpu.memory_space<vmem>>, %arg3: memref<128x128xf32, #tpu.memory_space<vmem>>) attributes {dimension_semantics = [#tpu.dimension_semantics<parallel>], iteration_bounds = array<i64: 1>, scalar_prefetch = 0 : i64, scratch_operands = 0 : i64, tpu.core_type = #tpu.core_type<tc>, window_params = [{transform_indices = @transform_0, window_bounds = array<i64: 128, 256>}, {pipeline_mode = #tpu.pipeline_mode<synchronous>, transform_indices = @transform_1, window_bounds = array<i64: 128, 256>}, {transform_indices = @transform_2, window_bounds = array<i64: 128, 128>}]} {
    %c0 = arith.constant 0 : index
    %c0_0 = arith.constant 0 : index
    %0 = vector.load %arg1[%c0, %c0_0] : memref<128x256xf32, #tpu.memory_space<vmem>>, vector<128x256xf32>
    %c0_1 = arith.constant 0 : index
    %c0_2 = arith.constant 0 : index
    %1 = vector.load %arg2[%c0_1, %c0_2] : memref<128x256xf32, #tpu.memory_space<vmem>>, vector<128x256xf32>
    %cst = arith.constant dense<0.000000e+00> : vector<128x128xf32>
    %2 = tpu.matmul %0, %1, %cst {dimension_numbers = #tpu.dot_dimension_numbers<[1], [1], [0], [0], [0, 0, 1, 0], [], []>} : vector<128x256xf32>, vector<128x256xf32>, vector<128x128xf32> -> vector<128x128xf32>
    %3 = arith.mulf %0, %0 : vector<128x256xf32>
    %cst_3 = arith.constant dense<0.000000e+00> : vector<128xf32>
    %4 = vector.multi_reduction <add>, %3, %cst_3 [1] : vector<128x256xf32> to vector<128xf32>
    %5 = vector.shape_cast %4 : vector<128xf32> to vector<128x1xf32>
    %cst_4 = arith.constant 1.000000e+00 : f32
    %6 = vector.broadcast %cst_4 : f32 to vector<1x256xf32>
    %7 = arith.mulf %1, %1 : vector<128x256xf32>
    %cst_5 = arith.constant dense<0.000000e+00> : vector<1x128xf32>
    %8 = tpu.matmul %6, %7, %cst_5 {dimension_numbers = #tpu.dot_dimension_numbers<[1], [1], [0], [0], [0, 0, 1, 0], [], []>} : vector<1x256xf32>, vector<128x256xf32>, vector<1x128xf32> -> vector<1x128xf32>
    %9 = vector.broadcast %5 : vector<128x1xf32> to vector<128x128xf32>
    %10 = vector.broadcast %8 : vector<1x128xf32> to vector<128x128xf32>
    %11 = arith.addf %9, %10 : vector<128x128xf32>
    %cst_6 = arith.constant 2.000000e+00 : f32
    %12 = vector.broadcast %cst_6 : f32 to vector<128x128xf32>
    %13 = arith.mulf %12, %2 : vector<128x128xf32>
    %14 = arith.subf %11, %13 : vector<128x128xf32>
    %cst_7 = arith.constant 0.000000e+00 : f32
    %15 = vector.broadcast %cst_7 : f32 to vector<128x128xf32>
    %16 = arith.maximumf %14, %15 : vector<128x128xf32>
    %c0_8 = arith.constant 0 : index
    %c0_9 = arith.constant 0 : index
    %17 = vector.load %arg3[%c0_8, %c0_9] : memref<128x128xf32, #tpu.memory_space<vmem>>, vector<128x128xf32>
    tpu.vector_store %arg3[%c0_8, %c0_9], %16 {strides = array<i32>} : memref<128x128xf32, #tpu.memory_space<vmem>>, vector<128x128xf32>,
    return
  }
  func.func @transform_0(%arg0: i32) -> (i32, i32) {
    %c0_i32 = arith.constant 0 : i32
    %c0_i32_0 = arith.constant 0 : i32
    return %arg0, %c0_i32 : i32, i32
  }
  func.func @transform_1(%arg0: i32) -> (i32, i32) {
    %c0_i32 = arith.constant 0 : i32
    %c0_i32_0 = arith.constant 0 : i32
    %c0_i32_1 = arith.constant 0 : i32
    return %c0_i32, %c0_i32_0 : i32, i32
  }
  func.func @transform_2(%arg0: i32) -> (i32, i32) {
    %c0_i32 = arith.constant 0 : i32
    %c0_i32_0 = arith.constant 0 : i32
    return %arg0, %c0_i32 : i32, i32
  }
}

</mosaic_0001>

<bundles_post_ra>
// kernel: ama_filter_forward.12
= control target key start
LH: loop header
LB: loop body
LE: loop exit
PB: predicated region body
PF: predicated region fallthrough
CT: control target
= control target key end

     0   :  { %v610_v2 = vmov 0.0|0.0   ;;  %vm611_vm0 = vmmov 0   ;;  %v612_v4 = vmov 0.0   ;;  %s854_s1 = inlined_call_operand.vmem [shape: f32[128,128], index: 1, kind: input, shape index: {}, may-alias: {0,1}]   ;;  %s855_s0 = inlined_call_operand.vmem [shape: f32[128,128], index: 0, kind: input, shape index: {}, may-alias: {0,1}]   ;;  %s856_s2 = inlined_call_operand.vmem [shape: f32[128,128], index: 2, kind: output, shape index: {}]  }
   0x1   :  { %v27_v0 = vld [vmem:[%s854_s1] sm:$0xff]  ;;  %v28_v1 = vld [vmem:[%s854_s1 + $0x8] sm:$0xff]  ;;  %582 = vmatprep.subr.bf16.mxu1 %v610_v2  ;;  %v29_v3 = vld [vmem:[%s854_s1 + $0x10] sm:$0xff]  ;;  %547 = vmatprep.mubr.msk.f32.mxu1 %vm611_vm0, %v612_v4 }
   0x2   :  { %v550_v5 = vpack.c.bf16 %v28_v1, %v27_v0  ;;  %v236_v6 = vmul.f32 %v27_v0, %v27_v0  ;;  %v237_v7 = vmul.f32 %v28_v1, %v28_v1  ;;  %v30_v8 = vld [vmem:[%s854_s1 + $0x18] sm:$0xff]  ;;  %v238_v11 = vmul.f32 %v29_v3, %v29_v3  ;;  %v11_v13 = vld [vmem:[%s855_s0] sm:$0xff]  ;;  %v32_v15 = vld [vmem:[%s854_s1 + $0x28] sm:$0xff] }
   0x3   :  { %v554_v9 = vpack.c.bf16 %v30_v8, %v29_v3  ;;  %v239_v12 = vmul.f32 %v30_v8, %v30_v8  ;;  %v31_v14 = vld [vmem:[%s854_s1 + $0x20] sm:$0xff]  ;;  %491 = vmatprep.mubr.f32.mxu0 %v11_v13  ;;  %v655_v16 = vld [vmem:[%s855_s0 + $0x10] sm:$0xff]  ;;  %v188_v17 = vmul.f32 %v11_v13, %v11_v13  ;;  %v660_v20 = vld [vmem:[%s855_s0 + $0x8] sm:$0xff]  ;;  %v241_v26 = vmul.f32 %v32_v15, %v32_v15 }
   0x4   :  { %551 = vmatprep.subr.bf16.mxu0 %v550_v5  ;;  %v583_v10 = vpack.c.bf16 %v237_v7, %v236_v6  ;;  %v558_v19 = vpack.c.bf16 %v32_v15, %v31_v14  ;;  %v190_v21 = vmul.f32 %v655_v16, %v655_v16  ;;  %v667_v22 = vld [vmem:[%s855_s0 + $0x18] sm:$0xff]  ;;  %v189_v23 = vmul.f32 %v660_v20, %v660_v20  ;;  %v676_v27 = vld [vmem:[%s855_s0 + $0x20] sm:$0xff]  ;;  %v33_v28 = vld [vmem:[%s854_s1 + $0x30] sm:$0xff] }
   0x5   :  { %553 = vmatpush3.bf16.xpose.msra.mxu0 %v550_v5  ;;  %v586_v18 = vpack.c.bf16 %v239_v12, %v238_v11  ;;  %204 = vadd.xlane.f32.xlu0 %v188_v17  ;;  %v191_v24 = vmul.f32 %v667_v22, %v667_v22  ;;  %v240_v25 = vmul.f32 %v31_v14, %v31_v14  ;;  %v34_v29 = vld [vmem:[%s854_s1 + $0x38] sm:$0xff]  ;;  %v688_v30 = vld [vmem:[%s855_s0 + $0x28] sm:$0xff]  ;;  %v697_v35 = vld [vmem:[%s855_s0 + $0x30] sm:$0xff] }
   0x6   :  { %584 = vmatpush3.bf16.xpose.msra.mxu1 %v583_v10  ;;  %555 = vmatprep.subr.bf16.mxu0 %v554_v9  ;;  %v192_v31 = vmul.f32 %v676_v27, %v676_v27  ;;  %v193_v32 = vmul.f32 %v688_v30, %v688_v30  ;;  %v562_v34 = vpack.c.bf16 %v34_v29, %v33_v28  ;;  %v702_v36 = vld [vmem:[%s855_s0 + $0x38] sm:$0xff]  ;;  %v711_v41 = vld [vmem:[%s855_s0 + $0x40] sm:$0xff]  ;;  %v36_v43 = vld [vmem:[%s854_s1 + $0x48] sm:$0xff] }
   0x7   :  { %585 = vmatprep.subr.bf16.mxu1 %v610_v2  ;;  %208 = vadd.xlane.f32.xlu1 %v190_v21  ;;  %v589_v33 = vpack.c.bf16 %v241_v26, %v240_v25  ;;  %v194_v37 = vmul.f32 %v697_v35, %v697_v35  ;;  %v195_v38 = vmul.f32 %v702_v36, %v702_v36  ;;  %v35_v42 = vld [vmem:[%s854_s1 + $0x40] sm:$0xff]  ;;  %v723_v44 = vld [vmem:[%s855_s0 + $0x48] sm:$0xff]  ;;  %v732_v49 = vld [vmem:[%s855_s0 + $0x50] sm:$0xff]  ;;  %v613_v21 = vmov 1.0  }
   0x8   :  { %v242_v39 = vmul.f32 %v33_v28, %v33_v28  ;;  %v243_v40 = vmul.f32 %v34_v29, %v34_v29  ;;  %v196_v45 = vmul.f32 %v711_v41, %v711_v41  ;;  %v197_v46 = vmul.f32 %v723_v44, %v723_v44  ;;  %v737_v50 = vld [vmem:[%s855_s0 + $0x58] sm:$0xff]  ;;  %v23_v55 = vld [vmem:[%s855_s0 + $0x60] sm:$0xff]  ;;  %v37_v56 = vld [vmem:[%s854_s1 + $0x50] sm:$0xff] }
   0x9   :  { %206 = vadd.xlane.f32.xlu0 %v189_v23  ;;  %v566_v48 = vpack.c.bf16 %v36_v43, %v35_v42  ;;  %v198_v51 = vmul.f32 %v732_v49, %v732_v49  ;;  %v199_v52 = vmul.f32 %v737_v50, %v737_v50  ;;  %v244_v53 = vmul.f32 %v35_v42, %v35_v42  ;;  %v38_v57 = vld [vmem:[%s854_s1 + $0x58] sm:$0xff]  ;;  %v24_v58 = vld [vmem:[%s855_s0 + $0x68] sm:$0xff]  ;;  %v25_v63 = vld [vmem:[%s855_s0 + $0x70] sm:$0xff] }
   0xa   :  { %v592_v47 = vpack.c.bf16 %v243_v40, %v242_v39  ;;  %v245_v54 = vmul.f32 %v36_v43, %v36_v43  ;;  %v200_v59 = vmul.f32 %v23_v55, %v23_v55  ;;  %v201_v60 = vmul.f32 %v24_v58, %v24_v58  ;;  %v26_v0 = vld [vmem:[%s855_s0 + $0x78] sm:$0xff]  ;;  %v39_v6 = vld [vmem:[%s854_s1 + $0x60] sm:$0xff]  ;;  %v40_v7 = vld [vmem:[%s854_s1 + $0x68] sm:$0xff] }
   0xb   :  { %210 = vadd.xlane.f32.xlu1 %v191_v24  ;;  %v570_v62 = vpack.c.bf16 %v38_v57, %v37_v56  ;;  %v202_v1 = vmul.f32 %v25_v63, %v25_v63  ;;  %v203_v3 = vmul.f32 %v26_v0, %v26_v0  ;;  %v246_v4 = vmul.f32 %v37_v56, %v37_v56  ;;  %v41_v12 = vld [vmem:[%s854_s1 + $0x70] sm:$0xff]  ;;  %v42_v13 = vld [vmem:[%s854_s1 + $0x78] sm:$0xff] }
   0xc   :  { %v595_v61 = vpack.c.bf16 %v245_v54, %v244_v53  ;;  %v247_v5 = vmul.f32 %v38_v57, %v38_v57  ;;  %v248_v10 = vmul.f32 %v39_v6, %v39_v6  ;;  %v249_v11 = vmul.f32 %v40_v7, %v40_v7 }
   0xd   :  { %557 = vmatpush3.bf16.xpose.msra.mxu0 %v554_v9  ;;  %212 = vadd.xlane.f32.xlu0 %v192_v31  ;;  %v574_v9 = vpack.c.bf16 %v40_v7, %v39_v6  ;;  %v578_v15 = vpack.c.bf16 %v42_v13, %v41_v12  ;;  %v250_v17 = vmul.f32 %v41_v12, %v41_v12  ;;  %v322_v23 = vlaneseq }
   0xe   :  { %587 = vmatpush3.bf16.xpose.msra.mxu1 %v586_v18  ;;  %559 = vmatprep.subr.bf16.mxu0 %v558_v19  ;;  %v598_v8 = vpack.c.bf16 %v247_v5, %v246_v4  ;;  %v601_v14 = vpack.c.bf16 %v249_v11, %v248_v10  ;;  %v251_v18 = vmul.f32 %v42_v13, %v42_v13 }
   0xf   :  { %588 = vmatprep.subr.bf16.mxu1 %v610_v2  ;;  %214 = vadd.xlane.f32.xlu1 %v193_v32  ;;  %v323_v25 = vshrl.u32 %v322_v23, 7 }
  0x11   :  { %216 = vadd.xlane.f32.xlu0 %v194_v37 }
  0x13   :  { %218 = vadd.xlane.f32.xlu1 %v195_v38 }
  0x15   :  { %561 = vmatpush3.bf16.xpose.msra.mxu0 %v558_v19  ;;  %220 = vadd.xlane.f32.xlu0 %v196_v45  ;;  %v604_v19 = vpack.c.bf16 %v251_v18, %v250_v17 }
  0x16   :  { %590 = vmatpush3.bf16.xpose.msra.mxu1 %v589_v33  ;;  %563 = vmatprep.subr.bf16.mxu0 %v562_v34 }
  0x17   :  { %591 = vmatprep.subr.bf16.mxu1 %v610_v2  ;;  %222 = vadd.xlane.f32.xlu1 %v197_v46 }
  0x19   :  { %224 = vadd.xlane.f32.xlu0 %v198_v51 }
  0x1b   :  { %226 = vadd.xlane.f32.xlu1 %v199_v52 }
  0x1d   :  { %565 = vmatpush3.bf16.xpose.msra.mxu0 %v562_v34  ;;  %228 = vadd.xlane.f32.xlu0 %v200_v59 }
  0x1e   :  { %593 = vmatpush3.bf16.xpose.msra.mxu1 %v592_v47  ;;  %567 = vmatprep.subr.bf16.mxu0 %v566_v48 }
  0x1f   :  { %594 = vmatprep.subr.bf16.mxu1 %v610_v2  ;;  %230 = vadd.xlane.f32.xlu1 %v201_v60 }
  0x21   :  { %232 = vadd.xlane.f32.xlu0 %v202_v1 }
  0x23   :  { %234 = vadd.xlane.f32.xlu1 %v203_v3 }
  0x25   :  { %569 = vmatpush3.bf16.xpose.msra.mxu0 %v566_v48 }
  0x26   :  { %596 = vmatpush3.bf16.xpose.msra.mxu1 %v595_v61  ;;  %571 = vmatprep.subr.bf16.mxu0 %v570_v62 }
  0x27   :  { %597 = vmatprep.subr.bf16.mxu1 %v610_v2 }
  0x2d   :  { %573 = vmatpush3.bf16.xpose.msra.mxu0 %v570_v62 }
  0x2e   :  { %599 = vmatpush3.bf16.xpose.msra.mxu1 %v598_v8  ;;  %575 = vmatprep.subr.bf16.mxu0 %v574_v9 }
  0x2f   :  { %600 = vmatprep.subr.bf16.mxu1 %v610_v2 }
  0x35   :  { %577 = vmatpush3.bf16.xpose.msra.mxu0 %v574_v9 }
  0x36   :  { %602 = vmatpush3.bf16.xpose.msra.mxu1 %v601_v14  ;;  %579 = vmatprep.subr.bf16.mxu0 %v578_v15 }
  0x37   :  { %603 = vmatprep.subr.bf16.mxu1 %v610_v2 }
  0x3d   :  { %581 = vmatpush3.bf16.xpose.msra.mxu0 %v578_v15 }
  0x3e   :  { %605 = vmatpush3.bf16.xpose.msra.mxu1 %v604_v19 }
  0x44   :  { %492 = vmatmul.mubr.f32.vlgmr.msra.gmra.mrb[0].mxu0 %v660_v20 }
  0x45   :  { %548 = vmatmul.mubr.f32.vlgmr.msra.gmra.mrb[0].mxu1 %v613_v21  ;;  %494 = vmatprep.mubr.f32.mxu0 %v655_v16 }
  0x48   :  { %495 = vmatmul.mubr.f32.gmra.mrb[2].mxu0 %v667_v22 }
  0x49   :  { %497 = vmatprep.mubr.f32.mxu0 %v676_v27  ;;  %v324_v27 = vsub.s32 0, %v323_v25 }
  0x4c   :  { %498 = vmatmul.mubr.f32.gmra.mrb[4].mxu0 %v688_v30 }
  0x4d   :  { %500 = vmatprep.mubr.f32.mxu0 %v697_v35 }
  0x50   :  { %501 = vmatmul.mubr.f32.gmra.mrb[6].mxu0 %v702_v36 }
  0x51   :  { %503 = vmatprep.mubr.f32.mxu0 %v711_v41 }
  0x54   :  { %504 = vmatmul.mubr.f32.gmra.mrb[8].mxu0 %v723_v44 }
  0x55   :  { %506 = vmatprep.mubr.f32.mxu0 %v732_v49 }
  0x58   :  { %507 = vmatmul.mubr.f32.gmra.mrb[10].mxu0 %v737_v50 }
  0x59   :  { %509 = vmatprep.mubr.f32.mxu0 %v23_v55 }
  0x5c   :  { %510 = vmatmul.mubr.f32.gmra.mrb[12].mxu0 %v24_v58 }
  0x5d   :  { %512 = vmatprep.mubr.f32.mxu0 %v25_v63 }
  0x60   :  { %513 = vmatmul.mubr.f32.gmra.mrb[14].mxu0 %v26_v0 }
  0x92   :  { %v205_v16 = vpop.xlane.xlu0 %204 }
  0x94   :  { %v209_v2 = vpop.xlane.xlu1 %208 }
  0x96   :  { %v207_v22 = vpop.xlane.xlu0 %206 }
  0x98   :  { %v211_v20 = vpop.xlane.xlu1 %210 }
  0x9a   :  { %v213_v24 = vpop.xlane.xlu0 %212 }
  0x9c   :  { %v215_v26 = vpop.xlane.xlu1 %214 }
  0x9e   :  { %v217_v28 = vpop.xlane.xlu0 %216 }
  0xa0   :  { %v219_v30 = vpop.xlane.xlu1 %218 }
  0xa2   :  { %v221_v50 = vpop.xlane.xlu0 %220 }
  0xa4   :  { %v223_v47 = vpop.xlane.xlu1 %222 }
  0xa6   :  { %v225_v7 = vpop.xlane.xlu0 %224 }
  0xa8   :  { %v227_v3 = vpop.xlane.xlu1 %226 }
 0x117   :  { %v493_v29 = vpop.f32.mrb[0].mxu0 }
 0x118   :  { %v109_v31 = vpop.f32.mrb[1].mxu0  ;;  %v318_v32 = vpop.f32.mrb[0].mxu1  ;;  %v343_v35 = vmul.f32 2.0, %v493_v29 }
 0x119   :  { %v788_v33 = vrot.slane %v318_v32, %v324_v27  ;;  %v549_v34 = vpop.f32.mrb[1].mxu1  ;;  %v342_v36 = vmul.f32 2.0, %v109_v31 }
 0x11b   :  { %v326_v37 = vadd.f32 %v788_v33, %v205_v16  ;;  %v327_v38 = vadd.f32 %v788_v33, %v207_v22  ;;  %v329_v39 = vadd.f32 %v788_v33, %v211_v20  ;;  %v496_v40 = vpop.f32.mrb[2].mxu0  ;;  %v328_v45 = vadd.f32 %v788_v33, %v209_v2  ;;  %v231_v2 = vpop.xlane.xlu1 %230 }
 0x11c   :  { %v345_v41 = vmul.f32 2.0, %v496_v40  ;;  %v119_v42 = vpop.f32.mrb[3].mxu0  ;;  %v331_v49 = vadd.f32 %v788_v33, %v215_v26  ;;  %v330_v55 = vadd.f32 %v788_v33, %v213_v24  ;;  %v333_v62 = vadd.f32 %v788_v33, %v219_v30  ;;  %v229_v22 = vpop.xlane.xlu0 %228 }
 0x11d   :  { %v358_v43 = vsub.f32 %v326_v37, %v342_v36  ;;  %v359_v44 = vsub.f32 %v327_v38, %v343_v35  ;;  %v344_v46 = vmul.f32 2.0, %v119_v42  ;;  %v332_v1 = vadd.f32 %v788_v33, %v217_v28 }
 0x11e   :  { %v361_v48 = vsub.f32 %v329_v39, %v345_v41  ;;  %v335_v11 = vadd.f32 %v788_v33, %v223_v47  ;;  %v334_v14 = vadd.f32 %v788_v33, %v221_v50  ;;  %v337_v20 = vadd.f32 %v788_v33, %v227_v3 }
 0x11f   :  { %v374_v51 = vmax.f32 %v358_v43, 0.0  ;;  %v375_v52 = vmax.f32 %v359_v44, 0.0  ;;  %v360_v53 = vsub.f32 %v328_v45, %v344_v46  ;;  %v499_v54 = vpop.f32.mrb[4].mxu0  ;;  %v336_v25 = vadd.f32 %v788_v33, %v225_v7  ;;  %v235_v37 = vpop.xlane.xlu1 %234 }
 0x120   :  { %v377_v56 = vmax.f32 %v361_v48, 0.0  ;;  %v347_v57 = vmul.f32 2.0, %v499_v54  ;;  %v129_v58 = vpop.f32.mrb[5].mxu0  ;;  %v339_v32 = vadd.f32 %v788_v33, %v231_v2  ;;  %v338_v36 = vadd.f32 %v788_v33, %v229_v22  ;;  %v233_v41 = vpop.xlane.xlu0 %232 }
 0x121   :  { %390 = vst [vmem:[%s856_s2] sm:$0xff] %v374_v51  ;;  %391 = vst [vmem:[%s856_s2 + $0x8] sm:$0xff] %v375_v52  ;;  %v376_v59 = vmax.f32 %v360_v53, 0.0  ;;  %v346_v60 = vmul.f32 2.0, %v129_v58  ;;  %v341_v45 = vadd.f32 %v788_v33, %v235_v37  ;;  %v340_v48 = vadd.f32 %v788_v33, %v233_v41 }
 0x122   :  { %393 = vst [vmem:[%s856_s2 + $0x18] sm:$0xff] %v377_v56  ;;  %v363_v61 = vsub.f32 %v331_v49, %v347_v57 }
 0x123   :  { %392 = vst [vmem:[%s856_s2 + $0x10] sm:$0xff] %v376_v59  ;;  %v362_v63 = vsub.f32 %v330_v55, %v346_v60  ;;  %v502_v0 = vpop.f32.mrb[6].mxu0 }
 0x124   :  { %v379_v4 = vmax.f32 %v363_v61, 0.0  ;;  %v349_v5 = vmul.f32 2.0, %v502_v0  ;;  %v139_v6 = vpop.f32.mrb[7].mxu0 }
 0x125   :  { %v378_v8 = vmax.f32 %v362_v63, 0.0  ;;  %v348_v9 = vmul.f32 2.0, %v139_v6 }
 0x126   :  { %395 = vst [vmem:[%s856_s2 + $0x28] sm:$0xff] %v379_v4  ;;  %v365_v10 = vsub.f32 %v333_v62, %v349_v5 }
 0x127   :  { %394 = vst [vmem:[%s856_s2 + $0x20] sm:$0xff] %v378_v8  ;;  %v364_v12 = vsub.f32 %v332_v1, %v348_v9  ;;  %v505_v13 = vpop.f32.mrb[8].mxu0 }
 0x128   :  { %v381_v15 = vmax.f32 %v365_v10, 0.0  ;;  %v351_v17 = vmul.f32 2.0, %v505_v13  ;;  %v149_v18 = vpop.f32.mrb[9].mxu0 }
 0x129   :  { %v380_v19 = vmax.f32 %v364_v12, 0.0  ;;  %v350_v21 = vmul.f32 2.0, %v149_v18 }
 0x12a   :  { %397 = vst [vmem:[%s856_s2 + $0x38] sm:$0xff] %v381_v15  ;;  %v367_v16 = vsub.f32 %v335_v11, %v351_v17 }
 0x12b   :  { %396 = vst [vmem:[%s856_s2 + $0x30] sm:$0xff] %v380_v19  ;;  %v366_v23 = vsub.f32 %v334_v14, %v350_v21  ;;  %v508_v24 = vpop.f32.mrb[10].mxu0 }
 0x12c   :  { %v383_v26 = vmax.f32 %v367_v16, 0.0  ;;  %v353_v27 = vmul.f32 2.0, %v508_v24  ;;  %v159_v28 = vpop.f32.mrb[11].mxu0 }
 0x12d   :  { %v382_v29 = vmax.f32 %v366_v23, 0.0  ;;  %v352_v30 = vmul.f32 2.0, %v159_v28 }
 0x12e   :  { %399 = vst [vmem:[%s856_s2 + $0x48] sm:$0xff] %v383_v26  ;;  %v369_v31 = vsub.f32 %v337_v20, %v353_v27 }
 0x12f   :  { %398 = vst [vmem:[%s856_s2 + $0x40] sm:$0xff] %v382_v29  ;;  %v368_v34 = vsub.f32 %v336_v25, %v352_v30  ;;  %v511_v35 = vpop.f32.mrb[12].mxu0 }
 0x130   :  { %v385_v38 = vmax.f32 %v369_v31, 0.0  ;;  %v355_v39 = vmul.f32 2.0, %v511_v35  ;;  %v169_v40 = vpop.f32.mrb[13].mxu0 }
 0x131   :  { %v384_v42 = vmax.f32 %v368_v34, 0.0  ;;  %v354_v43 = vmul.f32 2.0, %v169_v40 }
 0x132   :  { %401 = vst [vmem:[%s856_s2 + $0x58] sm:$0xff] %v385_v38  ;;  %v371_v44 = vsub.f32 %v339_v32, %v355_v39 }
 0x133   :  { %400 = vst [vmem:[%s856_s2 + $0x50] sm:$0xff] %v384_v42  ;;  %v370_v46 = vsub.f32 %v338_v36, %v354_v43  ;;  %v514_v47 = vpop.f32.mrb[14].mxu0 }
 0x134   :  { %v387_v49 = vmax.f32 %v371_v44, 0.0  ;;  %v357_v50 = vmul.f32 2.0, %v514_v47  ;;  %v179_v51 = vpop.f32.mrb[15].mxu0 }
 0x135   :  { %v386_v52 = vmax.f32 %v370_v46, 0.0  ;;  %v356_v53 = vmul.f32 2.0, %v179_v51 }
 0x136   :  { %403 = vst [vmem:[%s856_s2 + $0x68] sm:$0xff] %v387_v49  ;;  %v373_v54 = vsub.f32 %v341_v45, %v357_v50 }
 0x137   :  { %402 = vst [vmem:[%s856_s2 + $0x60] sm:$0xff] %v386_v52  ;;  %v372_v55 = vsub.f32 %v340_v48, %v356_v53 }
 0x138   :  { %v389_v56 = vmax.f32 %v373_v54, 0.0 }
 0x139   :  { %v388_v57 = vmax.f32 %v372_v55, 0.0 }
 0x13a   :  { %405 = vst [vmem:[%s856_s2 + $0x78] sm:$0xff] %v389_v56 }
 0x13b   :  { %404 = vst [vmem:[%s856_s2 + $0x70] sm:$0xff] %v388_v57 }

// kernel: ama_filter_forward.13
= control target key start
LH: loop header
LB: loop body
LE: loop exit
PB: predicated region body
PF: predicated region fallthrough
CT: control target
= control target key end

     0   :  { %s1383_s1 = inlined_call_operand.vmem [shape: f32[128,128], index: 1, kind: input, shape index: {}]   ;;  %s1384_s0 = inlined_call_operand.vmem [shape: f32[128,128], index: 0, kind: input, shape index: {}]   ;;  %s1385_s3 = inlined_call_operand.vmem [shape: f32[128,128], index: 3, kind: input, shape index: {}]   ;;  %s1386_s5 = inlined_call_operand.vmem [shape: f32[128,128], index: 5, kind: input, shape index: {}]   ;;  %s1387_s2 = inlined_call_operand.vmem [shape: f32[1,128], index: 2, kind: input, shape index: {}]   ;;  %s1388_s7 = inlined_call_operand.vmem [shape: f32[128,128], index: 7, kind: output, shape index: {0}]   ;;  %s1389_s4 = inlined_call_operand.vmem [shape: f32[1,128], index: 4, kind: input, shape index: {}]   ;;  %s1390_s6 = inlined_call_operand.vmem [shape: f32[1,128], index: 6, kind: input, shape index: {}]   ;;  %s1391_s8 = inlined_call_operand.vmem [shape: f32[128,128], index: 8, kind: output, shape index: {1}]  }
   0x1   :  { %v44_v0 = vld [vmem:[%s1383_s1] sm:$0xff]  ;;  %v45_v1 = vld [vmem:[%s1383_s1 + $0x8] sm:$0xff]  ;;  %v46_v2 = vld [vmem:[%s1383_s1 + $0x10] sm:$0xff] }
   0x2   :  { %v887_v3 = vpack.c.bf16 %v45_v1, %v44_v0  ;;  %v47_v4 = vld [vmem:[%s1383_s1 + $0x18] sm:$0xff]  ;;  %v48_v6 = vld [vmem:[%s1383_s1 + $0x20] sm:$0xff]  ;;  %v49_v7 = vld [vmem:[%s1383_s1 + $0x28] sm:$0xff] }
   0x3   :  { %v891_v5 = vpack.c.bf16 %v47_v4, %v46_v2  ;;  %v895_v8 = vpack.c.bf16 %v49_v7, %v48_v6  ;;  %v28_v9 = vld [vmem:[%s1384_s0] sm:$0xff]  ;;  %v50_v10 = vld [vmem:[%s1383_s1 + $0x30] sm:$0xff]  ;;  %v51_v11 = vld [vmem:[%s1383_s1 + $0x38] sm:$0xff] }
   0x4   :  { %888 = vmatprep.subr.bf16.mxu0 %v887_v3  ;;  %751 = vmatprep.mubr.f32.mxu0 %v28_v9  ;;  %v899_v12 = vpack.c.bf16 %v51_v11, %v50_v10  ;;  %v52_v13 = vld [vmem:[%s1383_s1 + $0x40] sm:$0xff]  ;;  %v53_v14 = vld [vmem:[%s1383_s1 + $0x48] sm:$0xff]  ;;  %v214_v17 = vld [vmem:[%s1385_s3 + $0x10] sm:$0xff] }
   0x5   :  { %890 = vmatpush3.bf16.msra.mxu0 %v887_v3  ;;  %v212_v15 = vld [vmem:[%s1385_s3] sm:$0xff]  ;;  %v213_v16 = vld [vmem:[%s1385_s3 + $0x8] sm:$0xff]  ;;  %v215_v18 = vld [vmem:[%s1385_s3 + $0x18] sm:$0xff]  ;;  %v903_v21 = vpack.c.bf16 %v53_v14, %v52_v13 }
   0x6   :  { %892 = vmatprep.subr.bf16.mxu0 %v891_v5  ;;  %v919_v19 = vpack.c.bf16 %v213_v16, %v212_v15  ;;  %v923_v20 = vpack.c.bf16 %v215_v18, %v214_v17  ;;  %v216_v22 = vld [vmem:[%s1385_s3 + $0x20] sm:$0xff]  ;;  %v217_v23 = vld [vmem:[%s1385_s3 + $0x28] sm:$0xff]  ;;  %v54_v24 = vld [vmem:[%s1383_s1 + $0x50] sm:$0xff] }
   0x7   :  { %v55_v25 = vld [vmem:[%s1383_s1 + $0x58] sm:$0xff]  ;;  %v927_v26 = vpack.c.bf16 %v217_v23, %v216_v22  ;;  %v218_v28 = vld [vmem:[%s1385_s3 + $0x30] sm:$0xff]  ;;  %v56_v30 = vld [vmem:[%s1383_s1 + $0x60] sm:$0xff] }
   0x8   :  { %920 = vmatprep.subr.bf16.mxu1 %v919_v19  ;;  %v907_v27 = vpack.c.bf16 %v55_v25, %v54_v24  ;;  %v219_v29 = vld [vmem:[%s1385_s3 + $0x38] sm:$0xff]  ;;  %v57_v31 = vld [vmem:[%s1383_s1 + $0x68] sm:$0xff]  ;;  %v220_v34 = vld [vmem:[%s1385_s3 + $0x40] sm:$0xff] }
   0x9   :  { %894 = vmatpush3.bf16.msra.mxu0 %v891_v5  ;;  %922 = vmatpush3.bf16.msra.mxu1 %v919_v19  ;;  %v931_v32 = vpack.c.bf16 %v219_v29, %v218_v28  ;;  %v911_v33 = vpack.c.bf16 %v57_v31, %v56_v30  ;;  %v221_v35 = vld [vmem:[%s1385_s3 + $0x48] sm:$0xff]  ;;  %v58_v36 = vld [vmem:[%s1383_s1 + $0x70] sm:$0xff]  ;;  %v59_v37 = vld [vmem:[%s1383_s1 + $0x78] sm:$0xff] }
   0xa   :  { %896 = vmatprep.subr.bf16.mxu0 %v895_v8  ;;  %924 = vmatprep.subr.bf16.mxu1 %v923_v20  ;;  %v935_v38 = vpack.c.bf16 %v221_v35, %v220_v34  ;;  %v915_v39 = vpack.c.bf16 %v59_v37, %v58_v36  ;;  %v222_v40 = vld [vmem:[%s1385_s3 + $0x50] sm:$0xff]  ;;  %v223_v41 = vld [vmem:[%s1385_s3 + $0x58] sm:$0xff]  ;;  %v224_v43 = vld [vmem:[%s1385_s3 + $0x60] sm:$0xff] }
   0xb   :  { %v939_v42 = vpack.c.bf16 %v223_v41, %v222_v40  ;;  %v225_v44 = vld [vmem:[%s1385_s3 + $0x68] sm:$0xff]  ;;  %v30_v47 = vld [vmem:[%s1384_s0 + $0x10] sm:$0xff]  ;;  %v31_v48 = vld [vmem:[%s1384_s0 + $0x18] sm:$0xff] }
   0xc   :  { %v29_v45 = vld [vmem:[%s1384_s0 + $0x8] sm:$0xff]  ;;  %v943_v46 = vpack.c.bf16 %v225_v44, %v224_v43  ;;  %v32_v49 = vld [vmem:[%s1384_s0 + $0x20] sm:$0xff]  ;;  %v34_v51 = vld [vmem:[%s1384_s0 + $0x30] sm:$0xff] }
   0xd   :  { %898 = vmatpush3.bf16.msra.mxu0 %v895_v8  ;;  %926 = vmatpush3.bf16.msra.mxu1 %v923_v20  ;;  %v33_v50 = vld [vmem:[%s1384_s0 + $0x28] sm:$0xff]  ;;  %v35_v52 = vld [vmem:[%s1384_s0 + $0x38] sm:$0xff]  ;;  %v36_v53 = vld [vmem:[%s1384_s0 + $0x40] sm:$0xff] }
   0xe   :  { %900 = vmatprep.subr.bf16.mxu0 %v899_v12  ;;  %928 = vmatprep.subr.bf16.mxu1 %v927_v26  ;;  %v37_v54 = vld [vmem:[%s1384_s0 + $0x48] sm:$0xff]  ;;  %v38_v55 = vld [vmem:[%s1384_s0 + $0x50] sm:$0xff]  ;;  %v39_v56 = vld [vmem:[%s1384_s0 + $0x58] sm:$0xff] }
   0xf   :  { %v40_v57 = vld [vmem:[%s1384_s0 + $0x60] sm:$0xff]  ;;  %v41_v58 = vld [vmem:[%s1384_s0 + $0x68] sm:$0xff]  ;;  %v42_v59 = vld [vmem:[%s1384_s0 + $0x70] sm:$0xff] }
  0x10   :  { %v43_v60 = vld [vmem:[%s1384_s0 + $0x78] sm:$0xff]  ;;  %v226_v61 = vld [vmem:[%s1385_s3 + $0x70] sm:$0xff]  ;;  %v396_v0 = vld [vmem:[%s1386_s5] sm:$0xff] }
  0x11   :  { %902 = vmatpush3.bf16.msra.mxu0 %v899_v12  ;;  %930 = vmatpush3.bf16.msra.mxu1 %v927_v26  ;;  %v227_v62 = vld [vmem:[%s1385_s3 + $0x78] sm:$0xff]  ;;  %v397_v1 = vld [vmem:[%s1386_s5 + $0x8] sm:$0xff]  ;;  %v398_v2 = vld [vmem:[%s1386_s5 + $0x10] sm:$0xff] }
  0x12   :  { %904 = vmatprep.subr.bf16.mxu0 %v903_v21  ;;  %932 = vmatprep.subr.bf16.mxu1 %v931_v32  ;;  %v947_v63 = vpack.c.bf16 %v227_v62, %v226_v61  ;;  %v951_v3 = vpack.c.bf16 %v397_v1, %v396_v0  ;;  %v399_v4 = vld [vmem:[%s1386_s5 + $0x18] sm:$0xff]  ;;  %v400_v6 = vld [vmem:[%s1386_s5 + $0x20] sm:$0xff]  ;;  %v401_v7 = vld [vmem:[%s1386_s5 + $0x28] sm:$0xff] }
  0x13   :  { %v955_v5 = vpack.c.bf16 %v399_v4, %v398_v2  ;;  %v959_v8 = vpack.c.bf16 %v401_v7, %v400_v6  ;;  %v402_v9 = vld [vmem:[%s1386_s5 + $0x30] sm:$0xff]  ;;  %v403_v10 = vld [vmem:[%s1386_s5 + $0x38] sm:$0xff]  ;;  %v404_v12 = vld [vmem:[%s1386_s5 + $0x40] sm:$0xff] }
  0x14   :  { %v1212_v11 = vpack.c.bf16 %v403_v10, %v402_v9  ;;  %v405_v13 = vld [vmem:[%s1386_s5 + $0x48] sm:$0xff]  ;;  %v406_v15 = vld [vmem:[%s1386_s5 + $0x50] sm:$0xff]  ;;  %v407_v16 = vld [vmem:[%s1386_s5 + $0x58] sm:$0xff] }
  0x15   :  { %906 = vmatpush3.bf16.msra.mxu0 %v903_v21  ;;  %934 = vmatpush3.bf16.msra.mxu1 %v931_v32  ;;  %v1221_v14 = vpack.c.bf16 %v405_v13, %v404_v12  ;;  %v1231_v17 = vpack.c.bf16 %v407_v16, %v406_v15  ;;  %v408_v18 = vld [vmem:[%s1386_s5 + $0x60] sm:$0xff]  ;;  %v409_v19 = vld [vmem:[%s1386_s5 + $0x68] sm:$0xff] }
  0x16   :  { %908 = vmatprep.subr.bf16.mxu0 %v907_v27  ;;  %936 = vmatprep.subr.bf16.mxu1 %v935_v38  ;;  %v1241_v20 = vpack.c.bf16 %v409_v19, %v408_v18  ;;  %v1249_v21 = vld [vmem:[%s1387_s2] ss:$0 sm:$0xff] }
  0x19   :  { %910 = vmatpush3.bf16.msra.mxu0 %v907_v27  ;;  %938 = vmatpush3.bf16.msra.mxu1 %v935_v38 }
  0x1a   :  { %912 = vmatprep.subr.bf16.mxu0 %v911_v33  ;;  %940 = vmatprep.subr.bf16.mxu1 %v939_v42 }
  0x1d   :  { %914 = vmatpush3.bf16.msra.mxu0 %v911_v33  ;;  %942 = vmatpush3.bf16.msra.mxu1 %v939_v42 }
  0x1e   :  { %916 = vmatprep.subr.bf16.mxu0 %v915_v39  ;;  %944 = vmatprep.subr.bf16.mxu1 %v943_v46 }
  0x21   :  { %918 = vmatpush3.bf16.msra.mxu0 %v915_v39  ;;  %946 = vmatpush3.bf16.msra.mxu1 %v943_v46 }
  0x22   :  { %948 = vmatprep.subr.bf16.mxu1 %v947_v63  ;;  %952 = vmatprep.subr.bf16.mxu0 %v951_v3 }
  0x24   :  { %752 = vmatmul.mubr.f32.vlgmr.msra.gmra.mrb[0].mxu0 %v29_v45 }
  0x25   :  { %754 = vmatprep.mubr.f32.mxu0 %v30_v47  ;;  %950 = vmatpush3.bf16.msra.mxu1 %v947_v63 }
  0x26   :  { %983 = vmatprep.subr.bf16.mxu1 %v951_v3  ;;  %954 = vmatpush3.bf16.msra.mxu0 %v951_v3 }
  0x27   :  { %956 = vmatprep.subr.bf16.mxu0 %v955_v5 }
  0x28   :  { %755 = vmatmul.mubr.f32.gmra.mrb[2].mxu0 %v31_v48 }
  0x29   :  { %757 = vmatprep.mubr.f32.mxu0 %v32_v49 }
  0x2a   :  { %958 = vmatpush3.bf16.msra.mxu0 %v955_v5 }
  0x2b   :  { %960 = vmatprep.subr.bf16.mxu0 %v959_v8 }
  0x2c   :  { %758 = vmatmul.mubr.f32.gmra.mrb[4].mxu0 %v33_v50 }
  0x2d   :  { %760 = vmatprep.mubr.f32.mxu0 %v34_v51 }
  0x2e   :  { %962 = vmatpush3.bf16.msra.mxu0 %v959_v8 }
  0x2f   :  { %964 = vmatprep.subr.bf16.mxu0 %v1212_v11 }
  0x30   :  { %761 = vmatmul.mubr.f32.gmra.mrb[6].mxu0 %v35_v52 }
  0x31   :  { %763 = vmatprep.mubr.f32.mxu0 %v36_v53 }
  0x32   :  { %966 = vmatpush3.bf16.msra.mxu0 %v1212_v11 }
  0x33   :  { %968 = vmatprep.subr.bf16.mxu0 %v1221_v14 }
  0x34   :  { %764 = vmatmul.mubr.f32.gmra.mrb[8].mxu0 %v37_v54  ;;  %v410_v54 = vld [vmem:[%s1386_s5 + $0x70] sm:$0xff] }
  0x35   :  { %766 = vmatprep.mubr.f32.mxu0 %v38_v55  ;;  %v411_v55 = vld [vmem:[%s1386_s5 + $0x78] sm:$0xff] }
  0x36   :  { %970 = vmatpush3.bf16.msra.mxu0 %v1221_v14 }
  0x37   :  { %972 = vmatprep.subr.bf16.mxu0 %v1231_v17 }
  0x38   :  { %767 = vmatmul.mubr.f32.gmra.mrb[10].mxu0 %v39_v56  ;;  %v979_v56 = vpack.c.bf16 %v411_v55, %v410_v54 }
  0x39   :  { %769 = vmatprep.mubr.f32.mxu0 %v40_v57  ;;  %v621_v57 = vld [vmem:[%s1389_s4] ss:$0 sm:$0xff] }
  0x3a   :  { %974 = vmatpush3.bf16.msra.mxu0 %v1231_v17 }
  0x3b   :  { %976 = vmatprep.subr.bf16.mxu0 %v1241_v20 }
  0x3c   :  { %770 = vmatmul.mubr.f32.gmra.mrb[12].mxu0 %v41_v58 }
  0x3d   :  { %772 = vmatprep.mubr.f32.mxu0 %v42_v59 }
  0x3e   :  { %978 = vmatpush3.bf16.msra.mxu0 %v1241_v20 }
  0x3f   :  { %980 = vmatprep.subr.bf16.mxu0 %v979_v56 }
  0x40   :  { %773 = vmatmul.mubr.f32.gmra.mrb[14].mxu0 %v43_v60 }
  0x42   :  { %982 = vmatpush3.bf16.msra.mxu0 %v979_v56 }
  0xf7   :  { %v753_v22 = vpop.f32.mrb[0].mxu0 }
  0xf8   :  { %v139_v23 = vadd.f32 %v753_v22, %v1249_v21  ;;  %v133_v24 = vpop.f32.mrb[1].mxu0 }
  0xf9   :  { %v134_v25 = vadd.f32 %v1249_v21, %v133_v24 }
  0xfa   :  { %581 = vst [vmem:[%s1388_s7 + $0x8] sm:$0xff] %v139_v23 }
  0xfb   :  { %580 = vst [vmem:[%s1388_s7] sm:$0xff] %v134_v25  ;;  %v756_v26 = vpop.f32.mrb[2].mxu0  ;;  %807 = vmatprep.mubr.f32.mxu1 %v134_v25 }
  0xfc   :  { %v149_v27 = vadd.f32 %v756_v26, %v1249_v21  ;;  %v143_v28 = vpop.f32.mrb[3].mxu0  ;;  %808 = vmatmul.mubr.f32.vlgmr.msra.gmra.mrb[0].mxu1 %v139_v23 }
  0xfd   :  { %v144_v29 = vadd.f32 %v1249_v21, %v143_v28  ;;  %991 = vmatpush3.bf16.msra.mxu1 %v951_v3 }
  0xfe   :  { %583 = vst [vmem:[%s1388_s7 + $0x18] sm:$0xff] %v149_v27  ;;  %984 = vmatprep.subr.bf16.mxu1 %v955_v5 }
  0xff   :  { %582 = vst [vmem:[%s1388_s7 + $0x10] sm:$0xff] %v144_v29  ;;  %v759_v30 = vpop.f32.mrb[4].mxu0  ;;  %810 = vmatprep.mubr.f32.mxu1 %v144_v29 }
 0x100   :  { %v159_v31 = vadd.f32 %v759_v30, %v1249_v21  ;;  %v153_v32 = vpop.f32.mrb[5].mxu0  ;;  %811 = vmatmul.mubr.f32.gmra.mrb[2].mxu1 %v149_v27 }
 0x101   :  { %v154_v33 = vadd.f32 %v1249_v21, %v153_v32  ;;  %992 = vmatpush3.bf16.msra.mxu1 %v955_v5 }
 0x102   :  { %585 = vst [vmem:[%s1388_s7 + $0x28] sm:$0xff] %v159_v31  ;;  %985 = vmatprep.subr.bf16.mxu1 %v959_v8 }
 0x103   :  { %584 = vst [vmem:[%s1388_s7 + $0x20] sm:$0xff] %v154_v33  ;;  %v762_v34 = vpop.f32.mrb[6].mxu0  ;;  %813 = vmatprep.mubr.f32.mxu1 %v154_v33 }
 0x104   :  { %v169_v35 = vadd.f32 %v762_v34, %v1249_v21  ;;  %v163_v36 = vpop.f32.mrb[7].mxu0  ;;  %814 = vmatmul.mubr.f32.gmra.mrb[4].mxu1 %v159_v31 }
 0x105   :  { %v164_v37 = vadd.f32 %v1249_v21, %v163_v36  ;;  %993 = vmatpush3.bf16.msra.mxu1 %v959_v8 }
 0x106   :  { %587 = vst [vmem:[%s1388_s7 + $0x38] sm:$0xff] %v169_v35  ;;  %986 = vmatprep.subr.bf16.mxu1 %v1212_v11 }
 0x107   :  { %586 = vst [vmem:[%s1388_s7 + $0x30] sm:$0xff] %v164_v37  ;;  %v765_v38 = vpop.f32.mrb[8].mxu0  ;;  %816 = vmatprep.mubr.f32.mxu1 %v164_v37 }
 0x108   :  { %v179_v39 = vadd.f32 %v765_v38, %v1249_v21  ;;  %v173_v40 = vpop.f32.mrb[9].mxu0  ;;  %817 = vmatmul.mubr.f32.gmra.mrb[6].mxu1 %v169_v35 }
 0x109   :  { %v174_v41 = vadd.f32 %v1249_v21, %v173_v40  ;;  %994 = vmatpush3.bf16.msra.mxu1 %v1212_v11 }
 0x10a   :  { %589 = vst [vmem:[%s1388_s7 + $0x48] sm:$0xff] %v179_v39  ;;  %987 = vmatprep.subr.bf16.mxu1 %v1221_v14 }
 0x10b   :  { %588 = vst [vmem:[%s1388_s7 + $0x40] sm:$0xff] %v174_v41  ;;  %v768_v42 = vpop.f32.mrb[10].mxu0  ;;  %819 = vmatprep.mubr.f32.mxu1 %v174_v41 }
 0x10c   :  { %v189_v43 = vadd.f32 %v768_v42, %v1249_v21  ;;  %v183_v44 = vpop.f32.mrb[11].mxu0  ;;  %820 = vmatmul.mubr.f32.gmra.mrb[8].mxu1 %v179_v39  ;;  %v622_v42 = vld [vmem:[%s1390_s6] ss:$0 sm:$0xff] }
 0x10d   :  { %v184_v45 = vadd.f32 %v1249_v21, %v183_v44  ;;  %995 = vmatpush3.bf16.msra.mxu1 %v1221_v14 }
 0x10e   :  { %591 = vst [vmem:[%s1388_s7 + $0x58] sm:$0xff] %v189_v43  ;;  %988 = vmatprep.subr.bf16.mxu1 %v1231_v17 }
 0x10f   :  { %590 = vst [vmem:[%s1388_s7 + $0x50] sm:$0xff] %v184_v45  ;;  %v771_v46 = vpop.f32.mrb[12].mxu0  ;;  %822 = vmatprep.mubr.f32.mxu1 %v184_v45 }
 0x110   :  { %v199_v47 = vadd.f32 %v771_v46, %v1249_v21  ;;  %v193_v48 = vpop.f32.mrb[13].mxu0  ;;  %823 = vmatmul.mubr.f32.gmra.mrb[10].mxu1 %v189_v43 }
 0x111   :  { %v194_v49 = vadd.f32 %v1249_v21, %v193_v48  ;;  %996 = vmatpush3.bf16.msra.mxu1 %v1231_v17 }
 0x112   :  { %593 = vst [vmem:[%s1388_s7 + $0x68] sm:$0xff] %v199_v47  ;;  %989 = vmatprep.subr.bf16.mxu1 %v1241_v20 }
 0x113   :  { %592 = vst [vmem:[%s1388_s7 + $0x60] sm:$0xff] %v194_v49  ;;  %v774_v50 = vpop.f32.mrb[14].mxu0  ;;  %825 = vmatprep.mubr.f32.mxu1 %v194_v49 }
 0x114   :  { %v209_v51 = vadd.f32 %v774_v50, %v1249_v21  ;;  %v203_v52 = vpop.f32.mrb[15].mxu0  ;;  %826 = vmatmul.mubr.f32.gmra.mrb[12].mxu1 %v199_v47 }
 0x115   :  { %v204_v53 = vadd.f32 %v1249_v21, %v203_v52  ;;  %997 = vmatpush3.bf16.msra.mxu1 %v1241_v20 }
 0x116   :  { %595 = vst [vmem:[%s1388_s7 + $0x78] sm:$0xff] %v209_v51  ;;  %990 = vmatprep.subr.bf16.mxu1 %v979_v56 }
 0x117   :  { %594 = vst [vmem:[%s1388_s7 + $0x70] sm:$0xff] %v204_v53  ;;  %828 = vmatprep.mubr.f32.mxu1 %v204_v53 }
 0x118   :  { %829 = vmatmul.mubr.f32.gmra.mrb[14].mxu1 %v209_v51 }
 0x119   :  { %998 = vmatpush3.bf16.msra.mxu1 %v979_v56 }
 0x1cf   :  { %v809_v58 = vpop.f32.mrb[0].mxu1 }
 0x1d0   :  { %v307_v59 = vadd.f32 %v809_v58, %v621_v57  ;;  %v301_v60 = vpop.f32.mrb[1].mxu1 }
 0x1d1   :  { %v302_v61 = vadd.f32 %v621_v57, %v301_v60 }
 0x1d2   :  { %v381_v0 = vmax.f32 %v307_v59, 0.0 }
 0x1d3   :  { %v380_v62 = vmax.f32 %v302_v61, 0.0  ;;  %v812_v63 = vpop.f32.mrb[2].mxu1 }
 0x1d4   :  { %v317_v1 = vadd.f32 %v812_v63, %v621_v57  ;;  %v311_v2 = vpop.f32.mrb[3].mxu1 }
 0x1d5   :  { %v312_v3 = vadd.f32 %v621_v57, %v311_v2  ;;  %863 = vmatprep.mubr.f32.mxu0 %v380_v62 }
 0x1d6   :  { %864 = vmatmul.mubr.f32.vlgmr.msra.gmra.mrb[16].mxu0 %v381_v0  ;;  %v383_v6 = vmax.f32 %v317_v1, 0.0 }
 0x1d7   :  { %v382_v4 = vmax.f32 %v312_v3, 0.0  ;;  %v815_v5 = vpop.f32.mrb[4].mxu1 }
 0x1d8   :  { %v327_v7 = vadd.f32 %v815_v5, %v621_v57  ;;  %v321_v8 = vpop.f32.mrb[5].mxu1 }
 0x1d9   :  { %v322_v9 = vadd.f32 %v621_v57, %v321_v8  ;;  %866 = vmatprep.mubr.f32.mxu0 %v382_v4 }
 0x1da   :  { %867 = vmatmul.mubr.f32.gmra.mrb[18].mxu0 %v383_v6  ;;  %v385_v12 = vmax.f32 %v327_v7, 0.0 }
 0x1db   :  { %v384_v10 = vmax.f32 %v322_v9, 0.0  ;;  %v818_v11 = vpop.f32.mrb[6].mxu1 }
 0x1dc   :  { %v337_v13 = vadd.f32 %v818_v11, %v621_v57  ;;  %v331_v14 = vpop.f32.mrb[7].mxu1 }
 0x1dd   :  { %v332_v15 = vadd.f32 %v621_v57, %v331_v14  ;;  %869 = vmatprep.mubr.f32.mxu0 %v384_v10 }
 0x1de   :  { %870 = vmatmul.mubr.f32.gmra.mrb[20].mxu0 %v385_v12  ;;  %v387_v18 = vmax.f32 %v337_v13, 0.0 }
 0x1df   :  { %v386_v16 = vmax.f32 %v332_v15, 0.0  ;;  %v821_v17 = vpop.f32.mrb[8].mxu1 }
 0x1e0   :  { %v347_v19 = vadd.f32 %v821_v17, %v621_v57  ;;  %v341_v20 = vpop.f32.mrb[9].mxu1 }
 0x1e1   :  { %v342_v21 = vadd.f32 %v621_v57, %v341_v20  ;;  %872 = vmatprep.mubr.f32.mxu0 %v386_v16 }
 0x1e2   :  { %873 = vmatmul.mubr.f32.gmra.mrb[22].mxu0 %v387_v18  ;;  %v389_v24 = vmax.f32 %v347_v19, 0.0 }
 0x1e3   :  { %v388_v22 = vmax.f32 %v342_v21, 0.0  ;;  %v824_v23 = vpop.f32.mrb[10].mxu1 }
 0x1e4   :  { %v357_v25 = vadd.f32 %v824_v23, %v621_v57  ;;  %v351_v26 = vpop.f32.mrb[11].mxu1 }
 0x1e5   :  { %v352_v27 = vadd.f32 %v621_v57, %v351_v26  ;;  %875 = vmatprep.mubr.f32.mxu1 %v388_v22 }
 0x1e6   :  { %876 = vmatmul.mubr.f32.vlgmr.msra.gmra.mrb[16].mxu1 %v389_v24  ;;  %v391_v30 = vmax.f32 %v357_v25, 0.0 }
 0x1e7   :  { %v390_v28 = vmax.f32 %v352_v27, 0.0  ;;  %v827_v29 = vpop.f32.mrb[12].mxu1 }
 0x1e8   :  { %v367_v31 = vadd.f32 %v827_v29, %v621_v57  ;;  %v361_v32 = vpop.f32.mrb[13].mxu1 }
 0x1e9   :  { %v362_v33 = vadd.f32 %v621_v57, %v361_v32  ;;  %878 = vmatprep.mubr.f32.mxu1 %v390_v28 }
 0x1ea   :  { %879 = vmatmul.mubr.f32.gmra.mrb[18].mxu1 %v391_v30  ;;  %v393_v36 = vmax.f32 %v367_v31, 0.0 }
 0x1eb   :  { %v392_v34 = vmax.f32 %v362_v33, 0.0  ;;  %v830_v35 = vpop.f32.mrb[14].mxu1 }
 0x1ec   :  { %v377_v37 = vadd.f32 %v830_v35, %v621_v57  ;;  %v371_v38 = vpop.f32.mrb[15].mxu1 }
 0x1ed   :  { %v372_v39 = vadd.f32 %v621_v57, %v371_v38  ;;  %881 = vmatprep.mubr.f32.mxu1 %v392_v34 }
 0x1ee   :  { %882 = vmatmul.mubr.f32.gmra.mrb[20].mxu1 %v393_v36  ;;  %v395_v41 = vmax.f32 %v377_v37, 0.0 }
 0x1ef   :  { %v394_v40 = vmax.f32 %v372_v39, 0.0 }
 0x1f1   :  { %884 = vmatprep.mubr.f32.mxu1 %v394_v40 }
 0x1f2   :  { %885 = vmatmul.mubr.f32.gmra.mrb[22].mxu1 %v395_v41 }
 0x2a9   :  { %v865_v43 = vpop.f32.mrb[16].mxu0 }
 0x2aa   :  { %v491_v44 = vadd.f32 %v865_v43, %v622_v42  ;;  %v485_v45 = vpop.f32.mrb[17].mxu0 }
 0x2ab   :  { %v486_v46 = vadd.f32 %v622_v42, %v485_v45 }
 0x2ac   :  { %v565_v47 = vmax.f32 %v491_v44, 0.0 }
 0x2ad   :  { %v564_v48 = vmax.f32 %v486_v46, 0.0  ;;  %v868_v49 = vpop.f32.mrb[18].mxu0 }
 0x2ae   :  { %597 = vst [vmem:[%s1391_s8 + $0x8] sm:$0xff] %v565_v47  ;;  %v501_v50 = vadd.f32 %v868_v49, %v622_v42  ;;  %v495_v51 = vpop.f32.mrb[19].mxu0 }
 0x2af   :  { %596 = vst [vmem:[%s1391_s8] sm:$0xff] %v564_v48  ;;  %v496_v52 = vadd.f32 %v622_v42, %v495_v51 }
 0x2b0   :  { %v567_v53 = vmax.f32 %v501_v50, 0.0 }
 0x2b1   :  { %v566_v54 = vmax.f32 %v496_v52, 0.0  ;;  %v871_v55 = vpop.f32.mrb[20].mxu0 }
 0x2b2   :  { %599 = vst [vmem:[%s1391_s8 + $0x18] sm:$0xff] %v567_v53  ;;  %v511_v56 = vadd.f32 %v871_v55, %v622_v42  ;;  %v505_v57 = vpop.f32.mrb[21].mxu0 }
 0x2b3   :  { %598 = vst [vmem:[%s1391_s8 + $0x10] sm:$0xff] %v566_v54  ;;  %v506_v58 = vadd.f32 %v622_v42, %v505_v57 }
 0x2b4   :  { %v569_v59 = vmax.f32 %v511_v56, 0.0 }
 0x2b5   :  { %v568_v60 = vmax.f32 %v506_v58, 0.0  ;;  %v874_v61 = vpop.f32.mrb[22].mxu0 }
 0x2b6   :  { %601 = vst [vmem:[%s1391_s8 + $0x28] sm:$0xff] %v569_v59  ;;  %v521_v62 = vadd.f32 %v874_v61, %v622_v42  ;;  %v515_v63 = vpop.f32.mrb[23].mxu0 }
 0x2b7   :  { %600 = vst [vmem:[%s1391_s8 + $0x20] sm:$0xff] %v568_v60  ;;  %v516_v0 = vadd.f32 %v622_v42, %v515_v63 }
 0x2b8   :  { %v571_v1 = vmax.f32 %v521_v62, 0.0 }
 0x2b9   :  { %v570_v2 = vmax.f32 %v516_v0, 0.0  ;;  %v877_v3 = vpop.f32.mrb[16].mxu1 }
 0x2ba   :  { %603 = vst [vmem:[%s1391_s8 + $0x38] sm:$0xff] %v571_v1  ;;  %v531_v4 = vadd.f32 %v877_v3, %v622_v42  ;;  %v525_v5 = vpop.f32.mrb[17].mxu1 }
 0x2bb   :  { %602 = vst [vmem:[%s1391_s8 + $0x30] sm:$0xff] %v570_v2  ;;  %v526_v6 = vadd.f32 %v622_v42, %v525_v5 }
 0x2bc   :  { %v573_v7 = vmax.f32 %v531_v4, 0.0 }
 0x2bd   :  { %v572_v8 = vmax.f32 %v526_v6, 0.0  ;;  %v880_v9 = vpop.f32.mrb[18].mxu1 }
 0x2be   :  { %605 = vst [vmem:[%s1391_s8 + $0x48] sm:$0xff] %v573_v7  ;;  %v541_v10 = vadd.f32 %v880_v9, %v622_v42  ;;  %v535_v11 = vpop.f32.mrb[19].mxu1 }
 0x2bf   :  { %604 = vst [vmem:[%s1391_s8 + $0x40] sm:$0xff] %v572_v8  ;;  %v536_v12 = vadd.f32 %v622_v42, %v535_v11 }
 0x2c0   :  { %v575_v13 = vmax.f32 %v541_v10, 0.0 }
 0x2c1   :  { %v574_v14 = vmax.f32 %v536_v12, 0.0  ;;  %v883_v15 = vpop.f32.mrb[20].mxu1 }
 0x2c2   :  { %607 = vst [vmem:[%s1391_s8 + $0x58] sm:$0xff] %v575_v13  ;;  %v551_v16 = vadd.f32 %v883_v15, %v622_v42  ;;  %v545_v17 = vpop.f32.mrb[21].mxu1 }
 0x2c3   :  { %606 = vst [vmem:[%s1391_s8 + $0x50] sm:$0xff] %v574_v14  ;;  %v546_v18 = vadd.f32 %v622_v42, %v545_v17 }
 0x2c4   :  { %v577_v19 = vmax.f32 %v551_v16, 0.0 }
 0x2c5   :  { %v576_v20 = vmax.f32 %v546_v18, 0.0  ;;  %v886_v21 = vpop.f32.mrb[22].mxu1 }
 0x2c6   :  { %609 = vst [vmem:[%s1391_s8 + $0x68] sm:$0xff] %v577_v19  ;;  %v561_v22 = vadd.f32 %v886_v21, %v622_v42  ;;  %v555_v23 = vpop.f32.mrb[23].mxu1 }
 0x2c7   :  { %608 = vst [vmem:[%s1391_s8 + $0x60] sm:$0xff] %v576_v20  ;;  %v556_v24 = vadd.f32 %v622_v42, %v555_v23 }
 0x2c8   :  { %v579_v25 = vmax.f32 %v561_v22, 0.0 }
 0x2c9   :  { %v578_v26 = vmax.f32 %v556_v24, 0.0 }
 0x2ca   :  { %611 = vst [vmem:[%s1391_s8 + $0x78] sm:$0xff] %v579_v25 }
 0x2cb   :  { %610 = vst [vmem:[%s1391_s8 + $0x70] sm:$0xff] %v578_v26 }

// kernel: ama_filter_forward.14
= control target key start
LH: loop header
LB: loop body
LE: loop exit
PB: predicated region body
PF: predicated region fallthrough
CT: control target
= control target key end

     0   :  { %v978_v2 = vmov 0.0|0.0   ;;  %vm979_vm0 = vmmov 0   ;;  %v980_v4 = vmov 0.0   ;;  %s1565_s3 = inlined_call_operand.vmem [shape: f32[128,128], index: 3, kind: input, shape index: {}, may-alias: {2,3}]   ;;  %s1566_s2 = inlined_call_operand.vmem [shape: f32[128,128], index: 2, kind: input, shape index: {}, may-alias: {2,3}]   ;;  %s1567_s0 = inlined_call_operand.vmem [shape: bf16[128,128], index: 0, kind: input, shape index: {}]   ;;  %s1568_s4 = inlined_call_operand.vmem [shape: f32[128,128], index: 4, kind: output, shape index: {0}]   ;;  %s1569_s1 = inlined_call_operand.vmem [shape: f32[128,128], index: 1, kind: input, shape index: {}]   ;;  %s1570_s5 = inlined_call_operand.vmem [shape: f32[128,128], index: 5, kind: output, shape index: {1}]  }
   0x1   :  { %v38_v0 = vld [vmem:[%s1565_s3] sm:$0xff]  ;;  %v39_v1 = vld [vmem:[%s1565_s3 + $0x8] sm:$0xff]  ;;  %885 = vmatprep.subr.bf16.mxu1 %v978_v2  ;;  %v40_v3 = vld [vmem:[%s1565_s3 + $0x10] sm:$0xff]  ;;  %850 = vmatprep.mubr.msk.f32.mxu1 %vm979_vm0, %v980_v4 }
   0x2   :  { %v853_v5 = vpack.c.bf16 %v39_v1, %v38_v0  ;;  %v247_v6 = vmul.f32 %v38_v0, %v38_v0  ;;  %v248_v7 = vmul.f32 %v39_v1, %v39_v1  ;;  %v41_v8 = vld [vmem:[%s1565_s3 + $0x18] sm:$0xff]  ;;  %v249_v11 = vmul.f32 %v40_v3, %v40_v3  ;;  %v22_v13 = vld [vmem:[%s1566_s2] sm:$0xff]  ;;  %v43_v15 = vld [vmem:[%s1565_s3 + $0x28] sm:$0xff] }
   0x3   :  { %v857_v9 = vpack.c.bf16 %v41_v8, %v40_v3  ;;  %v250_v12 = vmul.f32 %v41_v8, %v41_v8  ;;  %v42_v14 = vld [vmem:[%s1565_s3 + $0x20] sm:$0xff]  ;;  %794 = vmatprep.mubr.f32.mxu0 %v22_v13  ;;  %v1039_v16 = vld [vmem:[%s1566_s2 + $0x10] sm:$0xff]  ;;  %v1046_v20 = vld [vmem:[%s1566_s2 + $0x18] sm:$0xff]  ;;  %v199_v21 = vmul.f32 %v22_v13, %v22_v13  ;;  %v252_v26 = vmul.f32 %v43_v15, %v43_v15 }
   0x4   :  { %854 = vmatprep.subr.bf16.mxu0 %v853_v5  ;;  %v886_v10 = vpack.c.bf16 %v248_v7, %v247_v6  ;;  %v201_v17 = vmul.f32 %v1039_v16, %v1039_v16  ;;  %v861_v19 = vpack.c.bf16 %v43_v15, %v42_v14  ;;  %v1051_v22 = vld [vmem:[%s1566_s2 + $0x8] sm:$0xff]  ;;  %v202_v23 = vmul.f32 %v1046_v20, %v1046_v20  ;;  %v44_v28 = vld [vmem:[%s1565_s3 + $0x30] sm:$0xff]  ;;  %v45_v29 = vld [vmem:[%s1565_s3 + $0x38] sm:$0xff] }
   0x5   :  { %856 = vmatpush3.bf16.xpose.msra.mxu0 %v853_v5  ;;  %v889_v18 = vpack.c.bf16 %v250_v12, %v249_v11  ;;  %215 = vadd.xlane.f32.xlu0 %v199_v21  ;;  %v200_v24 = vmul.f32 %v1051_v22, %v1051_v22  ;;  %v251_v25 = vmul.f32 %v42_v14, %v42_v14  ;;  %v1060_v27 = vld [vmem:[%s1566_s2 + $0x28] sm:$0xff]  ;;  %v1072_v30 = vld [vmem:[%s1566_s2 + $0x20] sm:$0xff]  ;;  %v1081_v35 = vld [vmem:[%s1566_s2 + $0x38] sm:$0xff]  ;;  %v981_v21 = vmov 1.0  }
   0x6   :  { %887 = vmatpush3.bf16.xpose.msra.mxu1 %v886_v10  ;;  %858 = vmatprep.subr.bf16.mxu0 %v857_v9  ;;  %v204_v31 = vmul.f32 %v1060_v27, %v1060_v27  ;;  %v203_v32 = vmul.f32 %v1072_v30, %v1072_v30  ;;  %v865_v34 = vpack.c.bf16 %v45_v29, %v44_v28  ;;  %v1086_v36 = vld [vmem:[%s1566_s2 + $0x30] sm:$0xff]  ;;  %v1095_v41 = vld [vmem:[%s1566_s2 + $0x48] sm:$0xff]  ;;  %v46_v42 = vld [vmem:[%s1565_s3 + $0x40] sm:$0xff] }
   0x7   :  { %888 = vmatprep.subr.bf16.mxu1 %v978_v2  ;;  %219 = vadd.xlane.f32.xlu1 %v201_v17  ;;  %v892_v33 = vpack.c.bf16 %v252_v26, %v251_v25  ;;  %v206_v37 = vmul.f32 %v1081_v35, %v1081_v35  ;;  %v205_v38 = vmul.f32 %v1086_v36, %v1086_v36  ;;  %v47_v43 = vld [vmem:[%s1565_s3 + $0x48] sm:$0xff]  ;;  %v1107_v44 = vld [vmem:[%s1566_s2 + $0x40] sm:$0xff]  ;;  %v1116_v49 = vld [vmem:[%s1566_s2 + $0x58] sm:$0xff] }
   0x8   :  { %v253_v39 = vmul.f32 %v44_v28, %v44_v28  ;;  %v254_v40 = vmul.f32 %v45_v29, %v45_v29  ;;  %v208_v45 = vmul.f32 %v1095_v41, %v1095_v41  ;;  %v207_v46 = vmul.f32 %v1107_v44, %v1107_v44  ;;  %v1121_v50 = vld [vmem:[%s1566_s2 + $0x50] sm:$0xff]  ;;  %v35_v55 = vld [vmem:[%s1566_s2 + $0x68] sm:$0xff]  ;;  %v49_v57 = vld [vmem:[%s1565_s3 + $0x58] sm:$0xff] }
   0x9   :  { %217 = vadd.xlane.f32.xlu0 %v200_v24  ;;  %v869_v48 = vpack.c.bf16 %v47_v43, %v46_v42  ;;  %v210_v51 = vmul.f32 %v1116_v49, %v1116_v49  ;;  %v209_v52 = vmul.f32 %v1121_v50, %v1121_v50  ;;  %v255_v53 = vmul.f32 %v46_v42, %v46_v42  ;;  %v48_v56 = vld [vmem:[%s1565_s3 + $0x50] sm:$0xff]  ;;  %v34_v58 = vld [vmem:[%s1566_s2 + $0x60] sm:$0xff]  ;;  %v37_v63 = vld [vmem:[%s1566_s2 + $0x78] sm:$0xff] }
   0xa   :  { %v895_v47 = vpack.c.bf16 %v254_v40, %v253_v39  ;;  %v256_v54 = vmul.f32 %v47_v43, %v47_v43  ;;  %v212_v59 = vmul.f32 %v35_v55, %v35_v55  ;;  %v211_v60 = vmul.f32 %v34_v58, %v34_v58  ;;  %v36_v0 = vld [vmem:[%s1566_s2 + $0x70] sm:$0xff]  ;;  %v50_v6 = vld [vmem:[%s1565_s3 + $0x60] sm:$0xff]  ;;  %v51_v7 = vld [vmem:[%s1565_s3 + $0x68] sm:$0xff] }
   0xb   :  { %221 = vadd.xlane.f32.xlu1 %v202_v23  ;;  %v873_v62 = vpack.c.bf16 %v49_v57, %v48_v56  ;;  %v214_v1 = vmul.f32 %v37_v63, %v37_v63  ;;  %v213_v3 = vmul.f32 %v36_v0, %v36_v0  ;;  %v257_v4 = vmul.f32 %v48_v56, %v48_v56  ;;  %v52_v12 = vld [vmem:[%s1565_s3 + $0x70] sm:$0xff]  ;;  %v53_v13 = vld [vmem:[%s1565_s3 + $0x78] sm:$0xff]  ;;  %v465_v29 = vld [vmem:[%s1567_s0] sm:$0xf] }
   0xc   :  { %v898_v61 = vpack.c.bf16 %v256_v54, %v255_v53  ;;  %v258_v5 = vmul.f32 %v49_v57, %v49_v57  ;;  %v259_v10 = vmul.f32 %v50_v6, %v50_v6  ;;  %v260_v11 = vmul.f32 %v51_v7, %v51_v7  ;;  %v473_v42 = vld [vmem:[%s1567_s0 + $0x20] sm:$0xf] }
   0xd   :  { %860 = vmatpush3.bf16.xpose.msra.mxu0 %v857_v9  ;;  %223 = vadd.xlane.f32.xlu0 %v203_v32  ;;  %v877_v9 = vpack.c.bf16 %v51_v7, %v50_v6  ;;  %v881_v15 = vpack.c.bf16 %v53_v13, %v52_v12  ;;  %v261_v17 = vmul.f32 %v52_v12, %v52_v12  ;;  %v333_v24 = vlaneseq  ;;  %v470_v32 = vld [vmem:[%s1567_s0 + $0x14] sm:$0xf] }
   0xe   :  { %890 = vmatpush3.bf16.xpose.msra.mxu1 %v889_v18  ;;  %862 = vmatprep.subr.bf16.mxu0 %v861_v19  ;;  %v901_v8 = vpack.c.bf16 %v258_v5, %v257_v4  ;;  %v904_v14 = vpack.c.bf16 %v260_v11, %v259_v10  ;;  %v262_v18 = vmul.f32 %v53_v13, %v53_v13  ;;  %vm481_vm2 = vcmp.gt.bf16.partialorder %v465_v29, 0 }
   0xf   :  { %891 = vmatprep.subr.bf16.mxu1 %v978_v2  ;;  %225 = vadd.xlane.f32.xlu1 %v204_v31  ;;  %v334_v28 = vshrl.u32 %v333_v24, 7  ;;  %v467_v31 = vld [vmem:[%s1567_s0 + $0x8] sm:$0xf]  ;;  %vm486_vm5 = vcmp.gt.bf16.partialorder %v470_v32, 0  ;;  %v982_v39 = vmov 0   ;;  %vm489_vm10 = vcmp.gt.bf16.partialorder %v473_v42, 0 }
  0x10   :  { %vm483_vm4 = vcmp.gt.bf16.partialorder %v467_v31, 0  ;;  %v1220_v43 = vsel %vm481_vm2, 65537, %v982_v39  ;;  %v1267_v7 = vsel %vm489_vm10, 65537, %v982_v39 }
  0x11   :  { %227 = vadd.xlane.f32.xlu0 %v205_v38  ;;  %v513_v57 = vunpack.c.l.b16 %v1220_v43 }
  0x13   :  { %229 = vadd.xlane.f32.xlu1 %v206_v37  ;;  %v471_v37 = vld [vmem:[%s1567_s0 + $0x18] sm:$0xf]  ;;  %vm1303_vm13 = vcmp.ne.s32.totalorder %v513_v57, 0 }
  0x14   :  { %vm487_vm8 = vcmp.gt.bf16.partialorder %v471_v37, 0 }
  0x15   :  { %864 = vmatpush3.bf16.xpose.msra.mxu0 %v861_v19  ;;  %231 = vadd.xlane.f32.xlu0 %v207_v46  ;;  %v907_v19 = vpack.c.bf16 %v262_v18, %v261_v17  ;;  %v1226_v46 = vsel %vm483_vm4, 65537, %v982_v39 }
  0x16   :  { %893 = vmatpush3.bf16.xpose.msra.mxu1 %v892_v33  ;;  %866 = vmatprep.subr.bf16.mxu0 %v865_v34  ;;  %v469_v33 = vld [vmem:[%s1567_s0 + $0x10] sm:$0xf] }
  0x17   :  { %894 = vmatprep.subr.bf16.mxu1 %v978_v2  ;;  %233 = vadd.xlane.f32.xlu1 %v208_v45  ;;  %vm485_vm6 = vcmp.gt.bf16.partialorder %v469_v33, 0 }
  0x19   :  { %235 = vadd.xlane.f32.xlu0 %v209_v52 }
  0x1b   :  { %237 = vadd.xlane.f32.xlu1 %v210_v51 }
  0x1d   :  { %868 = vmatpush3.bf16.xpose.msra.mxu0 %v865_v34  ;;  %239 = vadd.xlane.f32.xlu0 %v211_v60  ;;  %v472_v34 = vld [vmem:[%s1567_s0 + $0x1c] sm:$0xf]  ;;  %v475_v60 = vld [vmem:[%s1567_s0 + $0x28] sm:$0xf] }
  0x1e   :  { %896 = vmatpush3.bf16.xpose.msra.mxu1 %v895_v47  ;;  %870 = vmatprep.subr.bf16.mxu0 %v869_v48  ;;  %vm488_vm7 = vcmp.gt.bf16.partialorder %v472_v34, 0  ;;  %v1229_v47 = vsel %vm486_vm5, 65537, %v982_v39  ;;  %vm491_vm12 = vcmp.gt.bf16.partialorder %v475_v60, 0 }
  0x1f   :  { %897 = vmatprep.subr.bf16.mxu1 %v978_v2  ;;  %241 = vadd.xlane.f32.xlu1 %v212_v59  ;;  %v1236_v52 = vsel %vm488_vm7, 65537, %v982_v39  ;;  %v476_v59 = vld [vmem:[%s1567_s0 + $0x2c] sm:$0xf] }
  0x20   :  { %v520_v10 = vunpack.c.l.b16 %v1236_v52  ;;  %vm492_vm11 = vcmp.gt.bf16.partialorder %v476_v59, 0 }
  0x21   :  { %243 = vadd.xlane.f32.xlu0 %v213_v3 }
  0x23   :  { %245 = vadd.xlane.f32.xlu1 %v214_v1 }
  0x25   :  { %872 = vmatpush3.bf16.xpose.msra.mxu0 %v869_v48  ;;  %v1232_v48 = vsel %vm485_vm6, 65537, %v982_v39 }
  0x26   :  { %899 = vmatpush3.bf16.xpose.msra.mxu1 %v898_v61  ;;  %874 = vmatprep.subr.bf16.mxu0 %v873_v62  ;;  %v515_v61 = vunpack.c.l.b16 %v1226_v46 }
  0x27   :  { %900 = vmatprep.subr.bf16.mxu1 %v978_v2 }
  0x28   :  { %vm1322_vm15 = vcmp.ne.s32.totalorder %v515_v61, 0 }
  0x2d   :  { %876 = vmatpush3.bf16.xpose.msra.mxu0 %v873_v62  ;;  %v518_v62 = vunpack.c.l.b16 %v1229_v47 }
  0x2e   :  { %902 = vmatpush3.bf16.xpose.msra.mxu1 %v901_v8  ;;  %878 = vmatprep.subr.bf16.mxu0 %v877_v9 }
  0x2f   :  { %903 = vmatprep.subr.bf16.mxu1 %v978_v2  ;;  %vm1328_vm0 = vcmp.ne.s32.totalorder %v518_v62, 0 }
  0x35   :  { %880 = vmatpush3.bf16.xpose.msra.mxu0 %v877_v9 }
  0x36   :  { %905 = vmatpush3.bf16.xpose.msra.mxu1 %v904_v14  ;;  %882 = vmatprep.subr.bf16.mxu0 %v881_v15 }
  0x37   :  { %906 = vmatprep.subr.bf16.mxu1 %v978_v2 }
  0x3d   :  { %884 = vmatpush3.bf16.xpose.msra.mxu0 %v881_v15 }
  0x3e   :  { %908 = vmatpush3.bf16.xpose.msra.mxu1 %v907_v19  ;;  %v521_v19 = vunpack.c.l.b16 %v1267_v7 }
  0x40   :  { %vm1387_vm7 = vcmp.ne.s32.totalorder %v521_v19, 0 }
  0x44   :  { %795 = vmatmul.mubr.f32.vlgmr.msra.gmra.mrb[0].mxu0 %v1051_v22 }
  0x45   :  { %851 = vmatmul.mubr.f32.vlgmr.msra.gmra.mrb[0].mxu1 %v981_v21  ;;  %797 = vmatprep.mubr.f32.mxu0 %v1039_v16 }
  0x48   :  { %798 = vmatmul.mubr.f32.gmra.mrb[2].mxu0 %v1046_v20 }
  0x49   :  { %800 = vmatprep.mubr.f32.mxu0 %v1072_v30  ;;  %v468_v30 = vld [vmem:[%s1567_s0 + $0xc] sm:$0xf] }
  0x4a   :  { %vm484_vm3 = vcmp.gt.bf16.partialorder %v468_v30, 0 }
  0x4c   :  { %801 = vmatmul.mubr.f32.gmra.mrb[4].mxu0 %v1060_v27  ;;  %v466_v27 = vld [vmem:[%s1567_s0 + $0x4] sm:$0xf] }
  0x4d   :  { %803 = vmatprep.mubr.f32.mxu0 %v1086_v36  ;;  %vm482_vm1 = vcmp.gt.bf16.partialorder %v466_v27, 0  ;;  %v335_v36 = vsub.s32 0, %v334_v28  ;;  %v1278_v27 = vsel %vm492_vm11, 65537, %v982_v39  ;;  %v1281_v28 = vsel %vm491_vm12, 65537, %v982_v39 }
  0x4e   :  { %v1211_v40 = vsel %vm482_vm1, 65537, %v982_v39 }
  0x4f   :  { %v514_v51 = vunpack.c.l.b16 %v1211_v40 }
  0x50   :  { %804 = vmatmul.mubr.f32.gmra.mrb[6].mxu0 %v1081_v35 }
  0x51   :  { %806 = vmatprep.mubr.f32.mxu0 %v1107_v44  ;;  %v1223_v44 = vsel %vm484_vm3, 65537, %v982_v39  ;;  %vm1337_vm1 = vcmp.ne.s32.totalorder %v514_v51, 0  ;;  %vm1358_vm3 = vcmp.ne.s32.totalorder %v520_v10, 0 }
  0x54   :  { %807 = vmatmul.mubr.f32.gmra.mrb[8].mxu0 %v1095_v41  ;;  %v474_v41 = vld [vmem:[%s1567_s0 + $0x24] sm:$0xf] }
  0x55   :  { %809 = vmatprep.mubr.f32.mxu0 %v1121_v50  ;;  %vm490_vm9 = vcmp.gt.bf16.partialorder %v474_v41, 0 }
  0x56   :  { %v1263_v6 = vsel %vm490_vm9, 65537, %v982_v39 }
  0x57   :  { %v522_v18 = vunpack.c.l.b16 %v1263_v6 }
  0x58   :  { %810 = vmatmul.mubr.f32.gmra.mrb[10].mxu0 %v1116_v49 }
  0x59   :  { %812 = vmatprep.mubr.f32.mxu0 %v34_v58  ;;  %v516_v58 = vunpack.c.l.b16 %v1223_v44  ;;  %vm1378_vm6 = vcmp.ne.s32.totalorder %v522_v18, 0 }
  0x5b   :  { %vm1309_vm14 = vcmp.ne.s32.totalorder %v516_v58, 0 }
  0x5c   :  { %813 = vmatmul.mubr.f32.gmra.mrb[12].mxu0 %v35_v55 }
  0x5d   :  { %815 = vmatprep.mubr.f32.mxu0 %v36_v0  ;;  %v1255_v0 = vsel %vm487_vm8, 65537, %v982_v39 }
  0x5e   :  { %v519_v14 = vunpack.c.l.b16 %v1255_v0 }
  0x60   :  { %816 = vmatmul.mubr.f32.gmra.mrb[14].mxu0 %v37_v63  ;;  %v517_v63 = vunpack.c.l.b16 %v1232_v48  ;;  %vm1364_vm4 = vcmp.ne.s32.totalorder %v519_v14, 0 }
  0x62   :  { %vm1352_vm2 = vcmp.ne.s32.totalorder %v517_v63, 0 }
  0x92   :  { %v216_v16 = vpop.xlane.xlu0 %215 }
  0x94   :  { %v1172_v2 = vpop.xlane.xlu1 %219 }
  0x96   :  { %v1174_v22 = vpop.xlane.xlu0 %217 }
  0x98   :  { %v222_v20 = vpop.xlane.xlu1 %221 }
  0x9a   :  { %v1178_v25 = vpop.xlane.xlu0 %223 }
  0x9c   :  { %v1176_v23 = vpop.xlane.xlu1 %225 }
  0x9e   :  { %v1203_v35 = vpop.xlane.xlu0 %227 }
  0xa0   :  { %v1180_v26 = vpop.xlane.xlu1 %229 }
  0xa2   :  { %v1238_v53 = vpop.xlane.xlu0 %231 }
  0xa4   :  { %v1208_v38 = vpop.xlane.xlu1 %233 }
  0xa6   :  { %v1275_v21 = vpop.xlane.xlu0 %235 }
  0xa8   :  { %v1257_v1 = vpop.xlane.xlu1 %237 }
  0xac   :  { %v1287_v33 = vpop.xlane.xlu1 %241 }
 0x117   :  { %v796_v45 = vpop.f32.mrb[0].mxu0 }
 0x118   :  { %v329_v49 = vpop.f32.mrb[0].mxu1  ;;  %v120_v50 = vpop.f32.mrb[1].mxu0  ;;  %v354_v15 = vmul.f32 2.0, %v796_v45 }
 0x119   :  { %v1240_v54 = vrot.slane %v329_v49, %v335_v36  ;;  %v353_v55 = vmul.f32 2.0, %v120_v50  ;;  %v852_v56 = vpop.f32.mrb[1].mxu1 }
 0x11b   :  { %v337_v3 = vadd.f32 %v1240_v54, %v216_v16  ;;  %v799_v4 = vpop.f32.mrb[2].mxu0  ;;  %v340_v5 = vadd.f32 %v1240_v54, %v222_v20  ;;  %v339_v12 = vadd.f32 %v1240_v54, %v1172_v2  ;;  %v342_v29 = vadd.f32 %v1240_v54, %v1176_v23 }
 0x11c   :  { %v356_v8 = vmul.f32 2.0, %v799_v4  ;;  %v130_v9 = vpop.f32.mrb[3].mxu0  ;;  %v338_v32 = vadd.f32 %v1240_v54, %v1174_v22  ;;  %v341_v37 = vadd.f32 %v1240_v54, %v1178_v25  ;;  %v344_v49 = vadd.f32 %v1240_v54, %v1180_v26  ;;  %v1295_v25 = vpop.xlane.xlu0 %239 }
 0x11d   :  { %v369_v11 = vsub.f32 %v337_v3, %v353_v55  ;;  %v355_v13 = vmul.f32 2.0, %v130_v9  ;;  %v343_v22 = vadd.f32 %v1240_v54, %v1203_v35  ;;  %v346_v35 = vadd.f32 %v1240_v54, %v1208_v38 }
 0x11e   :  { %v372_v17 = vsub.f32 %v340_v5, %v356_v8  ;;  %v370_v50 = vsub.f32 %v338_v32, %v354_v15 }
 0x11f   :  { %v385_v16 = vmax.f32 %v369_v11, 0.0  ;;  %v371_v20 = vsub.f32 %v339_v12, %v355_v13  ;;  %v802_v24 = vpop.f32.mrb[4].mxu0 }
 0x120   :  { %v388_v2 = vmax.f32 %v372_v17, 0.0  ;;  %v358_v30 = vmul.f32 2.0, %v802_v24  ;;  %v140_v31 = vpop.f32.mrb[5].mxu0  ;;  %v386_v8 = vmax.f32 %v370_v50, 0.0  ;;  %v246_v17 = vpop.xlane.xlu1 %245 }
 0x121   :  { %v401_v34 = vsub.f32 0.0, %v385_v16  ;;  %v387_v36 = vmax.f32 %v371_v20, 0.0  ;;  %v357_v41 = vmul.f32 2.0, %v140_v31  ;;  %v244_v57 = vpop.xlane.xlu0 %243 }
 0x122   :  { %v404_v42 = vsub.f32 0.0, %v388_v2  ;;  %v374_v45 = vsub.f32 %v342_v29, %v358_v30  ;;  %v402_v15 = vsub.f32 0.0, %v386_v8  ;;  %v345_v2 = vadd.f32 %v1240_v54, %v1238_v53 }
 0x123   :  { %v417_v23 = vmul.f32 1.442695, %v401_v34  ;;  %v403_v55 = vsub.f32 0.0, %v387_v36  ;;  %v373_v56 = vsub.f32 %v341_v37, %v357_v41  ;;  %v805_v59 = vpop.f32.mrb[6].mxu0  ;;  %v1314_v53 = vadd.f32 %v1240_v54, %v246_v17 }
 0x124   :  { %v423_v60 = vmul.f32 1.442695, %v404_v42  ;;  %v390_v3 = vmax.f32 %v374_v45, 0.0  ;;  %v360_v4 = vmul.f32 2.0, %v805_v59  ;;  %v150_v5 = vpop.f32.mrb[7].mxu0  ;;  %v1333_v8 = vadd.f32 %v1240_v54, %v244_v57 }
 0x125   :  { %914 = vpow2.f32 %v417_v23  ;;  %v421_v9 = vmul.f32 1.442695, %v403_v55  ;;  %v389_v11 = vmax.f32 %v373_v56, 0.0  ;;  %v359_v12 = vmul.f32 2.0, %v150_v5 }
 0x126   :  { %916 = vpow2.f32 %v423_v60  ;;  %v406_v26 = vsub.f32 0.0, %v390_v3  ;;  %v376_v13 = vsub.f32 %v344_v49, %v360_v4  ;;  %v419_v42 = vmul.f32 1.442695, %v402_v15 }
 0x127   :  { %v405_v16 = vsub.f32 0.0, %v389_v11  ;;  %v375_v20 = vsub.f32 %v343_v22, %v359_v12  ;;  %v808_v24 = vpop.f32.mrb[8].mxu0  ;;  %918 = vpow2.f32 %v421_v9  ;;  %v348_v55 = vadd.f32 %v1240_v54, %v1257_v1 }
 0x128   :  { %v427_v29 = vmul.f32 1.442695, %v406_v26  ;;  %v392_v30 = vmax.f32 %v376_v13, 0.0  ;;  %v362_v31 = vmul.f32 2.0, %v808_v24  ;;  %v160_v32 = vpop.f32.mrb[9].mxu0  ;;  %v347_v3 = vadd.f32 %v1240_v54, %v1275_v21 }
 0x129   :  { %v425_v36 = vmul.f32 1.442695, %v405_v16  ;;  %v391_v37 = vmax.f32 %v375_v20, 0.0  ;;  %v361_v41 = vmul.f32 2.0, %v160_v32  ;;  %v350_v12 = vadd.f32 %v1240_v54, %v1287_v33  ;;  %v1346_v26 = vld [vmem:[%s1567_s0 + $0x34] sm:$0xf] }
 0x12a   :  { %920 = vpow2.f32 %v427_v29  ;;  %v408_v45 = vsub.f32 0.0, %v392_v30  ;;  %v378_v43 = vsub.f32 %v346_v35, %v362_v31  ;;  %v349_v16 = vadd.f32 %v1240_v54, %v1295_v25 }
 0x12b   :  { %922 = vpow2.f32 %v425_v36  ;;  %v407_v49 = vsub.f32 0.0, %v391_v37  ;;  %v377_v50 = vsub.f32 %v345_v2, %v361_v41  ;;  %v811_v23 = vpop.f32.mrb[10].mxu0  ;;  %vm494_vm5 = vcmp.gt.bf16.partialorder %v1346_v26, 0 }
 0x12c   :  { %v431_v56 = vmul.f32 1.442695, %v408_v45  ;;  %v394_v44 = vmax.f32 %v378_v43, 0.0  ;;  %v364_v58 = vmul.f32 2.0, %v811_v23  ;;  %v170_v59 = vpop.f32.mrb[11].mxu0  ;;  %924 = vpow2.f32 %v419_v42 }
 0x12d   :  { %v429_v22 = vmul.f32 1.442695, %v407_v49  ;;  %v393_v60 = vmax.f32 %v377_v50, 0.0  ;;  %v363_v4 = vmul.f32 2.0, %v170_v59  ;;  %v477_v59 = vld [vmem:[%s1567_s0 + $0x30] sm:$0xf] }
 0x12e   :  { %926 = vpow2.f32 %v431_v56  ;;  %v410_v9 = vsub.f32 0.0, %v394_v44  ;;  %v380_v11 = vsub.f32 %v348_v55, %v364_v58  ;;  %vm493_vm8 = vcmp.gt.bf16.partialorder %v477_v59, 0 }
 0x12f   :  { %v915_v61 = vpop.eup %914  ;;  %928 = vpow2.f32 %v429_v22  ;;  %v409_v21 = vsub.f32 0.0, %v393_v60  ;;  %v379_v47 = vsub.f32 %v347_v3, %v363_v4  ;;  %v814_v62 = vpop.f32.mrb[12].mxu0 }
 0x130   :  { %v917_v13 = vpop.eup %916  ;;  %v435_v15 = vmul.f32 1.442695, %v410_v9  ;;  %v396_v40 = vmax.f32 %v380_v11, 0.0  ;;  %v366_v51 = vmul.f32 2.0, %v814_v62  ;;  %v180_v17 = vpop.f32.mrb[13].mxu0 }
 0x131   :  { %v433_v33 = vmul.f32 1.442695, %v409_v21  ;;  %v395_v24 = vmax.f32 %v379_v47, 0.0  ;;  %v365_v35 = vmul.f32 2.0, %v180_v17  ;;  %v449_v2 = vadd.f32 1e-09, %v915_v61  ;;  %v919_v48 = vpop.eup %918 }
 0x132   :  { %930 = vpow2.f32 %v435_v15  ;;  %v412_v63 = vsub.f32 0.0, %v396_v40  ;;  %v382_v25 = vsub.f32 %v350_v12, %v366_v51  ;;  %v452_v30 = vadd.f32 1e-09, %v917_v13  ;;  %v480_v47 = vld [vmem:[%s1567_s0 + $0x3c] sm:$0xf] }
 0x133   :  { %932 = vpow2.f32 %v433_v33  ;;  %v411_v31 = vsub.f32 0.0, %v395_v24  ;;  %v381_v52 = vsub.f32 %v349_v16, %v365_v35  ;;  %v817_v10 = vpop.f32.mrb[14].mxu0  ;;  %v545_v32 = vsel %vm1303_vm13, %v449_v2, 0.0  ;;  %v479_v51 = vld [vmem:[%s1567_s0 + $0x38] sm:$0xf] }
 0x134   :  { %v921_v36 = vpop.eup %920  ;;  %v439_v0 = vmul.f32 1.442695, %v412_v63  ;;  %v398_v14 = vmax.f32 %v382_v25, 0.0  ;;  %v368_v37 = vmul.f32 2.0, %v817_v10  ;;  %561 = vadd.xlane.f32.xlu0 %v545_v32  ;;  %609 = vst [vmem:[%s1568_s4] sm:$0xff] %v545_v32  ;;  %v190_v41 = vpop.f32.mrb[15].mxu0  ;;  %v548_v42 = vsel %vm1309_vm14, %v452_v30, 0.0 }
 0x135   :  { %v923_v34 = vpop.eup %922  ;;  %v437_v43 = vmul.f32 1.442695, %v411_v31  ;;  %v397_v57 = vmax.f32 %v381_v52, 0.0  ;;  %v367_v49 = vmul.f32 2.0, %v190_v41  ;;  %612 = vst [vmem:[%s1568_s4 + $0x18] sm:$0xff] %v548_v42  ;;  %v524_v40 = vunpack.c.l.b16 %v1278_v27 }
 0x136   :  { %v451_v50 = vadd.f32 1e-09, %v919_v48  ;;  %v925_v6 = vpop.eup %924  ;;  %934 = vpow2.f32 %v439_v0  ;;  %v414_v18 = vsub.f32 0.0, %v398_v14  ;;  %v384_v23 = vsub.f32 %v1314_v53, %v368_v37 }
 0x137   :  { %v454_v55 = vadd.f32 1e-09, %v921_v36  ;;  %936 = vpow2.f32 %v437_v43  ;;  %v413_v56 = vsub.f32 0.0, %v397_v57  ;;  %v450_v44 = vadd.f32 1e-09, %v925_v6 }
 0x138   :  { %v383_v58 = vsub.f32 %v1333_v8, %v367_v49  ;;  %v927_v7 = vpop.eup %926  ;;  %v443_v19 = vmul.f32 1.442695, %v414_v18  ;;  %v400_v22 = vmax.f32 %v384_v23, 0.0  ;;  %v547_v60 = vsel %vm1322_vm15, %v451_v50, 0.0 }
 0x139   :  { %v550_v3 = vsel %vm1328_vm0, %v454_v55, 0.0  ;;  %v929_v53 = vpop.eup %928  ;;  %v441_v4 = vmul.f32 1.442695, %v413_v56  ;;  %v546_v9 = vsel %vm1337_vm1, %v450_v44, 0.0  ;;  %611 = vst [vmem:[%s1568_s4 + $0x10] sm:$0xff] %v547_v60  ;;  %565 = vadd.xlane.f32.xlu0 %v547_v60  ;;  %v523_v33 = vunpack.c.l.b16 %v1281_v28 }
 0x13a   :  { %v399_v11 = vmax.f32 %v383_v58, 0.0  ;;  %614 = vst [vmem:[%s1568_s4 + $0x28] sm:$0xff] %v550_v3  ;;  %v453_v5 = vadd.f32 1e-09, %v923_v34  ;;  %938 = vpow2.f32 %v443_v19  ;;  %v416_v8 = vsub.f32 0.0, %v400_v22  ;;  %563 = vadd.xlane.f32.xlu1 %v546_v9  ;;  %610 = vst [vmem:[%s1568_s4 + $0x8] sm:$0xff] %v546_v9 }
 0x13b   :  { %v456_v1 = vadd.f32 1e-09, %v927_v7  ;;  %v455_v46 = vadd.f32 1e-09, %v929_v53  ;;  %940 = vpow2.f32 %v441_v4  ;;  %v510_v27 = vsel %vm494_vm5, 65537, %v982_v39  ;;  %v625_v7 = vld [vmem:[%s1569_s1] sm:$0xff] }
 0x13c   :  { %v415_v61 = vsub.f32 0.0, %v399_v11  ;;  %v549_v21 = vsel %vm1352_vm2, %v453_v5, 0.0  ;;  %v931_v62 = vpop.eup %930  ;;  %v447_v12 = vmul.f32 1.442695, %v416_v8  ;;  %v509_v35 = vsel %vm493_vm8, 65537, %v982_v39  ;;  %v627_v11 = vld [vmem:[%s1569_s1 + $0x10] sm:$0xff] }
 0x13d   :  { %613 = vst [vmem:[%s1568_s4 + $0x20] sm:$0xff] %v549_v21  ;;  %v552_v13 = vsel %vm1358_vm3, %v456_v1, 0.0  ;;  %v551_v15 = vsel %vm1364_vm4, %v455_v46, 0.0  ;;  %v933_v17 = vpop.eup %932  ;;  %569 = vadd.xlane.f32.xlu0 %v549_v21  ;;  %v458_v20 = vadd.f32 1e-09, %v931_v62  ;;  %vm496_vm9 = vcmp.gt.bf16.partialorder %v480_v47, 0 }
 0x13e   :  { %v445_v16 = vmul.f32 1.442695, %v415_v61  ;;  %616 = vst [vmem:[%s1568_s4 + $0x38] sm:$0xff] %v552_v13  ;;  %615 = vst [vmem:[%s1568_s4 + $0x30] sm:$0xff] %v551_v15  ;;  %942 = vpow2.f32 %v447_v12  ;;  %567 = vadd.xlane.f32.xlu1 %v548_v42  ;;  %v457_v24 = vadd.f32 1e-09, %v933_v17  ;;  %v526_v26 = vunpack.c.l.b16 %v510_v27 }
 0x13f   :  { %v554_v2 = vsel %vm1378_vm6, %v458_v20, 0.0  ;;  %vm495_vm10 = vcmp.gt.bf16.partialorder %v479_v51, 0  ;;  %vm540_vm11 = vcmp.ne.s32.totalorder %v524_v40, 0  ;;  %vm539_vm12 = vcmp.ne.s32.totalorder %v523_v33, 0  ;;  %v626_v5 = vld [vmem:[%s1569_s1 + $0x8] sm:$0xff] }
 0x140   :  { %944 = vpow2.f32 %v445_v16  ;;  %v935_v29 = vpop.eup %934  ;;  %618 = vst [vmem:[%s1568_s4 + $0x48] sm:$0xff] %v554_v2  ;;  %v553_v28 = vsel %vm1387_vm7, %v457_v24, 0.0  ;;  %v525_v63 = vunpack.c.l.b16 %v509_v35  ;;  %v512_v25 = vsel %vm496_vm9, 65537, %v982_v39  ;;  %v631_v35 = vld [vmem:[%s1569_s1 + $0x30] sm:$0xff] }
 0x141   :  { %v937_v54 = vpop.eup %936  ;;  %573 = vadd.xlane.f32.xlu0 %v551_v15  ;;  %617 = vst [vmem:[%s1568_s4 + $0x40] sm:$0xff] %v553_v28  ;;  %v460_v48 = vadd.f32 1e-09, %v935_v29  ;;  %v511_v31 = vsel %vm495_vm10, 65537, %v982_v39  ;;  %vm542_vm13 = vcmp.ne.s32.totalorder %v526_v26, 0  ;;  %v528_v36 = vunpack.c.l.b16 %v512_v25  ;;  %v628_v15 = vld [vmem:[%s1569_s1 + $0x18] sm:$0xff] }
 0x142   :  { %571 = vadd.xlane.f32.xlu1 %v550_v3  ;;  %v459_v30 = vadd.f32 1e-09, %v937_v54  ;;  %vm541_vm14 = vcmp.ne.s32.totalorder %v525_v63, 0  ;;  %v527_v37 = vunpack.c.l.b16 %v511_v31  ;;  %v633_v31 = vld [vmem:[%s1569_s1 + $0x40] sm:$0xff] }
 0x143   :  { %v556_v52 = vsel %vm540_vm11, %v460_v48, 0.0  ;;  %vm544_vm15 = vcmp.ne.s32.totalorder %v528_v36, 0 }
 0x144   :  { %v939_v10 = vpop.eup %938  ;;  %620 = vst [vmem:[%s1568_s4 + $0x58] sm:$0xff] %v556_v52  ;;  %v555_v32 = vsel %vm539_vm12, %v459_v30, 0.0  ;;  %vm543_vm0 = vcmp.ne.s32.totalorder %v527_v37, 0 }
 0x145   :  { %v941_v0 = vpop.eup %940  ;;  %577 = vadd.xlane.f32.xlu0 %v553_v28  ;;  %619 = vst [vmem:[%s1568_s4 + $0x50] sm:$0xff] %v555_v32  ;;  %v462_v14 = vadd.f32 1e-09, %v939_v10 }
 0x146   :  { %575 = vadd.xlane.f32.xlu1 %v552_v13  ;;  %v461_v39 = vadd.f32 1e-09, %v941_v0  ;;  %v629_v13 = vld [vmem:[%s1569_s1 + $0x20] sm:$0xff] }
 0x147   :  { %v558_v41 = vsel %vm542_vm13, %v462_v14, 0.0 }
 0x148   :  { %v943_v42 = vpop.eup %942  ;;  %622 = vst [vmem:[%s1568_s4 + $0x68] sm:$0xff] %v558_v41  ;;  %v557_v45 = vsel %vm541_vm14, %v461_v39, 0.0 }
 0x149   :  { %581 = vadd.xlane.f32.xlu0 %v555_v32  ;;  %621 = vst [vmem:[%s1568_s4 + $0x60] sm:$0xff] %v557_v45  ;;  %v464_v43 = vadd.f32 1e-09, %v943_v42  ;;  %v635_v42 = vld [vmem:[%s1569_s1 + $0x50] sm:$0xff] }
 0x14a   :  { %v945_v34 = vpop.eup %944  ;;  %579 = vadd.xlane.f32.xlu1 %v554_v2  ;;  %v630_v2 = vld [vmem:[%s1569_s1 + $0x28] sm:$0xff] }
 0x14b   :  { %v463_v57 = vadd.f32 1e-09, %v945_v34  ;;  %v560_v49 = vsel %vm544_vm15, %v464_v43, 0.0 }
 0x14c   :  { %624 = vst [vmem:[%s1568_s4 + $0x78] sm:$0xff] %v560_v49 }
 0x14d   :  { %v559_v50 = vsel %vm543_vm0, %v463_v57, 0.0  ;;  %585 = vadd.xlane.f32.xlu0 %v557_v45  ;;  %v634_v45 = vld [vmem:[%s1569_s1 + $0x48] sm:$0xff] }
 0x14e   :  { %623 = vst [vmem:[%s1568_s4 + $0x70] sm:$0xff] %v559_v50  ;;  %583 = vadd.xlane.f32.xlu1 %v556_v52  ;;  %v632_v52 = vld [vmem:[%s1569_s1 + $0x38] sm:$0xff] }
 0x151   :  { %589 = vadd.xlane.f32.xlu0 %v559_v50 }
 0x152   :  { %587 = vadd.xlane.f32.xlu1 %v558_v41 }
 0x156   :  { %591 = vadd.xlane.f32.xlu1 %v560_v49 }
 0x1c1   :  { %v562_v38 = vpop.xlane.xlu0 %561 }
 0x1c2   :  { %v593_v6 = vmax.f32 %v562_v38, 1e-30 }
 0x1c4   :  { %946 = vrcp.f32 %v593_v6  ;;  %v637_v6 = vld [vmem:[%s1569_s1 + $0x60] sm:$0xff] }
 0x1c6   :  { %v566_v18 = vpop.xlane.xlu0 %565 }
 0x1c7   :  { %v564_v23 = vpop.xlane.xlu1 %563  ;;  %v595_v55 = vmax.f32 %v566_v18, 1e-30  ;;  %v636_v18 = vld [vmem:[%s1569_s1 + $0x58] sm:$0xff] }
 0x1c8   :  { %v594_v56 = vmax.f32 %v564_v23, 1e-30 }
 0x1c9   :  { %948 = vrcp.f32 %v595_v55 }
 0x1ca   :  { %950 = vrcp.f32 %v594_v56  ;;  %v570_v44 = vpop.xlane.xlu0 %569 }
 0x1cb   :  { %v568_v58 = vpop.xlane.xlu1 %567  ;;  %v597_v59 = vmax.f32 %v570_v44, 1e-30 }
 0x1cc   :  { %v596_v19 = vmax.f32 %v568_v58, 1e-30  ;;  %v639_v58 = vld [vmem:[%s1569_s1 + $0x70] sm:$0xff] }
 0x1cd   :  { %952 = vrcp.f32 %v597_v59  ;;  %v638_v59 = vld [vmem:[%s1569_s1 + $0x68] sm:$0xff] }
 0x1ce   :  { %v947_v22 = vpop.eup %946  ;;  %954 = vrcp.f32 %v596_v19  ;;  %v574_v60 = vpop.xlane.xlu0 %573 }
 0x1cf   :  { %v673_v3 = vmul.f32 %v947_v22, %v625_v7  ;;  %v572_v53 = vpop.xlane.xlu1 %571  ;;  %v599_v4 = vmax.f32 %v574_v60, 1e-30 }
 0x1d0   :  { %v598_v9 = vmax.f32 %v572_v53, 1e-30 }
 0x1d1   :  { %689 = vst [vmem:[%s1570_s5] sm:$0xff] %v673_v3  ;;  %956 = vrcp.f32 %v599_v4  ;;  %v640_v3 = vld [vmem:[%s1569_s1 + $0x78] sm:$0xff] }
 0x1d2   :  { %958 = vrcp.f32 %v598_v9  ;;  %v578_v8 = vpop.xlane.xlu0 %577 }
 0x1d3   :  { %v949_v1 = vpop.eup %948  ;;  %v576_v46 = vpop.xlane.xlu1 %575  ;;  %v601_v61 = vmax.f32 %v578_v8, 1e-30 }
 0x1d4   :  { %v951_v21 = vpop.eup %950  ;;  %v675_v47 = vmul.f32 %v949_v1, %v627_v11  ;;  %v600_v62 = vmax.f32 %v576_v46, 1e-30 }
 0x1d5   :  { %v674_v12 = vmul.f32 %v951_v21, %v626_v5  ;;  %960 = vrcp.f32 %v601_v61 }
 0x1d6   :  { %691 = vst [vmem:[%s1570_s5 + $0x10] sm:$0xff] %v675_v47  ;;  %962 = vrcp.f32 %v600_v62  ;;  %v582_v40 = vpop.xlane.xlu0 %581 }
 0x1d7   :  { %v953_v51 = vpop.eup %952  ;;  %690 = vst [vmem:[%s1570_s5 + $0x8] sm:$0xff] %v674_v12  ;;  %v580_v17 = vpop.xlane.xlu1 %579  ;;  %v603_v16 = vmax.f32 %v582_v40, 1e-30 }
 0x1d8   :  { %v955_v20 = vpop.eup %954  ;;  %v677_v33 = vmul.f32 %v953_v51, %v629_v13  ;;  %v602_v27 = vmax.f32 %v580_v17, 1e-30 }
 0x1d9   :  { %v676_v24 = vmul.f32 %v955_v20, %v628_v15  ;;  %964 = vrcp.f32 %v603_v16 }
 0x1da   :  { %693 = vst [vmem:[%s1570_s5 + $0x20] sm:$0xff] %v677_v33  ;;  %966 = vrcp.f32 %v602_v27  ;;  %v586_v29 = vpop.xlane.xlu0 %585 }
 0x1db   :  { %v957_v28 = vpop.eup %956  ;;  %692 = vst [vmem:[%s1570_s5 + $0x18] sm:$0xff] %v676_v24  ;;  %v584_v26 = vpop.xlane.xlu1 %583  ;;  %v605_v54 = vmax.f32 %v586_v29, 1e-30 }
 0x1dc   :  { %v959_v48 = vpop.eup %958  ;;  %v679_v63 = vmul.f32 %v957_v28, %v631_v35  ;;  %v604_v25 = vmax.f32 %v584_v26, 1e-30 }
 0x1dd   :  { %v678_v30 = vmul.f32 %v959_v48, %v630_v2  ;;  %968 = vrcp.f32 %v605_v54 }
 0x1de   :  { %695 = vst [vmem:[%s1570_s5 + $0x30] sm:$0xff] %v679_v63  ;;  %970 = vrcp.f32 %v604_v25  ;;  %v590_v10 = vpop.xlane.xlu0 %589 }
 0x1df   :  { %v961_v32 = vpop.eup %960  ;;  %694 = vst [vmem:[%s1570_s5 + $0x28] sm:$0xff] %v678_v30  ;;  %v588_v36 = vpop.xlane.xlu1 %587  ;;  %v607_v0 = vmax.f32 %v590_v10, 1e-30 }
 0x1e0   :  { %v963_v14 = vpop.eup %962  ;;  %v681_v37 = vmul.f32 %v961_v32, %v633_v31  ;;  %v606_v39 = vmax.f32 %v588_v36, 1e-30 }
 0x1e1   :  { %v680_v41 = vmul.f32 %v963_v14, %v632_v52  ;;  %972 = vrcp.f32 %v607_v0 }
 0x1e2   :  { %697 = vst [vmem:[%s1570_s5 + $0x40] sm:$0xff] %v681_v37  ;;  %974 = vrcp.f32 %v606_v39 }
 0x1e3   :  { %v965_v34 = vpop.eup %964  ;;  %696 = vst [vmem:[%s1570_s5 + $0x38] sm:$0xff] %v680_v41  ;;  %v592_v43 = vpop.xlane.xlu1 %591 }
 0x1e4   :  { %v967_v57 = vpop.eup %966  ;;  %v683_v49 = vmul.f32 %v965_v34, %v635_v42  ;;  %v608_v50 = vmax.f32 %v592_v43, 1e-30 }
 0x1e5   :  { %v682_v38 = vmul.f32 %v967_v57, %v634_v45 }
 0x1e6   :  { %699 = vst [vmem:[%s1570_s5 + $0x50] sm:$0xff] %v683_v49  ;;  %976 = vrcp.f32 %v608_v50 }
 0x1e7   :  { %v969_v23 = vpop.eup %968  ;;  %698 = vst [vmem:[%s1570_s5 + $0x48] sm:$0xff] %v682_v38 }
 0x1e8   :  { %v971_v55 = vpop.eup %970  ;;  %v685_v56 = vmul.f32 %v969_v23, %v637_v6 }
 0x1e9   :  { %v684_v44 = vmul.f32 %v971_v55, %v636_v18 }
 0x1ea   :  { %701 = vst [vmem:[%s1570_s5 + $0x60] sm:$0xff] %v685_v56 }
 0x1eb   :  { %v973_v7 = vpop.eup %972  ;;  %700 = vst [vmem:[%s1570_s5 + $0x58] sm:$0xff] %v684_v44 }
 0x1ec   :  { %v975_v19 = vpop.eup %974  ;;  %v687_v22 = vmul.f32 %v973_v7, %v639_v58 }
 0x1ed   :  { %v686_v60 = vmul.f32 %v975_v19, %v638_v59 }
 0x1ee   :  { %703 = vst [vmem:[%s1570_s5 + $0x70] sm:$0xff] %v687_v22 }
 0x1ef   :  { %702 = vst [vmem:[%s1570_s5 + $0x68] sm:$0xff] %v686_v60 }
 0x1f0   :  { %v977_v53 = vpop.eup %976 }
 0x1f1   :  { %v688_v4 = vmul.f32 %v977_v53, %v640_v3 }
 0x1f3   :  { %704 = vst [vmem:[%s1570_s5 + $0x78] sm:$0xff] %v688_v4 }

// kernel: ama_filter_forward.15
= control target key start
LH: loop header
LB: loop body
LE: loop exit
PB: predicated region body
PF: predicated region fallthrough
CT: control target
= control target key end

     0   :  { %s3796_s1 = inlined_call_operand.vmem [shape: f32[128,128], index: 1, kind: input, shape index: {}]   ;;  %s3797_s0 = inlined_call_operand.vmem [shape: f32[128,128], index: 0, kind: input, shape index: {}]   ;;  %s3798_s2 = inlined_call_operand.vmem [shape: f32[128,128], index: 2, kind: output, shape index: {}]  }
   0x1   :  { %v27_v0 = vld [vmem:[%s3796_s1] sm:$0xff]  ;;  %v28_v1 = vld [vmem:[%s3796_s1 + $0x8] sm:$0xff]  ;;  %v29_v2 = vld [vmem:[%s3796_s1 + $0x10] sm:$0xff] }
   0x2   :  { %v43_v3 = vand.u32 2147483647, %v27_v0  ;;  %v44_v4 = vand.u32 2147483647, %v28_v1  ;;  %v30_v5 = vld [vmem:[%s3796_s1 + $0x18] sm:$0xff]  ;;  %v31_v6 = vld [vmem:[%s3796_s1 + $0x20] sm:$0xff]  ;;  %v2458_v11 = vpack.c.bf16 %v28_v1, %v27_v0 }
   0x3   :  { %v45_v7 = vand.u32 2147483647, %v29_v2  ;;  %v46_v8 = vand.u32 2147483647, %v30_v5  ;;  %v32_v9 = vld [vmem:[%s3796_s1 + $0x28] sm:$0xff]  ;;  %v33_v10 = vld [vmem:[%s3796_s1 + $0x30] sm:$0xff]  ;;  %v2464_v20 = vpack.c.bf16 %v30_v5, %v29_v2 }
   0x4   :  { %vm59_vm0 = vcmp.gt.f32.partialorder %v43_v3, 10.0  ;;  %vm60_vm1 = vcmp.gt.f32.partialorder %v44_v4, 10.0  ;;  %v47_v12 = vand.u32 2147483647, %v31_v6  ;;  %v48_v14 = vand.u32 2147483647, %v32_v9 }
   0x5   :  { %vm2209_vm2 = vmneg %vm59_vm0  ;;  %vm2577_vm3 = vcmp.gt.f32.partialorder %v45_v7, 10.0  ;;  %v34_v15 = vld [vmem:[%s3796_s1 + $0x38] sm:$0xff]  ;;  %v2587_v16 = vld [vmem:[%s3796_s1 + $0x40] sm:$0xff]  ;;  %vm2589_vm5 = vcmp.gt.f32.partialorder %v46_v8, 10.0  ;;  %v49_v18 = vand.u32 2147483647, %v33_v10  ;;  %v2470_v31 = vpack.c.bf16 %v32_v9, %v31_v6 }
   0x6   :  { %vm2211_vm4 = vmneg %vm60_vm1  ;;  %v50_v19 = vand.u32 2147483647, %v34_v15  ;;  %v2596_v21 = vld [vmem:[%s3796_s1 + $0x48] sm:$0xff]  ;;  %vm2600_vm8 = vcmp.gt.f32.partialorder %v47_v12, 10.0  ;;  %v51_v23 = vand.u32 2147483647, %v2587_v16  ;;  %v252_v29 = vmax.f32 %v43_v3, %v47_v12 }
   0x7   :  { %vm2459_vm6 = vmpackc.low %vm2211_vm4, %vm2209_vm2  ;;  %v2608_v24 = vld [vmem:[%s3796_s1 + $0x50] sm:$0xff]  ;;  %v2613_v25 = vld [vmem:[%s3796_s1 + $0x58] sm:$0xff]  ;;  %vm2617_vm10 = vcmp.gt.f32.partialorder %v48_v14, 10.0  ;;  %vm2635_vm12 = vcmp.gt.f32.partialorder %v49_v18, 10.0  ;;  %v52_v34 = vand.u32 2147483647, %v2596_v21  ;;  %v2476_v37 = vpack.c.bf16 %v34_v15, %v33_v10 }
   0x8   :  { %2460 = vmatprep.subr.msk.bf16.mxu0 %vm2459_vm6, %v2458_v11  ;;  %2506 = vmatprep.subr.msk.bf16.mxu1 %vm2459_vm6, %v2458_v11  ;;  %vm2213_vm7 = vmneg %vm2577_vm3  ;;  %v2624_v27 = vld [vmem:[%s3796_s1 + $0x60] sm:$0xff]  ;;  %v2629_v28 = vld [vmem:[%s3796_s1 + $0x68] sm:$0xff]  ;;  %vm2639_vm13 = vcmp.gt.f32.partialorder %v50_v19, 10.0  ;;  %v53_v38 = vand.u32 2147483647, %v2608_v24  ;;  %vm2670_vm0 = vcmp.gt.f32.partialorder %v51_v23, 10.0  ;;  %v253_v43 = vmax.f32 %v44_v4, %v48_v14 }
   0x9   :  { %2463 = vmatpush3.bf16.msk.msra.mxu0 %vm2459_vm6, %v2458_v11  ;;  %2514 = vmatpush3.bf16.msk.msra.mxu1 %vm2459_vm6, %v2458_v11  ;;  %vm2215_vm9 = vmneg %vm2589_vm5  ;;  %v2647_v35 = vld [vmem:[%s3796_s1 + $0x70] sm:$0xff]  ;;  %v11_v36 = vld [vmem:[%s3797_s0] sm:$0xff]  ;;  %v54_v39 = vand.u32 2147483647, %v2613_v25  ;;  %v254_v44 = vmax.f32 %v45_v7, %v49_v18  ;;  %v255_v45 = vmax.f32 %v46_v8, %v50_v19  ;;  %v55_v47 = vand.u32 2147483647, %v2624_v27 }
   0xa   :  { %vm2631_vm11 = vmpackc.low %vm2215_vm9, %vm2213_vm7  ;;  %v2663_v40 = vld [vmem:[%s3796_s1 + $0x78] sm:$0xff]  ;;  %v19_v41 = vld [vmem:[%s3797_s0 + $0x40] sm:$0xff]  ;;  %2434 = vmatprep.mubr.f32.mxu0 %v11_v36  ;;  %v56_v48 = vand.u32 2147483647, %v2629_v28  ;;  %v57_v49 = vand.u32 2147483647, %v2647_v35  ;;  %v256_v50 = vmax.f32 %v252_v29, %v51_v23  ;;  %v257_v52 = vmax.f32 %v253_v43, %v52_v34 }
   0xb   :  { %2466 = vmatprep.subr.msk.bf16.mxu0 %vm2631_vm11, %v2464_v20  ;;  %2507 = vmatprep.subr.msk.bf16.mxu1 %vm2631_vm11, %v2464_v20  ;;  %vm2217_vm14 = vmneg %vm2600_vm8  ;;  %v58_v51 = vand.u32 2147483647, %v2663_v40  ;;  %v258_v53 = vmax.f32 %v254_v44, %v53_v38  ;;  %v259_v54 = vmax.f32 %v255_v45, %v54_v39  ;;  %vm2697_vm4 = vcmp.gt.f32.partialorder %v52_v34, 10.0  ;;  %v12_v10 = vld [vmem:[%s3797_s0 + $0x8] sm:$0xff]  ;;  %v13_v12 = vld [vmem:[%s3797_s0 + $0x10] sm:$0xff] }
   0xc   :  { %vm2219_vm15 = vmneg %vm2617_vm10  ;;  %2446 = vmatprep.mubr.f32.mxu1 %v19_v41  ;;  %v260_v56 = vmax.f32 %v256_v50, %v55_v47  ;;  %v261_v58 = vmax.f32 %v257_v52, %v56_v48  ;;  %vm2711_vm7 = vcmp.gt.f32.partialorder %v53_v38, 10.0  ;;  %v2482_v62 = vpack.c.bf16 %v2596_v21, %v2587_v16  ;;  %v20_v11 = vld [vmem:[%s3797_s0 + $0x48] sm:$0xff]  ;;  %v21_v13 = vld [vmem:[%s3797_s0 + $0x50] sm:$0xff] }
   0xd   :  { %2469 = vmatpush3.bf16.msk.msra.mxu0 %vm2631_vm11, %v2464_v20  ;;  %2515 = vmatpush3.bf16.msk.msra.mxu1 %vm2631_vm11, %v2464_v20  ;;  %vm2681_vm1 = vmpackc.low %vm2219_vm15, %vm2217_vm14  ;;  %v262_v59 = vmax.f32 %v258_v53, %v57_v49  ;;  %v263_v60 = vmax.f32 %v259_v54, %v58_v51  ;;  %vm2723_vm9 = vcmp.gt.f32.partialorder %v54_v39, 10.0  ;;  %vm2743_vm14 = vcmp.gt.f32.partialorder %v56_v48, 10.0  ;;  %v14_v14 = vld [vmem:[%s3797_s0 + $0x18] sm:$0xff]  ;;  %v15_v16 = vld [vmem:[%s3797_s0 + $0x20] sm:$0xff] }
   0xe   :  { %2472 = vmatprep.subr.msk.bf16.mxu0 %vm2681_vm1, %v2470_v31  ;;  %2508 = vmatprep.subr.msk.bf16.mxu1 %vm2681_vm1, %v2470_v31  ;;  %vm2221_vm2 = vmneg %vm2635_vm12  ;;  %v264_v0 = vmax.f32 %v260_v56, %v261_v58  ;;  %vm2733_vm12 = vcmp.gt.f32.partialorder %v55_v47, 10.0  ;;  %v2488_v6 = vpack.c.bf16 %v2613_v25, %v2608_v24  ;;  %v2494_v8 = vpack.c.bf16 %v2629_v28, %v2624_v27  ;;  %v22_v15 = vld [vmem:[%s3797_s0 + $0x58] sm:$0xff]  ;;  %v23_v17 = vld [vmem:[%s3797_s0 + $0x60] sm:$0xff] }
   0xf   :  { %vm2223_vm3 = vmneg %vm2639_vm13  ;;  %v265_v1 = vmax.f32 %v262_v59, %v263_v60  ;;  %v2500_v9 = vpack.c.bf16 %v2663_v40, %v2647_v35  ;;  %v16_v18 = vld [vmem:[%s3797_s0 + $0x28] sm:$0xff]  ;;  %v17_v20 = vld [vmem:[%s3797_s0 + $0x30] sm:$0xff] }
  0x10   :  { %vm2701_vm5 = vmpackc.low %vm2223_vm3, %vm2221_vm2  ;;  %vm2757_vm2 = vcmp.gt.f32.partialorder %v57_v49, 10.0  ;;  %vm74_vm3 = vcmp.gt.f32.partialorder %v58_v51, 10.0  ;;  %v24_v19 = vld [vmem:[%s3797_s0 + $0x68] sm:$0xff]  ;;  %v25_v21 = vld [vmem:[%s3797_s0 + $0x70] sm:$0xff] }
  0x11   :  { %2475 = vmatpush3.bf16.msk.msra.mxu0 %vm2681_vm1, %v2470_v31  ;;  %2516 = vmatpush3.bf16.msk.msra.mxu1 %vm2681_vm1, %v2470_v31  ;;  %vm2225_vm6 = vmneg %vm2670_vm0  ;;  %v266_v4 = vmax.f32 %v264_v0, %v265_v1  ;;  %v18_v22 = vld [vmem:[%s3797_s0 + $0x38] sm:$0xff] }
  0x12   :  { %2478 = vmatprep.subr.msk.bf16.mxu0 %vm2701_vm5, %v2476_v37  ;;  %2509 = vmatprep.subr.msk.bf16.mxu1 %vm2701_vm5, %v2476_v37  ;;  %vm2227_vm8 = vmneg %vm2697_vm4  ;;  %v26_v23 = vld [vmem:[%s3797_s0 + $0x78] sm:$0xff] }
  0x13   :  { %vm2727_vm10 = vmpackc.low %vm2227_vm8, %vm2225_vm6  ;;  %267 = vmax.xlane.f32.xlu0 %v266_v4 }
  0x14   :  { %vm2229_vm11 = vmneg %vm2711_vm7 }
  0x15   :  { %2481 = vmatpush3.bf16.msk.msra.mxu0 %vm2701_vm5, %v2476_v37  ;;  %2517 = vmatpush3.bf16.msk.msra.mxu1 %vm2701_vm5, %v2476_v37  ;;  %vm2231_vm13 = vmneg %vm2723_vm9 }
  0x16   :  { %2484 = vmatprep.subr.msk.bf16.mxu0 %vm2727_vm10, %v2482_v62  ;;  %2510 = vmatprep.subr.msk.bf16.mxu1 %vm2727_vm10, %v2482_v62  ;;  %vm2489_vm15 = vmpackc.low %vm2231_vm13, %vm2229_vm11 }
  0x17   :  { %vm2233_vm0 = vmneg %vm2733_vm12 }
  0x18   :  { %vm2235_vm1 = vmneg %vm2743_vm14 }
  0x19   :  { %2487 = vmatpush3.bf16.msk.msra.mxu0 %vm2727_vm10, %v2482_v62  ;;  %2518 = vmatpush3.bf16.msk.msra.mxu1 %vm2727_vm10, %v2482_v62  ;;  %vm2495_vm4 = vmpackc.low %vm2235_vm1, %vm2233_vm0 }
  0x1a   :  { %2490 = vmatprep.subr.msk.bf16.mxu0 %vm2489_vm15, %v2488_v6  ;;  %2511 = vmatprep.subr.msk.bf16.mxu1 %vm2489_vm15, %v2488_v6  ;;  %vm2237_vm5 = vmneg %vm2757_vm2 }
  0x1b   :  { %vm2239_vm6 = vmneg %vm74_vm3 }
  0x1c   :  { %vm2501_vm7 = vmpackc.low %vm2239_vm6, %vm2237_vm5 }
  0x1d   :  { %2493 = vmatpush3.bf16.msk.msra.mxu0 %vm2489_vm15, %v2488_v6  ;;  %2519 = vmatpush3.bf16.msk.msra.mxu1 %vm2489_vm15, %v2488_v6 }
  0x1e   :  { %2496 = vmatprep.subr.msk.bf16.mxu0 %vm2495_vm4, %v2494_v8  ;;  %2512 = vmatprep.subr.msk.bf16.mxu1 %vm2495_vm4, %v2494_v8 }
  0x21   :  { %2499 = vmatpush3.bf16.msk.msra.mxu0 %vm2495_vm4, %v2494_v8  ;;  %2520 = vmatpush3.bf16.msk.msra.mxu1 %vm2495_vm4, %v2494_v8 }
  0x22   :  { %2502 = vmatprep.subr.msk.bf16.mxu0 %vm2501_vm7, %v2500_v9  ;;  %2513 = vmatprep.subr.msk.bf16.mxu1 %vm2501_vm7, %v2500_v9 }
  0x25   :  { %2505 = vmatpush3.bf16.msk.msra.mxu0 %vm2501_vm7, %v2500_v9  ;;  %2521 = vmatpush3.bf16.msk.msra.mxu1 %vm2501_vm7, %v2500_v9 }
  0x28   :  { %2435 = vmatmul.mubr.f32.vlgmr.msra.gmra.mrb[0].mxu0 %v12_v10  ;;  %2447 = vmatmul.mubr.f32.vlgmr.msra.gmra.mrb[0].mxu1 %v20_v11 }
  0x29   :  { %2437 = vmatprep.mubr.f32.mxu0 %v13_v12  ;;  %2449 = vmatprep.mubr.f32.mxu1 %v21_v13 }
  0x2c   :  { %2438 = vmatmul.mubr.f32.gmra.mrb[2].mxu0 %v14_v14  ;;  %2450 = vmatmul.mubr.f32.gmra.mrb[2].mxu1 %v22_v15 }
  0x2d   :  { %2440 = vmatprep.mubr.f32.mxu0 %v15_v16  ;;  %2452 = vmatprep.mubr.f32.mxu1 %v23_v17 }
  0x30   :  { %2441 = vmatmul.mubr.f32.gmra.mrb[4].mxu0 %v16_v18  ;;  %2453 = vmatmul.mubr.f32.gmra.mrb[4].mxu1 %v24_v19 }
  0x31   :  { %2443 = vmatprep.mubr.f32.mxu0 %v17_v20  ;;  %2455 = vmatprep.mubr.f32.mxu1 %v25_v21 }
  0x34   :  { %2444 = vmatmul.mubr.f32.gmra.mrb[6].mxu0 %v18_v22  ;;  %2456 = vmatmul.mubr.f32.gmra.mrb[6].mxu1 %v26_v23 }
  0xa0   :  { %v268_v24 = vpop.xlane.xlu0 %267 }
  0xa1   :  { %v269_v25 = vrot.slane %v268_v24, 4 }
  0xa3   :  { %v270_v26 = vmax.f32 %v268_v24, %v269_v25 }
  0xa5   :  { %v271_v27 = vrot.slane %v270_v26, 2 }
  0xa7   :  { %v272_v28 = vmax.f32 %v270_v26, %v271_v27 }
  0xa9   :  { %v273_v29 = vrot.slane %v272_v28, 1 }
  0xab   :  { %v274_v30 = vmax.f32 %v272_v28, %v273_v29 }
  0xad   :  { %2522 = vpush %v274_v30 }
  0xde   :  { %s2813_s17 = spop %2522 }
  0xdf   :  { %p276_p0 = scmp.gt.f32.partialorder %s2813_s17, 10.0 }
  0xe0   :  { %s2866_s23 = smov (%p276_p0), 0  }
  0xfb   :  { %v2436_v31 = vpop.f32.mrb[0].mxu0  ;;  %v2448_v32 = vpop.f32.mrb[0].mxu1 }
  0xfc   :  { %237 = vst [vmem:[%s3798_s2 + $0x8] sm:$0xff] %v2436_v31  ;;  %245 = vst [vmem:[%s3798_s2 + $0x48] sm:$0xff] %v2448_v32  ;;  %v157_v33 = vpop.f32.mrb[1].mxu0  ;;  %v197_v34 = vpop.f32.mrb[1].mxu1 }
  0xfd   :  { %236 = vst [vmem:[%s3798_s2] sm:$0xff] %v157_v33  ;;  %244 = vst [vmem:[%s3798_s2 + $0x40] sm:$0xff] %v197_v34 }
  0xff   :  { %v2439_v35 = vpop.f32.mrb[2].mxu0  ;;  %v2451_v36 = vpop.f32.mrb[2].mxu1 }
 0x100   :  { %239 = vst [vmem:[%s3798_s2 + $0x18] sm:$0xff] %v2439_v35  ;;  %247 = vst [vmem:[%s3798_s2 + $0x58] sm:$0xff] %v2451_v36  ;;  %v167_v37 = vpop.f32.mrb[3].mxu0  ;;  %v207_v38 = vpop.f32.mrb[3].mxu1 }
 0x101   :  { %238 = vst [vmem:[%s3798_s2 + $0x10] sm:$0xff] %v167_v37  ;;  %246 = vst [vmem:[%s3798_s2 + $0x50] sm:$0xff] %v207_v38 }
 0x103   :  { %v2442_v39 = vpop.f32.mrb[4].mxu0  ;;  %v2454_v40 = vpop.f32.mrb[4].mxu1  ;;  %279 = sbr.rel (!%p276_p0) target bundleno = 699 (0x2bb), region = 13 }
 0x104   :  { %241 = vst [vmem:[%s3798_s2 + $0x28] sm:$0xff] %v2442_v39  ;;  %249 = vst [vmem:[%s3798_s2 + $0x68] sm:$0xff] %v2454_v40  ;;  %v177_v41 = vpop.f32.mrb[5].mxu0  ;;  %v217_v42 = vpop.f32.mrb[5].mxu1 }
 0x105   :  { %240 = vst [vmem:[%s3798_s2 + $0x20] sm:$0xff] %v177_v41  ;;  %248 = vst [vmem:[%s3798_s2 + $0x60] sm:$0xff] %v217_v42 }
 0x107   :  { %v2445_v43 = vpop.f32.mrb[6].mxu0  ;;  %v2457_v44 = vpop.f32.mrb[6].mxu1 }
 0x108   :  { %243 = vst [vmem:[%s3798_s2 + $0x38] sm:$0xff] %v2445_v43  ;;  %251 = vst [vmem:[%s3798_s2 + $0x78] sm:$0xff] %v2457_v44  ;;  %v187_v45 = vpop.f32.mrb[7].mxu0  ;;  %v227_v46 = vpop.f32.mrb[7].mxu1 }
 0x109   :  { %242 = vst [vmem:[%s3798_s2 + $0x30] sm:$0xff] %v187_v45  ;;  %250 = vst [vmem:[%s3798_s2 + $0x70] sm:$0xff] %v227_v46 }
 0x10a LB: > { %v293_v47 = vlaneseq  ;;  %s2241_s24 = sshll.u32 %s2539_s23, 3  ;;  %v289_v2 = vld [vmem:[%s3796_s1] sm:$0xff]  ;;  %v429_v4 = vld [vmem:[%s3796_s1 + $0x8] sm:$0xff]  ;;  %v545_v5 = vld [vmem:[%s3796_s1 + $0x10] sm:$0xff]  ;;  %s285_s23 = sadd.s32 1, %s2539_s23   ;;  %s2539_s23 = sphi %s2866_s23, %s285_s23  }
 0x10b   : > { %s287_s27 = scalar_lea.vmem %s3797_s0, %s2241_s24  ;;  %v290_v3 = vand.u32 2147483647, %v289_v2  ;;  %v661_v6 = vld [vmem:[%s3796_s1 + $0x18] sm:$0xff]  ;;  %v777_v7 = vld [vmem:[%s3796_s1 + $0x20] sm:$0xff]  ;;  %v430_v9 = vand.u32 2147483647, %v429_v4  ;;  %s2169_s9 = scalar_lea.vmem %s3798_s2, %s2241_s24 }
 0x10c   : > { %v294_v48 = vshrl.u32 %v293_v47, 7  ;;  %v288_v49 = vld [vmem:[%s287_s27] sm:$0xff]  ;;  %v893_v10 = vld [vmem:[%s3796_s1 + $0x28] sm:$0xff]  ;;  %v1009_v11 = vld [vmem:[%s3796_s1 + $0x30] sm:$0xff]  ;;  %v546_v14 = vand.u32 2147483647, %v545_v5 }
 0x10d   : > { %vm291_vm8 = vcmp.gt.f32.partialorder %v290_v3, 10.0  ;;  %v662_v15 = vand.u32 2147483647, %v661_v6  ;;  %v778_v16 = vand.u32 2147483647, %v777_v7  ;;  %v1125_v19 = vld [vmem:[%s3796_s1 + $0x38] sm:$0xff] }
 0x10e   : > { %v309_v50 = vsub.s32 2, %v294_v48  ;;  %v295_v51 = vsub.s32 0, %v294_v48  ;;  %v316_v52 = vsub.s32 3, %v294_v48  ;;  %v302_v53 = vsub.s32 1, %v294_v48  ;;  %p282_p1 = scmp.ge.s32.totalorder %s285_s23, 16  }
 0x10f   : > { %v330_v58 = vsub.s32 5, %v294_v48  ;;  %v323_v59 = vsub.s32 4, %v294_v48  ;;  %v344_v62 = vsub.s32 7, %v294_v48  ;;  %v337_v63 = vsub.s32 6, %v294_v48 }
 0x110   : > { %v2877_v54 = vrot.slane %v288_v49, %v309_v50  ;;  %v2879_v55 = vrot.slane %v288_v49, %v295_v51  ;;  %v2883_v56 = vrot.slane %v288_v49, %v316_v52  ;;  %v2885_v57 = vrot.slane %v288_v49, %v302_v53  ;;  %v3026_v51 = vld [vmem:[%s3796_s1 + $0x40] sm:$0xff] }
 0x111   : > { %v2889_v60 = vrot.slane %v288_v49, %v330_v58  ;;  %v2891_v61 = vrot.slane %v288_v49, %v323_v59  ;;  %v2895_v0 = vrot.slane %v288_v49, %v344_v62  ;;  %v2897_v1 = vrot.slane %v288_v49, %v337_v63 }
 0x112   : > { %312 = vbcast.lane.b32.xlu1 %v2877_v54, 256  ;;  %298 = vbcast.lane.b32.xlu0 %v2879_v55, 256  ;;  %v2966_v8 = vsel %vm291_vm8, %v289_v2, 0.0  ;;  %v894_v20 = vand.u32 2147483647, %v893_v10  ;;  %vm431_vm9 = vcmp.gt.f32.partialorder %v430_v9, 10.0 }
 0x113   : > { %v1010_v21 = vand.u32 2147483647, %v1009_v11  ;;  %vm2981_vm10 = vcmp.gt.f32.partialorder %v546_v14, 10.0  ;;  %vm2985_vm11 = vcmp.gt.f32.partialorder %v662_v15, 10.0  ;;  %vm2989_vm12 = vcmp.gt.f32.partialorder %v778_v16, 10.0 }
 0x114   : > { %v1126_v29 = vand.u32 2147483647, %v1125_v19  ;;  %v2997_v34 = vsel %vm431_vm9, %v429_v4, 0.0  ;;  %vm2999_vm13 = vcmp.gt.f32.partialorder %v894_v20, 10.0  ;;  %v3009_v43 = vsel %vm2981_vm10, %v545_v5, 0.0 }
 0x115   : > { %vm3003_vm14 = vcmp.gt.f32.partialorder %v1010_v21, 10.0  ;;  %v3013_v44 = vsel %vm2985_vm11, %v661_v6, 0.0  ;;  %v3017_v45 = vsel %vm2989_vm12, %v777_v7, 0.0  ;;  %v3034_v58 = vsel %vm2999_vm13, %v893_v10, 0.0 }
 0x116   : > { %319 = vbcast.lane.b32.xlu1 %v2883_v56, 256  ;;  %305 = vbcast.lane.b32.xlu0 %v2885_v57, 256  ;;  %vm3019_vm15 = vcmp.gt.f32.partialorder %v1126_v29, 10.0  ;;  %v3038_v59 = vsel %vm3003_vm14, %v1009_v11, 0.0  ;;  %vm2179_vm8 = vcmask 1041409   ;;  %vm2181_vm9 = vcmask 1042434  }
 0x117   : > { %v3042_v9 = vsel %vm3019_vm15, %v1125_v19, 0.0  ;;  %vm2183_vm10 = vcmask 1043459   ;;  %vm2185_vm11 = vcmask 1044484   ;;  %vm2187_vm12 = vcmask 1045509  }
 0x118   : > { %vm2189_vm13 = vcmask 1046534   ;;  %vm2191_vm14 = vcmask 1047559  }
 0x11a   : > { %333 = vbcast.lane.b32.xlu1 %v2889_v60, 256  ;;  %326 = vbcast.lane.b32.xlu0 %v2891_v61, 256 }
 0x11e   : > { %347 = vbcast.lane.b32.xlu1 %v2895_v0, 256  ;;  %340 = vbcast.lane.b32.xlu0 %v2897_v1, 256 }
 0x122   : > { %439 = vbcast.lane.b32.xlu1 %v2885_v57, 264  ;;  %435 = vbcast.lane.b32.xlu0 %v2879_v55, 264 }
 0x126   : > { %447 = vbcast.lane.b32.xlu1 %v2883_v56, 264  ;;  %443 = vbcast.lane.b32.xlu0 %v2877_v54, 264 }
 0x12a   : > { %455 = vbcast.lane.b32.xlu1 %v2889_v60, 264  ;;  %451 = vbcast.lane.b32.xlu0 %v2891_v61, 264 }
 0x12e   : > { %463 = vbcast.lane.b32.xlu1 %v2895_v0, 264  ;;  %459 = vbcast.lane.b32.xlu0 %v2897_v1, 264 }
 0x132   : > { %555 = vbcast.lane.b32.xlu1 %v2885_v57, 272  ;;  %551 = vbcast.lane.b32.xlu0 %v2879_v55, 272 }
 0x136   : > { %563 = vbcast.lane.b32.xlu1 %v2883_v56, 272  ;;  %559 = vbcast.lane.b32.xlu0 %v2877_v54, 272 }
 0x13a   : > { %571 = vbcast.lane.b32.xlu1 %v2889_v60, 272  ;;  %567 = vbcast.lane.b32.xlu0 %v2891_v61, 272 }
 0x13e   : > { %579 = vbcast.lane.b32.xlu1 %v2895_v0, 272  ;;  %575 = vbcast.lane.b32.xlu0 %v2897_v1, 272 }
 0x142   : > { %671 = vbcast.lane.b32.xlu1 %v2885_v57, 280  ;;  %667 = vbcast.lane.b32.xlu0 %v2879_v55, 280 }
 0x146   : > { %679 = vbcast.lane.b32.xlu1 %v2883_v56, 280  ;;  %675 = vbcast.lane.b32.xlu0 %v2877_v54, 280 }
 0x14a   : > { %687 = vbcast.lane.b32.xlu1 %v2889_v60, 280  ;;  %683 = vbcast.lane.b32.xlu0 %v2891_v61, 280 }
 0x14e   : > { %695 = vbcast.lane.b32.xlu1 %v2895_v0, 280  ;;  %691 = vbcast.lane.b32.xlu0 %v2897_v1, 280 }
 0x152   : > { %787 = vbcast.lane.b32.xlu1 %v2885_v57, 288  ;;  %783 = vbcast.lane.b32.xlu0 %v2879_v55, 288 }
 0x156   : > { %795 = vbcast.lane.b32.xlu1 %v2883_v56, 288  ;;  %791 = vbcast.lane.b32.xlu0 %v2877_v54, 288 }
 0x15a   : > { %803 = vbcast.lane.b32.xlu1 %v2889_v60, 288  ;;  %799 = vbcast.lane.b32.xlu0 %v2891_v61, 288 }
 0x15e   : > { %811 = vbcast.lane.b32.xlu1 %v2895_v0, 288  ;;  %807 = vbcast.lane.b32.xlu0 %v2897_v1, 288 }
 0x162   : > { %903 = vbcast.lane.b32.xlu1 %v2885_v57, 296  ;;  %899 = vbcast.lane.b32.xlu0 %v2879_v55, 296 }
 0x166   : > { %911 = vbcast.lane.b32.xlu1 %v2883_v56, 296  ;;  %907 = vbcast.lane.b32.xlu0 %v2877_v54, 296 }
 0x16a   : > { %919 = vbcast.lane.b32.xlu1 %v2889_v60, 296  ;;  %915 = vbcast.lane.b32.xlu0 %v2891_v61, 296 }
 0x16e   : > { %927 = vbcast.lane.b32.xlu1 %v2895_v0, 296  ;;  %923 = vbcast.lane.b32.xlu0 %v2897_v1, 296 }
 0x172   : > { %1019 = vbcast.lane.b32.xlu1 %v2885_v57, 304  ;;  %1015 = vbcast.lane.b32.xlu0 %v2879_v55, 304 }
 0x176   : > { %1027 = vbcast.lane.b32.xlu1 %v2883_v56, 304  ;;  %1023 = vbcast.lane.b32.xlu0 %v2877_v54, 304 }
 0x17a   : > { %1035 = vbcast.lane.b32.xlu1 %v2889_v60, 304  ;;  %1031 = vbcast.lane.b32.xlu0 %v2891_v61, 304 }
 0x17e   : > { %1043 = vbcast.lane.b32.xlu1 %v2895_v0, 304  ;;  %1039 = vbcast.lane.b32.xlu0 %v2897_v1, 304 }
 0x182   : > { %1135 = vbcast.lane.b32.xlu1 %v2885_v57, 312  ;;  %1131 = vbcast.lane.b32.xlu0 %v2879_v55, 312 }
 0x184   : > { %v313_v12 = vpop.permute.xlu1 %312  ;;  %v299_v13 = vpop.permute.xlu0 %298 }
 0x185   : > { %v351_v17 = vmul.f32 %v313_v12, %v2966_v8  ;;  %v349_v18 = vmul.f32 %v299_v13, %v2966_v8  ;;  %v1242_v12 = vand.u32 2147483647, %v3026_v51 }
 0x186   : > { %1143 = vbcast.lane.b32.xlu1 %v2883_v56, 312  ;;  %1139 = vbcast.lane.b32.xlu0 %v2877_v54, 312 }
 0x187   : > { %v2244_v22 = vclamps-f32 %v351_v17, 10.0  ;;  %v2242_v23 = vclamps-f32 %v349_v18, 10.0  ;;  %vm3339_vm0 = vcmp.gt.f32.partialorder %v1242_v12, 10.0 }
 0x188   : > { %v320_v24 = vpop.permute.xlu1 %319  ;;  %v306_v25 = vpop.permute.xlu0 %305 }
 0x189   : > { %v385_v30 = vrot.slane %v2244_v22, 4  ;;  %v373_v31 = vrot.slane %v2242_v23, 4  ;;  %v352_v32 = vmul.f32 %v320_v24, %v2966_v8  ;;  %v350_v33 = vmul.f32 %v306_v25, %v2966_v8 }
 0x18a   : > { %1151 = vbcast.lane.b32.xlu1 %v2889_v60, 312  ;;  %1147 = vbcast.lane.b32.xlu0 %v2891_v61, 312 }
 0x18b   : > { %v386_v37 = vadd.f32 %v2244_v22, %v385_v30  ;;  %v374_v38 = vadd.f32 %v2242_v23, %v373_v31  ;;  %v2245_v39 = vclamps-f32 %v352_v32, 10.0  ;;  %v2243_v40 = vclamps-f32 %v350_v33, 10.0 }
 0x18c   : > { %v334_v41 = vpop.permute.xlu1 %333  ;;  %v327_v42 = vpop.permute.xlu0 %326 }
 0x18d   : > { %v387_v47 = vrot.slane %v386_v37, 2  ;;  %v375_v48 = vrot.slane %v374_v38, 2  ;;  %v391_v49 = vrot.slane %v2245_v39, 4  ;;  %v379_v50 = vrot.slane %v2243_v40, 4 }
 0x18e   : > { %v354_v52 = vmul.f32 %v334_v41, %v2966_v8  ;;  %v353_v53 = vmul.f32 %v327_v42, %v2966_v8  ;;  %1159 = vbcast.lane.b32.xlu1 %v2895_v0, 312  ;;  %1155 = vbcast.lane.b32.xlu0 %v2897_v1, 312 }
 0x18f   : > { %v388_v62 = vadd.f32 %v387_v47, %v386_v37  ;;  %v376_v63 = vadd.f32 %v375_v48, %v374_v38  ;;  %v392_v2 = vadd.f32 %v2245_v39, %v391_v49  ;;  %v380_v3 = vadd.f32 %v2243_v40, %v379_v50 }
 0x190   : > { %v2247_v4 = vclamps-f32 %v354_v52, 10.0  ;;  %v2246_v5 = vclamps-f32 %v353_v53, 10.0  ;;  %v348_v6 = vpop.permute.xlu1 %347  ;;  %v341_v7 = vpop.permute.xlu0 %340 }
 0x191   : > { %v389_v10 = vrot.slane %v388_v62, 1  ;;  %v377_v13 = vrot.slane %v376_v63, 1  ;;  %v393_v14 = vrot.slane %v392_v2, 2  ;;  %v381_v15 = vrot.slane %v380_v3, 2 }
 0x192   : > { %v403_v11 = vrot.slane %v2247_v4, 4  ;;  %v397_v16 = vrot.slane %v2246_v5, 4  ;;  %v356_v17 = vmul.f32 %v348_v6, %v2966_v8  ;;  %v355_v18 = vmul.f32 %v341_v7, %v2966_v8  ;;  %1251 = vbcast.lane.b32.xlu1 %v2885_v57, 320  ;;  %1247 = vbcast.lane.b32.xlu0 %v2879_v55, 320 }
 0x193   : > { %v3049_v20 = vadd.f32 %v389_v10, %v388_v62  ;;  %v3051_v19 = vadd.f32 %v377_v13, %v376_v63  ;;  %v394_v21 = vadd.f32 %v393_v14, %v392_v2  ;;  %v382_v22 = vadd.f32 %v381_v15, %v380_v3 }
 0x194   : > { %v404_v23 = vadd.f32 %v2247_v4, %v403_v11  ;;  %v398_v24 = vadd.f32 %v2246_v5, %v397_v16  ;;  %v2249_v25 = vclamps-f32 %v356_v17, 10.0  ;;  %v2248_v26 = vclamps-f32 %v355_v18, 10.0  ;;  %v440_v27 = vpop.permute.xlu1 %439  ;;  %v436_v28 = vpop.permute.xlu0 %435 }
 0x195   : > { %v395_v29 = vrot.slane %v394_v21, 1  ;;  %v383_v30 = vrot.slane %v382_v22, 1  ;;  %v466_v8 = vmul.f32 %v440_v27, %v2997_v34  ;;  %v465_v31 = vmul.f32 %v436_v28, %v2997_v34 }
 0x196   : > { %v405_v32 = vrot.slane %v404_v23, 2  ;;  %v399_v33 = vrot.slane %v398_v24, 2  ;;  %v415_v35 = vrot.slane %v2249_v25, 4  ;;  %v409_v36 = vrot.slane %v2248_v26, 4  ;;  %1259 = vbcast.lane.b32.xlu1 %v2883_v56, 320  ;;  %1255 = vbcast.lane.b32.xlu0 %v2877_v54, 320 }
 0x197   : > { %v3057_v37 = vadd.f32 %v395_v29, %v394_v21  ;;  %v3059_v38 = vadd.f32 %v383_v30, %v382_v22  ;;  %v2251_v39 = vclamps-f32 %v466_v8, 10.0  ;;  %v2250_v40 = vclamps-f32 %v465_v31, 10.0 }
 0x198   : > { %v406_v41 = vadd.f32 %v405_v32, %v404_v23  ;;  %v400_v42 = vadd.f32 %v399_v33, %v398_v24  ;;  %v416_v46 = vadd.f32 %v2249_v25, %v415_v35  ;;  %v410_v47 = vadd.f32 %v2248_v26, %v409_v36  ;;  %v448_v48 = vpop.permute.xlu1 %447  ;;  %v444_v49 = vpop.permute.xlu0 %443 }
 0x199   : > { %v495_v50 = vrot.slane %v2251_v39, 4  ;;  %v489_v52 = vrot.slane %v2250_v40, 4  ;;  %v468_v53 = vmul.f32 %v448_v48, %v2997_v34  ;;  %v467_v62 = vmul.f32 %v444_v49, %v2997_v34 }
 0x19a   : > { %v407_v63 = vrot.slane %v406_v41, 1  ;;  %v401_v2 = vrot.slane %v400_v42, 1  ;;  %v417_v3 = vrot.slane %v416_v46, 2  ;;  %v411_v4 = vrot.slane %v410_v47, 2  ;;  %1267 = vbcast.lane.b32.xlu1 %v2889_v60, 320  ;;  %1263 = vbcast.lane.b32.xlu0 %v2891_v61, 320 }
 0x19b   : > { %v496_v5 = vadd.f32 %v2251_v39, %v495_v50  ;;  %v490_v6 = vadd.f32 %v2250_v40, %v489_v52  ;;  %v2253_v7 = vclamps-f32 %v468_v53, 10.0  ;;  %v2252_v10 = vclamps-f32 %v467_v62, 10.0 }
 0x19c   : > { %v3065_v13 = vadd.f32 %v407_v63, %v406_v41  ;;  %v3067_v14 = vadd.f32 %v401_v2, %v400_v42  ;;  %v418_v15 = vadd.f32 %v417_v3, %v416_v46  ;;  %v412_v11 = vadd.f32 %v411_v4, %v410_v47  ;;  %v456_v16 = vpop.permute.xlu1 %455  ;;  %v452_v17 = vpop.permute.xlu0 %451 }
 0x19d   : > { %v497_v18 = vrot.slane %v496_v5, 2  ;;  %v491_v21 = vrot.slane %v490_v6, 2  ;;  %v507_v22 = vrot.slane %v2253_v7, 4  ;;  %v501_v23 = vrot.slane %v2252_v10, 4 }
 0x19e   : > { %v419_v24 = vrot.slane %v418_v15, 1  ;;  %v413_v25 = vrot.slane %v412_v11, 1  ;;  %v470_v26 = vmul.f32 %v456_v16, %v2997_v34  ;;  %v469_v27 = vmul.f32 %v452_v17, %v2997_v34  ;;  %1275 = vbcast.lane.b32.xlu1 %v2895_v0, 320  ;;  %1271 = vbcast.lane.b32.xlu0 %v2897_v1, 320 }
 0x19f   : > { %v498_v28 = vadd.f32 %v497_v18, %v496_v5  ;;  %v492_v29 = vadd.f32 %v491_v21, %v490_v6  ;;  %v508_v30 = vadd.f32 %v2253_v7, %v507_v22  ;;  %v502_v8 = vadd.f32 %v2252_v10, %v501_v23 }
 0x1a0   : > { %v3073_v31 = vadd.f32 %v419_v24, %v418_v15  ;;  %v3075_v32 = vadd.f32 %v413_v25, %v412_v11  ;;  %v2255_v33 = vclamps-f32 %v470_v26, 10.0  ;;  %v2254_v35 = vclamps-f32 %v469_v27, 10.0  ;;  %v464_v36 = vpop.permute.xlu1 %463  ;;  %v460_v39 = vpop.permute.xlu0 %459 }
 0x1a1   : > { %v499_v40 = vrot.slane %v498_v28, 1  ;;  %v493_v41 = vrot.slane %v492_v29, 1  ;;  %v509_v42 = vrot.slane %v508_v30, 2  ;;  %v503_v46 = vrot.slane %v502_v8, 2 }
 0x1a2   : > { %v519_v47 = vrot.slane %v2255_v33, 4  ;;  %v513_v48 = vrot.slane %v2254_v35, 4  ;;  %v472_v49 = vmul.f32 %v464_v36, %v2997_v34  ;;  %v471_v50 = vmul.f32 %v460_v39, %v2997_v34  ;;  %1367 = vbcast.lane.b32.xlu1 %v2885_v57, 328  ;;  %1363 = vbcast.lane.b32.xlu0 %v2879_v55, 328 }
 0x1a3   : > { %v500_v52 = vadd.f32 %v499_v40, %v498_v28  ;;  %v494_v53 = vadd.f32 %v493_v41, %v492_v29  ;;  %v510_v62 = vadd.f32 %v509_v42, %v508_v30  ;;  %v504_v63 = vadd.f32 %v503_v46, %v502_v8 }
 0x1a4   : > { %v520_v2 = vadd.f32 %v2255_v33, %v519_v47  ;;  %v514_v3 = vadd.f32 %v2254_v35, %v513_v48  ;;  %v2257_v4 = vclamps-f32 %v472_v49, 10.0  ;;  %v2256_v5 = vclamps-f32 %v471_v50, 10.0  ;;  %v556_v6 = vpop.permute.xlu1 %555  ;;  %v552_v7 = vpop.permute.xlu0 %551 }
 0x1a5   : > { %v3082_v10 = vadd.f32 %v500_v52, %v3059_v38  ;;  %v3085_v15 = vadd.f32 %v494_v53, %v3051_v19  ;;  %v511_v34 = vrot.slane %v510_v62, 1  ;;  %v505_v11 = vrot.slane %v504_v63, 1 }
 0x1a6   : > { %v521_v16 = vrot.slane %v520_v2, 2  ;;  %v515_v17 = vrot.slane %v514_v3, 2  ;;  %v531_v18 = vrot.slane %v2257_v4, 4  ;;  %v525_v21 = vrot.slane %v2256_v5, 4  ;;  %1375 = vbcast.lane.b32.xlu1 %v2883_v56, 328  ;;  %1371 = vbcast.lane.b32.xlu0 %v2877_v54, 328 }
 0x1a7   : > { %v512_v22 = vadd.f32 %v511_v34, %v510_v62  ;;  %v506_v23 = vadd.f32 %v505_v11, %v504_v63  ;;  %v582_v24 = vmul.f32 %v556_v6, %v3009_v43  ;;  %v581_v38 = vmul.f32 %v552_v7, %v3009_v43 }
 0x1a8   : > { %v522_v25 = vadd.f32 %v521_v16, %v520_v2  ;;  %v516_v26 = vadd.f32 %v515_v17, %v514_v3  ;;  %v532_v19 = vadd.f32 %v2257_v4, %v531_v18  ;;  %v526_v27 = vadd.f32 %v2256_v5, %v525_v21  ;;  %v564_v28 = vpop.permute.xlu1 %563  ;;  %v560_v29 = vpop.permute.xlu0 %559 }
 0x1a9   : > { %v3092_v30 = vadd.f32 %v512_v22, %v3057_v37  ;;  %v3095_v8 = vadd.f32 %v506_v23, %v3049_v20  ;;  %v2259_v33 = vclamps-f32 %v582_v24, 10.0  ;;  %v2258_v35 = vclamps-f32 %v581_v38, 10.0 }
 0x1aa   : > { %v523_v36 = vrot.slane %v522_v25, 1  ;;  %v517_v39 = vrot.slane %v516_v26, 1  ;;  %v533_v40 = vrot.slane %v532_v19, 2  ;;  %v527_v41 = vrot.slane %v526_v27, 2  ;;  %1383 = vbcast.lane.b32.xlu1 %v2889_v60, 328  ;;  %1379 = vbcast.lane.b32.xlu0 %v2891_v61, 328 }
 0x1ab   : > { %v611_v42 = vrot.slane %v2259_v33, 4  ;;  %v605_v46 = vrot.slane %v2258_v35, 4  ;;  %v584_v47 = vmul.f32 %v564_v28, %v3009_v43  ;;  %v583_v37 = vmul.f32 %v560_v29, %v3009_v43 }
 0x1ac   : > { %v524_v48 = vadd.f32 %v523_v36, %v522_v25  ;;  %v518_v49 = vadd.f32 %v517_v39, %v516_v26  ;;  %v534_v20 = vadd.f32 %v533_v40, %v532_v19  ;;  %v528_v50 = vadd.f32 %v527_v41, %v526_v27  ;;  %v572_v52 = vpop.permute.xlu1 %571  ;;  %v568_v53 = vpop.permute.xlu0 %567 }
 0x1ad   : > { %v612_v62 = vadd.f32 %v2259_v33, %v611_v42  ;;  %v606_v63 = vadd.f32 %v2258_v35, %v605_v46  ;;  %v2261_v2 = vclamps-f32 %v584_v47, 10.0  ;;  %v2260_v3 = vclamps-f32 %v583_v37, 10.0 }
 0x1ae   : > { %v3102_v4 = vadd.f32 %v524_v48, %v3065_v13  ;;  %v3105_v5 = vadd.f32 %v518_v49, %v3067_v14  ;;  %v535_v6 = vrot.slane %v534_v20, 1  ;;  %v529_v7 = vrot.slane %v528_v50, 1  ;;  %1391 = vbcast.lane.b32.xlu1 %v2895_v0, 328  ;;  %1387 = vbcast.lane.b32.xlu0 %v2897_v1, 328 }
 0x1af   : > { %v613_v34 = vrot.slane %v612_v62, 2  ;;  %v607_v11 = vrot.slane %v606_v63, 2  ;;  %v623_v16 = vrot.slane %v2261_v2, 4  ;;  %v617_v17 = vrot.slane %v2260_v3, 4 }
 0x1b0   : > { %v536_v18 = vadd.f32 %v535_v6, %v534_v20  ;;  %v530_v21 = vadd.f32 %v529_v7, %v528_v50  ;;  %v586_v22 = vmul.f32 %v572_v52, %v3009_v43  ;;  %v585_v13 = vmul.f32 %v568_v53, %v3009_v43  ;;  %v580_v23 = vpop.permute.xlu1 %579  ;;  %v576_v24 = vpop.permute.xlu0 %575 }
 0x1b1   : > { %v614_v14 = vadd.f32 %v613_v34, %v612_v62  ;;  %v608_v38 = vadd.f32 %v607_v11, %v606_v63  ;;  %v624_v25 = vadd.f32 %v2261_v2, %v623_v16  ;;  %v618_v26 = vadd.f32 %v2260_v3, %v617_v17 }
 0x1b2   : > { %v3112_v19 = vadd.f32 %v536_v18, %v3073_v31  ;;  %v3115_v27 = vadd.f32 %v530_v21, %v3075_v32  ;;  %v2263_v28 = vclamps-f32 %v586_v22, 10.0  ;;  %v2262_v29 = vclamps-f32 %v585_v13, 10.0  ;;  %1483 = vbcast.lane.b32.xlu1 %v2885_v57, 336  ;;  %1479 = vbcast.lane.b32.xlu0 %v2879_v55, 336 }
 0x1b3   : > { %v615_v33 = vrot.slane %v614_v14, 1  ;;  %v609_v35 = vrot.slane %v608_v38, 1  ;;  %v625_v36 = vrot.slane %v624_v25, 2  ;;  %v619_v39 = vrot.slane %v618_v26, 2 }
 0x1b4   : > { %v635_v40 = vrot.slane %v2263_v28, 4  ;;  %v629_v41 = vrot.slane %v2262_v29, 4  ;;  %v588_v42 = vmul.f32 %v580_v23, %v3009_v43  ;;  %v587_v31 = vmul.f32 %v576_v24, %v3009_v43  ;;  %v672_v46 = vpop.permute.xlu1 %671  ;;  %v668_v47 = vpop.permute.xlu0 %667 }
 0x1b5   : > { %v616_v32 = vadd.f32 %v615_v33, %v614_v14  ;;  %v610_v37 = vadd.f32 %v609_v35, %v608_v38  ;;  %v626_v48 = vadd.f32 %v625_v36, %v624_v25  ;;  %v620_v49 = vadd.f32 %v619_v39, %v618_v26 }
 0x1b6   : > { %v636_v20 = vadd.f32 %v2263_v28, %v635_v40  ;;  %v630_v50 = vadd.f32 %v2262_v29, %v629_v41  ;;  %v2265_v52 = vclamps-f32 %v588_v42, 10.0  ;;  %v2264_v53 = vclamps-f32 %v587_v31, 10.0  ;;  %1491 = vbcast.lane.b32.xlu1 %v2883_v56, 336  ;;  %1487 = vbcast.lane.b32.xlu0 %v2877_v54, 336 }
 0x1b7   : > { %v3124_v62 = vadd.f32 %v616_v32, %v3082_v10  ;;  %v3127_v63 = vadd.f32 %v610_v37, %v3085_v15  ;;  %v627_v43 = vrot.slane %v626_v48, 1  ;;  %v621_v2 = vrot.slane %v620_v49, 1 }
 0x1b8   : > { %v637_v3 = vrot.slane %v636_v20, 2  ;;  %v631_v6 = vrot.slane %v630_v50, 2  ;;  %v647_v7 = vrot.slane %v2265_v52, 4  ;;  %v641_v34 = vrot.slane %v2264_v53, 4  ;;  %v680_v11 = vpop.permute.xlu1 %679  ;;  %v676_v16 = vpop.permute.xlu0 %675 }
 0x1b9   : > { %v628_v17 = vadd.f32 %v627_v43, %v626_v48  ;;  %v622_v18 = vadd.f32 %v621_v2, %v620_v49  ;;  %v698_v21 = vmul.f32 %v672_v46, %v3013_v44  ;;  %v697_v22 = vmul.f32 %v668_v47, %v3013_v44 }
 0x1ba   : > { %v638_v13 = vadd.f32 %v637_v3, %v636_v20  ;;  %v632_v10 = vadd.f32 %v631_v6, %v630_v50  ;;  %v648_v23 = vadd.f32 %v2265_v52, %v647_v7  ;;  %v642_v24 = vadd.f32 %v2264_v53, %v641_v34  ;;  %1599 = vbcast.lane.b32.xlu1 %v2885_v57, 344 }
 0x1bb   : > { %v3133_v15 = vadd.f32 %v628_v17, %v3092_v30  ;;  %v3136_v14 = vadd.f32 %v622_v18, %v3095_v8  ;;  %v2267_v38 = vclamps-f32 %v698_v21, 10.0  ;;  %v2266_v25 = vclamps-f32 %v697_v22, 10.0  ;;  %1595 = vbcast.lane.b32.xlu0 %v2879_v55, 344 }
 0x1bc   : > { %v639_v26 = vrot.slane %v638_v13, 1  ;;  %v633_v28 = vrot.slane %v632_v10, 1  ;;  %v649_v29 = vrot.slane %v648_v23, 2  ;;  %v643_v33 = vrot.slane %v642_v24, 2  ;;  %v688_v35 = vpop.permute.xlu1 %687  ;;  %v684_v36 = vpop.permute.xlu0 %683 }
 0x1bd   : > { %v727_v39 = vrot.slane %v2267_v38, 4  ;;  %v721_v40 = vrot.slane %v2266_v25, 4  ;;  %v700_v41 = vmul.f32 %v680_v11, %v3013_v44  ;;  %v699_v30 = vmul.f32 %v676_v16, %v3013_v44 }
 0x1be   : > { %v640_v42 = vadd.f32 %v639_v26, %v638_v13  ;;  %v634_v31 = vadd.f32 %v633_v28, %v632_v10  ;;  %v650_v8 = vadd.f32 %v649_v29, %v648_v23  ;;  %v644_v46 = vadd.f32 %v643_v33, %v642_v24  ;;  %1603 = vbcast.lane.b32.xlu1 %v2877_v54, 344 }
 0x1bf   : > { %v728_v47 = vadd.f32 %v2267_v38, %v727_v39  ;;  %v722_v32 = vadd.f32 %v2266_v25, %v721_v40  ;;  %v2269_v37 = vclamps-f32 %v700_v41, 10.0  ;;  %v2268_v48 = vclamps-f32 %v699_v30, 10.0  ;;  %1495 = vbcast.lane.b32.xlu0 %v2891_v61, 336 }
 0x1c0   : > { %v3144_v49 = vadd.f32 %v640_v42, %v3102_v4  ;;  %v3147_v20 = vadd.f32 %v634_v31, %v3105_v5  ;;  %v651_v50 = vrot.slane %v650_v8, 1  ;;  %v645_v52 = vrot.slane %v644_v46, 1  ;;  %v696_v53 = vpop.permute.xlu1 %695  ;;  %v692_v43 = vpop.permute.xlu0 %691 }
 0x1c1   : > { %v729_v2 = vrot.slane %v728_v47, 2  ;;  %v723_v3 = vrot.slane %v722_v32, 2  ;;  %v739_v6 = vrot.slane %v2269_v37, 4  ;;  %v733_v7 = vrot.slane %v2268_v48, 4 }
 0x1c2   : > { %v652_v34 = vadd.f32 %v651_v50, %v650_v8  ;;  %v646_v11 = vadd.f32 %v645_v52, %v644_v46  ;;  %v702_v16 = vmul.f32 %v688_v35, %v3013_v44  ;;  %v701_v17 = vmul.f32 %v684_v36, %v3013_v44  ;;  %1607 = vbcast.lane.b32.xlu1 %v2883_v56, 344 }
 0x1c3   : > { %v730_v4 = vadd.f32 %v729_v2, %v728_v47  ;;  %v724_v18 = vadd.f32 %v723_v3, %v722_v32  ;;  %v740_v5 = vadd.f32 %v2269_v37, %v739_v6  ;;  %v734_v21 = vadd.f32 %v2268_v48, %v733_v7  ;;  %1499 = vbcast.lane.b32.xlu0 %v2889_v60, 336 }
 0x1c4   : > { %v3154_v22 = vadd.f32 %v652_v34, %v3112_v19  ;;  %v3157_v13 = vadd.f32 %v646_v11, %v3115_v27  ;;  %v2271_v10 = vclamps-f32 %v702_v16, 10.0  ;;  %v2270_v23 = vclamps-f32 %v701_v17, 10.0  ;;  %v788_v24 = vpop.permute.xlu1 %787  ;;  %v784_v38 = vpop.permute.xlu0 %783 }
 0x1c5   : > { %v731_v25 = vrot.slane %v730_v4, 1  ;;  %v725_v26 = vrot.slane %v724_v18, 1  ;;  %v741_v28 = vrot.slane %v740_v5, 2  ;;  %v735_v29 = vrot.slane %v734_v21, 2 }
 0x1c6   : > { %v751_v33 = vrot.slane %v2271_v10, 4  ;;  %v745_v35 = vrot.slane %v2270_v23, 4  ;;  %v704_v36 = vmul.f32 %v696_v53, %v3013_v44  ;;  %v703_v39 = vmul.f32 %v692_v43, %v3013_v44  ;;  %1715 = vbcast.lane.b32.xlu1 %v2885_v57, 352 }
 0x1c7   : > { %v732_v19 = vadd.f32 %v731_v25, %v730_v4  ;;  %v726_v40 = vadd.f32 %v725_v26, %v724_v18  ;;  %v742_v27 = vadd.f32 %v741_v28, %v740_v5  ;;  %v736_v41 = vadd.f32 %v735_v29, %v734_v21  ;;  %1711 = vbcast.lane.b32.xlu0 %v2879_v55, 352 }
 0x1c8   : > { %v752_v30 = vadd.f32 %v2271_v10, %v751_v33  ;;  %v746_v42 = vadd.f32 %v2270_v23, %v745_v35  ;;  %v2273_v31 = vclamps-f32 %v704_v36, 10.0  ;;  %v2272_v8 = vclamps-f32 %v703_v39, 10.0  ;;  %v796_v46 = vpop.permute.xlu1 %795  ;;  %v792_v47 = vpop.permute.xlu0 %791 }
 0x1c9   : > { %v3164_v32 = vadd.f32 %v732_v19, %v3124_v62  ;;  %v3167_v37 = vadd.f32 %v726_v40, %v3127_v63  ;;  %v743_v44 = vrot.slane %v742_v27, 1  ;;  %v737_v48 = vrot.slane %v736_v41, 1 }
 0x1ca   : > { %v753_v50 = vrot.slane %v752_v30, 2  ;;  %v747_v52 = vrot.slane %v746_v42, 2  ;;  %v763_v53 = vrot.slane %v2273_v31, 4  ;;  %v757_v43 = vrot.slane %v2272_v8, 4  ;;  %1611 = vbcast.lane.b32.xlu1 %v2891_v61, 344 }
 0x1cb   : > { %v744_v2 = vadd.f32 %v743_v44, %v742_v27  ;;  %v738_v3 = vadd.f32 %v737_v48, %v736_v41  ;;  %v814_v6 = vmul.f32 %v788_v24, %v3017_v45  ;;  %v813_v7 = vmul.f32 %v784_v38, %v3017_v45  ;;  %1503 = vbcast.lane.b32.xlu0 %v2897_v1, 336 }
 0x1cc   : > { %v754_v62 = vadd.f32 %v753_v50, %v752_v30  ;;  %v748_v34 = vadd.f32 %v747_v52, %v746_v42  ;;  %v764_v63 = vadd.f32 %v2273_v31, %v763_v53  ;;  %v758_v11 = vadd.f32 %v2272_v8, %v757_v43  ;;  %v804_v16 = vpop.permute.xlu1 %803  ;;  %v800_v17 = vpop.permute.xlu0 %799 }
 0x1cd   : > { %v3174_v4 = vadd.f32 %v744_v2, %v3133_v15  ;;  %v3177_v18 = vadd.f32 %v738_v3, %v3136_v14  ;;  %v2275_v5 = vclamps-f32 %v814_v6, 10.0  ;;  %v2274_v21 = vclamps-f32 %v813_v7, 10.0 }
 0x1ce   : > { %v755_v10 = vrot.slane %v754_v62, 1  ;;  %v749_v23 = vrot.slane %v748_v34, 1  ;;  %v765_v24 = vrot.slane %v764_v63, 2  ;;  %v759_v38 = vrot.slane %v758_v11, 2  ;;  %1507 = vbcast.lane.b32.xlu1 %v2895_v0, 336 }
 0x1cf   : > { %v843_v25 = vrot.slane %v2275_v5, 4  ;;  %v837_v26 = vrot.slane %v2274_v21, 4  ;;  %v816_v28 = vmul.f32 %v796_v46, %v3017_v45  ;;  %v815_v29 = vmul.f32 %v792_v47, %v3017_v45  ;;  %1719 = vbcast.lane.b32.xlu0 %v2877_v54, 352 }
 0x1d0   : > { %v756_v15 = vadd.f32 %v755_v10, %v754_v62  ;;  %v750_v33 = vadd.f32 %v749_v23, %v748_v34  ;;  %v766_v14 = vadd.f32 %v765_v24, %v764_v63  ;;  %v760_v35 = vadd.f32 %v759_v38, %v758_v11  ;;  %v812_v36 = vpop.permute.xlu1 %811  ;;  %v808_v39 = vpop.permute.xlu0 %807 }
 0x1d1   : > { %v844_v19 = vadd.f32 %v2275_v5, %v843_v25  ;;  %v838_v40 = vadd.f32 %v2274_v21, %v837_v26  ;;  %v2277_v27 = vclamps-f32 %v816_v28, 10.0  ;;  %v2276_v41 = vclamps-f32 %v815_v29, 10.0 }
 0x1d2   : > { %v3184_v30 = vadd.f32 %v756_v15, %v3144_v49  ;;  %v3187_v42 = vadd.f32 %v750_v33, %v3147_v20  ;;  %v767_v31 = vrot.slane %v766_v14, 1  ;;  %v761_v8 = vrot.slane %v760_v35, 1  ;;  %1723 = vbcast.lane.b32.xlu1 %v2883_v56, 352 }
 0x1d3   : > { %v845_v46 = vrot.slane %v844_v19, 2  ;;  %v839_v47 = vrot.slane %v838_v40, 2  ;;  %v855_v44 = vrot.slane %v2277_v27, 4  ;;  %v849_v48 = vrot.slane %v2276_v41, 4  ;;  %1615 = vbcast.lane.b32.xlu0 %v2889_v60, 344 }
 0x1d4   : > { %v768_v50 = vadd.f32 %v767_v31, %v766_v14  ;;  %v762_v52 = vadd.f32 %v761_v8, %v760_v35  ;;  %v818_v53 = vmul.f32 %v804_v16, %v3017_v45  ;;  %v817_v49 = vmul.f32 %v800_v17, %v3017_v45  ;;  %v904_v43 = vpop.permute.xlu1 %903  ;;  %v900_v2 = vpop.permute.xlu0 %899 }
 0x1d5   : > { %v846_v20 = vadd.f32 %v845_v46, %v844_v19  ;;  %v840_v3 = vadd.f32 %v839_v47, %v838_v40  ;;  %v856_v6 = vadd.f32 %v2277_v27, %v855_v44  ;;  %v850_v7 = vadd.f32 %v2276_v41, %v849_v48 }
 0x1d6   : > { %v3194_v62 = vadd.f32 %v768_v50, %v3154_v22  ;;  %v3197_v34 = vadd.f32 %v762_v52, %v3157_v13  ;;  %v2279_v63 = vclamps-f32 %v818_v53, 10.0  ;;  %v2278_v11 = vclamps-f32 %v817_v49, 10.0  ;;  %1831 = vbcast.lane.b32.xlu1 %v2885_v57, 360 }
 0x1d7   : > { %v847_v5 = vrot.slane %v846_v20, 1  ;;  %v841_v16 = vrot.slane %v840_v3, 1  ;;  %v857_v21 = vrot.slane %v856_v6, 2  ;;  %v851_v17 = vrot.slane %v850_v7, 2  ;;  %1827 = vbcast.lane.b32.xlu0 %v2879_v55, 360 }
 0x1d8   : > { %v867_v10 = vrot.slane %v2279_v63, 4  ;;  %v861_v23 = vrot.slane %v2278_v11, 4  ;;  %v820_v24 = vmul.f32 %v812_v36, %v3017_v45  ;;  %v819_v22 = vmul.f32 %v808_v39, %v3017_v45  ;;  %v912_v38 = vpop.permute.xlu1 %911  ;;  %v908_v25 = vpop.permute.xlu0 %907 }
 0x1d9   : > { %v848_v13 = vadd.f32 %v847_v5, %v846_v20  ;;  %v842_v26 = vadd.f32 %v841_v16, %v840_v3  ;;  %v858_v28 = vadd.f32 %v857_v21, %v856_v6  ;;  %v852_v29 = vadd.f32 %v851_v17, %v850_v7 }
 0x1da   : > { %v868_v15 = vadd.f32 %v2279_v63, %v867_v10  ;;  %v862_v33 = vadd.f32 %v2278_v11, %v861_v23  ;;  %v2281_v14 = vclamps-f32 %v820_v24, 10.0  ;;  %v2280_v35 = vclamps-f32 %v819_v22, 10.0  ;;  %1727 = vbcast.lane.b32.xlu1 %v2891_v61, 352 }
 0x1db   : > { %v3205_v19 = vadd.f32 %v848_v13, %v3164_v32  ;;  %v3208_v40 = vadd.f32 %v842_v26, %v3167_v37  ;;  %v859_v36 = vrot.slane %v858_v28, 1  ;;  %v853_v45 = vrot.slane %v852_v29, 1  ;;  %1619 = vbcast.lane.b32.xlu0 %v2897_v1, 344 }
 0x1dc   : > { %v869_v39 = vrot.slane %v868_v15, 2  ;;  %v863_v27 = vrot.slane %v862_v33, 2  ;;  %v879_v41 = vrot.slane %v2281_v14, 4  ;;  %v873_v31 = vrot.slane %v2280_v35, 4  ;;  %v920_v8 = vpop.permute.xlu1 %919  ;;  %v916_v46 = vpop.permute.xlu0 %915 }
 0x1dd   : > { %v860_v47 = vadd.f32 %v859_v36, %v858_v28  ;;  %v854_v44 = vadd.f32 %v853_v45, %v852_v29  ;;  %v930_v48 = vmul.f32 %v904_v43, %v3034_v58  ;;  %v929_v32 = vmul.f32 %v900_v2, %v3034_v58 }
 0x1de   : > { %v870_v50 = vadd.f32 %v869_v39, %v868_v15  ;;  %v864_v52 = vadd.f32 %v863_v27, %v862_v33  ;;  %v880_v37 = vadd.f32 %v2281_v14, %v879_v41  ;;  %v874_v53 = vadd.f32 %v2280_v35, %v873_v31  ;;  %1623 = vbcast.lane.b32.xlu1 %v2895_v0, 344 }
 0x1df   : > { %v3215_v49 = vadd.f32 %v860_v47, %v3174_v4  ;;  %v3218_v20 = vadd.f32 %v854_v44, %v3177_v18  ;;  %v2283_v3 = vclamps-f32 %v930_v48, 10.0  ;;  %v2282_v6 = vclamps-f32 %v929_v32, 10.0  ;;  %1835 = vbcast.lane.b32.xlu0 %v2877_v54, 360 }
 0x1e0   : > { %v871_v7 = vrot.slane %v870_v50, 1  ;;  %v865_v43 = vrot.slane %v864_v52, 1  ;;  %v881_v63 = vrot.slane %v880_v37, 2  ;;  %v875_v2 = vrot.slane %v874_v53, 2  ;;  %v928_v11 = vpop.permute.xlu1 %927  ;;  %v924_v5 = vpop.permute.xlu0 %923 }
 0x1e1   : > { %v959_v16 = vrot.slane %v2283_v3, 4  ;;  %v953_v21 = vrot.slane %v2282_v6, 4  ;;  %v932_v17 = vmul.f32 %v912_v38, %v3034_v58  ;;  %v931_v4 = vmul.f32 %v908_v25, %v3034_v58 }
 0x1e2   : > { %v872_v10 = vadd.f32 %v871_v7, %v870_v50  ;;  %v866_v23 = vadd.f32 %v865_v43, %v864_v52  ;;  %v882_v18 = vadd.f32 %v881_v63, %v880_v37  ;;  %v876_v24 = vadd.f32 %v875_v2, %v874_v53  ;;  %1839 = vbcast.lane.b32.xlu1 %v2883_v56, 360 }
 0x1e3   : > { %v960_v22 = vadd.f32 %v2283_v3, %v959_v16  ;;  %v954_v13 = vadd.f32 %v2282_v6, %v953_v21  ;;  %v2285_v26 = vclamps-f32 %v932_v17, 10.0  ;;  %v2284_v28 = vclamps-f32 %v931_v4, 10.0  ;;  %1731 = vbcast.lane.b32.xlu0 %v2889_v60, 352 }
 0x1e4   : > { %v3226_v29 = vadd.f32 %v872_v10, %v3184_v30  ;;  %v3229_v15 = vadd.f32 %v866_v23, %v3187_v42  ;;  %v883_v38 = vrot.slane %v882_v18, 1  ;;  %v877_v25 = vrot.slane %v876_v24, 1  ;;  %v1020_v33 = vpop.permute.xlu1 %1019  ;;  %v1016_v14 = vpop.permute.xlu0 %1015 }
 0x1e5   : > { %v961_v35 = vrot.slane %v960_v22, 2  ;;  %v955_v36 = vrot.slane %v954_v13, 2  ;;  %v971_v45 = vrot.slane %v2285_v26, 4  ;;  %v965_v39 = vrot.slane %v2284_v28, 4 }
 0x1e6   : > { %v884_v27 = vadd.f32 %v883_v38, %v882_v18  ;;  %v878_v41 = vadd.f32 %v877_v25, %v876_v24  ;;  %v934_v31 = vmul.f32 %v920_v8, %v3034_v58  ;;  %v933_v47 = vmul.f32 %v916_v46, %v3034_v58  ;;  %1947 = vbcast.lane.b32.xlu1 %v2885_v57, 368 }
 0x1e7   : > { %v962_v30 = vadd.f32 %v961_v35, %v960_v22  ;;  %v956_v44 = vadd.f32 %v955_v36, %v954_v13  ;;  %v972_v42 = vadd.f32 %v2285_v26, %v971_v45  ;;  %v966_v48 = vadd.f32 %v2284_v28, %v965_v39  ;;  %1943 = vbcast.lane.b32.xlu0 %v2879_v55, 368 }
 0x1e8   : > { %v3236_v32 = vadd.f32 %v884_v27, %v3194_v62  ;;  %v3239_v50 = vadd.f32 %v878_v41, %v3197_v34  ;;  %v2287_v52 = vclamps-f32 %v934_v31, 10.0  ;;  %v2286_v37 = vclamps-f32 %v933_v47, 10.0  ;;  %v1028_v53 = vpop.permute.xlu1 %1027  ;;  %v1024_v8 = vpop.permute.xlu0 %1023 }
 0x1e9   : > { %v963_v3 = vrot.slane %v962_v30, 1  ;;  %v957_v46 = vrot.slane %v956_v44, 1  ;;  %v973_v6 = vrot.slane %v972_v42, 2  ;;  %v967_v7 = vrot.slane %v966_v48, 2 }
 0x1ea   : > { %v983_v43 = vrot.slane %v2287_v52, 4  ;;  %v977_v63 = vrot.slane %v2286_v37, 4  ;;  %v936_v2 = vmul.f32 %v928_v11, %v3034_v58  ;;  %v935_v16 = vmul.f32 %v924_v5, %v3034_v58  ;;  %1843 = vbcast.lane.b32.xlu1 %v2891_v61, 360 }
 0x1eb   : > { %v964_v62 = vadd.f32 %v963_v3, %v962_v30  ;;  %v958_v21 = vadd.f32 %v957_v46, %v956_v44  ;;  %v974_v34 = vadd.f32 %v973_v6, %v972_v42  ;;  %v968_v17 = vadd.f32 %v967_v7, %v966_v48  ;;  %1735 = vbcast.lane.b32.xlu0 %v2897_v1, 352 }
 0x1ec   : > { %v984_v4 = vadd.f32 %v2287_v52, %v983_v43  ;;  %v978_v10 = vadd.f32 %v2286_v37, %v977_v63  ;;  %v2289_v23 = vclamps-f32 %v936_v2, 10.0  ;;  %v2288_v18 = vclamps-f32 %v935_v16, 10.0  ;;  %v1036_v24 = vpop.permute.xlu1 %1035  ;;  %v1032_v22 = vpop.permute.xlu0 %1031 }
 0x1ed   : > { %v3246_v13 = vadd.f32 %v964_v62, %v3205_v19  ;;  %v3249_v11 = vadd.f32 %v958_v21, %v3208_v40  ;;  %v975_v58 = vrot.slane %v974_v34, 1  ;;  %v969_v5 = vrot.slane %v968_v17, 1 }
 0x1ee   : > { %v985_v26 = vrot.slane %v984_v4, 2  ;;  %v979_v28 = vrot.slane %v978_v10, 2  ;;  %v995_v38 = vrot.slane %v2289_v23, 4  ;;  %v989_v25 = vrot.slane %v2288_v18, 4  ;;  %1739 = vbcast.lane.b32.xlu1 %v2895_v0, 352 }
 0x1ef   : > { %v976_v35 = vadd.f32 %v975_v58, %v974_v34  ;;  %v970_v36 = vadd.f32 %v969_v5, %v968_v17  ;;  %v1046_v45 = vmul.f32 %v1020_v33, %v3038_v59  ;;  %v1045_v39 = vmul.f32 %v1016_v14, %v3038_v59  ;;  %1951 = vbcast.lane.b32.xlu0 %v2877_v54, 368 }
 0x1f0   : > { %v986_v19 = vadd.f32 %v985_v26, %v984_v4  ;;  %v980_v27 = vadd.f32 %v979_v28, %v978_v10  ;;  %v996_v40 = vadd.f32 %v2289_v23, %v995_v38  ;;  %v990_v41 = vadd.f32 %v2288_v18, %v989_v25  ;;  %v1044_v31 = vpop.permute.xlu1 %1043  ;;  %v1040_v47 = vpop.permute.xlu0 %1039 }
 0x1f1   : > { %v3256_v30 = vadd.f32 %v976_v35, %v3215_v49  ;;  %v3259_v44 = vadd.f32 %v970_v36, %v3218_v20  ;;  %v2291_v42 = vclamps-f32 %v1046_v45, 10.0  ;;  %v2290_v48 = vclamps-f32 %v1045_v39, 10.0 }
 0x1f2   : > { %v987_v52 = vrot.slane %v986_v19, 1  ;;  %v981_v33 = vrot.slane %v980_v27, 1  ;;  %v997_v37 = vrot.slane %v996_v40, 2  ;;  %v991_v14 = vrot.slane %v990_v41, 2  ;;  %1955 = vbcast.lane.b32.xlu1 %v2883_v56, 368 }
 0x1f3   : > { %v1075_v3 = vrot.slane %v2291_v42, 4  ;;  %v1069_v46 = vrot.slane %v2290_v48, 4  ;;  %v1048_v6 = vmul.f32 %v1028_v53, %v3038_v59  ;;  %v1047_v7 = vmul.f32 %v1024_v8, %v3038_v59  ;;  %1847 = vbcast.lane.b32.xlu0 %v2889_v60, 360 }
 0x1f4   : > { %v988_v49 = vadd.f32 %v987_v52, %v986_v19  ;;  %v982_v43 = vadd.f32 %v981_v33, %v980_v27  ;;  %v998_v20 = vadd.f32 %v997_v37, %v996_v40  ;;  %v992_v63 = vadd.f32 %v991_v14, %v990_v41  ;;  %v3265_v2 = vpop.permute.xlu1 %1135  ;;  %v3267_v16 = vpop.permute.xlu0 %1131 }
 0x1f5   : > { %v1076_v62 = vadd.f32 %v2291_v42, %v1075_v3  ;;  %v1070_v21 = vadd.f32 %v2290_v48, %v1069_v46  ;;  %v2293_v34 = vclamps-f32 %v1048_v6, 10.0  ;;  %v2292_v17 = vclamps-f32 %v1047_v7, 10.0 }
 0x1f6   : > { %v3270_v4 = vadd.f32 %v988_v49, %v3226_v29  ;;  %v3273_v53 = vadd.f32 %v982_v43, %v3229_v15  ;;  %v999_v8 = vrot.slane %v998_v20, 1  ;;  %v993_v10 = vrot.slane %v992_v63, 1  ;;  %2063 = vbcast.lane.b32.xlu1 %v2885_v57, 376 }
 0x1f7   : > { %v1077_v23 = vrot.slane %v1076_v62, 2  ;;  %v1071_v18 = vrot.slane %v1070_v21, 2  ;;  %v1087_v58 = vrot.slane %v2293_v34, 4  ;;  %v1081_v5 = vrot.slane %v2292_v17, 4  ;;  %2059 = vbcast.lane.b32.xlu0 %v2879_v55, 376 }
 0x1f8   : > { %v1000_v26 = vadd.f32 %v999_v8, %v998_v20  ;;  %v994_v28 = vadd.f32 %v993_v10, %v992_v63  ;;  %v1050_v38 = vmul.f32 %v1036_v24, %v3038_v59  ;;  %v1049_v29 = vmul.f32 %v1032_v22, %v3038_v59  ;;  %v3279_v25 = vpop.permute.xlu1 %1143  ;;  %v3281_v15 = vpop.permute.xlu0 %1139 }
 0x1f9   : > { %v1078_v35 = vadd.f32 %v1077_v23, %v1076_v62  ;;  %v1072_v36 = vadd.f32 %v1071_v18, %v1070_v21  ;;  %v1088_v45 = vadd.f32 %v2293_v34, %v1087_v58  ;;  %v1082_v57 = vadd.f32 %v2292_v17, %v1081_v5 }
 0x1fa   : > { %v3284_v39 = vadd.f32 %v1000_v26, %v3236_v32  ;;  %v3287_v19 = vadd.f32 %v994_v28, %v3239_v50  ;;  %v2295_v55 = vclamps-f32 %v1050_v38, 10.0  ;;  %v2294_v27 = vclamps-f32 %v1049_v29, 10.0  ;;  %1959 = vbcast.lane.b32.xlu1 %v2891_v61, 368 }
 0x1fb   : > { %v1079_v24 = vrot.slane %v1078_v35, 1  ;;  %v1073_v22 = vrot.slane %v1072_v36, 1  ;;  %v1089_v40 = vrot.slane %v1088_v45, 2  ;;  %v1083_v41 = vrot.slane %v1082_v57, 2  ;;  %1851 = vbcast.lane.b32.xlu0 %v2897_v1, 360 }
 0x1fc   : > { %v1099_v42 = vrot.slane %v2295_v55, 4  ;;  %v1093_v48 = vrot.slane %v2294_v27, 4  ;;  %v1052_v52 = vmul.f32 %v1044_v31, %v3038_v59  ;;  %v1051_v32 = vmul.f32 %v1040_v47, %v3038_v59  ;;  %v3293_v33 = vpop.permute.xlu1 %1151  ;;  %v3295_v50 = vpop.permute.xlu0 %1147 }
 0x1fd   : > { %v1080_v37 = vadd.f32 %v1079_v24, %v1078_v35  ;;  %v1074_v14 = vadd.f32 %v1073_v22, %v1072_v36  ;;  %v1090_v3 = vadd.f32 %v1089_v40, %v1088_v45  ;;  %v1084_v46 = vadd.f32 %v1083_v41, %v1082_v57 }
 0x1fe   : > { %v1100_v6 = vadd.f32 %v2295_v55, %v1099_v42  ;;  %v1094_v7 = vadd.f32 %v2294_v27, %v1093_v48  ;;  %v2297_v49 = vclamps-f32 %v1052_v52, 10.0  ;;  %v2296_v43 = vclamps-f32 %v1051_v32, 10.0  ;;  %1855 = vbcast.lane.b32.xlu1 %v2895_v0, 360 }
 0x1ff   : > { %v3299_v20 = vadd.f32 %v1080_v37, %v3246_v13  ;;  %v3302_v31 = vadd.f32 %v1074_v14, %v3249_v11  ;;  %v1091_v59 = vrot.slane %v1090_v3, 1  ;;  %v1085_v47 = vrot.slane %v1084_v46, 1  ;;  %2067 = vbcast.lane.b32.xlu0 %v2877_v54, 376 }
 0x200   : > { %v1101_v63 = vrot.slane %v1100_v6, 2  ;;  %v1095_v62 = vrot.slane %v1094_v7, 2  ;;  %v1111_v21 = vrot.slane %v2297_v49, 4  ;;  %v1105_v34 = vrot.slane %v2296_v43, 4  ;;  %v3305_v17 = vpop.permute.xlu1 %1159  ;;  %v3307_v8 = vpop.permute.xlu0 %1155 }
 0x201   : > { %v1092_v10 = vadd.f32 %v1091_v59, %v1090_v3  ;;  %v1086_v23 = vadd.f32 %v1085_v47, %v1084_v46  ;;  %v1162_v13 = vmul.f32 %v3265_v2, %v3042_v9  ;;  %v1161_v11 = vmul.f32 %v3267_v16, %v3042_v9 }
 0x202   : > { %v1102_v18 = vadd.f32 %v1101_v63, %v1100_v6  ;;  %v1096_v58 = vadd.f32 %v1095_v62, %v1094_v7  ;;  %v1112_v5 = vadd.f32 %v2297_v49, %v1111_v21  ;;  %v1106_v54 = vadd.f32 %v2296_v43, %v1105_v34  ;;  %2071 = vbcast.lane.b32.xlu1 %v2883_v56, 376 }
 0x203   : > { %v3315_v26 = vadd.f32 %v1092_v10, %v3256_v30  ;;  %v3318_v28 = vadd.f32 %v1086_v23, %v3259_v44  ;;  %v2299_v38 = vclamps-f32 %v1162_v13, 10.0  ;;  %v2298_v29 = vclamps-f32 %v1161_v11, 10.0  ;;  %1963 = vbcast.lane.b32.xlu0 %v2889_v60, 368 }
 0x204   : > { %v1103_v2 = vrot.slane %v1102_v18, 1  ;;  %v1097_v35 = vrot.slane %v1096_v58, 1  ;;  %v1113_v36 = vrot.slane %v1112_v5, 2  ;;  %v1107_v16 = vrot.slane %v1106_v54, 2  ;;  %v3321_v45 = vpop.permute.xlu1 %1251  ;;  %v3323_v57 = vpop.permute.xlu0 %1247 }
 0x205   : > { %v1191_v55 = vrot.slane %v2299_v38, 4  ;;  %v1185_v56 = vrot.slane %v2298_v29, 4  ;;  %v1164_v30 = vmul.f32 %v3279_v25, %v3042_v9  ;;  %v1163_v44 = vmul.f32 %v3281_v15, %v3042_v9 }
 0x206   : > { %v1104_v27 = vadd.f32 %v1103_v2, %v1102_v18  ;;  %v1098_v24 = vadd.f32 %v1097_v35, %v1096_v58  ;;  %v1114_v22 = vadd.f32 %v1113_v36, %v1112_v5  ;;  %v1108_v40 = vadd.f32 %v1107_v16, %v1106_v54  ;;  %2075 = vbcast.lane.b32.xlu1 %v2891_v61, 376 }
 0x207   : > { %v1192_v41 = vadd.f32 %v2299_v38, %v1191_v55  ;;  %v1186_v42 = vadd.f32 %v2298_v29, %v1185_v56  ;;  %v2301_v48 = vclamps-f32 %v1164_v30, 10.0  ;;  %v2300_v52 = vclamps-f32 %v1163_v44, 10.0  ;;  %1967 = vbcast.lane.b32.xlu0 %v2897_v1, 368 }
 0x208   : > { %v3332_v32 = vadd.f32 %v1104_v27, %v3270_v4  ;;  %v3335_v25 = vadd.f32 %v1098_v24, %v3273_v53  ;;  %v1115_v37 = vrot.slane %v1114_v22, 1  ;;  %v1109_v15 = vrot.slane %v1108_v40, 1  ;;  %v3343_v61 = vpop.permute.xlu1 %1259  ;;  %v3345_v3 = vpop.permute.xlu0 %1255 }
 0x209   : > { %v1193_v46 = vrot.slane %v1192_v41, 2  ;;  %v1187_v6 = vrot.slane %v1186_v42, 2  ;;  %v1203_v7 = vrot.slane %v2301_v48, 4  ;;  %v1197_v4 = vrot.slane %v2300_v52, 4 }
 0x20a   : > { %v1116_v49 = vadd.f32 %v1115_v37, %v1114_v22  ;;  %v1110_v43 = vadd.f32 %v1109_v15, %v1108_v40  ;;  %v1166_v53 = vmul.f32 %v3293_v33, %v3042_v9  ;;  %v1165_v51 = vmul.f32 %v3295_v50, %v3042_v9  ;;  %2079 = vbcast.lane.b32.xlu1 %v2889_v60, 376 }
 0x20b   : > { %v1194_v12 = vadd.f32 %v1193_v46, %v1192_v41  ;;  %v1188_v59 = vadd.f32 %v1187_v6, %v1186_v42  ;;  %v1204_v47 = vadd.f32 %v2301_v48, %v1203_v7  ;;  %v1198_v63 = vadd.f32 %v2300_v52, %v1197_v4  ;;  %1971 = vbcast.lane.b32.xlu0 %v2895_v0, 368  ;;  %v2532_v41 = vld [vmem:[%s3796_s1 + $0x40] sm:$0xff] }
 0x20c   : > { %v3354_v62 = vadd.f32 %v1116_v49, %v3284_v39  ;;  %v3357_v21 = vadd.f32 %v1110_v43, %v3287_v19  ;;  %v2303_v34 = vclamps-f32 %v1166_v53, 10.0  ;;  %v2302_v10 = vclamps-f32 %v1165_v51, 10.0  ;;  %v3359_v33 = vpop.permute.xlu1 %1267  ;;  %v3361_v23 = vpop.permute.xlu0 %1263 }
 0x20d   : > { %v1195_v50 = vrot.slane %v1194_v12, 1  ;;  %v1189_v60 = vrot.slane %v1188_v59, 1  ;;  %v1205_v13 = vrot.slane %v1204_v47, 2  ;;  %v1199_v11 = vrot.slane %v1198_v63, 2 }
 0x20e   : > { %v1215_v18 = vrot.slane %v2303_v34, 4  ;;  %v1209_v58 = vrot.slane %v2302_v10, 4  ;;  %v1168_v5 = vmul.f32 %v3305_v17, %v3042_v9  ;;  %v1167_v39 = vmul.f32 %v3307_v8, %v3042_v9  ;;  %2087 = vbcast.lane.b32.xlu1 %v2895_v0, 376  ;;  %v3376_v9 = vld [vmem:[%s3796_s1 + $0x48] sm:$0xff] }
 0x20f   : > { %v1196_v19 = vadd.f32 %v1195_v50, %v1194_v12  ;;  %v1190_v54 = vadd.f32 %v1189_v60, %v1188_v59  ;;  %v1206_v38 = vadd.f32 %v1205_v13, %v1204_v47  ;;  %v1200_v29 = vadd.f32 %v1199_v11, %v1198_v63  ;;  %2083 = vbcast.lane.b32.xlu0 %v2897_v1, 376 }
 0x210   : > { %v1216_v2 = vadd.f32 %v2303_v34, %v1215_v18  ;;  %v1210_v35 = vadd.f32 %v2302_v10, %v1209_v58  ;;  %v2305_v36 = vclamps-f32 %v1168_v5, 10.0  ;;  %v2304_v16 = vclamps-f32 %v1167_v39, 10.0  ;;  %v3369_v55 = vpop.permute.xlu1 %1275  ;;  %v3371_v56 = vpop.permute.xlu0 %1271 }
 0x211   : > { %v3379_v0 = vadd.f32 %v1196_v19, %v3299_v20  ;;  %v3382_v17 = vadd.f32 %v1190_v54, %v3302_v31  ;;  %v1207_v1 = vrot.slane %v1206_v38, 1  ;;  %v1201_v8 = vrot.slane %v1200_v29, 1 }
 0x212   : > { %v1217_v30 = vrot.slane %v1216_v2, 2  ;;  %v1211_v44 = vrot.slane %v1210_v35, 2  ;;  %v1227_v27 = vrot.slane %v2305_v36, 4  ;;  %v1221_v24 = vrot.slane %v2304_v16, 4 }
 0x213   : > { %v1208_v22 = vadd.f32 %v1207_v1, %v1206_v38  ;;  %v1202_v40 = vadd.f32 %v1201_v8, %v1200_v29  ;;  %v1244_v42 = vsel %vm3339_vm0, %v2532_v41, 0.0  ;;  %v1358_v20 = vand.u32 2147483647, %v3376_v9 }
 0x214   : > { %v1218_v48 = vadd.f32 %v1217_v30, %v1216_v2  ;;  %v1212_v31 = vadd.f32 %v1211_v44, %v1210_v35  ;;  %v1228_v52 = vadd.f32 %v2305_v36, %v1227_v27  ;;  %v1222_v37 = vadd.f32 %v2304_v16, %v1221_v24  ;;  %v3390_v15 = vpop.permute.xlu1 %1367  ;;  %v3392_v46 = vpop.permute.xlu0 %1363 }
 0x215   : > { %v3395_v6 = vadd.f32 %v1208_v22, %v3315_v26  ;;  %v3398_v7 = vadd.f32 %v1202_v40, %v3318_v28  ;;  %v1278_v4 = vmul.f32 %v3321_v45, %v1244_v42  ;;  %v1277_v14 = vmul.f32 %v3323_v57, %v1244_v42 }
 0x216   : > { %v1219_v49 = vrot.slane %v1218_v48, 1  ;;  %v1213_v43 = vrot.slane %v1212_v31, 1  ;;  %v1229_v53 = vrot.slane %v1228_v52, 2  ;;  %v1223_v51 = vrot.slane %v1222_v37, 2 }
 0x217   : > { %v2307_v12 = vclamps-f32 %v1278_v4, 10.0  ;;  %v2306_v59 = vclamps-f32 %v1277_v14, 10.0  ;;  %v1280_v47 = vmul.f32 %v3343_v61, %v1244_v42  ;;  %v1279_v63 = vmul.f32 %v3345_v3, %v1244_v42 }
 0x218   : > { %v1220_v34 = vadd.f32 %v1219_v49, %v1218_v48  ;;  %v1214_v26 = vadd.f32 %v1213_v43, %v1212_v31  ;;  %v1230_v10 = vadd.f32 %v1229_v53, %v1228_v52  ;;  %v1224_v50 = vadd.f32 %v1223_v51, %v1222_v37  ;;  %v3404_v28 = vpop.permute.xlu1 %1375  ;;  %v3406_v60 = vpop.permute.xlu0 %1371 }
 0x219   : > { %v1307_v45 = vrot.slane %v2307_v12, 4  ;;  %v1301_v57 = vrot.slane %v2306_v59, 4  ;;  %v2309_v13 = vclamps-f32 %v1280_v47, 10.0  ;;  %v2308_v11 = vclamps-f32 %v1279_v63, 10.0 }
 0x21a   : > { %v3409_v18 = vadd.f32 %v1220_v34, %v3332_v32  ;;  %v3412_v58 = vadd.f32 %v1214_v26, %v3335_v25  ;;  %v1231_v61 = vrot.slane %v1230_v10, 1  ;;  %v1225_v3 = vrot.slane %v1224_v50, 1 }
 0x21b   : > { %v1308_v5 = vadd.f32 %v2307_v12, %v1307_v45  ;;  %v1302_v39 = vadd.f32 %v2306_v59, %v1301_v57  ;;  %v1319_v19 = vrot.slane %v2309_v13, 4  ;;  %v1313_v54 = vrot.slane %v2308_v11, 4 }
 0x21c   : > { %v1232_v38 = vadd.f32 %v1231_v61, %v1230_v10  ;;  %v1226_v29 = vadd.f32 %v1225_v3, %v1224_v50  ;;  %v1282_v2 = vmul.f32 %v3359_v33, %v1244_v42  ;;  %v1281_v35 = vmul.f32 %v3361_v23, %v1244_v42  ;;  %v3416_v36 = vpop.permute.xlu1 %1383  ;;  %v3418_v16 = vpop.permute.xlu0 %1379 }
 0x21d   : > { %v1309_v32 = vrot.slane %v1308_v5, 2  ;;  %v1303_v1 = vrot.slane %v1302_v39, 2  ;;  %v1320_v25 = vadd.f32 %v2309_v13, %v1319_v19  ;;  %v1314_v8 = vadd.f32 %v2308_v11, %v1313_v54  ;;  %v3445_v19 = vld [vmem:[%s3796_s1 + $0x50] sm:$0xff]  ;;  %v3450_v54 = vld [vmem:[%s3796_s1 + $0x58] sm:$0xff] }
 0x21e   : > { %v3421_v30 = vadd.f32 %v1232_v38, %v3354_v62  ;;  %v3424_v44 = vadd.f32 %v1226_v29, %v3357_v21  ;;  %v2311_v27 = vclamps-f32 %v1282_v2, 10.0  ;;  %v2310_v24 = vclamps-f32 %v1281_v35, 10.0 }
 0x21f   : > { %v1310_v22 = vadd.f32 %v1309_v32, %v1308_v5  ;;  %v1304_v33 = vadd.f32 %v1303_v1, %v1302_v39  ;;  %v1321_v40 = vrot.slane %v1320_v25, 2  ;;  %v1315_v23 = vrot.slane %v1314_v8, 2 }
 0x220   : > { %v1331_v41 = vrot.slane %v2311_v27, 4  ;;  %v1325_v48 = vrot.slane %v2310_v24, 4  ;;  %v1284_v31 = vmul.f32 %v3369_v55, %v1244_v42  ;;  %v1283_v52 = vmul.f32 %v3371_v56, %v1244_v42  ;;  %v3428_v37 = vpop.permute.xlu1 %1391  ;;  %v3430_v4 = vpop.permute.xlu0 %1387 }
 0x221   : > { %v1311_v62 = vrot.slane %v1310_v22, 1  ;;  %v1305_v14 = vrot.slane %v1304_v33, 1  ;;  %v1322_v21 = vadd.f32 %v1321_v40, %v1320_v25  ;;  %v1316_v49 = vadd.f32 %v1315_v23, %v1314_v8 }
 0x222   : > { %v1332_v43 = vadd.f32 %v2311_v27, %v1331_v41  ;;  %v1326_v53 = vadd.f32 %v2310_v24, %v1325_v48  ;;  %v2313_v51 = vclamps-f32 %v1284_v31, 10.0  ;;  %v2312_v12 = vclamps-f32 %v1283_v52, 10.0 }
 0x223   : > { %v1312_v59 = vadd.f32 %v1311_v62, %v1310_v22  ;;  %v1306_v47 = vadd.f32 %v1305_v14, %v1304_v33  ;;  %v1323_v63 = vrot.slane %v1322_v21, 1  ;;  %v1317_v34 = vrot.slane %v1316_v49, 1 }
 0x224   : > { %v1333_v26 = vrot.slane %v1332_v43, 2  ;;  %v1327_v55 = vrot.slane %v1326_v53, 2  ;;  %v1343_v10 = vrot.slane %v2313_v51, 4  ;;  %v1337_v56 = vrot.slane %v2312_v12, 4  ;;  %v3432_v42 = vpop.permute.xlu1 %1483  ;;  %v3434_v50 = vpop.permute.xlu0 %1479 }
 0x225   : > { %v3437_v45 = vadd.f32 %v1312_v59, %v3379_v0  ;;  %v3440_v57 = vadd.f32 %v1306_v47, %v3382_v17  ;;  %v1324_v13 = vadd.f32 %v1323_v63, %v1322_v21  ;;  %v1318_v11 = vadd.f32 %v1317_v34, %v1316_v49 }
 0x226   : > { %v1334_v61 = vadd.f32 %v1333_v26, %v1332_v43  ;;  %v1328_v3 = vadd.f32 %v1327_v55, %v1326_v53  ;;  %v1344_v5 = vadd.f32 %v2313_v51, %v1343_v10  ;;  %v1338_v39 = vadd.f32 %v2312_v12, %v1337_v56 }
 0x227   : > { %v3453_v0 = vadd.f32 %v1324_v13, %v3395_v6  ;;  %v3456_v17 = vadd.f32 %v1318_v11, %v3398_v7  ;;  %vm1359_vm1 = vcmp.gt.f32.partialorder %v1358_v20, 10.0  ;;  %v1474_v8 = vand.u32 2147483647, %v3445_v19 }
 0x228   : > { %v1335_v38 = vrot.slane %v1334_v61, 1  ;;  %v1329_v29 = vrot.slane %v1328_v3, 1  ;;  %v1345_v2 = vrot.slane %v1344_v5, 2  ;;  %v1339_v35 = vrot.slane %v1338_v39, 2  ;;  %v3460_v32 = vpop.permute.xlu1 %1491  ;;  %v3462_v1 = vpop.permute.xlu0 %1487 }
 0x229   : > { %v1360_v25 = vsel %vm1359_vm1, %v3376_v9, 0.0  ;;  %v1590_v6 = vand.u32 2147483647, %v3450_v54  ;;  %vm3495_vm2 = vcmp.gt.f32.partialorder %v1474_v8, 10.0 }
 0x22a   : > { %v1336_v27 = vadd.f32 %v1335_v38, %v1334_v61  ;;  %v1330_v7 = vadd.f32 %v1329_v29, %v1328_v3  ;;  %v1346_v24 = vadd.f32 %v1345_v2, %v1344_v5  ;;  %v1340_v22 = vadd.f32 %v1339_v35, %v1338_v39 }
 0x22b   : > { %v1394_v20 = vmul.f32 %v3390_v15, %v1360_v25  ;;  %v1393_v33 = vmul.f32 %v3392_v46, %v1360_v25  ;;  %v1396_v40 = vmul.f32 %v3404_v28, %v1360_v25  ;;  %v1395_v23 = vmul.f32 %v3406_v60, %v1360_v25 }
 0x22c   : > { %v3472_v41 = vadd.f32 %v1336_v27, %v3409_v18  ;;  %v3475_v9 = vadd.f32 %v1330_v7, %v3412_v58  ;;  %v1347_v48 = vrot.slane %v1346_v24, 1  ;;  %v1341_v31 = vrot.slane %v1340_v22, 1  ;;  %v3477_v52 = vpop.permute.xlu1 %1599 }
 0x22d   : > { %v2315_v62 = vclamps-f32 %v1394_v20, 10.0  ;;  %v2314_v14 = vclamps-f32 %v1393_v33, 10.0  ;;  %v2317_v21 = vclamps-f32 %v1396_v40, 10.0  ;;  %v2316_v15 = vclamps-f32 %v1395_v23, 10.0  ;;  %v3479_v49 = vpop.permute.xlu0 %1595 }
 0x22e   : > { %v1348_v46 = vadd.f32 %v1347_v48, %v1346_v24  ;;  %v1342_v28 = vadd.f32 %v1341_v31, %v1340_v22  ;;  %v1398_v60 = vmul.f32 %v3416_v36, %v1360_v25  ;;  %v1397_v18 = vmul.f32 %v3418_v16, %v1360_v25 }
 0x22f   : > { %v1423_v43 = vrot.slane %v2315_v62, 4  ;;  %v1417_v53 = vrot.slane %v2314_v14, 4  ;;  %v1435_v58 = vrot.slane %v2317_v21, 4  ;;  %v1429_v51 = vrot.slane %v2316_v15, 4 }
 0x230   : > { %v3484_v12 = vadd.f32 %v1348_v46, %v3421_v30  ;;  %v3487_v59 = vadd.f32 %v1342_v28, %v3424_v44  ;;  %v2319_v47 = vclamps-f32 %v1398_v60, 10.0  ;;  %v2318_v63 = vclamps-f32 %v1397_v18, 10.0  ;;  %v3489_v34 = vpop.permute.xlu1 %1603 }
 0x231   : > { %v1424_v26 = vadd.f32 %v2315_v62, %v1423_v43  ;;  %v1418_v55 = vadd.f32 %v2314_v14, %v1417_v53  ;;  %v1436_v10 = vadd.f32 %v2317_v21, %v1435_v58  ;;  %v1430_v36 = vadd.f32 %v2316_v15, %v1429_v51  ;;  %v3491_v56 = vpop.permute.xlu0 %1495 }
 0x232   : > { %v1447_v16 = vrot.slane %v2319_v47, 4  ;;  %v1441_v13 = vrot.slane %v2318_v63, 4  ;;  %v1400_v11 = vmul.f32 %v3428_v37, %v1360_v25  ;;  %v1399_v30 = vmul.f32 %v3430_v4, %v1360_v25 }
 0x233   : > { %v1425_v44 = vrot.slane %v1424_v26, 2  ;;  %v1419_v3 = vrot.slane %v1418_v55, 2  ;;  %v1437_v5 = vrot.slane %v1436_v10, 2  ;;  %v1431_v39 = vrot.slane %v1430_v36, 2 }
 0x234   : > { %v1448_v38 = vadd.f32 %v2319_v47, %v1447_v16  ;;  %v1442_v29 = vadd.f32 %v2318_v63, %v1441_v13  ;;  %v2321_v2 = vclamps-f32 %v1400_v11, 10.0  ;;  %v2320_v35 = vclamps-f32 %v1399_v30, 10.0  ;;  %v3499_v27 = vpop.permute.xlu1 %1607 }
 0x235   : > { %v1426_v7 = vadd.f32 %v1425_v44, %v1424_v26  ;;  %v1420_v24 = vadd.f32 %v1419_v3, %v1418_v55  ;;  %v1438_v22 = vadd.f32 %v1437_v5, %v1436_v10  ;;  %v1432_v37 = vadd.f32 %v1431_v39, %v1430_v36  ;;  %v3501_v20 = vpop.permute.xlu0 %1499  ;;  %v3510_v26 = vld [vmem:[%s3796_s1 + $0x60] sm:$0xff] }
 0x236   : > { %v1449_v4 = vrot.slane %v1448_v38, 2  ;;  %v1443_v25 = vrot.slane %v1442_v29, 2  ;;  %v1459_v8 = vrot.slane %v2321_v2, 4  ;;  %v1453_v33 = vrot.slane %v2320_v35, 4 }
 0x237   : > { %v1427_v40 = vrot.slane %v1426_v7, 1  ;;  %v1421_v23 = vrot.slane %v1420_v24, 1  ;;  %v1439_v48 = vrot.slane %v1438_v22, 1  ;;  %v1433_v31 = vrot.slane %v1432_v37, 1 }
 0x238   : > { %v1450_v62 = vadd.f32 %v1449_v4, %v1448_v38  ;;  %v1444_v14 = vadd.f32 %v1443_v25, %v1442_v29  ;;  %v1460_v21 = vadd.f32 %v2321_v2, %v1459_v8  ;;  %v1454_v15 = vadd.f32 %v2320_v35, %v1453_v33  ;;  %v3503_v46 = vpop.permute.xlu1 %1715 }
 0x239   : > { %v1428_v28 = vadd.f32 %v1427_v40, %v1426_v7  ;;  %v1422_v60 = vadd.f32 %v1421_v23, %v1420_v24  ;;  %v1440_v18 = vadd.f32 %v1439_v48, %v1438_v22  ;;  %v1434_v43 = vadd.f32 %v1433_v31, %v1432_v37  ;;  %v3505_v53 = vpop.permute.xlu0 %1711 }
 0x23a   : > { %v1451_v58 = vrot.slane %v1450_v62, 1  ;;  %v1445_v51 = vrot.slane %v1444_v14, 1  ;;  %v1461_v47 = vrot.slane %v1460_v21, 2  ;;  %v1455_v63 = vrot.slane %v1454_v15, 2 }
 0x23b   : > { %v3513_v55 = vadd.f32 %v1428_v28, %v3437_v45  ;;  %v3516_v10 = vadd.f32 %v1422_v60, %v3440_v57  ;;  %v3519_v36 = vadd.f32 %v1440_v18, %v3453_v0  ;;  %v3522_v16 = vadd.f32 %v1434_v43, %v3456_v17 }
 0x23c   : > { %v1452_v13 = vadd.f32 %v1451_v58, %v1450_v62  ;;  %v1446_v11 = vadd.f32 %v1445_v51, %v1444_v14  ;;  %v1462_v30 = vadd.f32 %v1461_v47, %v1460_v21  ;;  %v1456_v44 = vadd.f32 %v1455_v63, %v1454_v15  ;;  %v3524_v3 = vpop.permute.xlu1 %1611 }
 0x23d   : > { %v3529_v45 = vsel %vm3495_vm2, %v3445_v19, 0.0  ;;  %vm1591_vm3 = vcmp.gt.f32.partialorder %v1590_v6, 10.0  ;;  %v1706_v57 = vand.u32 2147483647, %v3510_v26  ;;  %v3540_v38 = vpop.permute.xlu0 %1503 }
 0x23e   : > { %v3535_v0 = vadd.f32 %v1452_v13, %v3472_v41  ;;  %v3538_v17 = vadd.f32 %v1446_v11, %v3475_v9  ;;  %v1463_v5 = vrot.slane %v1462_v30, 1  ;;  %v1457_v39 = vrot.slane %v1456_v44, 1 }
 0x23f   : > { %v1510_v61 = vmul.f32 %v3432_v42, %v3529_v45  ;;  %v1509_v19 = vmul.f32 %v3434_v50, %v3529_v45  ;;  %v1512_v6 = vmul.f32 %v3460_v32, %v3529_v45  ;;  %v1511_v41 = vmul.f32 %v3462_v1, %v3529_v45 }
 0x240   : > { %v1464_v29 = vadd.f32 %v1463_v5, %v1462_v30  ;;  %v1458_v2 = vadd.f32 %v1457_v39, %v1456_v44  ;;  %v3551_v9 = vsel %vm1591_vm3, %v3450_v54, 0.0  ;;  %v1513_v35 = vmul.f32 %v3491_v56, %v3529_v45  ;;  %v3555_v7 = vpop.permute.xlu1 %1507 }
 0x241   : > { %v2323_v42 = vclamps-f32 %v1510_v61, 10.0  ;;  %v2322_v24 = vclamps-f32 %v1509_v19, 10.0  ;;  %v2325_v22 = vclamps-f32 %v1512_v6, 10.0  ;;  %v2324_v50 = vclamps-f32 %v1511_v41, 10.0  ;;  %v3569_v48 = vpop.permute.xlu0 %1719 }
 0x242   : > { %v3558_v37 = vadd.f32 %v1464_v29, %v3484_v12  ;;  %v3561_v32 = vadd.f32 %v1458_v2, %v3487_v59  ;;  %v1626_v1 = vmul.f32 %v3477_v52, %v3551_v9  ;;  %v1625_v54 = vmul.f32 %v3479_v49, %v3551_v9 }
 0x243   : > { %v1539_v4 = vrot.slane %v2323_v42, 4  ;;  %v1533_v56 = vrot.slane %v2322_v24, 4  ;;  %v1551_v25 = vrot.slane %v2325_v22, 4  ;;  %v1545_v8 = vrot.slane %v2324_v50, 4 }
 0x244   : > { %v2331_v33 = vclamps-f32 %v1626_v1, 10.0  ;;  %v2330_v40 = vclamps-f32 %v1625_v54, 10.0  ;;  %v1627_v23 = vmul.f32 %v3489_v34, %v3551_v9  ;;  %v2326_v12 = vclamps-f32 %v1513_v35, 10.0  ;;  %v3571_v52 = vpop.permute.xlu1 %1723 }
 0x245   : > { %v1540_v59 = vadd.f32 %v2323_v42, %v1539_v4  ;;  %v1534_v31 = vadd.f32 %v2322_v24, %v1533_v56  ;;  %v1552_v62 = vadd.f32 %v2325_v22, %v1551_v25  ;;  %v1546_v14 = vadd.f32 %v2324_v50, %v1545_v8 }
 0x246   : > { %v1655_v21 = vrot.slane %v2331_v33, 4  ;;  %v1649_v49 = vrot.slane %v2330_v40, 4  ;;  %v2332_v15 = vclamps-f32 %v1627_v23, 10.0  ;;  %v1557_v28 = vrot.slane %v2326_v12, 4 }
 0x247   : > { %vm3573_vm4 = vcmp.gt.f32.partialorder %v1706_v57, 10.0  ;;  %v1541_v18 = vrot.slane %v1540_v59, 2  ;;  %v1535_v43 = vrot.slane %v1534_v31, 2  ;;  %v1553_v34 = vrot.slane %v1552_v62, 2  ;;  %v3577_v57 = vpop.permute.xlu0 %1615 }
 0x248   : > { %v1547_v58 = vrot.slane %v1546_v14, 2  ;;  %v1656_v51 = vadd.f32 %v2331_v33, %v1655_v21  ;;  %v1650_v47 = vadd.f32 %v2330_v40, %v1649_v49  ;;  %v1661_v63 = vrot.slane %v2332_v15, 4  ;;  %v3579_v42 = vpop.permute.xlu1 %1831 }
 0x249   : > { %v1558_v13 = vadd.f32 %v2326_v12, %v1557_v28  ;;  %v1542_v11 = vadd.f32 %v1541_v18, %v1540_v59  ;;  %v1536_v30 = vadd.f32 %v1535_v43, %v1534_v31  ;;  %v1554_v44 = vadd.f32 %v1553_v34, %v1552_v62 }
 0x24a   : > { %v1548_v5 = vadd.f32 %v1547_v58, %v1546_v14  ;;  %v1657_v39 = vrot.slane %v1656_v51, 2  ;;  %v1651_v61 = vrot.slane %v1650_v47, 2  ;;  %v1662_v19 = vadd.f32 %v2332_v15, %v1661_v63 }
 0x24b   : > { %v1559_v6 = vrot.slane %v1558_v13, 2  ;;  %v1543_v41 = vrot.slane %v1542_v11, 1  ;;  %v1537_v29 = vrot.slane %v1536_v30, 1  ;;  %v1555_v2 = vrot.slane %v1554_v44, 1  ;;  %v3587_v28 = vpop.permute.xlu0 %1827 }
 0x24c   : > { %v1549_v35 = vrot.slane %v1548_v5, 1  ;;  %v1658_v24 = vadd.f32 %v1657_v39, %v1656_v51  ;;  %v1652_v22 = vadd.f32 %v1651_v61, %v1650_v47  ;;  %v1663_v50 = vrot.slane %v1662_v19, 2 }
 0x24d   : > { %v1560_v1 = vadd.f32 %v1559_v6, %v1558_v13  ;;  %v1544_v54 = vadd.f32 %v1543_v41, %v1542_v11  ;;  %v1538_v4 = vadd.f32 %v1537_v29, %v1536_v30  ;;  %v1556_v56 = vadd.f32 %v1555_v2, %v1554_v44 }
 0x24e   : > { %v1550_v25 = vadd.f32 %v1549_v35, %v1548_v5  ;;  %v1659_v8 = vrot.slane %v1658_v24, 1  ;;  %v1653_v33 = vrot.slane %v1652_v22, 1  ;;  %v1664_v40 = vadd.f32 %v1663_v50, %v1662_v19 }
 0x24f   : > { %v1561_v23 = vrot.slane %v1560_v1, 1  ;;  %v1582_v12 = vadd.f32 %v1544_v54, %v3513_v55  ;;  %v1581_v59 = vadd.f32 %v1538_v4, %v3516_v10  ;;  %v3584_v31 = vadd.f32 %v1556_v56, %v3519_v36  ;;  %v3600_v36 = vpop.permute.xlu1 %1727 }
 0x250   : > { %v1583_v62 = vadd.f32 %v1550_v25, %v3522_v16  ;;  %v1660_v14 = vadd.f32 %v1659_v8, %v1658_v24  ;;  %v1654_v21 = vadd.f32 %v1653_v33, %v1652_v22  ;;  %v1665_v49 = vrot.slane %v1664_v40, 1 }
 0x251   : > { %v1562_v15 = vadd.f32 %v1561_v23, %v1560_v1  ;;  %v1628_v18 = vmul.f32 %v3499_v27, %v3551_v9  ;;  %v1514_v43 = vmul.f32 %v3501_v20, %v3529_v45  ;;  %v3596_v55 = vsel %vm3573_vm4, %v3510_v26, 0.0 }
 0x252   : > { %v1629_v10 = vmul.f32 %v3524_v3, %v3551_v9  ;;  %v3602_v16 = vadd.f32 %v1660_v14, %v1582_v12  ;;  %v3604_v34 = vadd.f32 %v1654_v21, %v1581_v59  ;;  %v1666_v58 = vadd.f32 %v1665_v49, %v1664_v40  ;;  %v1821_v14 = vld [vmem:[%s3796_s1 + $0x68] sm:$0xff] }
 0x253   : > { %v3607_v27 = vadd.f32 %v1562_v15, %v3538_v17  ;;  %v2333_v51 = vclamps-f32 %v1628_v18, 10.0  ;;  %v2327_v20 = vclamps-f32 %v1514_v43, 10.0  ;;  %v1742_v60 = vmul.f32 %v3503_v46, %v3596_v55  ;;  %v1624_v2 = vpop.permute.xlu1 %1623 }
 0x254   : > { %v1741_v26 = vmul.f32 %v3505_v53, %v3596_v55  ;;  %v3613_v47 = vadd.f32 %v1666_v58, %v1583_v62  ;;  %v2334_v3 = vclamps-f32 %v1629_v10, 10.0  ;;  %v1515_v63 = vmul.f32 %v3540_v38, %v3529_v45  ;;  %v1620_v53 = vpop.permute.xlu0 %1619 }
 0x255   : > { %v1516_v13 = vmul.f32 %v3555_v7, %v3529_v45  ;;  %v1667_v11 = vrot.slane %v2333_v51, 4  ;;  %v1563_v17 = vrot.slane %v2327_v20, 4  ;;  %v2339_v30 = vclamps-f32 %v1742_v60, 10.0 }
 0x256   : > { %v2338_v44 = vclamps-f32 %v1741_v26, 10.0  ;;  %v1673_v5 = vrot.slane %v2334_v3, 4  ;;  %v2328_v39 = vclamps-f32 %v1515_v63, 10.0  ;;  %v1743_v46 = vmul.f32 %v3569_v48, %v3596_v55 }
 0x257   : > { %v2329_v61 = vclamps-f32 %v1516_v13, 10.0  ;;  %v1668_v19 = vadd.f32 %v2333_v51, %v1667_v11  ;;  %v1564_v6 = vadd.f32 %v2327_v20, %v1563_v17  ;;  %v1771_v41 = vrot.slane %v2339_v30, 4  ;;  %v3624_v21 = vpop.permute.xlu1 %1839 }
 0x258   : > { %v1765_v29 = vrot.slane %v2338_v44, 4  ;;  %v1674_v38 = vadd.f32 %v2334_v3, %v1673_v5  ;;  %v1569_v35 = vrot.slane %v2328_v39, 4  ;;  %v2340_v45 = vclamps-f32 %v1743_v46, 10.0  ;;  %v1836_v12 = vpop.permute.xlu0 %1835 }
 0x259   : > { %v1575_v24 = vrot.slane %v2329_v61, 4  ;;  %v1669_v7 = vrot.slane %v1668_v19, 2  ;;  %v1565_v22 = vrot.slane %v1564_v6, 2  ;;  %v1772_v50 = vadd.f32 %v2339_v30, %v1771_v41 }
 0x25a   : > { %v1766_v1 = vadd.f32 %v2338_v44, %v1765_v29  ;;  %v1570_v54 = vadd.f32 %v2328_v39, %v1569_v35  ;;  %v1777_v4 = vrot.slane %v2340_v45, 4  ;;  %v1675_v8 = vrot.slane %v1674_v38, 2 }
 0x25b   : > { %v1670_v56 = vadd.f32 %v1669_v7, %v1668_v19  ;;  %v1566_v25 = vadd.f32 %v1565_v22, %v1564_v6  ;;  %v1576_v48 = vadd.f32 %v2329_v61, %v1575_v24  ;;  %v1773_v33 = vrot.slane %v1772_v50, 2  ;;  %v3638_v5 = vpop.permute.xlu1 %1947 }
 0x25c   : > { %v1767_v40 = vrot.slane %v1766_v1, 2  ;;  %v1571_v23 = vrot.slane %v1570_v54, 2  ;;  %v1778_v49 = vadd.f32 %v2340_v45, %v1777_v4  ;;  %v1676_v43 = vadd.f32 %v1675_v8, %v1674_v38  ;;  %v3632_v13 = vpop.permute.xlu0 %1731 }
 0x25d   : > { %v1671_v59 = vrot.slane %v1670_v56, 1  ;;  %v1567_v62 = vrot.slane %v1566_v25, 1  ;;  %v1577_v10 = vrot.slane %v1576_v48, 2  ;;  %v1774_v58 = vadd.f32 %v1773_v33, %v1772_v50 }
 0x25e   : > { %v1768_v51 = vadd.f32 %v1767_v40, %v1766_v1  ;;  %v1572_v20 = vadd.f32 %v1571_v23, %v1570_v54  ;;  %v1822_v60 = vand.u32 2147483647, %v1821_v14  ;;  %v1779_v63 = vrot.slane %v1778_v49, 2 }
 0x25f   : > { %v1672_v15 = vadd.f32 %v1671_v59, %v1670_v56  ;;  %v1568_v18 = vadd.f32 %v1567_v62, %v1566_v25  ;;  %v1677_v11 = vrot.slane %v1676_v43, 1  ;;  %v1578_v17 = vadd.f32 %v1577_v10, %v1576_v48  ;;  %v1844_v25 = vpop.permute.xlu1 %1843 }
 0x260   : > { %v1744_v30 = vmul.f32 %v3571_v52, %v3596_v55  ;;  %v1630_v44 = vmul.f32 %v3577_v57, %v3551_v9  ;;  %v1775_v39 = vrot.slane %v1774_v58, 1  ;;  %v1769_v61 = vrot.slane %v1768_v51, 1 }
 0x261   : > { %v3627_v26 = vadd.f32 %v1672_v15, %v3584_v31  ;;  %v3630_v3 = vadd.f32 %v1568_v18, %v3535_v0  ;;  %v1573_v31 = vrot.slane %v1572_v20, 1  ;;  %vm1823_vm5 = vcmp.gt.f32.partialorder %v1822_v60, 10.0 }
 0x262   : > { %v2341_v46 = vclamps-f32 %v1744_v30, 10.0  ;;  %v2335_v0 = vclamps-f32 %v1630_v44, 10.0  ;;  %v3640_v19 = vsel %vm1823_vm5, %v1821_v14, 0.0  ;;  %v1745_v6 = vmul.f32 %v3600_v36, %v3596_v55  ;;  %v3651_v36 = vpop.permute.xlu0 %1943 }
 0x263   : > { %v1780_v41 = vadd.f32 %v1779_v63, %v1778_v49  ;;  %v1858_v52 = vmul.f32 %v3579_v42, %v3640_v19  ;;  %v1857_v57 = vmul.f32 %v3587_v28, %v3640_v19  ;;  %v1631_v29 = vmul.f32 %v1620_v53, %v3551_v9 }
 0x264   : > { %v1783_v38 = vrot.slane %v2341_v46, 4  ;;  %v1679_v35 = vrot.slane %v2335_v0, 4  ;;  %v2342_v24 = vclamps-f32 %v1745_v6, 10.0  ;;  %v1632_v45 = vmul.f32 %v1624_v2, %v3551_v9  ;;  %v1740_v6 = vpop.permute.xlu1 %1739 }
 0x265   : > { %v2347_v7 = vclamps-f32 %v1858_v52, 10.0  ;;  %v2346_v22 = vclamps-f32 %v1857_v57, 10.0  ;;  %v2336_v50 = vclamps-f32 %v1631_v29, 10.0  ;;  %v1859_v1 = vmul.f32 %v1836_v12, %v3640_v19 }
 0x266   : > { %v1784_v54 = vadd.f32 %v2341_v46, %v1783_v38  ;;  %v1680_v4 = vadd.f32 %v2335_v0, %v1679_v35  ;;  %v1789_v42 = vrot.slane %v2342_v24, 4  ;;  %v2337_v56 = vclamps-f32 %v1632_v45, 10.0  ;;  %v1736_v63 = vpop.permute.xlu0 %1735 }
 0x267   : > { %v1887_v28 = vrot.slane %v2347_v7, 4  ;;  %v1881_v8 = vrot.slane %v2346_v22, 4  ;;  %v1685_v53 = vrot.slane %v2336_v50, 4  ;;  %v2348_v48 = vclamps-f32 %v1859_v1, 10.0 }
 0x268   : > { %v1785_v33 = vrot.slane %v1784_v54, 2  ;;  %v1681_v40 = vrot.slane %v1680_v4, 2  ;;  %v1790_v23 = vadd.f32 %v2342_v24, %v1789_v42  ;;  %v1691_v9 = vrot.slane %v2337_v56, 4 }
 0x269   : > { %v1579_v2 = vrot.slane %v1578_v17, 1  ;;  %v1781_v59 = vrot.slane %v1780_v41, 1  ;;  %v1888_v62 = vadd.f32 %v2347_v7, %v1887_v28  ;;  %v1882_v14 = vadd.f32 %v2346_v22, %v1881_v8 }
 0x26a   : > { %v1686_v12 = vadd.f32 %v2336_v50, %v1685_v53  ;;  %v1893_v49 = vrot.slane %v2348_v48, 4  ;;  %v1786_v15 = vadd.f32 %v1785_v33, %v1784_v54  ;;  %v1682_v18 = vadd.f32 %v1681_v40, %v1680_v4 }
 0x26b   : > { %v1791_v10 = vrot.slane %v1790_v23, 2  ;;  %v1692_v60 = vadd.f32 %v2337_v56, %v1691_v9  ;;  %v1776_v30 = vadd.f32 %v1775_v39, %v1774_v58  ;;  %v1770_v44 = vadd.f32 %v1769_v61, %v1768_v51 }
 0x26c   : > { %v1678_v46 = vadd.f32 %v1677_v11, %v1676_v43  ;;  %v1889_v0 = vrot.slane %v1888_v62, 2  ;;  %v1574_v52 = vadd.f32 %v1573_v31, %v1572_v20  ;;  %v1580_v57 = vadd.f32 %v1579_v2, %v1578_v17 }
 0x26d   : > { %v1782_v29 = vadd.f32 %v1781_v59, %v1780_v41  ;;  %v1883_v38 = vrot.slane %v1882_v14, 2  ;;  %v1687_v35 = vrot.slane %v1686_v12, 2  ;;  %v1894_v24 = vadd.f32 %v2348_v48, %v1893_v49 }
 0x26e   : > { %v1787_v45 = vrot.slane %v1786_v15, 1  ;;  %v1683_v7 = vrot.slane %v1682_v18, 1  ;;  %v3653_v22 = vadd.f32 %v1791_v10, %v1790_v23  ;;  %v1693_v50 = vrot.slane %v1692_v60, 2 }
 0x26f   : > { %v3656_v1 = vadd.f32 %v1776_v30, %v3602_v16  ;;  %v3659_v58 = vadd.f32 %v1770_v44, %v3604_v34  ;;  %v3662_v43 = vadd.f32 %v1678_v46, %v3607_v27  ;;  %v3664_v51 = vadd.f32 %v1889_v0, %v1888_v62  ;;  %v1937_v16 = vld [vmem:[%s3796_s1 + $0x70] sm:$0xff]  ;;  %v1952_v34 = vpop.permute.xlu0 %1951 }
 0x270   : > { %v3667_v20 = vadd.f32 %v1574_v52, %v3561_v32  ;;  %v3670_v11 = vadd.f32 %v1580_v57, %v3558_v37  ;;  %v3673_v17 = vadd.f32 %v1782_v29, %v3613_v47  ;;  %v1884_v39 = vadd.f32 %v1883_v38, %v1882_v14  ;;  %v3684_v37 = vpop.permute.xlu1 %1955 }
 0x271   : > { %v3678_v61 = vadd.f32 %v1687_v35, %v1686_v12  ;;  %v1895_v27 = vrot.slane %v1894_v24, 2  ;;  %v1860_v31 = vmul.f32 %v3624_v21, %v3640_v19  ;;  %v1746_v32 = vmul.f32 %v3632_v13, %v3596_v55 }
 0x272   : > { %v1788_v41 = vadd.f32 %v1787_v45, %v1786_v15  ;;  %v1684_v47 = vadd.f32 %v1683_v7, %v1682_v18  ;;  %v1793_v54 = vrot.slane %v3653_v22, 1  ;;  %v1694_v4 = vadd.f32 %v1693_v50, %v1692_v60 }
 0x273   : > { %v1891_v42 = vrot.slane %v3664_v51, 1  ;;  %v2349_v56 = vclamps-f32 %v1860_v31, 10.0  ;;  %v2343_v28 = vclamps-f32 %v1746_v32, 10.0  ;;  %v1938_v8 = vand.u32 2147483647, %v1937_v16  ;;  %v1848_v14 = vpop.permute.xlu0 %1847 }
 0x274   : > { %v1885_v53 = vrot.slane %v1884_v39, 1  ;;  %v1861_v48 = vmul.f32 %v1844_v25, %v3640_v19  ;;  %v1747_v21 = vmul.f32 %v1736_v63, %v3596_v55  ;;  %v1748_v33 = vmul.f32 %v1740_v6, %v3596_v55  ;;  %v3697_v18 = vpop.permute.xlu1 %2063 }
 0x275   : > { %v1896_v13 = vadd.f32 %v1895_v27, %v1894_v24  ;;  %v1899_v40 = vrot.slane %v2349_v56, 4  ;;  %v1795_v23 = vrot.slane %v2343_v28, 4  ;;  %vm1939_vm6 = vcmp.gt.f32.partialorder %v1938_v8, 10.0 }
 0x276   : > { %v3691_v9 = vsel %vm1939_vm6, %v1937_v16, 0.0  ;;  %v2350_v2 = vclamps-f32 %v1861_v48, 10.0  ;;  %v2344_v59 = vclamps-f32 %v1747_v21, 10.0  ;;  %v2345_v62 = vclamps-f32 %v1748_v33, 10.0 }
 0x277   : > { %v1900_v12 = vadd.f32 %v2349_v56, %v1899_v40  ;;  %v1796_v49 = vadd.f32 %v2343_v28, %v1795_v23  ;;  %v1974_v15 = vmul.f32 %v3638_v5, %v3691_v9  ;;  %v1973_v25 = vmul.f32 %v3651_v36, %v3691_v9  ;;  %v2060_v16 = vpop.permute.xlu0 %2059 }
 0x278   : > { %v1905_v55 = vrot.slane %v2350_v2, 4  ;;  %v1801_v10 = vrot.slane %v2344_v59, 4  ;;  %v1807_v60 = vrot.slane %v2345_v62, 4  ;;  %v1975_v63 = vmul.f32 %v1952_v34, %v3691_v9  ;;  %v1960_v56 = vpop.permute.xlu1 %1959 }
 0x279   : > { %v1901_v30 = vrot.slane %v1900_v12, 2  ;;  %v1797_v44 = vrot.slane %v1796_v49, 2  ;;  %v2355_v46 = vclamps-f32 %v1974_v15, 10.0  ;;  %v2354_v0 = vclamps-f32 %v1973_v25, 10.0 }
 0x27a   : > { %v1906_v6 = vadd.f32 %v2350_v2, %v1905_v55  ;;  %v1802_v52 = vadd.f32 %v2344_v59, %v1801_v10  ;;  %v1808_v57 = vadd.f32 %v2345_v62, %v1807_v60  ;;  %v2356_v29 = vclamps-f32 %v1975_v63, 10.0 }
 0x27b   : > { %v3701_v5 = vadd.f32 %v1788_v41, %v3627_v26  ;;  %v1689_v36 = vrot.slane %v3678_v61, 1  ;;  %v2003_v38 = vrot.slane %v2355_v46, 4  ;;  %v1997_v35 = vrot.slane %v2354_v0, 4 }
 0x27c   : > { %v1695_v24 = vrot.slane %v1694_v4, 1  ;;  %v1897_v45 = vrot.slane %v1896_v13, 1  ;;  %v1902_v7 = vadd.f32 %v1901_v30, %v1900_v12  ;;  %v2009_v50 = vrot.slane %v2356_v29, 4  ;;  %v2053_v12 = vld [vmem:[%s3796_s1 + $0x78] sm:$0xff] }
 0x27d   : > { %v1794_v34 = vadd.f32 %v1793_v54, %v3653_v22  ;;  %v1798_v27 = vadd.f32 %v1797_v44, %v1796_v49  ;;  %v2004_v31 = vadd.f32 %v2355_v46, %v2003_v38  ;;  %v1907_v32 = vrot.slane %v1906_v6, 2 }
 0x27e   : > { %v1892_v28 = vadd.f32 %v1891_v42, %v3664_v51  ;;  %v1886_v8 = vadd.f32 %v1885_v53, %v1884_v39  ;;  %v1803_v26 = vrot.slane %v1802_v52, 2  ;;  %v1809_v41 = vrot.slane %v1808_v57, 2  ;;  %v1852_v53 = vpop.permute.xlu0 %1851 }
 0x27f   : > { %v1702_v48 = vadd.f32 %v1684_v47, %v3630_v3  ;;  %v1998_v21 = vadd.f32 %v2354_v0, %v1997_v35  ;;  %v2010_v33 = vadd.f32 %v2356_v29, %v2009_v50  ;;  %v1862_v40 = vmul.f32 %v1848_v14, %v3640_v19 }
 0x280   : > { %v1696_v23 = vadd.f32 %v1695_v24, %v1694_v4  ;;  %v1898_v2 = vadd.f32 %v1897_v45, %v1896_v13  ;;  %v1903_v59 = vrot.slane %v1902_v7, 1  ;;  %v2005_v62 = vrot.slane %v2004_v31, 2 }
 0x281   : > { %v3709_v22 = vadd.f32 %v1794_v34, %v3662_v43  ;;  %v3712_v54 = vadd.f32 %v1689_v36, %v3678_v61  ;;  %v1799_v51 = vrot.slane %v1798_v27, 1  ;;  %v1908_v39 = vadd.f32 %v1907_v32, %v1906_v6 }
 0x282   : > { %v3715_v42 = vadd.f32 %v1892_v28, %v3656_v1  ;;  %v3718_v3 = vadd.f32 %v1886_v8, %v3659_v58  ;;  %v3720_v47 = vadd.f32 %v1803_v26, %v1802_v52  ;;  %v3722_v4 = vadd.f32 %v1809_v41, %v1808_v57  ;;  %v1856_v1 = vpop.permute.xlu1 %1855  ;;  %v2068_v36 = vpop.permute.xlu0 %2067 }
 0x283   : > { %v1999_v13 = vrot.slane %v1998_v21, 2  ;;  %v2011_v14 = vrot.slane %v2010_v33, 2  ;;  %v1976_v43 = vmul.f32 %v3684_v37, %v3691_v9  ;;  %v2351_v61 = vclamps-f32 %v1862_v40, 10.0 }
 0x284   : > { %v3730_v49 = vadd.f32 %v1696_v23, %v3670_v11  ;;  %v3733_v58 = vadd.f32 %v1898_v2, %v3673_v17  ;;  %v1904_v15 = vadd.f32 %v1903_v59, %v1902_v7  ;;  %v2006_v25 = vadd.f32 %v2005_v62, %v2004_v31 }
 0x285   : > { %v1800_v55 = vadd.f32 %v1799_v51, %v1798_v27  ;;  %v1909_v10 = vrot.slane %v1908_v39, 1  ;;  %v2357_v60 = vclamps-f32 %v1976_v43, 10.0  ;;  %v1911_v63 = vrot.slane %v2351_v61, 4 }
 0x286   : > { %v1805_v37 = vrot.slane %v3720_v47, 1  ;;  %v1811_v30 = vrot.slane %v3722_v4, 1  ;;  %v2054_v44 = vand.u32 2147483647, %v2053_v12  ;;  %v1977_v46 = vmul.f32 %v1960_v56, %v3691_v9  ;;  %v2072_v7 = vpop.permute.xlu1 %2071  ;;  %v1964_v51 = vpop.permute.xlu0 %1963 }
 0x287   : > { %v2000_v0 = vadd.f32 %v1999_v13, %v1998_v21  ;;  %v2012_v6 = vadd.f32 %v2011_v14, %v2010_v33  ;;  %v2015_v11 = vrot.slane %v2357_v60, 4  ;;  %v1912_v52 = vadd.f32 %v2351_v61, %v1911_v63 }
 0x288   : > { %v2007_v57 = vrot.slane %v2006_v25, 1  ;;  %vm2055_vm7 = vcmp.gt.f32.partialorder %v2054_v44, 10.0  ;;  %v2358_v17 = vclamps-f32 %v1977_v46, 10.0  ;;  %v1863_v29 = vmul.f32 %v1852_v53, %v3640_v19 }
 0x289   : > { %v2016_v38 = vadd.f32 %v2357_v60, %v2015_v11  ;;  %v1913_v35 = vrot.slane %v1912_v52, 2  ;;  %v3739_v24 = vsel %vm2055_vm7, %v2053_v12, 0.0  ;;  %v1864_v45 = vmul.f32 %v1856_v1, %v3640_v19 }
 0x28a   : > { %v2090_v50 = vmul.f32 %v3697_v18, %v3739_v24  ;;  %v2089_v34 = vmul.f32 %v2060_v16, %v3739_v24  ;;  %v2021_v27 = vrot.slane %v2358_v17, 4  ;;  %v2352_v31 = vclamps-f32 %v1863_v29, 10.0  ;;  %v2076_v43 = vpop.permute.xlu1 %2075 }
 0x28b   : > { %v3746_v32 = vadd.f32 %v1904_v15, %v3701_v5  ;;  %v2001_v56 = vrot.slane %v2000_v0, 1  ;;  %v2013_v28 = vrot.slane %v2012_v6, 1  ;;  %v2017_v8 = vrot.slane %v2016_v38, 2 }
 0x28c   : > { %v1914_v26 = vadd.f32 %v1913_v35, %v1912_v52  ;;  %v2363_v41 = vclamps-f32 %v2090_v50, 10.0  ;;  %v2362_v21 = vclamps-f32 %v2089_v34, 10.0  ;;  %v2353_v33 = vclamps-f32 %v1864_v45, 10.0 }
 0x28d   : > { %v1818_v40 = vadd.f32 %v1800_v55, %v1702_v48  ;;  %v1910_v19 = vadd.f32 %v1909_v10, %v1908_v39  ;;  %v2022_v23 = vadd.f32 %v2358_v17, %v2021_v27  ;;  %v2091_v2 = vmul.f32 %v2068_v36, %v3739_v24 }
 0x28e   : > { %v2008_v18 = vadd.f32 %v2007_v57, %v2006_v25  ;;  %v2119_v59 = vrot.slane %v2363_v41, 4  ;;  %v2113_v16 = vrot.slane %v2362_v21, 4  ;;  %v1917_v62 = vrot.slane %v2352_v31, 4  ;;  %v2080_v35 = vpop.permute.xlu1 %2079 }
 0x28f   : > { %v2002_v53 = vadd.f32 %v2001_v56, %v2000_v0  ;;  %v2014_v5 = vadd.f32 %v2013_v28, %v2012_v6  ;;  %v2018_v13 = vadd.f32 %v2017_v8, %v2016_v38  ;;  %v2364_v14 = vclamps-f32 %v2091_v2, 10.0 }
 0x290   : > { %v1915_v61 = vrot.slane %v1914_v26, 1  ;;  %v2120_v12 = vadd.f32 %v2363_v41, %v2119_v59  ;;  %v2114_v1 = vadd.f32 %v2362_v21, %v2113_v16  ;;  %v1923_v15 = vrot.slane %v2353_v33, 4 }
 0x291   : > { %v3750_v48 = vadd.f32 %v1910_v19, %v3709_v22  ;;  %v2023_v39 = vrot.slane %v2022_v23, 2  ;;  %v2125_v55 = vrot.slane %v2364_v14, 4  ;;  %v2046_v25 = vadd.f32 %v2008_v18, %v3715_v42  ;;  %v1968_v22 = vpop.permute.xlu0 %1967 }
 0x292   : > { %v2121_v10 = vrot.slane %v2120_v12, 2  ;;  %v2115_v60 = vrot.slane %v2114_v1, 2  ;;  %v1918_v63 = vadd.f32 %v2352_v31, %v1917_v62  ;;  %v2045_v44 = vadd.f32 %v2002_v53, %v3718_v3  ;;  %v2088_v53 = vpop.permute.xlu1 %2087 }
 0x293   : > { %v2047_v46 = vadd.f32 %v2014_v5, %v3733_v58  ;;  %v2019_v0 = vrot.slane %v2018_v13, 1  ;;  %v2126_v6 = vadd.f32 %v2364_v14, %v2125_v55  ;;  %v1916_v11 = vadd.f32 %v1915_v61, %v1914_v26 }
 0x294   : > { %v2122_v52 = vadd.f32 %v2121_v10, %v2120_v12  ;;  %v2116_v57 = vadd.f32 %v2115_v60, %v2114_v1  ;;  %v1924_v17 = vadd.f32 %v2353_v33, %v1923_v15  ;;  %v3755_v29 = vadd.f32 %v2023_v39, %v2022_v23 }
 0x295   : > { %v2127_v36 = vrot.slane %v2126_v6, 2  ;;  %v2092_v38 = vmul.f32 %v2072_v7, %v3739_v24  ;;  %v1978_v42 = vmul.f32 %v1964_v51, %v3691_v9  ;;  %v1919_v3 = vrot.slane %v1918_v63, 2  ;;  %v1972_v59 = vpop.permute.xlu0 %1971 }
 0x296   : > { %v2123_v45 = vrot.slane %v2122_v52, 1  ;;  %v2117_v50 = vrot.slane %v2116_v57, 1  ;;  %v2020_v58 = vadd.f32 %v2019_v0, %v2018_v13  ;;  %v3759_v56 = vadd.f32 %v1916_v11, %v1818_v40 }
 0x297   : > { %v2128_v34 = vadd.f32 %v2127_v36, %v2126_v6  ;;  %v2365_v27 = vclamps-f32 %v2092_v38, 10.0  ;;  %v2359_v31 = vclamps-f32 %v1978_v42, 10.0  ;;  %v1925_v26 = vrot.slane %v1924_v17, 2 }
 0x298   : > { %v2124_v28 = vadd.f32 %v2123_v45, %v2122_v52  ;;  %v2118_v8 = vadd.f32 %v2117_v50, %v2116_v57  ;;  %v2025_v41 = vrot.slane %v3755_v29, 1  ;;  %v2093_v2 = vmul.f32 %v2076_v43, %v3739_v24 }
 0x299   : > { %v2129_v21 = vrot.slane %v2128_v34, 1  ;;  %v2131_v7 = vrot.slane %v2365_v27, 4  ;;  %v2027_v33 = vrot.slane %v2359_v31, 4  ;;  %v1979_v18 = vmul.f32 %v1968_v22, %v3691_v9  ;;  %v2084_v50 = vpop.permute.xlu0 %2083 }
 0x29a   : > { %v2162_v19 = vadd.f32 %v2124_v28, %v2046_v25  ;;  %v2161_v23 = vadd.f32 %v2118_v8, %v2045_v44  ;;  %v3764_v16 = vadd.f32 %v1919_v3, %v1918_v63  ;;  %v2366_v13 = vclamps-f32 %v2093_v2, 10.0 }
 0x29b   : > { %v2130_v62 = vadd.f32 %v2129_v21, %v2128_v34  ;;  %v2132_v40 = vadd.f32 %v2365_v27, %v2131_v7  ;;  %v2028_v51 = vadd.f32 %v2359_v31, %v2027_v33  ;;  %v2360_v14 = vclamps-f32 %v1979_v18, 10.0 }
 0x29c   : > { %v2180_v5 = vsel %vm2179_vm8, %v2162_v19, %v2161_v23  ;;  %v2094_v61 = vmul.f32 %v2080_v35, %v3739_v24  ;;  %v1980_v43 = vmul.f32 %v1972_v59, %v3691_v9  ;;  %v2137_v39 = vrot.slane %v2366_v13, 4 }
 0x29d   : > { %v2163_v12 = vadd.f32 %v2130_v62, %v2047_v46  ;;  %v2133_v1 = vrot.slane %v2132_v40, 2  ;;  %v2029_v15 = vrot.slane %v2028_v51, 2  ;;  %v2033_v55 = vrot.slane %v2360_v14, 4 }
 0x29e   : > { %v2367_v25 = vclamps-f32 %v2094_v61, 10.0  ;;  %v2096_v10 = vmul.f32 %v2088_v53, %v3739_v24  ;;  %v2361_v0 = vclamps-f32 %v1980_v43, 10.0  ;;  %v2138_v6 = vadd.f32 %v2366_v13, %v2137_v39 }
 0x29f   : > { %v2182_v60 = vsel %vm2181_vm9, %v2163_v12, %v2180_v5  ;;  %v2134_v63 = vadd.f32 %v2133_v1, %v2132_v40  ;;  %v2030_v44 = vadd.f32 %v2029_v15, %v2028_v51  ;;  %v2034_v11 = vadd.f32 %v2360_v14, %v2033_v55 }
 0x2a0   : > { %v2143_v52 = vrot.slane %v2367_v25, 4  ;;  %v2369_v57 = vclamps-f32 %v2096_v10, 10.0  ;;  %v2048_v46 = vadd.f32 %v2020_v58, %v3746_v32  ;;  %v1926_v22 = vadd.f32 %v1925_v26, %v1924_v17 }
 0x2a1   : > { %v2135_v36 = vrot.slane %v2134_v63, 1  ;;  %v2039_v38 = vrot.slane %v2361_v0, 4  ;;  %v2031_v9 = vrot.slane %v2030_v44, 1  ;;  %v2139_v42 = vrot.slane %v2138_v6, 2 }
 0x2a2   : > { %v2144_v35 = vadd.f32 %v2367_v25, %v2143_v52  ;;  %v2155_v45 = vrot.slane %v2369_v57, 4  ;;  %v2035_v34 = vrot.slane %v2034_v11, 2  ;;  %v2026_v31 = vadd.f32 %v2025_v41, %v3755_v29 }
 0x2a3   : > { %v2136_v3 = vadd.f32 %v2135_v36, %v2134_v63  ;;  %v2040_v27 = vadd.f32 %v2361_v0, %v2039_v38  ;;  %v2140_v28 = vadd.f32 %v2139_v42, %v2138_v6  ;;  %v1927_v7 = vrot.slane %v1926_v22, 1 }
 0x2a4   : > { %v2145_v8 = vrot.slane %v2144_v35, 2  ;;  %v2156_v21 = vadd.f32 %v2369_v57, %v2155_v45  ;;  %v2095_v17 = vmul.f32 %v2084_v50, %v3739_v24  ;;  %v2032_v58 = vadd.f32 %v2031_v9, %v2030_v44 }
 0x2a5   : > { %v2164_v33 = vadd.f32 %v2136_v3, %v2048_v46  ;;  %v2041_v32 = vrot.slane %v2040_v27, 2  ;;  %v2141_v26 = vrot.slane %v2140_v28, 1  ;;  %v2036_v18 = vadd.f32 %v2035_v34, %v2034_v11 }
 0x2a6   : > { %v2146_v19 = vadd.f32 %v2145_v8, %v2144_v35  ;;  %v2157_v23 = vrot.slane %v2156_v21, 2  ;;  %v2368_v62 = vclamps-f32 %v2095_v17, 10.0  ;;  %v2049_v40 = vadd.f32 %v2026_v31, %v3750_v48 }
 0x2a7   : > { %v2184_v2 = vsel %vm2183_vm10, %v2164_v33, %v2182_v60  ;;  %v2042_v59 = vadd.f32 %v2041_v32, %v2040_v27  ;;  %v2142_v29 = vadd.f32 %v2141_v26, %v2140_v28  ;;  %v1812_v53 = vadd.f32 %v1811_v30, %v3722_v4 }
 0x2a8   : > { %v2147_v41 = vrot.slane %v2146_v19, 1  ;;  %v2158_v51 = vadd.f32 %v2157_v23, %v2156_v21  ;;  %v1921_v24 = vrot.slane %v3764_v16, 1  ;;  %v2149_v5 = vrot.slane %v2368_v62, 4 }
 0x2a9   : > { %v2050_v13 = vadd.f32 %v2032_v58, %v3759_v56  ;;  %v2165_v14 = vadd.f32 %v2142_v29, %v2049_v40  ;;  %v2043_v12 = vrot.slane %v2042_v59, 1  ;;  %v1806_v48 = vadd.f32 %v1805_v37, %v3720_v47 }
 0x2aa   : > { %v2148_v61 = vadd.f32 %v2147_v41, %v2146_v19  ;;  %v2037_v1 = vrot.slane %v2036_v18, 1  ;;  %v2150_v15 = vadd.f32 %v2368_v62, %v2149_v5  ;;  %v1928_v43 = vadd.f32 %v1927_v7, %v1926_v22 }
 0x2ab   : > { %v2186_v39 = vsel %vm2185_vm11, %v2165_v14, %v2184_v2  ;;  %v2159_v4 = vrot.slane %v2158_v51, 1  ;;  %v1703_v30 = vadd.f32 %v3712_v54, %v3667_v20  ;;  %v1922_v56 = vadd.f32 %v1921_v24, %v3764_v16  ;;  %v2170_v16 = vld [vmem:[%s2169_s9] sm:$0xff] }
 0x2ac   : > { %v2166_v55 = vadd.f32 %v2148_v61, %v2050_v13  ;;  %v2151_v25 = vrot.slane %v2150_v15, 2  ;;  %v1820_v10 = vadd.f32 %v1812_v53, %v3730_v49  ;;  %v2044_v63 = vadd.f32 %v2043_v12, %v2042_v59 }
 0x2ad   : > { %v1819_v44 = vadd.f32 %v1806_v48, %v1703_v30  ;;  %v2038_v47 = vadd.f32 %v2037_v1, %v2036_v18  ;;  %v2160_v6 = vadd.f32 %v2159_v4, %v2158_v51 }
 0x2ae   : > { %v2188_v60 = vsel %vm2187_vm12, %v2166_v55, %v2186_v39  ;;  %v2152_v37 = vadd.f32 %v2151_v25, %v2150_v15  ;;  %v1936_v0 = vadd.f32 %v1928_v43, %v1820_v10 }
 0x2af   : > { %v1935_v11 = vadd.f32 %v1922_v56, %v1819_v44 }
 0x2b0   : > { %v2153_v52 = vrot.slane %v2152_v37, 1  ;;  %v2052_v57 = vadd.f32 %v2044_v63, %v1936_v0 }
 0x2b1   : > { %v2051_v46 = vadd.f32 %v2038_v47, %v1935_v11 }
 0x2b2   : > { %v2154_v20 = vadd.f32 %v2153_v52, %v2152_v37  ;;  %v2168_v54 = vadd.f32 %v2160_v6, %v2052_v57 }
 0x2b4   : > { %v2167_v49 = vadd.f32 %v2154_v20, %v2051_v46  ;;  %284 = sbr.rel (!%p282_p1) target bundleno = 266 (0x10a), region = 41 }
 0x2b6   : > { %v2190_v22 = vsel %vm2189_vm13, %v2167_v49, %v2188_v60 }
 0x2b7   : > { %v2192_v36 = vsel %vm2191_vm14, %v2168_v54, %v2190_v22 }
 0x2b8   : > { %v2194_v38 = vadd.f32 %v2192_v36, %v2170_v16 }
 0x2ba   : > { %2195 = vst [vmem:[%s2169_s9] sm:$0xff] %v2194_v38 }
 0x2bb PF:  {}

// kernel: ama_filter_forward.21
= control target key start
LH: loop header
LB: loop body
LE: loop exit
PB: predicated region body
PF: predicated region fallthrough
CT: control target
= control target key end

     0   :  { %s1463_s1 = inlined_call_operand.vmem [shape: f32[256,128], index: 1, kind: input, shape index: {}]   ;;  %s1464_s0 = inlined_call_operand.vmem [shape: f32[128,256], index: 0, kind: input, shape index: {}]   ;;  %s1465_s3 = inlined_call_operand.vmem [shape: f32[128,128], index: 3, kind: input, shape index: {}]   ;;  %s1466_s5 = inlined_call_operand.vmem [shape: f32[128,128], index: 5, kind: input, shape index: {}]   ;;  %s1467_s2 = inlined_call_operand.vmem [shape: f32[1,128], index: 2, kind: input, shape index: {}]   ;;  %s1468_s7 = inlined_call_operand.vmem [shape: f32[128,128], index: 7, kind: output, shape index: {0}]   ;;  %s1469_s4 = inlined_call_operand.vmem [shape: f32[1,128], index: 4, kind: input, shape index: {}]   ;;  %s1470_s6 = inlined_call_operand.vmem [shape: f32[1,128], index: 6, kind: input, shape index: {}]   ;;  %s1471_s8 = inlined_call_operand.vmem [shape: f32[128,128], index: 8, kind: output, shape index: {1}]  }
   0x1   :  { %v76_v0 = vld [vmem:[%s1463_s1 + $0x80] sm:$0xff]  ;;  %v77_v1 = vld [vmem:[%s1463_s1 + $0x88] sm:$0xff]  ;;  %v78_v5 = vld [vmem:[%s1463_s1 + $0x90] sm:$0xff] }
   0x2   :  { %v60_v2 = vld [vmem:[%s1463_s1] sm:$0xff]  ;;  %v911_v3 = vpack.c.bf16 %v77_v1, %v76_v0  ;;  %v61_v4 = vld [vmem:[%s1463_s1 + $0x8] sm:$0xff]  ;;  %v79_v6 = vld [vmem:[%s1463_s1 + $0x98] sm:$0xff] }
   0x3   :  { %v913_v7 = vpack.c.bf16 %v61_v4, %v60_v2  ;;  %v915_v8 = vpack.c.bf16 %v79_v6, %v78_v5  ;;  %v62_v9 = vld [vmem:[%s1463_s1 + $0x10] sm:$0xff]  ;;  %v63_v10 = vld [vmem:[%s1463_s1 + $0x18] sm:$0xff]  ;;  %v80_v11 = vld [vmem:[%s1463_s1 + $0xa0] sm:$0xff] }
   0x4   :  { %912 = vmatprep.subr.bf16.mxu0 %v911_v3  ;;  %v81_v12 = vld [vmem:[%s1463_s1 + $0xa8] sm:$0xff]  ;;  %v917_v13 = vpack.c.bf16 %v63_v10, %v62_v9  ;;  %v64_v15 = vld [vmem:[%s1463_s1 + $0x20] sm:$0xff]  ;;  %v82_v17 = vld [vmem:[%s1463_s1 + $0xb0] sm:$0xff] }
   0x5   :  { %914 = vmatpush3.bf16.msra.mxu0 %v913_v7  ;;  %v919_v14 = vpack.c.bf16 %v81_v12, %v80_v11  ;;  %v65_v16 = vld [vmem:[%s1463_s1 + $0x28] sm:$0xff]  ;;  %v83_v18 = vld [vmem:[%s1463_s1 + $0xb8] sm:$0xff]  ;;  %v66_v21 = vld [vmem:[%s1463_s1 + $0x30] sm:$0xff] }
   0x6   :  { %916 = vmatprep.subr.bf16.mxu0 %v915_v8  ;;  %v921_v19 = vpack.c.bf16 %v65_v16, %v64_v15  ;;  %v923_v20 = vpack.c.bf16 %v83_v18, %v82_v17  ;;  %v67_v22 = vld [vmem:[%s1463_s1 + $0x38] sm:$0xff]  ;;  %v84_v23 = vld [vmem:[%s1463_s1 + $0xc0] sm:$0xff]  ;;  %v85_v24 = vld [vmem:[%s1463_s1 + $0xc8] sm:$0xff] }
   0x7   :  { %v29_v25 = vld [vmem:[%s1464_s0 + $0x8] sm:$0xff]  ;;  %v925_v26 = vpack.c.bf16 %v67_v22, %v66_v21  ;;  %v927_v27 = vpack.c.bf16 %v85_v24, %v84_v23  ;;  %v68_v28 = vld [vmem:[%s1463_s1 + $0x40] sm:$0xff]  ;;  %v86_v30 = vld [vmem:[%s1463_s1 + $0xd0] sm:$0xff] }
   0x8   :  { %163 = vmatprep.mubr.f32.mxu0 %v29_v25  ;;  %v69_v29 = vld [vmem:[%s1463_s1 + $0x48] sm:$0xff]  ;;  %v87_v31 = vld [vmem:[%s1463_s1 + $0xd8] sm:$0xff]  ;;  %v70_v34 = vld [vmem:[%s1463_s1 + $0x50] sm:$0xff] }
   0x9   :  { %918 = vmatpush3.bf16.msra.mxu0 %v917_v13  ;;  %v929_v32 = vpack.c.bf16 %v69_v29, %v68_v28  ;;  %v931_v33 = vpack.c.bf16 %v87_v31, %v86_v30  ;;  %v71_v35 = vld [vmem:[%s1463_s1 + $0x58] sm:$0xff]  ;;  %v88_v36 = vld [vmem:[%s1463_s1 + $0xe0] sm:$0xff]  ;;  %v89_v37 = vld [vmem:[%s1463_s1 + $0xe8] sm:$0xff] }
   0xa   :  { %920 = vmatprep.subr.bf16.mxu0 %v919_v14  ;;  %v933_v38 = vpack.c.bf16 %v71_v35, %v70_v34  ;;  %v72_v39 = vld [vmem:[%s1463_s1 + $0x60] sm:$0xff]  ;;  %v73_v40 = vld [vmem:[%s1463_s1 + $0x68] sm:$0xff]  ;;  %v935_v41 = vpack.c.bf16 %v89_v37, %v88_v36  ;;  %v90_v42 = vld [vmem:[%s1463_s1 + $0xf0] sm:$0xff] }
   0xb   :  { %v244_v43 = vld [vmem:[%s1465_s3] sm:$0xff]  ;;  %v245_v44 = vld [vmem:[%s1465_s3 + $0x8] sm:$0xff]  ;;  %v91_v45 = vld [vmem:[%s1463_s1 + $0xf8] sm:$0xff]  ;;  %v937_v52 = vpack.c.bf16 %v73_v40, %v72_v39 }
   0xc   :  { %v943_v46 = vpack.c.bf16 %v245_v44, %v244_v43  ;;  %v246_v47 = vld [vmem:[%s1465_s3 + $0x10] sm:$0xff]  ;;  %v247_v48 = vld [vmem:[%s1465_s3 + $0x18] sm:$0xff]  ;;  %v248_v50 = vld [vmem:[%s1465_s3 + $0x20] sm:$0xff]  ;;  %v939_v53 = vpack.c.bf16 %v91_v45, %v90_v42 }
   0xd   :  { %922 = vmatpush3.bf16.msra.mxu0 %v921_v19  ;;  %v947_v49 = vpack.c.bf16 %v247_v48, %v246_v47  ;;  %v249_v51 = vld [vmem:[%s1465_s3 + $0x28] sm:$0xff]  ;;  %v74_v54 = vld [vmem:[%s1463_s1 + $0x70] sm:$0xff]  ;;  %v75_v55 = vld [vmem:[%s1463_s1 + $0x78] sm:$0xff] }
   0xe   :  { %924 = vmatprep.subr.bf16.mxu0 %v923_v20  ;;  %944 = vmatprep.subr.bf16.mxu1 %v943_v46  ;;  %v951_v56 = vpack.c.bf16 %v249_v51, %v248_v50  ;;  %v250_v57 = vld [vmem:[%s1465_s3 + $0x30] sm:$0xff]  ;;  %v251_v58 = vld [vmem:[%s1465_s3 + $0x38] sm:$0xff]  ;;  %v941_v59 = vpack.c.bf16 %v75_v55, %v74_v54  ;;  %v252_v61 = vld [vmem:[%s1465_s3 + $0x40] sm:$0xff] }
   0xf   :  { %946 = vmatpush3.bf16.msra.mxu1 %v943_v46  ;;  %v955_v60 = vpack.c.bf16 %v251_v58, %v250_v57  ;;  %v253_v62 = vld [vmem:[%s1465_s3 + $0x48] sm:$0xff]  ;;  %v28_v63 = vld [vmem:[%s1464_s0] sm:$0xff]  ;;  %v31_v0 = vld [vmem:[%s1464_s0 + $0x18] sm:$0xff] }
  0x10   :  { %948 = vmatprep.subr.bf16.mxu1 %v947_v49  ;;  %v959_v1 = vpack.c.bf16 %v253_v62, %v252_v61  ;;  %v254_v2 = vld [vmem:[%s1465_s3 + $0x50] sm:$0xff]  ;;  %v255_v3 = vld [vmem:[%s1465_s3 + $0x58] sm:$0xff]  ;;  %v33_v5 = vld [vmem:[%s1464_s0 + $0x28] sm:$0xff] }
  0x11   :  { %926 = vmatpush3.bf16.msra.mxu0 %v925_v26  ;;  %v30_v4 = vld [vmem:[%s1464_s0 + $0x10] sm:$0xff]  ;;  %v963_v6 = vpack.c.bf16 %v255_v3, %v254_v2  ;;  %v32_v7 = vld [vmem:[%s1464_s0 + $0x20] sm:$0xff]  ;;  %v35_v8 = vld [vmem:[%s1464_s0 + $0x38] sm:$0xff] }
  0x12   :  { %928 = vmatprep.subr.bf16.mxu0 %v927_v27  ;;  %v34_v9 = vld [vmem:[%s1464_s0 + $0x30] sm:$0xff]  ;;  %v37_v10 = vld [vmem:[%s1464_s0 + $0x48] sm:$0xff]  ;;  %v36_v11 = vld [vmem:[%s1464_s0 + $0x40] sm:$0xff] }
  0x13   :  { %950 = vmatpush3.bf16.msra.mxu1 %v947_v49  ;;  %v39_v12 = vld [vmem:[%s1464_s0 + $0x58] sm:$0xff]  ;;  %v38_v13 = vld [vmem:[%s1464_s0 + $0x50] sm:$0xff]  ;;  %v41_v14 = vld [vmem:[%s1464_s0 + $0x68] sm:$0xff] }
  0x14   :  { %952 = vmatprep.subr.bf16.mxu1 %v951_v56  ;;  %v40_v15 = vld [vmem:[%s1464_s0 + $0x60] sm:$0xff]  ;;  %v43_v16 = vld [vmem:[%s1464_s0 + $0x78] sm:$0xff]  ;;  %v42_v17 = vld [vmem:[%s1464_s0 + $0x70] sm:$0xff] }
  0x15   :  { %930 = vmatpush3.bf16.msra.mxu0 %v929_v32  ;;  %v45_v18 = vld [vmem:[%s1464_s0 + $0x88] sm:$0xff]  ;;  %v44_v19 = vld [vmem:[%s1464_s0 + $0x80] sm:$0xff]  ;;  %v47_v20 = vld [vmem:[%s1464_s0 + $0x98] sm:$0xff] }
  0x16   :  { %932 = vmatprep.subr.bf16.mxu0 %v931_v33  ;;  %v46_v21 = vld [vmem:[%s1464_s0 + $0x90] sm:$0xff]  ;;  %v49_v22 = vld [vmem:[%s1464_s0 + $0xa8] sm:$0xff]  ;;  %v48_v23 = vld [vmem:[%s1464_s0 + $0xa0] sm:$0xff] }
  0x17   :  { %954 = vmatpush3.bf16.msra.mxu1 %v951_v56  ;;  %v51_v24 = vld [vmem:[%s1464_s0 + $0xb8] sm:$0xff]  ;;  %v50_v25 = vld [vmem:[%s1464_s0 + $0xb0] sm:$0xff]  ;;  %v53_v26 = vld [vmem:[%s1464_s0 + $0xc8] sm:$0xff] }
  0x18   :  { %956 = vmatprep.subr.bf16.mxu1 %v955_v60  ;;  %v52_v27 = vld [vmem:[%s1464_s0 + $0xc0] sm:$0xff]  ;;  %v55_v28 = vld [vmem:[%s1464_s0 + $0xd8] sm:$0xff]  ;;  %v54_v29 = vld [vmem:[%s1464_s0 + $0xd0] sm:$0xff] }
  0x19   :  { %934 = vmatpush3.bf16.msra.mxu0 %v933_v38  ;;  %v57_v30 = vld [vmem:[%s1464_s0 + $0xe8] sm:$0xff]  ;;  %v56_v31 = vld [vmem:[%s1464_s0 + $0xe0] sm:$0xff]  ;;  %v59_v32 = vld [vmem:[%s1464_s0 + $0xf8] sm:$0xff] }
  0x1a   :  { %936 = vmatprep.subr.bf16.mxu0 %v935_v41  ;;  %v58_v33 = vld [vmem:[%s1464_s0 + $0xf0] sm:$0xff]  ;;  %v256_v34 = vld [vmem:[%s1465_s3 + $0x60] sm:$0xff]  ;;  %v257_v35 = vld [vmem:[%s1465_s3 + $0x68] sm:$0xff] }
  0x1b   :  { %958 = vmatpush3.bf16.msra.mxu1 %v955_v60  ;;  %v967_v36 = vpack.c.bf16 %v257_v35, %v256_v34  ;;  %v258_v37 = vld [vmem:[%s1465_s3 + $0x70] sm:$0xff]  ;;  %v259_v38 = vld [vmem:[%s1465_s3 + $0x78] sm:$0xff]  ;;  %v428_v40 = vld [vmem:[%s1466_s5] sm:$0xff] }
  0x1c   :  { %960 = vmatprep.subr.bf16.mxu1 %v959_v1  ;;  %v971_v39 = vpack.c.bf16 %v259_v38, %v258_v37  ;;  %v429_v41 = vld [vmem:[%s1466_s5 + $0x8] sm:$0xff]  ;;  %v1301_v45 = vld [vmem:[%s1467_s2] ss:$0 sm:$0xff]  ;;  %v430_v50 = vld [vmem:[%s1466_s5 + $0x10] sm:$0xff] }
  0x1d   :  { %938 = vmatpush3.bf16.msra.mxu0 %v937_v52  ;;  %v975_v42 = vpack.c.bf16 %v429_v41, %v428_v40  ;;  %v431_v51 = vld [vmem:[%s1466_s5 + $0x18] sm:$0xff]  ;;  %v432_v57 = vld [vmem:[%s1466_s5 + $0x20] sm:$0xff]  ;;  %v433_v58 = vld [vmem:[%s1466_s5 + $0x28] sm:$0xff] }
  0x1e   :  { %940 = vmatprep.subr.bf16.mxu0 %v939_v53  ;;  %v979_v55 = vpack.c.bf16 %v431_v51, %v430_v50  ;;  %v983_v62 = vpack.c.bf16 %v433_v58, %v432_v57 }
  0x1f   :  { %962 = vmatpush3.bf16.msra.mxu1 %v959_v1  ;;  %v435_v1 = vld [vmem:[%s1466_s5 + $0x38] sm:$0xff] }
  0x20   :  { %964 = vmatprep.subr.bf16.mxu1 %v963_v6 }
  0x21   :  { %942 = vmatpush3.bf16.msra.mxu0 %v941_v59 }
  0x23   :  { %966 = vmatpush3.bf16.msra.mxu1 %v963_v6 }
  0x24   :  { %164 = vmatmul.mubr.f32.vlgmr.msra.gmra.mrb[0].mxu0 %v28_v63  ;;  %968 = vmatprep.subr.bf16.mxu1 %v967_v36 }
  0x25   :  { %168 = vmatprep.mubr.f32.mxu0 %v31_v0  ;;  %v434_v0 = vld [vmem:[%s1466_s5 + $0x30] sm:$0xff] }
  0x27   :  { %970 = vmatpush3.bf16.msra.mxu1 %v967_v36 }
  0x28   :  { %169 = vmatmul.mubr.f32.gmra.mrb[2].mxu0 %v30_v4  ;;  %972 = vmatprep.subr.bf16.mxu1 %v971_v39 }
  0x29   :  { %173 = vmatprep.mubr.f32.mxu0 %v33_v5  ;;  %v987_v5 = vpack.c.bf16 %v435_v1, %v434_v0  ;;  %v443_v0 = vld [vmem:[%s1466_s5 + $0x78] sm:$0xff] }
  0x2b   :  { %974 = vmatpush3.bf16.msra.mxu1 %v971_v39 }
  0x2c   :  { %174 = vmatmul.mubr.f32.gmra.mrb[4].mxu0 %v32_v7  ;;  %976 = vmatprep.subr.bf16.mxu1 %v975_v42  ;;  %v436_v7 = vld [vmem:[%s1466_s5 + $0x40] sm:$0xff] }
  0x2d   :  { %178 = vmatprep.mubr.f32.mxu0 %v35_v8  ;;  %v437_v8 = vld [vmem:[%s1466_s5 + $0x48] sm:$0xff] }
  0x30   :  { %179 = vmatmul.mubr.f32.gmra.mrb[6].mxu0 %v34_v9 }
  0x31   :  { %183 = vmatprep.mubr.f32.mxu0 %v37_v10 }
  0x34   :  { %184 = vmatmul.mubr.f32.gmra.mrb[8].mxu0 %v36_v11 }
  0x35   :  { %188 = vmatprep.mubr.f32.mxu0 %v39_v12  ;;  %v991_v12 = vpack.c.bf16 %v437_v8, %v436_v7 }
  0x38   :  { %189 = vmatmul.mubr.f32.gmra.mrb[10].mxu0 %v38_v13 }
  0x39   :  { %193 = vmatprep.mubr.f32.mxu0 %v41_v14  ;;  %v438_v14 = vld [vmem:[%s1466_s5 + $0x50] sm:$0xff] }
  0x3c   :  { %194 = vmatmul.mubr.f32.gmra.mrb[12].mxu0 %v40_v15  ;;  %v439_v15 = vld [vmem:[%s1466_s5 + $0x58] sm:$0xff] }
  0x3d   :  { %198 = vmatprep.mubr.f32.mxu0 %v43_v16 }
  0x40   :  { %199 = vmatmul.mubr.f32.gmra.mrb[14].mxu0 %v42_v17 }
  0x41   :  { %203 = vmatprep.mubr.f32.mxu0 %v45_v18 }
  0x44   :  { %204 = vmatmul.mubr.f32.gmra.mrb[16].mxu0 %v44_v19  ;;  %v995_v19 = vpack.c.bf16 %v439_v15, %v438_v14 }
  0x45   :  { %208 = vmatprep.mubr.f32.mxu0 %v47_v20 }
  0x48   :  { %209 = vmatmul.mubr.f32.gmra.mrb[18].mxu0 %v46_v21  ;;  %v440_v21 = vld [vmem:[%s1466_s5 + $0x60] sm:$0xff] }
  0x49   :  { %213 = vmatprep.mubr.f32.mxu0 %v49_v22  ;;  %v441_v22 = vld [vmem:[%s1466_s5 + $0x68] sm:$0xff] }
  0x4c   :  { %214 = vmatmul.mubr.f32.gmra.mrb[20].mxu0 %v48_v23 }
  0x4d   :  { %218 = vmatprep.mubr.f32.mxu0 %v51_v24 }
  0x50   :  { %219 = vmatmul.mubr.f32.gmra.mrb[22].mxu0 %v50_v25 }
  0x51   :  { %223 = vmatprep.mubr.f32.mxu0 %v53_v26  ;;  %v999_v26 = vpack.c.bf16 %v441_v22, %v440_v21 }
  0x54   :  { %224 = vmatmul.mubr.f32.gmra.mrb[24].mxu0 %v52_v27 }
  0x55   :  { %228 = vmatprep.mubr.f32.mxu0 %v55_v28 }
  0x58   :  { %229 = vmatmul.mubr.f32.gmra.mrb[26].mxu0 %v54_v29 }
  0x59   :  { %233 = vmatprep.mubr.f32.mxu0 %v57_v30 }
  0x5c   :  { %234 = vmatmul.mubr.f32.gmra.mrb[28].mxu0 %v56_v31 }
  0x5d   :  { %238 = vmatprep.mubr.f32.mxu0 %v59_v32 }
  0x60   :  { %239 = vmatmul.mubr.f32.gmra.mrb[30].mxu0 %v58_v33 }
  0xf7   :  { %v687_v43 = vpop.f32.mrb[0].mxu0 }
  0xf8   :  { %v688_v44 = vpop.f32.mrb[1].mxu0 }
  0xf9   :  { %v689_v46 = vadd.f32 %v688_v44, %v687_v43 }
  0xfb   :  { %v690_v47 = vpop.f32.mrb[2].mxu0  ;;  %v166_v48 = vadd.f32 %v689_v46, %v1301_v45 }
  0xfc   :  { %v691_v49 = vpop.f32.mrb[3].mxu0 }
  0xfd   :  { %v692_v52 = vadd.f32 %v691_v49, %v690_v47  ;;  %831 = vmatprep.mubr.f32.mxu1 %v166_v48  ;;  %612 = vst [vmem:[%s1468_s7] sm:$0xff] %v166_v48 }
  0xff   :  { %v171_v53 = vadd.f32 %v692_v52, %v1301_v45  ;;  %v693_v54 = vpop.f32.mrb[4].mxu0 }
 0x100   :  { %v694_v56 = vpop.f32.mrb[5].mxu0 }
 0x101   :  { %613 = vst [vmem:[%s1468_s7 + $0x8] sm:$0xff] %v171_v53  ;;  %v695_v59 = vadd.f32 %v694_v56, %v693_v54  ;;  %832 = vmatmul.mubr.f32.vlgmr.msra.gmra.mrb[0].mxu1 %v171_v53 }
 0x102   :  { %978 = vmatpush3.bf16.msra.mxu1 %v975_v42 }
 0x103   :  { %v176_v60 = vadd.f32 %v695_v59, %v1301_v45  ;;  %v696_v61 = vpop.f32.mrb[6].mxu0  ;;  %980 = vmatprep.subr.bf16.mxu1 %v979_v55 }
 0x104   :  { %v697_v63 = vpop.f32.mrb[7].mxu0 }
 0x105   :  { %614 = vst [vmem:[%s1468_s7 + $0x10] sm:$0xff] %v176_v60  ;;  %v698_v2 = vadd.f32 %v697_v63, %v696_v61  ;;  %834 = vmatprep.mubr.f32.mxu1 %v176_v60  ;;  %v442_v63 = vld [vmem:[%s1466_s5 + $0x70] sm:$0xff] }
 0x106   :  { %982 = vmatpush3.bf16.msra.mxu1 %v979_v55  ;;  %v1003_v1 = vpack.c.bf16 %v443_v0, %v442_v63 }
 0x107   :  { %v181_v3 = vadd.f32 %v698_v2, %v1301_v45  ;;  %v699_v4 = vpop.f32.mrb[8].mxu0  ;;  %984 = vmatprep.subr.bf16.mxu1 %v983_v62 }
 0x108   :  { %v700_v6 = vpop.f32.mrb[9].mxu0 }
 0x109   :  { %615 = vst [vmem:[%s1468_s7 + $0x18] sm:$0xff] %v181_v3  ;;  %v701_v9 = vadd.f32 %v700_v6, %v699_v4  ;;  %835 = vmatmul.mubr.f32.gmra.mrb[2].mxu1 %v181_v3 }
 0x10a   :  { %986 = vmatpush3.bf16.msra.mxu1 %v983_v62 }
 0x10b   :  { %v186_v10 = vadd.f32 %v701_v9, %v1301_v45  ;;  %v702_v11 = vpop.f32.mrb[10].mxu0  ;;  %988 = vmatprep.subr.bf16.mxu1 %v987_v5 }
 0x10c   :  { %v703_v13 = vpop.f32.mrb[11].mxu0 }
 0x10d   :  { %616 = vst [vmem:[%s1468_s7 + $0x20] sm:$0xff] %v186_v10  ;;  %v704_v16 = vadd.f32 %v703_v13, %v702_v11  ;;  %837 = vmatprep.mubr.f32.mxu1 %v186_v10 }
 0x10e   :  { %990 = vmatpush3.bf16.msra.mxu1 %v987_v5 }
 0x10f   :  { %v191_v17 = vadd.f32 %v704_v16, %v1301_v45  ;;  %v705_v18 = vpop.f32.mrb[12].mxu0  ;;  %992 = vmatprep.subr.bf16.mxu1 %v991_v12 }
 0x110   :  { %v706_v20 = vpop.f32.mrb[13].mxu0 }
 0x111   :  { %617 = vst [vmem:[%s1468_s7 + $0x28] sm:$0xff] %v191_v17  ;;  %v707_v23 = vadd.f32 %v706_v20, %v705_v18  ;;  %838 = vmatmul.mubr.f32.gmra.mrb[4].mxu1 %v191_v17 }
 0x112   :  { %994 = vmatpush3.bf16.msra.mxu1 %v991_v12 }
 0x113   :  { %v196_v24 = vadd.f32 %v707_v23, %v1301_v45  ;;  %v708_v25 = vpop.f32.mrb[14].mxu0  ;;  %996 = vmatprep.subr.bf16.mxu1 %v995_v19 }
 0x114   :  { %v709_v27 = vpop.f32.mrb[15].mxu0 }
 0x115   :  { %618 = vst [vmem:[%s1468_s7 + $0x30] sm:$0xff] %v196_v24  ;;  %v710_v28 = vadd.f32 %v709_v27, %v708_v25  ;;  %840 = vmatprep.mubr.f32.mxu1 %v196_v24 }
 0x116   :  { %998 = vmatpush3.bf16.msra.mxu1 %v995_v19 }
 0x117   :  { %v201_v29 = vadd.f32 %v710_v28, %v1301_v45  ;;  %v711_v30 = vpop.f32.mrb[16].mxu0  ;;  %1000 = vmatprep.subr.bf16.mxu1 %v999_v26 }
 0x118   :  { %v712_v31 = vpop.f32.mrb[17].mxu0 }
 0x119   :  { %619 = vst [vmem:[%s1468_s7 + $0x38] sm:$0xff] %v201_v29  ;;  %v713_v32 = vadd.f32 %v712_v31, %v711_v30  ;;  %841 = vmatmul.mubr.f32.gmra.mrb[6].mxu1 %v201_v29 }
 0x11a   :  { %1002 = vmatpush3.bf16.msra.mxu1 %v999_v26 }
 0x11b   :  { %v206_v33 = vadd.f32 %v713_v32, %v1301_v45  ;;  %v714_v34 = vpop.f32.mrb[18].mxu0  ;;  %1004 = vmatprep.subr.bf16.mxu1 %v1003_v1 }
 0x11c   :  { %v715_v35 = vpop.f32.mrb[19].mxu0 }
 0x11d   :  { %620 = vst [vmem:[%s1468_s7 + $0x40] sm:$0xff] %v206_v33  ;;  %v716_v36 = vadd.f32 %v715_v35, %v714_v34  ;;  %843 = vmatprep.mubr.f32.mxu1 %v206_v33 }
 0x11e   :  { %1006 = vmatpush3.bf16.msra.mxu1 %v1003_v1 }
 0x11f   :  { %v211_v37 = vadd.f32 %v716_v36, %v1301_v45  ;;  %v717_v38 = vpop.f32.mrb[20].mxu0 }
 0x120   :  { %v718_v39 = vpop.f32.mrb[21].mxu0 }
 0x121   :  { %621 = vst [vmem:[%s1468_s7 + $0x48] sm:$0xff] %v211_v37  ;;  %v719_v40 = vadd.f32 %v718_v39, %v717_v38  ;;  %844 = vmatmul.mubr.f32.gmra.mrb[8].mxu1 %v211_v37 }
 0x123   :  { %v216_v41 = vadd.f32 %v719_v40, %v1301_v45  ;;  %v720_v42 = vpop.f32.mrb[22].mxu0 }
 0x124   :  { %v721_v43 = vpop.f32.mrb[23].mxu0 }
 0x125   :  { %622 = vst [vmem:[%s1468_s7 + $0x50] sm:$0xff] %v216_v41  ;;  %v722_v44 = vadd.f32 %v721_v43, %v720_v42  ;;  %846 = vmatprep.mubr.f32.mxu1 %v216_v41 }
 0x127   :  { %v221_v46 = vadd.f32 %v722_v44, %v1301_v45  ;;  %v723_v47 = vpop.f32.mrb[24].mxu0 }
 0x128   :  { %v724_v48 = vpop.f32.mrb[25].mxu0 }
 0x129   :  { %623 = vst [vmem:[%s1468_s7 + $0x58] sm:$0xff] %v221_v46  ;;  %v725_v49 = vadd.f32 %v724_v48, %v723_v47  ;;  %847 = vmatmul.mubr.f32.gmra.mrb[10].mxu1 %v221_v46 }
 0x12b   :  { %v226_v50 = vadd.f32 %v725_v49, %v1301_v45  ;;  %v726_v51 = vpop.f32.mrb[26].mxu0 }
 0x12c   :  { %v727_v52 = vpop.f32.mrb[27].mxu0 }
 0x12d   :  { %624 = vst [vmem:[%s1468_s7 + $0x60] sm:$0xff] %v226_v50  ;;  %v728_v53 = vadd.f32 %v727_v52, %v726_v51  ;;  %849 = vmatprep.mubr.f32.mxu1 %v226_v50  ;;  %v654_v51 = vld [vmem:[%s1470_s6] ss:$0 sm:$0xff] }
 0x12f   :  { %v231_v54 = vadd.f32 %v728_v53, %v1301_v45  ;;  %v729_v55 = vpop.f32.mrb[28].mxu0 }
 0x130   :  { %v730_v56 = vpop.f32.mrb[29].mxu0 }
 0x131   :  { %625 = vst [vmem:[%s1468_s7 + $0x68] sm:$0xff] %v231_v54  ;;  %v731_v57 = vadd.f32 %v730_v56, %v729_v55  ;;  %850 = vmatmul.mubr.f32.gmra.mrb[12].mxu1 %v231_v54 }
 0x133   :  { %v236_v58 = vadd.f32 %v731_v57, %v1301_v45  ;;  %v732_v59 = vpop.f32.mrb[30].mxu0 }
 0x134   :  { %v733_v60 = vpop.f32.mrb[31].mxu0 }
 0x135   :  { %626 = vst [vmem:[%s1468_s7 + $0x70] sm:$0xff] %v236_v58  ;;  %v734_v61 = vadd.f32 %v733_v60, %v732_v59  ;;  %852 = vmatprep.mubr.f32.mxu1 %v236_v58 }
 0x137   :  { %v241_v62 = vadd.f32 %v734_v61, %v1301_v45  ;;  %v653_v45 = vld [vmem:[%s1469_s4] ss:$0 sm:$0xff] }
 0x139   :  { %627 = vst [vmem:[%s1468_s7 + $0x78] sm:$0xff] %v241_v62  ;;  %853 = vmatmul.mubr.f32.gmra.mrb[14].mxu1 %v241_v62 }
 0x1d4   :  { %v833_v2 = vpop.f32.mrb[0].mxu1 }
 0x1d5   :  { %v339_v3 = vadd.f32 %v833_v2, %v653_v45  ;;  %v333_v4 = vpop.f32.mrb[1].mxu1 }
 0x1d6   :  { %v334_v5 = vadd.f32 %v653_v45, %v333_v4 }
 0x1d7   :  { %v413_v7 = vmax.f32 %v339_v3, 0.0 }
 0x1d8   :  { %v412_v6 = vmax.f32 %v334_v5, 0.0 }
 0x1da   :  { %887 = vmatprep.mubr.f32.mxu1 %v412_v6 }
 0x1db   :  { %888 = vmatmul.mubr.f32.vlgmr.msra.gmra.mrb[16].mxu1 %v413_v7 }
 0x1dc   :  { %v836_v8 = vpop.f32.mrb[2].mxu1 }
 0x1dd   :  { %v349_v9 = vadd.f32 %v836_v8, %v653_v45  ;;  %v343_v10 = vpop.f32.mrb[3].mxu1 }
 0x1de   :  { %v344_v11 = vadd.f32 %v653_v45, %v343_v10 }
 0x1df   :  { %v415_v13 = vmax.f32 %v349_v9, 0.0 }
 0x1e0   :  { %v414_v12 = vmax.f32 %v344_v11, 0.0 }
 0x1e2   :  { %890 = vmatprep.mubr.f32.mxu1 %v414_v12 }
 0x1e3   :  { %891 = vmatmul.mubr.f32.gmra.mrb[18].mxu1 %v415_v13 }
 0x1e4   :  { %v839_v14 = vpop.f32.mrb[4].mxu1 }
 0x1e5   :  { %v359_v15 = vadd.f32 %v839_v14, %v653_v45  ;;  %v353_v16 = vpop.f32.mrb[5].mxu1 }
 0x1e6   :  { %v354_v17 = vadd.f32 %v653_v45, %v353_v16 }
 0x1e7   :  { %v417_v19 = vmax.f32 %v359_v15, 0.0 }
 0x1e8   :  { %v416_v18 = vmax.f32 %v354_v17, 0.0 }
 0x1ea   :  { %893 = vmatprep.mubr.f32.mxu1 %v416_v18 }
 0x1eb   :  { %894 = vmatmul.mubr.f32.gmra.mrb[20].mxu1 %v417_v19 }
 0x1ec   :  { %v842_v20 = vpop.f32.mrb[6].mxu1 }
 0x1ed   :  { %v369_v21 = vadd.f32 %v842_v20, %v653_v45  ;;  %v363_v22 = vpop.f32.mrb[7].mxu1 }
 0x1ee   :  { %v364_v23 = vadd.f32 %v653_v45, %v363_v22 }
 0x1ef   :  { %v419_v25 = vmax.f32 %v369_v21, 0.0 }
 0x1f0   :  { %v418_v24 = vmax.f32 %v364_v23, 0.0 }
 0x1f2   :  { %896 = vmatprep.mubr.f32.mxu1 %v418_v24 }
 0x1f3   :  { %897 = vmatmul.mubr.f32.gmra.mrb[22].mxu1 %v419_v25 }
 0x1f4   :  { %v845_v26 = vpop.f32.mrb[8].mxu1 }
 0x1f5   :  { %v379_v27 = vadd.f32 %v845_v26, %v653_v45  ;;  %v373_v28 = vpop.f32.mrb[9].mxu1 }
 0x1f6   :  { %v374_v29 = vadd.f32 %v653_v45, %v373_v28 }
 0x1f7   :  { %v421_v31 = vmax.f32 %v379_v27, 0.0 }
 0x1f8   :  { %v420_v30 = vmax.f32 %v374_v29, 0.0 }
 0x1fa   :  { %899 = vmatprep.mubr.f32.mxu1 %v420_v30 }
 0x1fb   :  { %900 = vmatmul.mubr.f32.gmra.mrb[24].mxu1 %v421_v31 }
 0x1fc   :  { %v848_v32 = vpop.f32.mrb[10].mxu1 }
 0x1fd   :  { %v389_v33 = vadd.f32 %v848_v32, %v653_v45  ;;  %v383_v34 = vpop.f32.mrb[11].mxu1 }
 0x1fe   :  { %v384_v35 = vadd.f32 %v653_v45, %v383_v34 }
 0x1ff   :  { %v423_v37 = vmax.f32 %v389_v33, 0.0 }
 0x200   :  { %v422_v36 = vmax.f32 %v384_v35, 0.0 }
 0x202   :  { %902 = vmatprep.mubr.f32.mxu1 %v422_v36 }
 0x203   :  { %903 = vmatmul.mubr.f32.gmra.mrb[26].mxu1 %v423_v37 }
 0x204   :  { %v851_v38 = vpop.f32.mrb[12].mxu1 }
 0x205   :  { %v399_v39 = vadd.f32 %v851_v38, %v653_v45  ;;  %v393_v40 = vpop.f32.mrb[13].mxu1 }
 0x206   :  { %v394_v41 = vadd.f32 %v653_v45, %v393_v40 }
 0x207   :  { %v425_v43 = vmax.f32 %v399_v39, 0.0 }
 0x208   :  { %v424_v42 = vmax.f32 %v394_v41, 0.0 }
 0x20a   :  { %905 = vmatprep.mubr.f32.mxu1 %v424_v42 }
 0x20b   :  { %906 = vmatmul.mubr.f32.gmra.mrb[28].mxu1 %v425_v43 }
 0x20c   :  { %v854_v44 = vpop.f32.mrb[14].mxu1 }
 0x20d   :  { %v409_v46 = vadd.f32 %v854_v44, %v653_v45  ;;  %v403_v47 = vpop.f32.mrb[15].mxu1 }
 0x20e   :  { %v404_v48 = vadd.f32 %v653_v45, %v403_v47 }
 0x20f   :  { %v427_v50 = vmax.f32 %v409_v46, 0.0 }
 0x210   :  { %v426_v49 = vmax.f32 %v404_v48, 0.0 }
 0x212   :  { %908 = vmatprep.mubr.f32.mxu1 %v426_v49 }
 0x213   :  { %909 = vmatmul.mubr.f32.gmra.mrb[30].mxu1 %v427_v50 }
 0x2ae   :  { %v889_v52 = vpop.f32.mrb[16].mxu1 }
 0x2af   :  { %v523_v53 = vadd.f32 %v889_v52, %v654_v51  ;;  %v517_v54 = vpop.f32.mrb[17].mxu1 }
 0x2b0   :  { %v518_v55 = vadd.f32 %v654_v51, %v517_v54 }
 0x2b1   :  { %v597_v56 = vmax.f32 %v523_v53, 0.0 }
 0x2b2   :  { %v596_v57 = vmax.f32 %v518_v55, 0.0 }
 0x2b3   :  { %629 = vst [vmem:[%s1471_s8 + $0x8] sm:$0xff] %v597_v56 }
 0x2b4   :  { %628 = vst [vmem:[%s1471_s8] sm:$0xff] %v596_v57 }
 0x2b6   :  { %v892_v58 = vpop.f32.mrb[18].mxu1 }
 0x2b7   :  { %v533_v59 = vadd.f32 %v892_v58, %v654_v51  ;;  %v527_v60 = vpop.f32.mrb[19].mxu1 }
 0x2b8   :  { %v528_v61 = vadd.f32 %v654_v51, %v527_v60 }
 0x2b9   :  { %v599_v62 = vmax.f32 %v533_v59, 0.0 }
 0x2ba   :  { %v598_v63 = vmax.f32 %v528_v61, 0.0 }
 0x2bb   :  { %631 = vst [vmem:[%s1471_s8 + $0x18] sm:$0xff] %v599_v62 }
 0x2bc   :  { %630 = vst [vmem:[%s1471_s8 + $0x10] sm:$0xff] %v598_v63 }
 0x2be   :  { %v895_v0 = vpop.f32.mrb[20].mxu1 }
 0x2bf   :  { %v543_v1 = vadd.f32 %v895_v0, %v654_v51  ;;  %v537_v45 = vpop.f32.mrb[21].mxu1 }
 0x2c0   :  { %v538_v2 = vadd.f32 %v654_v51, %v537_v45 }
 0x2c1   :  { %v601_v3 = vmax.f32 %v543_v1, 0.0 }
 0x2c2   :  { %v600_v4 = vmax.f32 %v538_v2, 0.0 }
 0x2c3   :  { %633 = vst [vmem:[%s1471_s8 + $0x28] sm:$0xff] %v601_v3 }
 0x2c4   :  { %632 = vst [vmem:[%s1471_s8 + $0x20] sm:$0xff] %v600_v4 }
 0x2c6   :  { %v898_v5 = vpop.f32.mrb[22].mxu1 }
 0x2c7   :  { %v553_v6 = vadd.f32 %v898_v5, %v654_v51  ;;  %v547_v7 = vpop.f32.mrb[23].mxu1 }
 0x2c8   :  { %v548_v8 = vadd.f32 %v654_v51, %v547_v7 }
 0x2c9   :  { %v603_v9 = vmax.f32 %v553_v6, 0.0 }
 0x2ca   :  { %v602_v10 = vmax.f32 %v548_v8, 0.0 }
 0x2cb   :  { %635 = vst [vmem:[%s1471_s8 + $0x38] sm:$0xff] %v603_v9 }
 0x2cc   :  { %634 = vst [vmem:[%s1471_s8 + $0x30] sm:$0xff] %v602_v10 }
 0x2ce   :  { %v901_v11 = vpop.f32.mrb[24].mxu1 }
 0x2cf   :  { %v563_v12 = vadd.f32 %v901_v11, %v654_v51  ;;  %v557_v13 = vpop.f32.mrb[25].mxu1 }
 0x2d0   :  { %v558_v14 = vadd.f32 %v654_v51, %v557_v13 }
 0x2d1   :  { %v605_v15 = vmax.f32 %v563_v12, 0.0 }
 0x2d2   :  { %v604_v16 = vmax.f32 %v558_v14, 0.0 }
 0x2d3   :  { %637 = vst [vmem:[%s1471_s8 + $0x48] sm:$0xff] %v605_v15 }
 0x2d4   :  { %636 = vst [vmem:[%s1471_s8 + $0x40] sm:$0xff] %v604_v16 }
 0x2d6   :  { %v904_v17 = vpop.f32.mrb[26].mxu1 }
 0x2d7   :  { %v573_v18 = vadd.f32 %v904_v17, %v654_v51  ;;  %v567_v19 = vpop.f32.mrb[27].mxu1 }
 0x2d8   :  { %v568_v20 = vadd.f32 %v654_v51, %v567_v19 }
 0x2d9   :  { %v607_v21 = vmax.f32 %v573_v18, 0.0 }
 0x2da   :  { %v606_v22 = vmax.f32 %v568_v20, 0.0 }
 0x2db   :  { %639 = vst [vmem:[%s1471_s8 + $0x58] sm:$0xff] %v607_v21 }
 0x2dc   :  { %638 = vst [vmem:[%s1471_s8 + $0x50] sm:$0xff] %v606_v22 }
 0x2de   :  { %v907_v23 = vpop.f32.mrb[28].mxu1 }
 0x2df   :  { %v583_v24 = vadd.f32 %v907_v23, %v654_v51  ;;  %v577_v25 = vpop.f32.mrb[29].mxu1 }
 0x2e0   :  { %v578_v26 = vadd.f32 %v654_v51, %v577_v25 }
 0x2e1   :  { %v609_v27 = vmax.f32 %v583_v24, 0.0 }
 0x2e2   :  { %v608_v28 = vmax.f32 %v578_v26, 0.0 }
 0x2e3   :  { %641 = vst [vmem:[%s1471_s8 + $0x68] sm:$0xff] %v609_v27 }
 0x2e4   :  { %640 = vst [vmem:[%s1471_s8 + $0x60] sm:$0xff] %v608_v28 }
 0x2e6   :  { %v910_v29 = vpop.f32.mrb[30].mxu1 }
 0x2e7   :  { %v593_v30 = vadd.f32 %v910_v29, %v654_v51  ;;  %v587_v31 = vpop.f32.mrb[31].mxu1 }
 0x2e8   :  { %v588_v32 = vadd.f32 %v654_v51, %v587_v31 }
 0x2e9   :  { %v611_v33 = vmax.f32 %v593_v30, 0.0 }
 0x2ea   :  { %v610_v34 = vmax.f32 %v588_v32, 0.0 }
 0x2eb   :  { %643 = vst [vmem:[%s1471_s8 + $0x78] sm:$0xff] %v611_v33 }
 0x2ec   :  { %642 = vst [vmem:[%s1471_s8 + $0x70] sm:$0xff] %v610_v34 }

// kernel: ama_filter_forward.20
= control target key start
LH: loop header
LB: loop body
LE: loop exit
PB: predicated region body
PF: predicated region fallthrough
CT: control target
= control target key end

     0   :  { %v555_v3 = vmov 1.0   ;;  %s966_s1 = inlined_call_operand.vmem [shape: f32[128,256], index: 1, kind: input, shape index: {}, may-alias: {0,1}]   ;;  %s967_s0 = inlined_call_operand.vmem [shape: f32[128,256], index: 0, kind: input, shape index: {}, may-alias: {0,1}]   ;;  %s968_s2 = inlined_call_operand.vmem [shape: f32[128,128], index: 2, kind: output, shape index: {}]  }
   0x1   :  { %v44_v0 = vld [vmem:[%s966_s1 + $0x8] sm:$0xff]  ;;  %v46_v1 = vld [vmem:[%s966_s1 + $0x18] sm:$0xff]  ;;  %v43_v2 = vld [vmem:[%s966_s1] sm:$0xff]  ;;  %396 = vmatprep.mubr.f32.mxu1 %v555_v3 }
   0x2   :  { %v490_v4 = vpack.c.bf16 %v46_v1, %v44_v0  ;;  %v45_v5 = vld [vmem:[%s966_s1 + $0x10] sm:$0xff]  ;;  %v301_v6 = vmul.f32 %v44_v0, %v44_v0  ;;  %v303_v7 = vmul.f32 %v46_v1, %v46_v1  ;;  %v300_v8 = vmul.f32 %v43_v2, %v43_v2  ;;  %v48_v9 = vld [vmem:[%s966_s1 + $0x28] sm:$0xff]  ;;  %v50_v10 = vld [vmem:[%s966_s1 + $0x38] sm:$0xff] }
   0x3   :  { %v492_v11 = vpack.c.bf16 %v45_v5, %v43_v2  ;;  %v302_v12 = vmul.f32 %v45_v5, %v45_v5  ;;  %v494_v13 = vpack.c.bf16 %v50_v10, %v48_v9  ;;  %v305_v14 = vmul.f32 %v48_v9, %v48_v9  ;;  %v47_v16 = vld [vmem:[%s966_s1 + $0x20] sm:$0xff]  ;;  %v49_v17 = vld [vmem:[%s966_s1 + $0x30] sm:$0xff]  ;;  %v52_v20 = vld [vmem:[%s966_s1 + $0x48] sm:$0xff] }
   0x4   :  { %491 = vmatprep.subr.bf16.mxu0 %v490_v4  ;;  %v522_v15 = vpack.c.bf16 %v303_v7, %v301_v6  ;;  %v307_v18 = vmul.f32 %v50_v10, %v50_v10  ;;  %v54_v21 = vld [vmem:[%s966_s1 + $0x58] sm:$0xff]  ;;  %v304_v23 = vmul.f32 %v47_v16, %v47_v16  ;;  %v306_v24 = vmul.f32 %v49_v17, %v49_v17  ;;  %v12_v30 = vld [vmem:[%s967_s0 + $0x8] sm:$0xff]  ;;  %v51_v31 = vld [vmem:[%s966_s1 + $0x40] sm:$0xff] }
   0x5   :  { %493 = vmatpush1.bf16.xpose.msra.mxu0 %v492_v11  ;;  %v524_v19 = vpack.c.bf16 %v302_v12, %v300_v8  ;;  %v309_v25 = vmul.f32 %v52_v20, %v52_v20  ;;  %v311_v26 = vmul.f32 %v54_v21, %v54_v21  ;;  %v496_v27 = vpack.c.bf16 %v49_v17, %v47_v16  ;;  %v53_v32 = vld [vmem:[%s966_s1 + $0x50] sm:$0xff]  ;;  %v56_v34 = vld [vmem:[%s966_s1 + $0x68] sm:$0xff]  ;;  %v58_v35 = vld [vmem:[%s966_s1 + $0x78] sm:$0xff] }
   0x6   :  { %523 = vmatprep.subr.bf16.mxu1 %v522_v15  ;;  %495 = vmatprep.subr.bf16.mxu0 %v494_v13  ;;  %v526_v22 = vpack.c.bf16 %v307_v18, %v305_v14  ;;  %v498_v28 = vpack.c.bf16 %v54_v21, %v52_v20  ;;  %v528_v29 = vpack.c.bf16 %v306_v24, %v304_v23  ;;  %v55_v43 = vld [vmem:[%s966_s1 + $0x60] sm:$0xff]  ;;  %v57_v44 = vld [vmem:[%s966_s1 + $0x70] sm:$0xff]  ;;  %v60_v46 = vld [vmem:[%s966_s1 + $0x88] sm:$0xff] }
   0x7   :  { %525 = vmatpush1.bf16.xpose.msra.mxu1 %v524_v19  ;;  %v530_v33 = vpack.c.bf16 %v311_v26, %v309_v25  ;;  %139 = vmatprep.mubr.f32.mxu0 %v12_v30  ;;  %v308_v36 = vmul.f32 %v51_v31, %v51_v31  ;;  %v310_v37 = vmul.f32 %v53_v32, %v53_v32  ;;  %v62_v47 = vld [vmem:[%s966_s1 + $0x98] sm:$0xff]  ;;  %v632_v51 = vld [vmem:[%s967_s0] sm:$0xff]  ;;  %v642_v56 = vld [vmem:[%s967_s0 + $0x10] sm:$0xff] }
   0x8   :  { %527 = vmatprep.subr.bf16.mxu1 %v526_v22  ;;  %v313_v38 = vmul.f32 %v56_v34, %v56_v34  ;;  %v315_v39 = vmul.f32 %v58_v35, %v58_v35  ;;  %v500_v40 = vpack.c.bf16 %v53_v32, %v51_v31  ;;  %v502_v41 = vpack.c.bf16 %v58_v35, %v56_v34  ;;  %v637_v55 = vld [vmem:[%s967_s0 + $0x18] sm:$0xff]  ;;  %v647_v57 = vld [vmem:[%s967_s0 + $0x28] sm:$0xff]  ;;  %v656_v61 = vld [vmem:[%s967_s0 + $0x20] sm:$0xff] }
   0x9   :  { %v532_v42 = vpack.c.bf16 %v310_v37, %v308_v36  ;;  %v312_v48 = vmul.f32 %v55_v43, %v55_v43  ;;  %v314_v49 = vmul.f32 %v57_v44, %v57_v44  ;;  %v221_v50 = vmul.f32 %v12_v30, %v12_v30  ;;  %v661_v62 = vld [vmem:[%s967_s0 + $0x38] sm:$0xff]  ;;  %v666_v63 = vld [vmem:[%s967_s0 + $0x30] sm:$0xff]  ;;  %v59_v7 = vld [vmem:[%s966_s1 + $0x80] sm:$0xff] }
   0xa   :  { %v534_v45 = vpack.c.bf16 %v315_v39, %v313_v38  ;;  %v504_v52 = vpack.c.bf16 %v57_v44, %v55_v43  ;;  %v317_v53 = vmul.f32 %v60_v46, %v60_v46  ;;  %v319_v54 = vmul.f32 %v62_v47, %v62_v47  ;;  %v61_v8 = vld [vmem:[%s966_s1 + $0x90] sm:$0xff]  ;;  %v64_v11 = vld [vmem:[%s966_s1 + $0xa8] sm:$0xff]  ;;  %v695_v13 = vld [vmem:[%s967_s0 + $0x40] sm:$0xff] }
   0xb   :  { %v506_v58 = vpack.c.bf16 %v62_v47, %v60_v46  ;;  %v223_v59 = vmul.f32 %v637_v55, %v637_v55  ;;  %v222_v60 = vmul.f32 %v642_v56, %v642_v56  ;;  %v220_v0 = vmul.f32 %v632_v51, %v632_v51  ;;  %v690_v12 = vld [vmem:[%s967_s0 + $0x48] sm:$0xff]  ;;  %v66_v15 = vld [vmem:[%s966_s1 + $0xb8] sm:$0xff]  ;;  %v712_v19 = vld [vmem:[%s967_s0 + $0x50] sm:$0xff] }
   0xc   :  { %v227_v1 = vmul.f32 %v661_v62, %v661_v62  ;;  %v226_v2 = vmul.f32 %v666_v63, %v666_v63  ;;  %v224_v4 = vmul.f32 %v656_v61, %v656_v61  ;;  %v225_v5 = vmul.f32 %v647_v57, %v647_v57  ;;  %v707_v18 = vld [vmem:[%s967_s0 + $0x58] sm:$0xff]  ;;  %v740_v34 = vld [vmem:[%s967_s0 + $0x70] sm:$0xff]  ;;  %v68_v44 = vld [vmem:[%s966_s1 + $0xc8] sm:$0xff] }
   0xd   :  { %497 = vmatpush1.bf16.xpose.msra.mxu0 %v496_v27  ;;  %v536_v6 = vpack.c.bf16 %v314_v49, %v312_v48  ;;  %v252_v9 = vadd.f32 %v221_v50, %v220_v0  ;;  %v538_v10 = vpack.c.bf16 %v319_v54, %v317_v53  ;;  %v229_v16 = vmul.f32 %v690_v12, %v690_v12  ;;  %v763_v46 = vld [vmem:[%s967_s0 + $0x80] sm:$0xff]  ;;  %v70_v47 = vld [vmem:[%s966_s1 + $0xd8] sm:$0xff] }
   0xe   :  { %499 = vmatprep.subr.bf16.mxu0 %v498_v28  ;;  %v258_v14 = vadd.f32 %v225_v5, %v224_v4  ;;  %v228_v17 = vmul.f32 %v695_v13, %v695_v13  ;;  %v255_v20 = vadd.f32 %v223_v59, %v222_v60  ;;  %v231_v21 = vmul.f32 %v707_v18, %v707_v18  ;;  %v721_v28 = vld [vmem:[%s967_s0 + $0x68] sm:$0xff]  ;;  %v775_v50 = vld [vmem:[%s967_s0 + $0x98] sm:$0xff]  ;;  %v794_v5 = vld [vmem:[%s967_s0 + $0xa0] sm:$0xff] }
   0xf   :  { %529 = vmatpush1.bf16.xpose.msra.mxu1 %v528_v29  ;;  %253 = vadd.xlane.f32.xlu0 %v252_v9  ;;  %v230_v22 = vmul.f32 %v712_v19, %v712_v19  ;;  %v261_v23 = vadd.f32 %v227_v1, %v226_v2  ;;  %v316_v24 = vmul.f32 %v59_v7, %v59_v7  ;;  %v726_v29 = vld [vmem:[%s967_s0 + $0x60] sm:$0xff]  ;;  %v789_v4 = vld [vmem:[%s967_s0 + $0xa8] sm:$0xff]  ;;  %v803_v9 = vld [vmem:[%s967_s0 + $0xb8] sm:$0xff] }
  0x10   :  { %531 = vmatprep.subr.bf16.mxu1 %v530_v33  ;;  %259 = vadd.xlane.f32.xlu1 %v258_v14  ;;  %v318_v25 = vmul.f32 %v61_v8, %v61_v8  ;;  %v321_v26 = vmul.f32 %v64_v11, %v64_v11  ;;  %v323_v27 = vmul.f32 %v66_v15, %v66_v15  ;;  %v735_v33 = vld [vmem:[%s967_s0 + $0x78] sm:$0xff] }
  0x11   :  { %v508_v30 = vpack.c.bf16 %v61_v8, %v59_v7  ;;  %v233_v31 = vmul.f32 %v721_v28, %v721_v28  ;;  %v232_v32 = vmul.f32 %v726_v29, %v726_v29  ;;  %v264_v35 = vadd.f32 %v229_v16, %v228_v17 }
  0x12   :  { %v510_v36 = vpack.c.bf16 %v66_v15, %v64_v11  ;;  %v235_v37 = vmul.f32 %v735_v33, %v735_v33  ;;  %v234_v38 = vmul.f32 %v740_v34, %v740_v34  ;;  %v267_v39 = vadd.f32 %v231_v21, %v230_v22  ;;  %v67_v21 = vld [vmem:[%s966_s1 + $0xc0] sm:$0xff]  ;;  %v69_v22 = vld [vmem:[%s966_s1 + $0xd0] sm:$0xff] }
  0x13   :  { %256 = vadd.xlane.f32.xlu0 %v255_v20  ;;  %v542_v43 = vpack.c.bf16 %v323_v27, %v321_v26  ;;  %v236_v49 = vmul.f32 %v763_v46, %v763_v46  ;;  %v270_v53 = vadd.f32 %v233_v31, %v232_v32  ;;  %v239_v54 = vmul.f32 %v775_v50, %v775_v50  ;;  %v831_v26 = vld [vmem:[%s967_s0 + $0xc0] sm:$0xff]  ;;  %v74_v27 = vld [vmem:[%s966_s1 + $0xf8] sm:$0xff] }
  0x14   :  { %262 = vadd.xlane.f32.xlu1 %v261_v23  ;;  %v273_v59 = vadd.f32 %v235_v37, %v234_v38  ;;  %v325_v1 = vmul.f32 %v68_v44, %v68_v44  ;;  %v327_v2 = vmul.f32 %v70_v47, %v70_v47  ;;  %v241_v7 = vmul.f32 %v789_v4, %v789_v4  ;;  %v843_v32 = vld [vmem:[%s967_s0 + $0xd8] sm:$0xff] }
  0x15   :  { %501 = vmatpush1.bf16.xpose.msra.mxu0 %v500_v40  ;;  %v540_v40 = vpack.c.bf16 %v318_v25, %v316_v24  ;;  %v240_v8 = vmul.f32 %v794_v5, %v794_v5  ;;  %v514_v14 = vpack.c.bf16 %v70_v47, %v68_v44  ;;  %v243_v15 = vmul.f32 %v803_v9, %v803_v9  ;;  %v72_v24 = vld [vmem:[%s966_s1 + $0xe8] sm:$0xff]  ;;  %v39_v47 = vld [vmem:[%s967_s0 + $0xe0] sm:$0xff] }
  0x16   :  { %503 = vmatprep.subr.bf16.mxu0 %v502_v41  ;;  %v63_v41 = vld [vmem:[%s966_s1 + $0xa0] sm:$0xff]  ;;  %v546_v23 = vpack.c.bf16 %v327_v2, %v325_v1  ;;  %v826_v25 = vld [vmem:[%s967_s0 + $0xc8] sm:$0xff]  ;;  %v244_v31 = vmul.f32 %v831_v26, %v831_v26  ;;  %v247_v37 = vmul.f32 %v843_v32, %v843_v32 }
  0x17   :  { %533 = vmatpush1.bf16.xpose.msra.mxu1 %v532_v42  ;;  %v65_v42 = vld [vmem:[%s966_s1 + $0xb0] sm:$0xff]  ;;  %265 = vadd.xlane.f32.xlu0 %v264_v35  ;;  %v320_v60 = vmul.f32 %v63_v41, %v63_v41  ;;  %v40_v44 = vld [vmem:[%s967_s0 + $0xe8] sm:$0xff] }
  0x18   :  { %535 = vmatprep.subr.bf16.mxu1 %v534_v45  ;;  %v758_v45 = vld [vmem:[%s967_s0 + $0x88] sm:$0xff]  ;;  %268 = vadd.xlane.f32.xlu1 %v267_v39  ;;  %v322_v0 = vmul.f32 %v65_v42, %v65_v42  ;;  %v848_v35 = vld [vmem:[%s967_s0 + $0xd0] sm:$0xff] }
  0x19   :  { %v237_v48 = vmul.f32 %v758_v45, %v758_v45  ;;  %v246_v38 = vmul.f32 %v848_v35, %v848_v35 }
  0x1a   :  { %v544_v20 = vpack.c.bf16 %v322_v0, %v320_v60  ;;  %v518_v60 = vpack.c.bf16 %v74_v27, %v72_v24 }
  0x1b   :  { %271 = vadd.xlane.f32.xlu0 %v270_v53  ;;  %v276_v11 = vadd.f32 %v237_v48, %v236_v49  ;;  %v516_v48 = vpack.c.bf16 %v69_v22, %v67_v21  ;;  %v249_v49 = vmul.f32 %v40_v44, %v40_v44  ;;  %v248_v53 = vmul.f32 %v39_v47, %v39_v47 }
  0x1c   :  { %274 = vadd.xlane.f32.xlu1 %v273_v59  ;;  %v291_v2 = vadd.f32 %v247_v37, %v246_v38 }
  0x1d   :  { %505 = vmatpush1.bf16.xpose.msra.mxu0 %v504_v52  ;;  %v780_v52 = vld [vmem:[%s967_s0 + $0x90] sm:$0xff] }
  0x1e   :  { %507 = vmatprep.subr.bf16.mxu0 %v506_v58  ;;  %v238_v58 = vmul.f32 %v780_v52, %v780_v52 }
  0x1f   :  { %537 = vmatpush1.bf16.xpose.msra.mxu1 %v536_v6  ;;  %v512_v6 = vpack.c.bf16 %v65_v42, %v63_v41  ;;  %277 = vadd.xlane.f32.xlu0 %v276_v11  ;;  %v326_v41 = vmul.f32 %v69_v22, %v69_v22  ;;  %v329_v42 = vmul.f32 %v72_v24, %v72_v24 }
  0x20   :  { %539 = vmatprep.subr.bf16.mxu1 %v538_v10  ;;  %v808_v10 = vld [vmem:[%s967_s0 + $0xb0] sm:$0xff]  ;;  %v279_v17 = vadd.f32 %v239_v54, %v238_v58  ;;  %v42_v54 = vld [vmem:[%s967_s0 + $0xf8] sm:$0xff] }
  0x21   :  { %v242_v16 = vmul.f32 %v808_v10, %v808_v10  ;;  %v41_v58 = vld [vmem:[%s967_s0 + $0xf0] sm:$0xff]  ;;  %v251_v0 = vmul.f32 %v42_v54, %v42_v54 }
  0x22   :  { %280 = vadd.xlane.f32.xlu1 %v279_v17  ;;  %v250_v1 = vmul.f32 %v41_v58, %v41_v58 }
  0x23   :  { %v285_v39 = vadd.f32 %v243_v15, %v242_v16 }
  0x24   :  { %v297_v15 = vadd.f32 %v251_v0, %v250_v1 }
  0x25   :  { %509 = vmatpush1.bf16.xpose.msra.mxu0 %v508_v30  ;;  %v245_v30 = vmul.f32 %v826_v25, %v826_v25 }
  0x26   :  { %511 = vmatprep.subr.bf16.mxu0 %v510_v36  ;;  %v282_v36 = vadd.f32 %v241_v7, %v240_v8  ;;  %286 = vadd.xlane.f32.xlu1 %v285_v39  ;;  %v71_v7 = vld [vmem:[%s966_s1 + $0xe0] sm:$0xff]  ;;  %v73_v8 = vld [vmem:[%s966_s1 + $0xf0] sm:$0xff] }
  0x27   :  { %541 = vmatpush1.bf16.xpose.msra.mxu1 %v540_v40  ;;  %v324_v40 = vmul.f32 %v67_v21, %v67_v21  ;;  %v288_v59 = vadd.f32 %v245_v30, %v244_v31  ;;  %v328_v16 = vmul.f32 %v71_v7, %v71_v7  ;;  %v330_v17 = vmul.f32 %v73_v8, %v73_v8 }
  0x28   :  { %543 = vmatprep.subr.bf16.mxu1 %v542_v43  ;;  %v331_v43 = vmul.f32 %v74_v27, %v74_v27  ;;  %283 = vadd.xlane.f32.xlu0 %v282_v36 }
  0x29   :  { %v552_v21 = vpack.c.bf16 %v330_v17, %v328_v16 }
  0x2a   :  { %v550_v11 = vpack.c.bf16 %v331_v43, %v329_v42  ;;  %292 = vadd.xlane.f32.xlu1 %v291_v2 }
  0x2c   :  { %289 = vadd.xlane.f32.xlu0 %v288_v59 }
  0x2d   :  { %513 = vmatpush1.bf16.xpose.msra.mxu0 %v512_v6  ;;  %v548_v6 = vpack.c.bf16 %v326_v41, %v324_v40 }
  0x2e   :  { %515 = vmatprep.subr.bf16.mxu0 %v514_v14  ;;  %v294_v14 = vadd.f32 %v249_v49, %v248_v53  ;;  %298 = vadd.xlane.f32.xlu1 %v297_v15 }
  0x2f   :  { %545 = vmatpush1.bf16.xpose.msra.mxu1 %v544_v20  ;;  %v520_v20 = vpack.c.bf16 %v73_v8, %v71_v7 }
  0x30   :  { %547 = vmatprep.subr.bf16.mxu1 %v546_v23  ;;  %295 = vadd.xlane.f32.xlu0 %v294_v14 }
  0x35   :  { %517 = vmatpush1.bf16.xpose.msra.mxu0 %v516_v48 }
  0x36   :  { %519 = vmatprep.subr.bf16.mxu0 %v518_v60 }
  0x37   :  { %549 = vmatpush1.bf16.xpose.msra.mxu1 %v548_v6 }
  0x38   :  { %551 = vmatprep.subr.bf16.mxu1 %v550_v11 }
  0x3d   :  { %521 = vmatpush1.bf16.xpose.msra.mxu0 %v520_v20 }
  0x3f   :  { %553 = vmatpush1.bf16.xpose.msra.mxu1 %v552_v21 }
  0x44   :  { %140 = vmatmul.mubr.f32.vlgmr.msra.gmra.mrb[0].mxu0 %v632_v51 }
  0x45   :  { %144 = vmatprep.mubr.f32.mxu0 %v637_v55 }
  0x46   :  { %397 = vmatmul.mubr.f32.vlgmr.msra.gmra.mrb[0].mxu1 %v555_v3  ;;  %v402_v3 = vlaneseq }
  0x48   :  { %145 = vmatmul.mubr.f32.gmra.mrb[2].mxu0 %v642_v56  ;;  %v403_v51 = vshrl.u32 %v402_v3, 7 }
  0x49   :  { %149 = vmatprep.mubr.f32.mxu0 %v647_v57 }
  0x4a   :  { %v404_v56 = vsub.s32 0, %v403_v51 }
  0x4c   :  { %150 = vmatmul.mubr.f32.gmra.mrb[4].mxu0 %v656_v61 }
  0x4d   :  { %154 = vmatprep.mubr.f32.mxu0 %v661_v62 }
  0x50   :  { %155 = vmatmul.mubr.f32.gmra.mrb[6].mxu0 %v666_v63 }
  0x51   :  { %159 = vmatprep.mubr.f32.mxu0 %v690_v12 }
  0x54   :  { %160 = vmatmul.mubr.f32.gmra.mrb[8].mxu0 %v695_v13 }
  0x55   :  { %164 = vmatprep.mubr.f32.mxu0 %v707_v18 }
  0x58   :  { %165 = vmatmul.mubr.f32.gmra.mrb[10].mxu0 %v712_v19 }
  0x59   :  { %169 = vmatprep.mubr.f32.mxu0 %v721_v28 }
  0x5c   :  { %170 = vmatmul.mubr.f32.gmra.mrb[12].mxu0 %v726_v29 }
  0x5d   :  { %174 = vmatprep.mubr.f32.mxu0 %v735_v33 }
  0x60   :  { %175 = vmatmul.mubr.f32.gmra.mrb[14].mxu0 %v740_v34 }
  0x61   :  { %179 = vmatprep.mubr.f32.mxu0 %v758_v45 }
  0x64   :  { %180 = vmatmul.mubr.f32.gmra.mrb[16].mxu0 %v763_v46 }
  0x65   :  { %184 = vmatprep.mubr.f32.mxu0 %v775_v50 }
  0x68   :  { %185 = vmatmul.mubr.f32.gmra.mrb[18].mxu0 %v780_v52 }
  0x69   :  { %189 = vmatprep.mubr.f32.mxu0 %v789_v4 }
  0x6c   :  { %190 = vmatmul.mubr.f32.gmra.mrb[20].mxu0 %v794_v5 }
  0x6d   :  { %194 = vmatprep.mubr.f32.mxu0 %v803_v9 }
  0x70   :  { %195 = vmatmul.mubr.f32.gmra.mrb[22].mxu0 %v808_v10 }
  0x71   :  { %199 = vmatprep.mubr.f32.mxu0 %v826_v25 }
  0x74   :  { %200 = vmatmul.mubr.f32.gmra.mrb[24].mxu0 %v831_v26 }
  0x75   :  { %204 = vmatprep.mubr.f32.mxu0 %v843_v32 }
  0x78   :  { %205 = vmatmul.mubr.f32.gmra.mrb[26].mxu0 %v848_v35 }
  0x79   :  { %209 = vmatprep.mubr.f32.mxu0 %v40_v44 }
  0x7c   :  { %210 = vmatmul.mubr.f32.gmra.mrb[28].mxu0 %v39_v47 }
  0x7d   :  { %214 = vmatprep.mubr.f32.mxu0 %v42_v54 }
  0x80   :  { %215 = vmatmul.mubr.f32.gmra.mrb[30].mxu0 %v41_v58 }
  0x9c   :  { %v254_v55 = vpop.xlane.xlu0 %253 }
  0x9d   :  { %v260_v62 = vpop.xlane.xlu1 %259 }
  0xa0   :  { %v257_v12 = vpop.xlane.xlu0 %256 }
  0xa1   :  { %v263_v5 = vpop.xlane.xlu1 %262 }
  0xa4   :  { %v266_v27 = vpop.xlane.xlu0 %265 }
  0xa5   :  { %v269_v38 = vpop.xlane.xlu1 %268 }
  0xa8   :  { %v272_v47 = vpop.xlane.xlu0 %271 }
  0xa9   :  { %v275_v60 = vpop.xlane.xlu1 %274 }
  0xac   :  { %v278_v11 = vpop.xlane.xlu0 %277 }
  0xaf   :  { %v281_v3 = vpop.xlane.xlu1 %280 }
 0x117   :  { %v141_v57 = vpop.f32.mrb[0].mxu0 }
 0x118   :  { %v143_v61 = vpop.f32.mrb[1].mxu0  ;;  %v422_v28 = vmul.f32 2.0, %v141_v57 }
 0x119   :  { %v398_v63 = vpop.f32.mrb[0].mxu1 }
 0x11a   :  { %v900_v13 = vrot.slane %v398_v63, %v404_v56  ;;  %v400_v18 = vpop.f32.mrb[1].mxu1  ;;  %v284_v63 = vpop.xlane.xlu0 %283 }
 0x11b   :  { %v146_v19 = vpop.f32.mrb[2].mxu0 }
 0x11c   :  { %v406_v29 = vadd.f32 %v900_v13, %v254_v55  ;;  %v407_v33 = vadd.f32 %v900_v13, %v257_v12  ;;  %v423_v34 = vmul.f32 2.0, %v146_v19  ;;  %v148_v45 = vpop.f32.mrb[3].mxu0  ;;  %v408_v52 = vadd.f32 %v900_v13, %v260_v62 }
 0x11d   :  { %v409_v25 = vadd.f32 %v900_v13, %v263_v5  ;;  %v410_v36 = vadd.f32 %v900_v13, %v266_v27  ;;  %v411_v43 = vadd.f32 %v900_v13, %v269_v38  ;;  %v412_v58 = vadd.f32 %v900_v13, %v272_v47 }
 0x11e   :  { %v438_v46 = vsub.f32 %v406_v29, %v422_v28  ;;  %v439_v50 = vsub.f32 %v407_v33, %v423_v34  ;;  %v413_v7 = vadd.f32 %v900_v13, %v275_v60  ;;  %v414_v20 = vadd.f32 %v900_v13, %v278_v11  ;;  %v287_v34 = vpop.xlane.xlu1 %286 }
 0x11f   :  { %v151_v4 = vpop.f32.mrb[4].mxu0  ;;  %v415_v61 = vadd.f32 %v900_v13, %v281_v3  ;;  %v416_v29 = vadd.f32 %v900_v13, %v284_v63 }
 0x120   :  { %v454_v9 = vmax.f32 %v438_v46, 0.0  ;;  %v455_v10 = vmax.f32 %v439_v50, 0.0  ;;  %v424_v22 = vmul.f32 2.0, %v151_v4  ;;  %v153_v23 = vpop.f32.mrb[5].mxu0  ;;  %v417_v4 = vadd.f32 %v900_v13, %v287_v34 }
 0x122   :  { %470 = vst [vmem:[%s968_s2] sm:$0xff] %v454_v9  ;;  %471 = vst [vmem:[%s968_s2 + $0x8] sm:$0xff] %v455_v10  ;;  %v440_v24 = vsub.f32 %v408_v52, %v424_v22  ;;  %v290_v9 = vpop.xlane.xlu0 %289  ;;  %v293_v27 = vpop.xlane.xlu1 %292 }
 0x123   :  { %v156_v26 = vpop.f32.mrb[6].mxu0 }
 0x124   :  { %v456_v30 = vmax.f32 %v440_v24, 0.0  ;;  %v425_v31 = vmul.f32 2.0, %v156_v26  ;;  %v158_v32 = vpop.f32.mrb[7].mxu0 }
 0x126   :  { %472 = vst [vmem:[%s968_s2 + $0x10] sm:$0xff] %v456_v30  ;;  %v441_v35 = vsub.f32 %v409_v25, %v425_v31  ;;  %v418_v25 = vadd.f32 %v900_v13, %v290_v9  ;;  %v296_v38 = vpop.xlane.xlu0 %295  ;;  %v299_v47 = vpop.xlane.xlu1 %298 }
 0x127   :  { %v161_v37 = vpop.f32.mrb[8].mxu0 }
 0x128   :  { %v457_v39 = vmax.f32 %v441_v35, 0.0  ;;  %v426_v40 = vmul.f32 2.0, %v161_v37  ;;  %v163_v41 = vpop.f32.mrb[9].mxu0 }
 0x12a   :  { %473 = vst [vmem:[%s968_s2 + $0x18] sm:$0xff] %v457_v39  ;;  %v442_v42 = vsub.f32 %v410_v36, %v426_v40  ;;  %v419_v36 = vadd.f32 %v900_v13, %v293_v27 }
 0x12b   :  { %v166_v44 = vpop.f32.mrb[10].mxu0 }
 0x12c   :  { %v458_v48 = vmax.f32 %v442_v42, 0.0  ;;  %v427_v49 = vmul.f32 2.0, %v166_v44  ;;  %v168_v53 = vpop.f32.mrb[11].mxu0 }
 0x12e   :  { %474 = vst [vmem:[%s968_s2 + $0x20] sm:$0xff] %v458_v48  ;;  %v443_v54 = vsub.f32 %v411_v43, %v427_v49  ;;  %v420_v43 = vadd.f32 %v900_v13, %v296_v38 }
 0x12f   :  { %v171_v59 = vpop.f32.mrb[12].mxu0 }
 0x130   :  { %v459_v0 = vmax.f32 %v443_v54, 0.0  ;;  %v428_v1 = vmul.f32 2.0, %v171_v59  ;;  %v173_v2 = vpop.f32.mrb[13].mxu0 }
 0x132   :  { %475 = vst [vmem:[%s968_s2 + $0x28] sm:$0xff] %v459_v0  ;;  %v444_v6 = vsub.f32 %v412_v58, %v428_v1  ;;  %v421_v58 = vadd.f32 %v900_v13, %v299_v47 }
 0x133   :  { %v176_v8 = vpop.f32.mrb[14].mxu0 }
 0x134   :  { %v460_v14 = vmax.f32 %v444_v6, 0.0  ;;  %v429_v15 = vmul.f32 2.0, %v176_v8  ;;  %v178_v16 = vpop.f32.mrb[15].mxu0 }
 0x136   :  { %476 = vst [vmem:[%s968_s2 + $0x30] sm:$0xff] %v460_v14  ;;  %v445_v17 = vsub.f32 %v413_v7, %v429_v15 }
 0x137   :  { %v181_v21 = vpop.f32.mrb[16].mxu0 }
 0x138   :  { %v461_v51 = vmax.f32 %v445_v17, 0.0  ;;  %v430_v55 = vmul.f32 2.0, %v181_v21  ;;  %v183_v56 = vpop.f32.mrb[17].mxu0 }
 0x13a   :  { %477 = vst [vmem:[%s968_s2 + $0x38] sm:$0xff] %v461_v51  ;;  %v446_v57 = vsub.f32 %v414_v20, %v430_v55 }
 0x13b   :  { %v186_v62 = vpop.f32.mrb[18].mxu0 }
 0x13c   :  { %v462_v12 = vmax.f32 %v446_v57, 0.0  ;;  %v431_v18 = vmul.f32 2.0, %v186_v62  ;;  %v188_v19 = vpop.f32.mrb[19].mxu0 }
 0x13e   :  { %478 = vst [vmem:[%s968_s2 + $0x40] sm:$0xff] %v462_v12  ;;  %v447_v28 = vsub.f32 %v415_v61, %v431_v18 }
 0x13f   :  { %v191_v33 = vpop.f32.mrb[20].mxu0 }
 0x140   :  { %v463_v45 = vmax.f32 %v447_v28, 0.0  ;;  %v432_v46 = vmul.f32 2.0, %v191_v33  ;;  %v193_v50 = vpop.f32.mrb[21].mxu0 }
 0x142   :  { %479 = vst [vmem:[%s968_s2 + $0x48] sm:$0xff] %v463_v45  ;;  %v448_v52 = vsub.f32 %v416_v29, %v432_v46 }
 0x143   :  { %v196_v5 = vpop.f32.mrb[22].mxu0 }
 0x144   :  { %v464_v10 = vmax.f32 %v448_v52, 0.0  ;;  %v433_v22 = vmul.f32 2.0, %v196_v5  ;;  %v198_v23 = vpop.f32.mrb[23].mxu0 }
 0x146   :  { %480 = vst [vmem:[%s968_s2 + $0x50] sm:$0xff] %v464_v10  ;;  %v449_v24 = vsub.f32 %v417_v4, %v433_v22 }
 0x147   :  { %v201_v26 = vpop.f32.mrb[24].mxu0 }
 0x148   :  { %v465_v30 = vmax.f32 %v449_v24, 0.0  ;;  %v434_v31 = vmul.f32 2.0, %v201_v26  ;;  %v203_v32 = vpop.f32.mrb[25].mxu0 }
 0x14a   :  { %481 = vst [vmem:[%s968_s2 + $0x58] sm:$0xff] %v465_v30  ;;  %v450_v35 = vsub.f32 %v418_v25, %v434_v31 }
 0x14b   :  { %v206_v37 = vpop.f32.mrb[26].mxu0 }
 0x14c   :  { %v466_v39 = vmax.f32 %v450_v35, 0.0  ;;  %v435_v40 = vmul.f32 2.0, %v206_v37  ;;  %v208_v41 = vpop.f32.mrb[27].mxu0 }
 0x14e   :  { %482 = vst [vmem:[%s968_s2 + $0x60] sm:$0xff] %v466_v39  ;;  %v451_v42 = vsub.f32 %v419_v36, %v435_v40 }
 0x14f   :  { %v211_v44 = vpop.f32.mrb[28].mxu0 }
 0x150   :  { %v467_v48 = vmax.f32 %v451_v42, 0.0  ;;  %v436_v49 = vmul.f32 2.0, %v211_v44  ;;  %v213_v53 = vpop.f32.mrb[29].mxu0 }
 0x152   :  { %483 = vst [vmem:[%s968_s2 + $0x68] sm:$0xff] %v467_v48  ;;  %v452_v54 = vsub.f32 %v420_v43, %v436_v49 }
 0x153   :  { %v216_v59 = vpop.f32.mrb[30].mxu0 }
 0x154   :  { %v468_v60 = vmax.f32 %v452_v54, 0.0  ;;  %v437_v0 = vmul.f32 2.0, %v216_v59  ;;  %v218_v1 = vpop.f32.mrb[31].mxu0 }
 0x156   :  { %484 = vst [vmem:[%s968_s2 + $0x70] sm:$0xff] %v468_v60  ;;  %v453_v2 = vsub.f32 %v421_v58, %v437_v0 }
 0x158   :  { %v469_v6 = vmax.f32 %v453_v2, 0.0 }
 0x15a   :  { %485 = vst [vmem:[%s968_s2 + $0x78] sm:$0xff] %v469_v6 }

</bundles_post_ra>
